<compile_context>
chip_gen: v7x
topology: tpu7x:2x2x1
jax: 0.10.0
libtpu: 0.0.40
codegen_flags: <defaults>
</compile_context>

<pallas_src>
import numpy as np
import jax
import jax.numpy as jnp
from jax.experimental import pallas as pl
from jax.experimental.pallas import tpu as pltpu

HIDDEN_SIZE = 30
BN_EPS = 1e-5

# ConvTranspose2d(k=4, s=2, p=1) vertical decomposition: output row y = 2*i + a is
#   sum_th  padded_input_row[_DECONV_POFF[a][th] + i]  @  band(kernel row _DECONV_KH[a][th])
_DECONV_KH = ((1, 3), (0, 2))
_DECONV_POFF = ((1, 0), (2, 1))

_VMEM = pl.BlockSpec(memory_space=pltpu.MemorySpace.VMEM)


# ----------------------------- in-kernel helpers ---------------------------- #

def _matmul(lhs_f32, w_bf16):
    """bf16 MXU matmul with f32 accumulation."""
    return jnp.dot(lhs_f32.astype(jnp.bfloat16), w_bf16,
                   preferred_element_type=jnp.float32)


def _conv_stride2(xbuf, w_ref, n, oh):
    """k=4 / stride-2 conv.  xbuf: (N, Hp, Win*Cin) (Hp = Hin+2, vertical pad rows only);
    w_ref: (4, Win*Cin, OW*Cout) banded weights.  Returns (N*OH, OW*Cout) f32."""
    hp, cols = xbuf.shape[1], xbuf.shape[2]
    ph = xbuf.reshape(n, hp // 2, 2, cols)            # split padded rows by parity
    acc = None
    for i in range(4):                                # kernel rows
        lhs = ph[:, i // 2:i // 2 + oh, i % 2, :].reshape(n * oh, cols)
        t = _matmul(lhs, w_ref[i])
        acc = t if acc is None else acc + t
    return acc


def _conv_stride1(xbuf, w_ref, n, oh, kh):
    """stride-1 conv on vertically padded (N, Hp, Win*Cin); w_ref: (kh, Win*Cin, OW*Cout)."""
    cols = xbuf.shape[2]
    acc = None
    for i in range(kh):
        lhs = xbuf[:, i:i + oh, :].reshape(n * oh, cols)
        t = _matmul(lhs, w_ref[i])
        acc = t if acc is None else acc + t
    return acc


def _deconv_phase(xbuf, w_ref, a, n, oh):
    """One output-row parity of ConvTranspose2d(k4, s2, p1).
    xbuf: (N, Hin+2, Win*Cin); w_ref: (4, Win*Cin, Wout*Cout).  -> (N*Hin, Wout*Cout)."""
    cols = xbuf.shape[2]
    acc = None
    for th in range(2):
        off = _DECONV_POFF[a][th]
        lhs = xbuf[:, off:off + oh, :].reshape(n * oh, cols)
        t = _matmul(lhs, w_ref[2 * a + th])
        acc = t if acc is None else acc + t
    return acc


def _bn_scale_shift(slabs, gamma, beta, n_groups, count):
    """Train-mode BatchNorm scale/shift from one or more (M_k, n_groups*C) slabs of the
    same conv output; broadcast back to the (1, n_groups*C) lane layout."""
    c = gamma.shape[1]
    csum = None
    csq = None
    for y in slabs:
        s = jnp.sum(y, axis=0, keepdims=True)
        q = jnp.sum(y * y, axis=0, keepdims=True)
        csum = s if csum is None else csum + s
        csq = q if csq is None else csq + q
    ssum = csum[:, 0:c]
    ssq = csq[:, 0:c]
    for k in range(1, n_groups):                      # fold the w-groups per channel
        ssum = ssum + csum[:, k * c:(k + 1) * c]
        ssq = ssq + csq[:, k * c:(k + 1) * c]
    mean = ssum / count
    var = ssq / count - mean * mean                   # biased variance (train mode)
    scale = gamma * jax.lax.rsqrt(var + BN_EPS)
    shift = beta - mean * scale
    scale_l = jnp.concatenate([scale] * n_groups, axis=1)
    shift_l = jnp.concatenate([shift] * n_groups, axis=1)
    return scale_l, shift_l


def _bn_tanh(y, gamma, beta, n_groups, count):
    scale_l, shift_l = _bn_scale_shift([y], gamma, beta, n_groups, count)
    return jnp.tanh(y * scale_l + shift_l)


def _interleave_rows(y_even, y_odd, n, half, cols):
    """Merge per-sample even/odd output rows: two (N*half, cols) -> (N, 2*half, cols)."""
    e = y_even.reshape(n, half, cols)
    o = y_odd.reshape(n, half, cols)
    return jnp.stack([e, o], axis=2).reshape(n, 2 * half, cols)


# --------------------------------- kernel ----------------------------------- #

def _ae_kernel(x_ref,
               w1_ref, g1_ref, b1_ref,
               w2_ref, g2_ref, b2_ref,
               w3_ref, g3_ref, b3_ref,
               wen_ref, ben_ref, wde_ref, bde_ref,
               wd1_ref, g4_ref, b4_ref,
               wd2_ref, bd2_ref,
               code_ref, dec_ref,
               buf1, buf2, buf3, buf4, buf5):
    n = x_ref.shape[0]
    f32 = jnp.float32

    # ---- conv1: 1 -> 16, k4 s2 p1 : 28x28 -> 14x14, BN + tanh ----------------
    buf1[:, 0, :] = jnp.zeros((n, 28), f32)           # zero only the vertical borders
    buf1[:, 29, :] = jnp.zeros((n, 28), f32)
    buf1[:, 1:29, :] = x_ref[...]
    y = _conv_stride2(buf1[...], w1_ref, n, 14)                       # (N*14, 224)
    h = _bn_tanh(y, g1_ref[...], b1_ref[...], 14, n * 14 * 14)

    # ---- conv2: 16 -> 32, k4 s2 p1 : 14x14 -> 7x7, BN + tanh -----------------
    buf2[:, 0, :] = jnp.zeros((n, 224), f32)
    buf2[:, 15, :] = jnp.zeros((n, 224), f32)
    buf2[:, 1:15, :] = h.reshape(n, 14, 224)
    y = _conv_stride2(buf2[...], w2_ref, n, 7)                        # (N*7, 224)
    h = _bn_tanh(y, g2_ref[...], b2_ref[...], 7, n * 7 * 7)

    # ---- conv3: 32 -> 16, k3 s1 p1 : 7x7 -> 7x7, BN + tanh -------------------
    buf3[:, 0, :] = jnp.zeros((n, 224), f32)
    buf3[:, 8, :] = jnp.zeros((n, 224), f32)
    buf3[:, 1:8, :] = h.reshape(n, 7, 224)
    y = _conv_stride1(buf3[...], w3_ref, n, 7, 3)                     # (N*7, 112)
    h = _bn_tanh(y, g3_ref[...], b3_ref[...], 7, n * 7 * 7)

    # ---- en_fc: per-sample 784 features -> 30 (accumulated over the 7 h-rows) -
    h3 = h.reshape(n, 7, 112)
    code = jnp.zeros((n, HIDDEN_SIZE), f32)
    for hh in range(7):
        code = code + _matmul(h3[:, hh, :], wen_ref[hh])
    code = code + ben_ref[...]
    code_ref[...] = code

    # ---- de_fc: 30 -> 784, written straight into deconv1's padded input ------
    buf4[:, 0, :] = jnp.zeros((n, 112), f32)
    buf4[:, 8, :] = jnp.zeros((n, 112), f32)
    for hh in range(7):
        buf4[:, 1 + hh, :] = _matmul(code, wde_ref[hh]) + bde_ref[hh]

    # ---- deconv1: 16 -> 16, k4 s2 p1 : 7x7 -> 14x14, BN + tanh ---------------
    xb = buf4[...]
    y0 = _deconv_phase(xb, wd1_ref, 0, n, 7)                          # even output rows
    y1 = _deconv_phase(xb, wd1_ref, 1, n, 7)                          # odd output rows
    scale_l, shift_l = _bn_scale_shift([y0, y1], g4_ref[...], b4_ref[...],
                                       14, n * 14 * 14)
    t0 = jnp.tanh(y0 * scale_l + shift_l)
    t1 = jnp.tanh(y1 * scale_l + shift_l)
    buf5[:, 0, :] = jnp.zeros((n, 224), f32)
    buf5[:, 15, :] = jnp.zeros((n, 224), f32)
    buf5[:, 1:15, :] = _interleave_rows(t0, t1, n, 7, 224)

    # ---- deconv2: 16 -> 1, k4 s2 p1 : 14x14 -> 28x28, + bias, sigmoid --------
    xb = buf5[...]
    z0 = jax.nn.sigmoid(_deconv_phase(xb, wd2_ref, 0, n, 14) + bd2_ref[...])
    z1 = jax.nn.sigmoid(_deconv_phase(xb, wd2_ref, 1, n, 14) + bd2_ref[...])
    dec_ref[...] = _interleave_rows(z0, z1, n, 14, 28)                # (N, 28, 28)


# ------------------------------ host wrapper -------------------------------- #

def autoencoder_forward_impl(x, kp):
    """x: (N, 1, 28, 28) f32; kp: packed params.  -> (code (N,30), decoded (N,1,28,28))."""
    n = x.shape[0]
    x2 = x.reshape(n, 28, 28)                         # free reshape: rows=(n,h), lanes=w
    code, dec = pl.pallas_call(
        _ae_kernel,
        out_shape=(jax.ShapeDtypeStruct((n, HIDDEN_SIZE), jnp.float32),
                   jax.ShapeDtypeStruct((n, 28, 28), jnp.float32)),
        in_specs=[_VMEM] * 19,
        out_specs=(_VMEM, _VMEM),
        scratch_shapes=[
            pltpu.VMEM((n, 30, 28), jnp.float32),        # conv1 padded input
            pltpu.VMEM((n, 16, 14 * 16), jnp.float32),   # conv2 padded input
            pltpu.VMEM((n, 9, 7 * 32), jnp.float32),     # conv3 padded input
            pltpu.VMEM((n, 9, 7 * 16), jnp.float32),     # deconv1 padded input
            pltpu.VMEM((n, 16, 14 * 16), jnp.float32),   # deconv2 padded input
        ],
        # Actual footprint is ~2 MiB; 32 MiB scoped limit leaves ample headroom on
        # v7x (64 MiB) as well as v5e/v6e (128 MiB).
        compiler_params=pltpu.CompilerParams(vmem_limit_bytes=32 * 1024 * 1024),
    )(x2,
      kp["w1"], kp["g1"], kp["b1"],
      kp["w2"], kp["g2"], kp["b2"],
      kp["w3"], kp["g3"], kp["b3"],
      kp["wen"], kp["ben"], kp["wde"], kp["bde"],
      kp["wd1"], kp["g4"], kp["b4"],
      kp["wd2"], kp["bd2"])
    return code, dec.reshape(n, 1, 28, 28)            # free reshape


autoencoder_forward = jax.jit(autoencoder_forward_impl)


# ----------------------- parameter init / packing --------------------------- #

def init_params(key):
    """PyTorch-layout parameters (same conventions as the nn.Module)."""
    ks = jax.random.split(key, 24)
    w = lambda k, s: 0.1 * jax.random.normal(k, s, jnp.float32)
    b = lambda k, s: 0.05 * jax.random.normal(k, s, jnp.float32)
    g = lambda k, s: 1.0 + 0.1 * jax.random.normal(k, s, jnp.float32)
    return {
        "c1_w": w(ks[0], (16, 1, 4, 4)),   "c1_b": b(ks[1], (16,)),
        "bn1_g": g(ks[2], (16,)),          "bn1_b": b(ks[3], (16,)),
        "c2_w": w(ks[4], (32, 16, 4, 4)),  "c2_b": b(ks[5], (32,)),
        "bn2_g": g(ks[6], (32,)),          "bn2_b": b(ks[7], (32,)),
        "c3_w": w(ks[8], (16, 32, 3, 3)),  "c3_b": b(ks[9], (16,)),
        "bn3_g": g(ks[10], (16,)),         "bn3_b": b(ks[11], (16,)),
        "enfc_w": w(ks[12], (HIDDEN_SIZE, 16 * 7 * 7)),
        "enfc_b": b(ks[13], (HIDDEN_SIZE,)),
        "defc_w": w(ks[14], (16 * 7 * 7, HIDDEN_SIZE)),
        "defc_b": b(ks[15], (16 * 7 * 7,)),
        "d1_w": w(ks[16], (16, 16, 4, 4)), "d1_b": b(ks[17], (16,)),
        "bn4_g": g(ks[18], (16,)),         "bn4_b": b(ks[19], (16,)),
        "d2_w": w(ks[20], (16, 1, 4, 4)),  "d2_b": b(ks[21], (1,)),
    }


def pack_params(p):
    """One-time repack of PyTorch-layout weights into banded bf16 matmul layouts.

    The kw taps + horizontal 'same' padding are folded into the contraction dimension
    (one banded matrix per kernel row), so each conv/deconv is a few large-K matmuls.
    Conv / deconv1 biases followed by train-mode BatchNorm cancel exactly -> dropped.
    """
    def band_conv(w, win, wout, stride, pad):
        w = np.asarray(w, np.float32)
        co, ci, kh, kw = w.shape
        mats = np.zeros((kh, win * ci, wout * co), np.float32)
        for i in range(kh):
            for wo in range(wout):
                for k in range(kw):
                    wi = stride * wo - pad + k
                    if 0 <= wi < win:
                        mats[i, wi * ci:(wi + 1) * ci,
                             wo * co:(wo + 1) * co] = w[:, :, i, k].T
        return jnp.asarray(mats, jnp.bfloat16)

    def band_deconv(wt, win, wout):
        wt = np.asarray(wt, np.float32)
        ci, co, _, kw = wt.shape
        khs = [_DECONV_KH[a][th] for a in (0, 1) for th in (0, 1)]
        mats = np.zeros((4, win * ci, wout * co), np.float32)
        for t, khh in enumerate(khs):
            for w_ in range(win):
                for k in range(kw):
                    x = 2 * w_ + k - 1
                    if 0 <= x < wout:
                        mats[t, w_ * ci:(w_ + 1) * ci,
                             x * co:(x + 1) * co] = wt[:, :, khh, k]
        return jnp.asarray(mats, jnp.bfloat16)

    row = lambda v: jnp.asarray(v, jnp.float32).reshape(1, -1)

    # en_fc / de_fc: permute PyTorch's per-sample (c, h, w) flatten into the kernel's
    # (h, (w, c)) layout, split per h-row.
    enfc = np.asarray(p["enfc_w"], np.float32).reshape(HIDDEN_SIZE, 16, 7, 7)
    wen = np.transpose(enfc, (2, 3, 1, 0)).reshape(7, 7 * 16, HIDDEN_SIZE)
    defc = np.asarray(p["defc_w"], np.float32).reshape(16, 7, 7, HIDDEN_SIZE)
    wde = np.transpose(
        np.transpose(defc, (1, 2, 0, 3)).reshape(7, 7 * 16, HIDDEN_SIZE), (0, 2, 1))
    defb = np.transpose(np.asarray(p["defc_b"], np.float32).reshape(16, 7, 7),
                        (1, 2, 0)).reshape(7, 1, 7 * 16)

    return {
        "w1": band_conv(p["c1_w"], 28, 14, 2, 1),     # (4, 28, 224)
        "g1": row(p["bn1_g"]), "b1": row(p["bn1_b"]),
        "w2": band_conv(p["c2_w"], 14, 7, 2, 1),      # (4, 224, 224)
        "g2": row(p["bn2_g"]), "b2": row(p["bn2_b"]),
        "w3": band_conv(p["c3_w"], 7, 7, 1, 1),       # (3, 224, 112)
        "g3": row(p["bn3_g"]), "b3": row(p["bn3_b"]),
        "wen": jnp.asarray(wen, jnp.bfloat16),        # (7, 112, 30)
        "ben": row(p["enfc_b"]),
        "wde": jnp.asarray(wde, jnp.bfloat16),        # (7, 30, 112)
        "bde": jnp.asarray(defb, jnp.float32),        # (7, 1, 112)
        "wd1": band_deconv(p["d1_w"], 7, 14),         # (4, 112, 224)
        "g4": row(p["bn4_g"]), "b4": row(p["bn4_b"]),
        "wd2": band_deconv(p["d2_w"], 14, 28),        # (4, 224, 28)
        "bd2": jnp.tile(row(p["d2_b"]), (1, 28)),     # (1, 28)
    }


# ------------------------- pure-JAX reference (lax) ------------------------- #

def reference_forward(x, p):
    """PyTorch-semantics reference: lax convs, train-mode BatchNorm, f32 precision."""
    dn = ("NCHW", "OIHW", "NCHW")
    hi = jax.lax.Precision.HIGHEST

    def bn_tanh(y, g, b):
        mean = jnp.mean(y, axis=(0, 2, 3), keepdims=True)
        var = jnp.mean(jnp.square(y - mean), axis=(0, 2, 3), keepdims=True)
        yn = (y - mean) * jax.lax.rsqrt(var + BN_EPS)
        return jnp.tanh(yn * g.reshape(1, -1, 1, 1) + b.reshape(1, -1, 1, 1))

    def conv(xin, w, b, stride, pad):
        y = jax.lax.conv_general_dilated(xin, w, (stride, stride),
                                         ((pad, pad), (pad, pad)),
                                         dimension_numbers=dn, precision=hi)
        return y + b.reshape(1, -1, 1, 1)

    def deconv(xin, wt, b):  # ConvTranspose2d(k=4, s=2, p=1) as a dilated conv
        wf = jnp.transpose(wt, (1, 0, 2, 3))[:, :, ::-1, ::-1]
        y = jax.lax.conv_general_dilated(xin, wf, (1, 1), ((2, 2), (2, 2)),
                                         lhs_dilation=(2, 2),
                                         dimension_numbers=dn, precision=hi)
        return y + b.reshape(1, -1, 1, 1)

    h = bn_tanh(conv(x, p["c1_w"], p["c1_b"], 2, 1), p["bn1_g"], p["bn1_b"])
    h = bn_tanh(conv(h, p["c2_w"], p["c2_b"], 2, 1), p["bn2_g"], p["bn2_b"])
    h = bn_tanh(conv(h, p["c3_w"], p["c3_b"], 1, 1), p["bn3_g"], p["bn3_b"])
    code = jnp.dot(h.reshape(h.shape[0], -1), p["enfc_w"].T, precision=hi) + p["enfc_b"]
    de = jnp.dot(code, p["defc_w"].T, precision=hi) + p["defc_b"]
    d = de.reshape(-1, 16, 7, 7)
    h = bn_tanh(deconv(d, p["d1_w"], p["d1_b"]), p["bn4_g"], p["bn4_b"])
    decoded = jax.nn.sigmoid(deconv(h, p["d2_w"], p["d2_b"]))
    return code, decoded


# ---------------------------------- main ------------------------------------ #

if __name__ == "__main__":
    key = jax.random.PRNGKey(0)
    k_params, k_x = jax.random.split(key)
    params = init_params(k_params)
    packed = pack_params(params)

    x = jax.random.normal(k_x, (2, 1, 28, 28), jnp.float32)

    code, decoded = autoencoder_forward(x, packed)
    jax.block_until_ready((code, decoded))

    assert code.shape == (2, HIDDEN_SIZE)
    assert decoded.shape == (2, 1, 28, 28)
    assert bool(jnp.all(jnp.isfinite(code))) and bool(jnp.all(jnp.isfinite(decoded)))

    # Numerical check against the pure-JAX/lax reference (kernel uses bf16 MXU operands
    # throughout, so tolerances are sized for bf16 vs f32 accumulation differences).
    code_want, dec_want = jax.jit(reference_forward)(x, params)
    code_err = float(jnp.max(jnp.abs(code - code_want)))
    dec_err = float(jnp.max(jnp.abs(decoded - dec_want)))
    assert code_err < 0.3, f"code mismatch vs reference: max abs err {code_err}"
    assert dec_err < 0.1, f"decoded mismatch vs reference: max abs err {dec_err}"

    print("KERNEL_OK")
</pallas_src>

<mosaic_0001>
module attributes {stable_mosaic.version = 11 : i64} {
  func.func @_ae_kernel(%arg0: memref<2x28x28xf32, #tpu.memory_space<vmem>>, %arg1: memref<4x28x224xbf16, #tpu.memory_space<vmem>>, %arg2: memref<1x16xf32, #tpu.memory_space<vmem>>, %arg3: memref<1x16xf32, #tpu.memory_space<vmem>>, %arg4: memref<4x224x224xbf16, #tpu.memory_space<vmem>>, %arg5: memref<1x32xf32, #tpu.memory_space<vmem>>, %arg6: memref<1x32xf32, #tpu.memory_space<vmem>>, %arg7: memref<3x224x112xbf16, #tpu.memory_space<vmem>>, %arg8: memref<1x16xf32, #tpu.memory_space<vmem>>, %arg9: memref<1x16xf32, #tpu.memory_space<vmem>>, %arg10: memref<7x112x30xbf16, #tpu.memory_space<vmem>>, %arg11: memref<1x30xf32, #tpu.memory_space<vmem>>, %arg12: memref<7x30x112xbf16, #tpu.memory_space<vmem>>, %arg13: memref<7x1x112xf32, #tpu.memory_space<vmem>>, %arg14: memref<4x112x224xbf16, #tpu.memory_space<vmem>>, %arg15: memref<1x16xf32, #tpu.memory_space<vmem>>, %arg16: memref<1x16xf32, #tpu.memory_space<vmem>>, %arg17: memref<4x224x28xbf16, #tpu.memory_space<vmem>>, %arg18: memref<1x28xf32, #tpu.memory_space<vmem>>, %arg19: memref<2x30xf32, #tpu.memory_space<vmem>>, %arg20: memref<2x28x28xf32, #tpu.memory_space<vmem>>, %arg21: memref<2x30x28xf32, #tpu.memory_space<vmem>>, %arg22: memref<2x16x224xf32, #tpu.memory_space<vmem>>, %arg23: memref<2x9x224xf32, #tpu.memory_space<vmem>>, %arg24: memref<2x9x112xf32, #tpu.memory_space<vmem>>, %arg25: memref<2x16x224xf32, #tpu.memory_space<vmem>>) attributes {dimension_semantics = [], scalar_prefetch = 0 : i64, scratch_operands = 5 : i64, tpu.core_type = #tpu.core_type<tc>} {
    %cst = arith.constant 0.000000e+00 : f32
    %0 = vector.broadcast %cst : f32 to vector<2x28xf32>
    %c0 = arith.constant 0 : index
    %c0_0 = arith.constant 0 : index
    %c0_1 = arith.constant 0 : index
    %1 = vector.load %arg21[%c0, %c0_0, %c0_1] : memref<2x30x28xf32, #tpu.memory_space<vmem>>, vector<2x1x28xf32>
    %2 = vector.shape_cast %1 : vector<2x1x28xf32> to vector<2x28xf32>
    %3 = vector.shape_cast %0 : vector<2x28xf32> to vector<2x1x28xf32>
    tpu.vector_store %arg21[%c0, %c0_0, %c0_1], %3 {strides = array<i32>} : memref<2x30x28xf32, #tpu.memory_space<vmem>>, vector<2x1x28xf32>,
    %cst_2 = arith.constant 0.000000e+00 : f32
    %4 = vector.broadcast %cst_2 : f32 to vector<2x28xf32>
    %c0_3 = arith.constant 0 : index
    %c29 = arith.constant 29 : index
    %c0_4 = arith.constant 0 : index
    %5 = vector.load %arg21[%c0_3, %c29, %c0_4] : memref<2x30x28xf32, #tpu.memory_space<vmem>>, vector<2x1x28xf32>
    %6 = vector.shape_cast %5 : vector<2x1x28xf32> to vector<2x28xf32>
    %7 = vector.shape_cast %4 : vector<2x28xf32> to vector<2x1x28xf32>
    tpu.vector_store %arg21[%c0_3, %c29, %c0_4], %7 {strides = array<i32>} : memref<2x30x28xf32, #tpu.memory_space<vmem>>, vector<2x1x28xf32>,
    %c0_5 = arith.constant 0 : index
    %c0_6 = arith.constant 0 : index
    %c0_7 = arith.constant 0 : index
    %8 = vector.load %arg0[%c0_5, %c0_6, %c0_7] : memref<2x28x28xf32, #tpu.memory_space<vmem>>, vector<2x28x28xf32>
    %c0_8 = arith.constant 0 : index
    %c1 = arith.constant 1 : index
    %c0_9 = arith.constant 0 : index
    %9 = vector.load %arg21[%c0_8, %c1, %c0_9] : memref<2x30x28xf32, #tpu.memory_space<vmem>>, vector<2x28x28xf32>
    tpu.vector_store %arg21[%c0_8, %c1, %c0_9], %8 {strides = array<i32>} : memref<2x30x28xf32, #tpu.memory_space<vmem>>, vector<2x28x28xf32>,
    %c0_10 = arith.constant 0 : index
    %c0_11 = arith.constant 0 : index
    %c0_12 = arith.constant 0 : index
    %10 = vector.load %arg21[%c0_10, %c0_11, %c0_12] : memref<2x30x28xf32, #tpu.memory_space<vmem>>, vector<2x30x28xf32>
    %11 = vector.shape_cast %10 : vector<2x30x28xf32> to vector<2x15x2x28xf32>
    %12 = vector.extract_strided_slice %11 {offsets = [0, 0, 0, 0], sizes = [2, 14, 1, 28], strides = [1, 1, 1, 1]} : vector<2x15x2x28xf32> to vector<2x14x1x28xf32>
    %13 = vector.shape_cast %12 : vector<2x14x1x28xf32> to vector<2x14x28xf32>
    %14 = vector.shape_cast %13 : vector<2x14x28xf32> to vector<28x28xf32>
    %c0_13 = arith.constant 0 : index
    %c0_14 = arith.constant 0 : index
    %c0_15 = arith.constant 0 : index
    %15 = vector.load %arg1[%c0_13, %c0_14, %c0_15] : memref<4x28x224xbf16, #tpu.memory_space<vmem>>, vector<1x28x224xbf16>
    %16 = vector.shape_cast %15 : vector<1x28x224xbf16> to vector<28x224xbf16>
    %17 = arith.truncf %14 : vector<28x28xf32> to vector<28x28xbf16>
    %cst_16 = arith.constant dense<0.000000e+00> : vector<28x224xf32>
    %18 = tpu.matmul %17, %16, %cst_16 {dimension_numbers = #tpu.dot_dimension_numbers<[1], [0], [0], [1], [0, 0, 1, 1], [], []>} : vector<28x28xbf16>, vector<28x224xbf16>, vector<28x224xf32> -> vector<28x224xf32>
    %19 = vector.extract_strided_slice %11 {offsets = [0, 0, 1, 0], sizes = [2, 14, 1, 28], strides = [1, 1, 1, 1]} : vector<2x15x2x28xf32> to vector<2x14x1x28xf32>
    %20 = vector.shape_cast %19 : vector<2x14x1x28xf32> to vector<2x14x28xf32>
    %21 = vector.shape_cast %20 : vector<2x14x28xf32> to vector<28x28xf32>
    %c1_17 = arith.constant 1 : index
    %c0_18 = arith.constant 0 : index
    %c0_19 = arith.constant 0 : index
    %22 = vector.load %arg1[%c1_17, %c0_18, %c0_19] : memref<4x28x224xbf16, #tpu.memory_space<vmem>>, vector<1x28x224xbf16>
    %23 = vector.shape_cast %22 : vector<1x28x224xbf16> to vector<28x224xbf16>
    %24 = arith.truncf %21 : vector<28x28xf32> to vector<28x28xbf16>
    %cst_20 = arith.constant dense<0.000000e+00> : vector<28x224xf32>
    %25 = tpu.matmul %24, %23, %cst_20 {dimension_numbers = #tpu.dot_dimension_numbers<[1], [0], [0], [1], [0, 0, 1, 1], [], []>} : vector<28x28xbf16>, vector<28x224xbf16>, vector<28x224xf32> -> vector<28x224xf32>
    %26 = arith.addf %18, %25 : vector<28x224xf32>
    %27 = vector.extract_strided_slice %11 {offsets = [0, 1, 0, 0], sizes = [2, 14, 1, 28], strides = [1, 1, 1, 1]} : vector<2x15x2x28xf32> to vector<2x14x1x28xf32>
    %28 = vector.shape_cast %27 : vector<2x14x1x28xf32> to vector<2x14x28xf32>
    %29 = vector.shape_cast %28 : vector<2x14x28xf32> to vector<28x28xf32>
    %c2 = arith.constant 2 : index
    %c0_21 = arith.constant 0 : index
    %c0_22 = arith.constant 0 : index
    %30 = vector.load %arg1[%c2, %c0_21, %c0_22] : memref<4x28x224xbf16, #tpu.memory_space<vmem>>, vector<1x28x224xbf16>
    %31 = vector.shape_cast %30 : vector<1x28x224xbf16> to vector<28x224xbf16>
    %32 = arith.truncf %29 : vector<28x28xf32> to vector<28x28xbf16>
    %cst_23 = arith.constant dense<0.000000e+00> : vector<28x224xf32>
    %33 = tpu.matmul %32, %31, %cst_23 {dimension_numbers = #tpu.dot_dimension_numbers<[1], [0], [0], [1], [0, 0, 1, 1], [], []>} : vector<28x28xbf16>, vector<28x224xbf16>, vector<28x224xf32> -> vector<28x224xf32>
    %34 = arith.addf %26, %33 : vector<28x224xf32>
    %35 = vector.extract_strided_slice %11 {offsets = [0, 1, 1, 0], sizes = [2, 14, 1, 28], strides = [1, 1, 1, 1]} : vector<2x15x2x28xf32> to vector<2x14x1x28xf32>
    %36 = vector.shape_cast %35 : vector<2x14x1x28xf32> to vector<2x14x28xf32>
    %37 = vector.shape_cast %36 : vector<2x14x28xf32> to vector<28x28xf32>
    %c3 = arith.constant 3 : index
    %c0_24 = arith.constant 0 : index
    %c0_25 = arith.constant 0 : index
    %38 = vector.load %arg1[%c3, %c0_24, %c0_25] : memref<4x28x224xbf16, #tpu.memory_space<vmem>>, vector<1x28x224xbf16>
    %39 = vector.shape_cast %38 : vector<1x28x224xbf16> to vector<28x224xbf16>
    %40 = arith.truncf %37 : vector<28x28xf32> to vector<28x28xbf16>
    %cst_26 = arith.constant dense<0.000000e+00> : vector<28x224xf32>
    %41 = tpu.matmul %40, %39, %cst_26 {dimension_numbers = #tpu.dot_dimension_numbers<[1], [0], [0], [1], [0, 0, 1, 1], [], []>} : vector<28x28xbf16>, vector<28x224xbf16>, vector<28x224xf32> -> vector<28x224xf32>
    %42 = arith.addf %34, %41 : vector<28x224xf32>
    %c0_27 = arith.constant 0 : index
    %c0_28 = arith.constant 0 : index
    %43 = vector.load %arg2[%c0_27, %c0_28] : memref<1x16xf32, #tpu.memory_space<vmem>>, vector<1x16xf32>
    %c0_29 = arith.constant 0 : index
    %c0_30 = arith.constant 0 : index
    %44 = vector.load %arg3[%c0_29, %c0_30] : memref<1x16xf32, #tpu.memory_space<vmem>>, vector<1x16xf32>
    %cst_31 = arith.constant dense<0.000000e+00> : vector<224xf32>
    %45 = vector.multi_reduction <add>, %42, %cst_31 [0] : vector<28x224xf32> to vector<224xf32>
    %46 = vector.shape_cast %45 : vector<224xf32> to vector<1x224xf32>
    %47 = arith.mulf %42, %42 : vector<28x224xf32>
    %cst_32 = arith.constant dense<0.000000e+00> : vector<224xf32>
    %48 = vector.multi_reduction <add>, %47, %cst_32 [0] : vector<28x224xf32> to vector<224xf32>
    %49 = vector.shape_cast %48 : vector<224xf32> to vector<1x224xf32>
    %50 = vector.extract_strided_slice %46 {offsets = [0, 0], sizes = [1, 16], strides = [1, 1]} : vector<1x224xf32> to vector<1x16xf32>
    %51 = vector.extract_strided_slice %49 {offsets = [0, 0], sizes = [1, 16], strides = [1, 1]} : vector<1x224xf32> to vector<1x16xf32>
    %52 = vector.extract_strided_slice %46 {offsets = [0, 16], sizes = [1, 16], strides = [1, 1]} : vector<1x224xf32> to vector<1x16xf32>
    %53 = arith.addf %50, %52 : vector<1x16xf32>
    %54 = vector.extract_strided_slice %49 {offsets = [0, 16], sizes = [1, 16], strides = [1, 1]} : vector<1x224xf32> to vector<1x16xf32>
    %55 = arith.addf %51, %54 : vector<1x16xf32>
    %56 = vector.extract_strided_slice %46 {offsets = [0, 32], sizes = [1, 16], strides = [1, 1]} : vector<1x224xf32> to vector<1x16xf32>
    %57 = arith.addf %53, %56 : vector<1x16xf32>
    %58 = vector.extract_strided_slice %49 {offsets = [0, 32], sizes = [1, 16], strides = [1, 1]} : vector<1x224xf32> to vector<1x16xf32>
    %59 = arith.addf %55, %58 : vector<1x16xf32>
    %60 = vector.extract_strided_slice %46 {offsets = [0, 48], sizes = [1, 16], strides = [1, 1]} : vector<1x224xf32> to vector<1x16xf32>
    %61 = arith.addf %57, %60 : vector<1x16xf32>
    %62 = vector.extract_strided_slice %49 {offsets = [0, 48], sizes = [1, 16], strides = [1, 1]} : vector<1x224xf32> to vector<1x16xf32>
    %63 = arith.addf %59, %62 : vector<1x16xf32>
    %64 = vector.extract_strided_slice %46 {offsets = [0, 64], sizes = [1, 16], strides = [1, 1]} : vector<1x224xf32> to vector<1x16xf32>
    %65 = arith.addf %61, %64 : vector<1x16xf32>
    %66 = vector.extract_strided_slice %49 {offsets = [0, 64], sizes = [1, 16], strides = [1, 1]} : vector<1x224xf32> to vector<1x16xf32>
    %67 = arith.addf %63, %66 : vector<1x16xf32>
    %68 = vector.extract_strided_slice %46 {offsets = [0, 80], sizes = [1, 16], strides = [1, 1]} : vector<1x224xf32> to vector<1x16xf32>
    %69 = arith.addf %65, %68 : vector<1x16xf32>
    %70 = vector.extract_strided_slice %49 {offsets = [0, 80], sizes = [1, 16], strides = [1, 1]} : vector<1x224xf32> to vector<1x16xf32>
    %71 = arith.addf %67, %70 : vector<1x16xf32>
    %72 = vector.extract_strided_slice %46 {offsets = [0, 96], sizes = [1, 16], strides = [1, 1]} : vector<1x224xf32> to vector<1x16xf32>
    %73 = arith.addf %69, %72 : vector<1x16xf32>
    %74 = vector.extract_strided_slice %49 {offsets = [0, 96], sizes = [1, 16], strides = [1, 1]} : vector<1x224xf32> to vector<1x16xf32>
    %75 = arith.addf %71, %74 : vector<1x16xf32>
    %76 = vector.extract_strided_slice %46 {offsets = [0, 112], sizes = [1, 16], strides = [1, 1]} : vector<1x224xf32> to vector<1x16xf32>
    %77 = arith.addf %73, %76 : vector<1x16xf32>
    %78 = vector.extract_strided_slice %49 {offsets = [0, 112], sizes = [1, 16], strides = [1, 1]} : vector<1x224xf32> to vector<1x16xf32>
    %79 = arith.addf %75, %78 : vector<1x16xf32>
    %80 = vector.extract_strided_slice %46 {offsets = [0, 128], sizes = [1, 16], strides = [1, 1]} : vector<1x224xf32> to vector<1x16xf32>
    %81 = arith.addf %77, %80 : vector<1x16xf32>
    %82 = vector.extract_strided_slice %49 {offsets = [0, 128], sizes = [1, 16], strides = [1, 1]} : vector<1x224xf32> to vector<1x16xf32>
    %83 = arith.addf %79, %82 : vector<1x16xf32>
    %84 = vector.extract_strided_slice %46 {offsets = [0, 144], sizes = [1, 16], strides = [1, 1]} : vector<1x224xf32> to vector<1x16xf32>
    %85 = arith.addf %81, %84 : vector<1x16xf32>
    %86 = vector.extract_strided_slice %49 {offsets = [0, 144], sizes = [1, 16], strides = [1, 1]} : vector<1x224xf32> to vector<1x16xf32>
    %87 = arith.addf %83, %86 : vector<1x16xf32>
    %88 = vector.extract_strided_slice %46 {offsets = [0, 160], sizes = [1, 16], strides = [1, 1]} : vector<1x224xf32> to vector<1x16xf32>
    %89 = arith.addf %85, %88 : vector<1x16xf32>
    %90 = vector.extract_strided_slice %49 {offsets = [0, 160], sizes = [1, 16], strides = [1, 1]} : vector<1x224xf32> to vector<1x16xf32>
    %91 = arith.addf %87, %90 : vector<1x16xf32>
    %92 = vector.extract_strided_slice %46 {offsets = [0, 176], sizes = [1, 16], strides = [1, 1]} : vector<1x224xf32> to vector<1x16xf32>
    %93 = arith.addf %89, %92 : vector<1x16xf32>
    %94 = vector.extract_strided_slice %49 {offsets = [0, 176], sizes = [1, 16], strides = [1, 1]} : vector<1x224xf32> to vector<1x16xf32>
    %95 = arith.addf %91, %94 : vector<1x16xf32>
    %96 = vector.extract_strided_slice %46 {offsets = [0, 192], sizes = [1, 16], strides = [1, 1]} : vector<1x224xf32> to vector<1x16xf32>
    %97 = arith.addf %93, %96 : vector<1x16xf32>
    %98 = vector.extract_strided_slice %49 {offsets = [0, 192], sizes = [1, 16], strides = [1, 1]} : vector<1x224xf32> to vector<1x16xf32>
    %99 = arith.addf %95, %98 : vector<1x16xf32>
    %100 = vector.extract_strided_slice %46 {offsets = [0, 208], sizes = [1, 16], strides = [1, 1]} : vector<1x224xf32> to vector<1x16xf32>
    %101 = arith.addf %97, %100 : vector<1x16xf32>
    %102 = vector.extract_strided_slice %49 {offsets = [0, 208], sizes = [1, 16], strides = [1, 1]} : vector<1x224xf32> to vector<1x16xf32>
    %103 = arith.addf %99, %102 : vector<1x16xf32>
    %cst_33 = arith.constant 3.920000e+02 : f32
    %104 = vector.broadcast %cst_33 : f32 to vector<1x16xf32>
    %105 = arith.divf %101, %104 : vector<1x16xf32>
    %cst_34 = arith.constant 3.920000e+02 : f32
    %106 = vector.broadcast %cst_34 : f32 to vector<1x16xf32>
    %107 = arith.divf %103, %106 : vector<1x16xf32>
    %108 = arith.mulf %105, %105 : vector<1x16xf32>
    %109 = arith.subf %107, %108 : vector<1x16xf32>
    %cst_35 = arith.constant 9.99999974E-6 : f32
    %110 = vector.broadcast %cst_35 : f32 to vector<1x16xf32>
    %111 = arith.addf %109, %110 : vector<1x16xf32>
    %112 = math.rsqrt %111 : vector<1x16xf32>
    %113 = arith.mulf %43, %112 : vector<1x16xf32>
    %114 = arith.mulf %105, %113 : vector<1x16xf32>
    %115 = arith.subf %44, %114 : vector<1x16xf32>
    %116 = tpu.concatenate %113, %113, %113, %113, %113, %113, %113, %113, %113, %113, %113, %113, %113, %113 in 1 : vector<1x16xf32>, vector<1x16xf32>, vector<1x16xf32>, vector<1x16xf32>, vector<1x16xf32>, vector<1x16xf32>, vector<1x16xf32>, vector<1x16xf32>, vector<1x16xf32>, vector<1x16xf32>, vector<1x16xf32>, vector<1x16xf32>, vector<1x16xf32>, vector<1x16xf32> -> vector<1x224xf32>
    %117 = tpu.concatenate %115, %115, %115, %115, %115, %115, %115, %115, %115, %115, %115, %115, %115, %115 in 1 : vector<1x16xf32>, vector<1x16xf32>, vector<1x16xf32>, vector<1x16xf32>, vector<1x16xf32>, vector<1x16xf32>, vector<1x16xf32>, vector<1x16xf32>, vector<1x16xf32>, vector<1x16xf32>, vector<1x16xf32>, vector<1x16xf32>, vector<1x16xf32>, vector<1x16xf32> -> vector<1x224xf32>
    %118 = vector.broadcast %116 : vector<1x224xf32> to vector<28x224xf32>
    %119 = arith.mulf %42, %118 : vector<28x224xf32>
    %120 = vector.broadcast %117 : vector<1x224xf32> to vector<28x224xf32>
    %121 = arith.addf %119, %120 : vector<28x224xf32>
    %122 = math.tanh %121 : vector<28x224xf32>
    %cst_36 = arith.constant 0.000000e+00 : f32
    %123 = vector.broadcast %cst_36 : f32 to vector<2x224xf32>
    %c0_37 = arith.constant 0 : index
    %c0_38 = arith.constant 0 : index
    %c0_39 = arith.constant 0 : index
    %124 = vector.load %arg22[%c0_37, %c0_38, %c0_39] : memref<2x16x224xf32, #tpu.memory_space<vmem>>, vector<2x1x224xf32>
    %125 = vector.shape_cast %124 : vector<2x1x224xf32> to vector<2x224xf32>
    %126 = vector.shape_cast %123 : vector<2x224xf32> to vector<2x1x224xf32>
    tpu.vector_store %arg22[%c0_37, %c0_38, %c0_39], %126 {strides = array<i32>} : memref<2x16x224xf32, #tpu.memory_space<vmem>>, vector<2x1x224xf32>,
    %cst_40 = arith.constant 0.000000e+00 : f32
    %127 = vector.broadcast %cst_40 : f32 to vector<2x224xf32>
    %c0_41 = arith.constant 0 : index
    %c15 = arith.constant 15 : index
    %c0_42 = arith.constant 0 : index
    %128 = vector.load %arg22[%c0_41, %c15, %c0_42] : memref<2x16x224xf32, #tpu.memory_space<vmem>>, vector<2x1x224xf32>
    %129 = vector.shape_cast %128 : vector<2x1x224xf32> to vector<2x224xf32>
    %130 = vector.shape_cast %127 : vector<2x224xf32> to vector<2x1x224xf32>
    tpu.vector_store %arg22[%c0_41, %c15, %c0_42], %130 {strides = array<i32>} : memref<2x16x224xf32, #tpu.memory_space<vmem>>, vector<2x1x224xf32>,
    %131 = vector.shape_cast %122 : vector<28x224xf32> to vector<2x14x224xf32>
    %c0_43 = arith.constant 0 : index
    %c1_44 = arith.constant 1 : index
    %c0_45 = arith.constant 0 : index
    %132 = vector.load %arg22[%c0_43, %c1_44, %c0_45] : memref<2x16x224xf32, #tpu.memory_space<vmem>>, vector<2x14x224xf32>
    tpu.vector_store %arg22[%c0_43, %c1_44, %c0_45], %131 {strides = array<i32>} : memref<2x16x224xf32, #tpu.memory_space<vmem>>, vector<2x14x224xf32>,
    %c0_46 = arith.constant 0 : index
    %c0_47 = arith.constant 0 : index
    %c0_48 = arith.constant 0 : index
    %133 = vector.load %arg22[%c0_46, %c0_47, %c0_48] : memref<2x16x224xf32, #tpu.memory_space<vmem>>, vector<2x16x224xf32>
    %134 = vector.shape_cast %133 : vector<2x16x224xf32> to vector<2x8x2x224xf32>
    %135 = vector.extract_strided_slice %134 {offsets = [0, 0, 0, 0], sizes = [2, 7, 1, 224], strides = [1, 1, 1, 1]} : vector<2x8x2x224xf32> to vector<2x7x1x224xf32>
    %136 = vector.shape_cast %135 : vector<2x7x1x224xf32> to vector<2x7x224xf32>
    %137 = vector.shape_cast %136 : vector<2x7x224xf32> to vector<14x224xf32>
    %c0_49 = arith.constant 0 : index
    %c0_50 = arith.constant 0 : index
    %c0_51 = arith.constant 0 : index
    %138 = vector.load %arg4[%c0_49, %c0_50, %c0_51] : memref<4x224x224xbf16, #tpu.memory_space<vmem>>, vector<1x224x224xbf16>
    %139 = vector.shape_cast %138 : vector<1x224x224xbf16> to vector<224x224xbf16>
    %140 = arith.truncf %137 : vector<14x224xf32> to vector<14x224xbf16>
    %cst_52 = arith.constant dense<0.000000e+00> : vector<14x224xf32>
    %141 = tpu.matmul %140, %139, %cst_52 {dimension_numbers = #tpu.dot_dimension_numbers<[1], [0], [0], [1], [0, 0, 1, 1], [], []>} : vector<14x224xbf16>, vector<224x224xbf16>, vector<14x224xf32> -> vector<14x224xf32>
    %142 = vector.extract_strided_slice %134 {offsets = [0, 0, 1, 0], sizes = [2, 7, 1, 224], strides = [1, 1, 1, 1]} : vector<2x8x2x224xf32> to vector<2x7x1x224xf32>
    %143 = vector.shape_cast %142 : vector<2x7x1x224xf32> to vector<2x7x224xf32>
    %144 = vector.shape_cast %143 : vector<2x7x224xf32> to vector<14x224xf32>
    %c1_53 = arith.constant 1 : index
    %c0_54 = arith.constant 0 : index
    %c0_55 = arith.constant 0 : index
    %145 = vector.load %arg4[%c1_53, %c0_54, %c0_55] : memref<4x224x224xbf16, #tpu.memory_space<vmem>>, vector<1x224x224xbf16>
    %146 = vector.shape_cast %145 : vector<1x224x224xbf16> to vector<224x224xbf16>
    %147 = arith.truncf %144 : vector<14x224xf32> to vector<14x224xbf16>
    %cst_56 = arith.constant dense<0.000000e+00> : vector<14x224xf32>
    %148 = tpu.matmul %147, %146, %cst_56 {dimension_numbers = #tpu.dot_dimension_numbers<[1], [0], [0], [1], [0, 0, 1, 1], [], []>} : vector<14x224xbf16>, vector<224x224xbf16>, vector<14x224xf32> -> vector<14x224xf32>
    %149 = arith.addf %141, %148 : vector<14x224xf32>
    %150 = vector.extract_strided_slice %134 {offsets = [0, 1, 0, 0], sizes = [2, 7, 1, 224], strides = [1, 1, 1, 1]} : vector<2x8x2x224xf32> to vector<2x7x1x224xf32>
    %151 = vector.shape_cast %150 : vector<2x7x1x224xf32> to vector<2x7x224xf32>
    %152 = vector.shape_cast %151 : vector<2x7x224xf32> to vector<14x224xf32>
    %c2_57 = arith.constant 2 : index
    %c0_58 = arith.constant 0 : index
    %c0_59 = arith.constant 0 : index
    %153 = vector.load %arg4[%c2_57, %c0_58, %c0_59] : memref<4x224x224xbf16, #tpu.memory_space<vmem>>, vector<1x224x224xbf16>
    %154 = vector.shape_cast %153 : vector<1x224x224xbf16> to vector<224x224xbf16>
    %155 = arith.truncf %152 : vector<14x224xf32> to vector<14x224xbf16>
    %cst_60 = arith.constant dense<0.000000e+00> : vector<14x224xf32>
    %156 = tpu.matmul %155, %154, %cst_60 {dimension_numbers = #tpu.dot_dimension_numbers<[1], [0], [0], [1], [0, 0, 1, 1], [], []>} : vector<14x224xbf16>, vector<224x224xbf16>, vector<14x224xf32> -> vector<14x224xf32>
    %157 = arith.addf %149, %156 : vector<14x224xf32>
    %158 = vector.extract_strided_slice %134 {offsets = [0, 1, 1, 0], sizes = [2, 7, 1, 224], strides = [1, 1, 1, 1]} : vector<2x8x2x224xf32> to vector<2x7x1x224xf32>
    %159 = vector.shape_cast %158 : vector<2x7x1x224xf32> to vector<2x7x224xf32>
    %160 = vector.shape_cast %159 : vector<2x7x224xf32> to vector<14x224xf32>
    %c3_61 = arith.constant 3 : index
    %c0_62 = arith.constant 0 : index
    %c0_63 = arith.constant 0 : index
    %161 = vector.load %arg4[%c3_61, %c0_62, %c0_63] : memref<4x224x224xbf16, #tpu.memory_space<vmem>>, vector<1x224x224xbf16>
    %162 = vector.shape_cast %161 : vector<1x224x224xbf16> to vector<224x224xbf16>
    %163 = arith.truncf %160 : vector<14x224xf32> to vector<14x224xbf16>
    %cst_64 = arith.constant dense<0.000000e+00> : vector<14x224xf32>
    %164 = tpu.matmul %163, %162, %cst_64 {dimension_numbers = #tpu.dot_dimension_numbers<[1], [0], [0], [1], [0, 0, 1, 1], [], []>} : vector<14x224xbf16>, vector<224x224xbf16>, vector<14x224xf32> -> vector<14x224xf32>
    %165 = arith.addf %157, %164 : vector<14x224xf32>
    %c0_65 = arith.constant 0 : index
    %c0_66 = arith.constant 0 : index
    %166 = vector.load %arg5[%c0_65, %c0_66] : memref<1x32xf32, #tpu.memory_space<vmem>>, vector<1x32xf32>
    %c0_67 = arith.constant 0 : index
    %c0_68 = arith.constant 0 : index
    %167 = vector.load %arg6[%c0_67, %c0_68] : memref<1x32xf32, #tpu.memory_space<vmem>>, vector<1x32xf32>
    %cst_69 = arith.constant dense<0.000000e+00> : vector<224xf32>
    %168 = vector.multi_reduction <add>, %165, %cst_69 [0] : vector<14x224xf32> to vector<224xf32>
    %169 = vector.shape_cast %168 : vector<224xf32> to vector<1x224xf32>
    %170 = arith.mulf %165, %165 : vector<14x224xf32>
    %cst_70 = arith.constant dense<0.000000e+00> : vector<224xf32>
    %171 = vector.multi_reduction <add>, %170, %cst_70 [0] : vector<14x224xf32> to vector<224xf32>
    %172 = vector.shape_cast %171 : vector<224xf32> to vector<1x224xf32>
    %173 = vector.extract_strided_slice %169 {offsets = [0, 0], sizes = [1, 32], strides = [1, 1]} : vector<1x224xf32> to vector<1x32xf32>
    %174 = vector.extract_strided_slice %172 {offsets = [0, 0], sizes = [1, 32], strides = [1, 1]} : vector<1x224xf32> to vector<1x32xf32>
    %175 = vector.extract_strided_slice %169 {offsets = [0, 32], sizes = [1, 32], strides = [1, 1]} : vector<1x224xf32> to vector<1x32xf32>
    %176 = arith.addf %173, %175 : vector<1x32xf32>
    %177 = vector.extract_strided_slice %172 {offsets = [0, 32], sizes = [1, 32], strides = [1, 1]} : vector<1x224xf32> to vector<1x32xf32>
    %178 = arith.addf %174, %177 : vector<1x32xf32>
    %179 = vector.extract_strided_slice %169 {offsets = [0, 64], sizes = [1, 32], strides = [1, 1]} : vector<1x224xf32> to vector<1x32xf32>
    %180 = arith.addf %176, %179 : vector<1x32xf32>
    %181 = vector.extract_strided_slice %172 {offsets = [0, 64], sizes = [1, 32], strides = [1, 1]} : vector<1x224xf32> to vector<1x32xf32>
    %182 = arith.addf %178, %181 : vector<1x32xf32>
    %183 = vector.extract_strided_slice %169 {offsets = [0, 96], sizes = [1, 32], strides = [1, 1]} : vector<1x224xf32> to vector<1x32xf32>
    %184 = arith.addf %180, %183 : vector<1x32xf32>
    %185 = vector.extract_strided_slice %172 {offsets = [0, 96], sizes = [1, 32], strides = [1, 1]} : vector<1x224xf32> to vector<1x32xf32>
    %186 = arith.addf %182, %185 : vector<1x32xf32>
    %187 = vector.extract_strided_slice %169 {offsets = [0, 128], sizes = [1, 32], strides = [1, 1]} : vector<1x224xf32> to vector<1x32xf32>
    %188 = arith.addf %184, %187 : vector<1x32xf32>
    %189 = vector.extract_strided_slice %172 {offsets = [0, 128], sizes = [1, 32], strides = [1, 1]} : vector<1x224xf32> to vector<1x32xf32>
    %190 = arith.addf %186, %189 : vector<1x32xf32>
    %191 = vector.extract_strided_slice %169 {offsets = [0, 160], sizes = [1, 32], strides = [1, 1]} : vector<1x224xf32> to vector<1x32xf32>
    %192 = arith.addf %188, %191 : vector<1x32xf32>
    %193 = vector.extract_strided_slice %172 {offsets = [0, 160], sizes = [1, 32], strides = [1, 1]} : vector<1x224xf32> to vector<1x32xf32>
    %194 = arith.addf %190, %193 : vector<1x32xf32>
    %195 = vector.extract_strided_slice %169 {offsets = [0, 192], sizes = [1, 32], strides = [1, 1]} : vector<1x224xf32> to vector<1x32xf32>
    %196 = arith.addf %192, %195 : vector<1x32xf32>
    %197 = vector.extract_strided_slice %172 {offsets = [0, 192], sizes = [1, 32], strides = [1, 1]} : vector<1x224xf32> to vector<1x32xf32>
    %198 = arith.addf %194, %197 : vector<1x32xf32>
    %cst_71 = arith.constant 9.800000e+01 : f32
    %199 = vector.broadcast %cst_71 : f32 to vector<1x32xf32>
    %200 = arith.divf %196, %199 : vector<1x32xf32>
    %cst_72 = arith.constant 9.800000e+01 : f32
    %201 = vector.broadcast %cst_72 : f32 to vector<1x32xf32>
    %202 = arith.divf %198, %201 : vector<1x32xf32>
    %203 = arith.mulf %200, %200 : vector<1x32xf32>
    %204 = arith.subf %202, %203 : vector<1x32xf32>
    %cst_73 = arith.constant 9.99999974E-6 : f32
    %205 = vector.broadcast %cst_73 : f32 to vector<1x32xf32>
    %206 = arith.addf %204, %205 : vector<1x32xf32>
    %207 = math.rsqrt %206 : vector<1x32xf32>
    %208 = arith.mulf %166, %207 : vector<1x32xf32>
    %209 = arith.mulf %200, %208 : vector<1x32xf32>
    %210 = arith.subf %167, %209 : vector<1x32xf32>
    %211 = tpu.concatenate %208, %208, %208, %208, %208, %208, %208 in 1 : vector<1x32xf32>, vector<1x32xf32>, vector<1x32xf32>, vector<1x32xf32>, vector<1x32xf32>, vector<1x32xf32>, vector<1x32xf32> -> vector<1x224xf32>
    %212 = tpu.concatenate %210, %210, %210, %210, %210, %210, %210 in 1 : vector<1x32xf32>, vector<1x32xf32>, vector<1x32xf32>, vector<1x32xf32>, vector<1x32xf32>, vector<1x32xf32>, vector<1x32xf32> -> vector<1x224xf32>
    %213 = vector.broadcast %211 : vector<1x224xf32> to vector<14x224xf32>
    %214 = arith.mulf %165, %213 : vector<14x224xf32>
    %215 = vector.broadcast %212 : vector<1x224xf32> to vector<14x224xf32>
    %216 = arith.addf %214, %215 : vector<14x224xf32>
    %217 = math.tanh %216 : vector<14x224xf32>
    %cst_74 = arith.constant 0.000000e+00 : f32
    %218 = vector.broadcast %cst_74 : f32 to vector<2x224xf32>
    %c0_75 = arith.constant 0 : index
    %c0_76 = arith.constant 0 : index
    %c0_77 = arith.constant 0 : index
    %219 = vector.load %arg23[%c0_75, %c0_76, %c0_77] : memref<2x9x224xf32, #tpu.memory_space<vmem>>, vector<2x1x224xf32>
    %220 = vector.shape_cast %219 : vector<2x1x224xf32> to vector<2x224xf32>
    %221 = vector.shape_cast %218 : vector<2x224xf32> to vector<2x1x224xf32>
    tpu.vector_store %arg23[%c0_75, %c0_76, %c0_77], %221 {strides = array<i32>} : memref<2x9x224xf32, #tpu.memory_space<vmem>>, vector<2x1x224xf32>,
    %cst_78 = arith.constant 0.000000e+00 : f32
    %222 = vector.broadcast %cst_78 : f32 to vector<2x224xf32>
    %c0_79 = arith.constant 0 : index
    %c8 = arith.constant 8 : index
    %c0_80 = arith.constant 0 : index
    %223 = vector.load %arg23[%c0_79, %c8, %c0_80] : memref<2x9x224xf32, #tpu.memory_space<vmem>>, vector<2x1x224xf32>
    %224 = vector.shape_cast %223 : vector<2x1x224xf32> to vector<2x224xf32>
    %225 = vector.shape_cast %222 : vector<2x224xf32> to vector<2x1x224xf32>
    tpu.vector_store %arg23[%c0_79, %c8, %c0_80], %225 {strides = array<i32>} : memref<2x9x224xf32, #tpu.memory_space<vmem>>, vector<2x1x224xf32>,
    %226 = vector.shape_cast %217 : vector<14x224xf32> to vector<2x7x224xf32>
    %c0_81 = arith.constant 0 : index
    %c1_82 = arith.constant 1 : index
    %c0_83 = arith.constant 0 : index
    %227 = vector.load %arg23[%c0_81, %c1_82, %c0_83] : memref<2x9x224xf32, #tpu.memory_space<vmem>>, vector<2x7x224xf32>
    tpu.vector_store %arg23[%c0_81, %c1_82, %c0_83], %226 {strides = array<i32>} : memref<2x9x224xf32, #tpu.memory_space<vmem>>, vector<2x7x224xf32>,
    %c0_84 = arith.constant 0 : index
    %c0_85 = arith.constant 0 : index
    %c0_86 = arith.constant 0 : index
    %228 = vector.load %arg23[%c0_84, %c0_85, %c0_86] : memref<2x9x224xf32, #tpu.memory_space<vmem>>, vector<2x9x224xf32>
    %229 = vector.extract_strided_slice %228 {offsets = [0, 0, 0], sizes = [2, 7, 224], strides = [1, 1, 1]} : vector<2x9x224xf32> to vector<2x7x224xf32>
    %230 = vector.shape_cast %229 : vector<2x7x224xf32> to vector<14x224xf32>
    %c0_87 = arith.constant 0 : index
    %c0_88 = arith.constant 0 : index
    %c0_89 = arith.constant 0 : index
    %231 = vector.load %arg7[%c0_87, %c0_88, %c0_89] : memref<3x224x112xbf16, #tpu.memory_space<vmem>>, vector<1x224x112xbf16>
    %232 = vector.shape_cast %231 : vector<1x224x112xbf16> to vector<224x112xbf16>
    %233 = arith.truncf %230 : vector<14x224xf32> to vector<14x224xbf16>
    %cst_90 = arith.constant dense<0.000000e+00> : vector<14x112xf32>
    %234 = tpu.matmul %233, %232, %cst_90 {dimension_numbers = #tpu.dot_dimension_numbers<[1], [0], [0], [1], [0, 0, 1, 1], [], []>} : vector<14x224xbf16>, vector<224x112xbf16>, vector<14x112xf32> -> vector<14x112xf32>
    %235 = vector.extract_strided_slice %228 {offsets = [0, 1, 0], sizes = [2, 7, 224], strides = [1, 1, 1]} : vector<2x9x224xf32> to vector<2x7x224xf32>
    %236 = vector.shape_cast %235 : vector<2x7x224xf32> to vector<14x224xf32>
    %c1_91 = arith.constant 1 : index
    %c0_92 = arith.constant 0 : index
    %c0_93 = arith.constant 0 : index
    %237 = vector.load %arg7[%c1_91, %c0_92, %c0_93] : memref<3x224x112xbf16, #tpu.memory_space<vmem>>, vector<1x224x112xbf16>
    %238 = vector.shape_cast %237 : vector<1x224x112xbf16> to vector<224x112xbf16>
    %239 = arith.truncf %236 : vector<14x224xf32> to vector<14x224xbf16>
    %cst_94 = arith.constant dense<0.000000e+00> : vector<14x112xf32>
    %240 = tpu.matmul %239, %238, %cst_94 {dimension_numbers = #tpu.dot_dimension_numbers<[1], [0], [0], [1], [0, 0, 1, 1], [], []>} : vector<14x224xbf16>, vector<224x112xbf16>, vector<14x112xf32> -> vector<14x112xf32>
    %241 = arith.addf %234, %240 : vector<14x112xf32>
    %242 = vector.extract_strided_slice %228 {offsets = [0, 2, 0], sizes = [2, 7, 224], strides = [1, 1, 1]} : vector<2x9x224xf32> to vector<2x7x224xf32>
    %243 = vector.shape_cast %242 : vector<2x7x224xf32> to vector<14x224xf32>
    %c2_95 = arith.constant 2 : index
    %c0_96 = arith.constant 0 : index
    %c0_97 = arith.constant 0 : index
    %244 = vector.load %arg7[%c2_95, %c0_96, %c0_97] : memref<3x224x112xbf16, #tpu.memory_space<vmem>>, vector<1x224x112xbf16>
    %245 = vector.shape_cast %244 : vector<1x224x112xbf16> to vector<224x112xbf16>
    %246 = arith.truncf %243 : vector<14x224xf32> to vector<14x224xbf16>
    %cst_98 = arith.constant dense<0.000000e+00> : vector<14x112xf32>
    %247 = tpu.matmul %246, %245, %cst_98 {dimension_numbers = #tpu.dot_dimension_numbers<[1], [0], [0], [1], [0, 0, 1, 1], [], []>} : vector<14x224xbf16>, vector<224x112xbf16>, vector<14x112xf32> -> vector<14x112xf32>
    %248 = arith.addf %241, %247 : vector<14x112xf32>
    %c0_99 = arith.constant 0 : index
    %c0_100 = arith.constant 0 : index
    %249 = vector.load %arg8[%c0_99, %c0_100] : memref<1x16xf32, #tpu.memory_space<vmem>>, vector<1x16xf32>
    %c0_101 = arith.constant 0 : index
    %c0_102 = arith.constant 0 : index
    %250 = vector.load %arg9[%c0_101, %c0_102] : memref<1x16xf32, #tpu.memory_space<vmem>>, vector<1x16xf32>
    %cst_103 = arith.constant dense<0.000000e+00> : vector<112xf32>
    %251 = vector.multi_reduction <add>, %248, %cst_103 [0] : vector<14x112xf32> to vector<112xf32>
    %252 = vector.shape_cast %251 : vector<112xf32> to vector<1x112xf32>
    %253 = arith.mulf %248, %248 : vector<14x112xf32>
    %cst_104 = arith.constant dense<0.000000e+00> : vector<112xf32>
    %254 = vector.multi_reduction <add>, %253, %cst_104 [0] : vector<14x112xf32> to vector<112xf32>
    %255 = vector.shape_cast %254 : vector<112xf32> to vector<1x112xf32>
    %256 = vector.extract_strided_slice %252 {offsets = [0, 0], sizes = [1, 16], strides = [1, 1]} : vector<1x112xf32> to vector<1x16xf32>
    %257 = vector.extract_strided_slice %255 {offsets = [0, 0], sizes = [1, 16], strides = [1, 1]} : vector<1x112xf32> to vector<1x16xf32>
    %258 = vector.extract_strided_slice %252 {offsets = [0, 16], sizes = [1, 16], strides = [1, 1]} : vector<1x112xf32> to vector<1x16xf32>
    %259 = arith.addf %256, %258 : vector<1x16xf32>
    %260 = vector.extract_strided_slice %255 {offsets = [0, 16], sizes = [1, 16], strides = [1, 1]} : vector<1x112xf32> to vector<1x16xf32>
    %261 = arith.addf %257, %260 : vector<1x16xf32>
    %262 = vector.extract_strided_slice %252 {offsets = [0, 32], sizes = [1, 16], strides = [1, 1]} : vector<1x112xf32> to vector<1x16xf32>
    %263 = arith.addf %259, %262 : vector<1x16xf32>
    %264 = vector.extract_strided_slice %255 {offsets = [0, 32], sizes = [1, 16], strides = [1, 1]} : vector<1x112xf32> to vector<1x16xf32>
    %265 = arith.addf %261, %264 : vector<1x16xf32>
    %266 = vector.extract_strided_slice %252 {offsets = [0, 48], sizes = [1, 16], strides = [1, 1]} : vector<1x112xf32> to vector<1x16xf32>
    %267 = arith.addf %263, %266 : vector<1x16xf32>
    %268 = vector.extract_strided_slice %255 {offsets = [0, 48], sizes = [1, 16], strides = [1, 1]} : vector<1x112xf32> to vector<1x16xf32>
    %269 = arith.addf %265, %268 : vector<1x16xf32>
    %270 = vector.extract_strided_slice %252 {offsets = [0, 64], sizes = [1, 16], strides = [1, 1]} : vector<1x112xf32> to vector<1x16xf32>
    %271 = arith.addf %267, %270 : vector<1x16xf32>
    %272 = vector.extract_strided_slice %255 {offsets = [0, 64], sizes = [1, 16], strides = [1, 1]} : vector<1x112xf32> to vector<1x16xf32>
    %273 = arith.addf %269, %272 : vector<1x16xf32>
    %274 = vector.extract_strided_slice %252 {offsets = [0, 80], sizes = [1, 16], strides = [1, 1]} : vector<1x112xf32> to vector<1x16xf32>
    %275 = arith.addf %271, %274 : vector<1x16xf32>
    %276 = vector.extract_strided_slice %255 {offsets = [0, 80], sizes = [1, 16], strides = [1, 1]} : vector<1x112xf32> to vector<1x16xf32>
    %277 = arith.addf %273, %276 : vector<1x16xf32>
    %278 = vector.extract_strided_slice %252 {offsets = [0, 96], sizes = [1, 16], strides = [1, 1]} : vector<1x112xf32> to vector<1x16xf32>
    %279 = arith.addf %275, %278 : vector<1x16xf32>
    %280 = vector.extract_strided_slice %255 {offsets = [0, 96], sizes = [1, 16], strides = [1, 1]} : vector<1x112xf32> to vector<1x16xf32>
    %281 = arith.addf %277, %280 : vector<1x16xf32>
    %cst_105 = arith.constant 9.800000e+01 : f32
    %282 = vector.broadcast %cst_105 : f32 to vector<1x16xf32>
    %283 = arith.divf %279, %282 : vector<1x16xf32>
    %cst_106 = arith.constant 9.800000e+01 : f32
    %284 = vector.broadcast %cst_106 : f32 to vector<1x16xf32>
    %285 = arith.divf %281, %284 : vector<1x16xf32>
    %286 = arith.mulf %283, %283 : vector<1x16xf32>
    %287 = arith.subf %285, %286 : vector<1x16xf32>
    %cst_107 = arith.constant 9.99999974E-6 : f32
    %288 = vector.broadcast %cst_107 : f32 to vector<1x16xf32>
    %289 = arith.addf %287, %288 : vector<1x16xf32>
    %290 = math.rsqrt %289 : vector<1x16xf32>
    %291 = arith.mulf %249, %290 : vector<1x16xf32>
    %292 = arith.mulf %283, %291 : vector<1x16xf32>
    %293 = arith.subf %250, %292 : vector<1x16xf32>
    %294 = tpu.concatenate %291, %291, %291, %291, %291, %291, %291 in 1 : vector<1x16xf32>, vector<1x16xf32>, vector<1x16xf32>, vector<1x16xf32>, vector<1x16xf32>, vector<1x16xf32>, vector<1x16xf32> -> vector<1x112xf32>
    %295 = tpu.concatenate %293, %293, %293, %293, %293, %293, %293 in 1 : vector<1x16xf32>, vector<1x16xf32>, vector<1x16xf32>, vector<1x16xf32>, vector<1x16xf32>, vector<1x16xf32>, vector<1x16xf32> -> vector<1x112xf32>
    %296 = vector.broadcast %294 : vector<1x112xf32> to vector<14x112xf32>
    %297 = arith.mulf %248, %296 : vector<14x112xf32>
    %298 = vector.broadcast %295 : vector<1x112xf32> to vector<14x112xf32>
    %299 = arith.addf %297, %298 : vector<14x112xf32>
    %300 = math.tanh %299 : vector<14x112xf32>
    %301 = vector.shape_cast %300 : vector<14x112xf32> to vector<2x7x112xf32>
    %cst_108 = arith.constant 0.000000e+00 : f32
    %302 = vector.broadcast %cst_108 : f32 to vector<2x30xf32>
    %303 = vector.extract_strided_slice %301 {offsets = [0, 0, 0], sizes = [2, 1, 112], strides = [1, 1, 1]} : vector<2x7x112xf32> to vector<2x1x112xf32>
    %304 = vector.shape_cast %303 : vector<2x1x112xf32> to vector<2x112xf32>
    %c0_109 = arith.constant 0 : index
    %c0_110 = arith.constant 0 : index
    %c0_111 = arith.constant 0 : index
    %305 = vector.load %arg10[%c0_109, %c0_110, %c0_111] : memref<7x112x30xbf16, #tpu.memory_space<vmem>>, vector<1x112x30xbf16>
    %306 = vector.shape_cast %305 : vector<1x112x30xbf16> to vector<112x30xbf16>
    %307 = arith.truncf %304 : vector<2x112xf32> to vector<2x112xbf16>
    %cst_112 = arith.constant dense<0.000000e+00> : vector<2x30xf32>
    %308 = tpu.matmul %307, %306, %cst_112 {dimension_numbers = #tpu.dot_dimension_numbers<[1], [0], [0], [1], [0, 0, 1, 1], [], []>} : vector<2x112xbf16>, vector<112x30xbf16>, vector<2x30xf32> -> vector<2x30xf32>
    %309 = arith.addf %302, %308 : vector<2x30xf32>
    %310 = vector.extract_strided_slice %301 {offsets = [0, 1, 0], sizes = [2, 1, 112], strides = [1, 1, 1]} : vector<2x7x112xf32> to vector<2x1x112xf32>
    %311 = vector.shape_cast %310 : vector<2x1x112xf32> to vector<2x112xf32>
    %c1_113 = arith.constant 1 : index
    %c0_114 = arith.constant 0 : index
    %c0_115 = arith.constant 0 : index
    %312 = vector.load %arg10[%c1_113, %c0_114, %c0_115] : memref<7x112x30xbf16, #tpu.memory_space<vmem>>, vector<1x112x30xbf16>
    %313 = vector.shape_cast %312 : vector<1x112x30xbf16> to vector<112x30xbf16>
    %314 = arith.truncf %311 : vector<2x112xf32> to vector<2x112xbf16>
    %cst_116 = arith.constant dense<0.000000e+00> : vector<2x30xf32>
    %315 = tpu.matmul %314, %313, %cst_116 {dimension_numbers = #tpu.dot_dimension_numbers<[1], [0], [0], [1], [0, 0, 1, 1], [], []>} : vector<2x112xbf16>, vector<112x30xbf16>, vector<2x30xf32> -> vector<2x30xf32>
    %316 = arith.addf %309, %315 : vector<2x30xf32>
    %317 = vector.extract_strided_slice %301 {offsets = [0, 2, 0], sizes = [2, 1, 112], strides = [1, 1, 1]} : vector<2x7x112xf32> to vector<2x1x112xf32>
    %318 = vector.shape_cast %317 : vector<2x1x112xf32> to vector<2x112xf32>
    %c2_117 = arith.constant 2 : index
    %c0_118 = arith.constant 0 : index
    %c0_119 = arith.constant 0 : index
    %319 = vector.load %arg10[%c2_117, %c0_118, %c0_119] : memref<7x112x30xbf16, #tpu.memory_space<vmem>>, vector<1x112x30xbf16>
    %320 = vector.shape_cast %319 : vector<1x112x30xbf16> to vector<112x30xbf16>
    %321 = arith.truncf %318 : vector<2x112xf32> to vector<2x112xbf16>
    %cst_120 = arith.constant dense<0.000000e+00> : vector<2x30xf32>
    %322 = tpu.matmul %321, %320, %cst_120 {dimension_numbers = #tpu.dot_dimension_numbers<[1], [0], [0], [1], [0, 0, 1, 1], [], []>} : vector<2x112xbf16>, vector<112x30xbf16>, vector<2x30xf32> -> vector<2x30xf32>
    %323 = arith.addf %316, %322 : vector<2x30xf32>
    %324 = vector.extract_strided_slice %301 {offsets = [0, 3, 0], sizes = [2, 1, 112], strides = [1, 1, 1]} : vector<2x7x112xf32> to vector<2x1x112xf32>
    %325 = vector.shape_cast %324 : vector<2x1x112xf32> to vector<2x112xf32>
    %c3_121 = arith.constant 3 : index
    %c0_122 = arith.constant 0 : index
    %c0_123 = arith.constant 0 : index
    %326 = vector.load %arg10[%c3_121, %c0_122, %c0_123] : memref<7x112x30xbf16, #tpu.memory_space<vmem>>, vector<1x112x30xbf16>
    %327 = vector.shape_cast %326 : vector<1x112x30xbf16> to vector<112x30xbf16>
    %328 = arith.truncf %325 : vector<2x112xf32> to vector<2x112xbf16>
    %cst_124 = arith.constant dense<0.000000e+00> : vector<2x30xf32>
    %329 = tpu.matmul %328, %327, %cst_124 {dimension_numbers = #tpu.dot_dimension_numbers<[1], [0], [0], [1], [0, 0, 1, 1], [], []>} : vector<2x112xbf16>, vector<112x30xbf16>, vector<2x30xf32> -> vector<2x30xf32>
    %330 = arith.addf %323, %329 : vector<2x30xf32>
    %331 = vector.extract_strided_slice %301 {offsets = [0, 4, 0], sizes = [2, 1, 112], strides = [1, 1, 1]} : vector<2x7x112xf32> to vector<2x1x112xf32>
    %332 = vector.shape_cast %331 : vector<2x1x112xf32> to vector<2x112xf32>
    %c4 = arith.constant 4 : index
    %c0_125 = arith.constant 0 : index
    %c0_126 = arith.constant 0 : index
    %333 = vector.load %arg10[%c4, %c0_125, %c0_126] : memref<7x112x30xbf16, #tpu.memory_space<vmem>>, vector<1x112x30xbf16>
    %334 = vector.shape_cast %333 : vector<1x112x30xbf16> to vector<112x30xbf16>
    %335 = arith.truncf %332 : vector<2x112xf32> to vector<2x112xbf16>
    %cst_127 = arith.constant dense<0.000000e+00> : vector<2x30xf32>
    %336 = tpu.matmul %335, %334, %cst_127 {dimension_numbers = #tpu.dot_dimension_numbers<[1], [0], [0], [1], [0, 0, 1, 1], [], []>} : vector<2x112xbf16>, vector<112x30xbf16>, vector<2x30xf32> -> vector<2x30xf32>
    %337 = arith.addf %330, %336 : vector<2x30xf32>
    %338 = vector.extract_strided_slice %301 {offsets = [0, 5, 0], sizes = [2, 1, 112], strides = [1, 1, 1]} : vector<2x7x112xf32> to vector<2x1x112xf32>
    %339 = vector.shape_cast %338 : vector<2x1x112xf32> to vector<2x112xf32>
    %c5 = arith.constant 5 : index
    %c0_128 = arith.constant 0 : index
    %c0_129 = arith.constant 0 : index
    %340 = vector.load %arg10[%c5, %c0_128, %c0_129] : memref<7x112x30xbf16, #tpu.memory_space<vmem>>, vector<1x112x30xbf16>
    %341 = vector.shape_cast %340 : vector<1x112x30xbf16> to vector<112x30xbf16>
    %342 = arith.truncf %339 : vector<2x112xf32> to vector<2x112xbf16>
    %cst_130 = arith.constant dense<0.000000e+00> : vector<2x30xf32>
    %343 = tpu.matmul %342, %341, %cst_130 {dimension_numbers = #tpu.dot_dimension_numbers<[1], [0], [0], [1], [0, 0, 1, 1], [], []>} : vector<2x112xbf16>, vector<112x30xbf16>, vector<2x30xf32> -> vector<2x30xf32>
    %344 = arith.addf %337, %343 : vector<2x30xf32>
    %345 = vector.extract_strided_slice %301 {offsets = [0, 6, 0], sizes = [2, 1, 112], strides = [1, 1, 1]} : vector<2x7x112xf32> to vector<2x1x112xf32>
    %346 = vector.shape_cast %345 : vector<2x1x112xf32> to vector<2x112xf32>
    %c6 = arith.constant 6 : index
    %c0_131 = arith.constant 0 : index
    %c0_132 = arith.constant 0 : index
    %347 = vector.load %arg10[%c6, %c0_131, %c0_132] : memref<7x112x30xbf16, #tpu.memory_space<vmem>>, vector<1x112x30xbf16>
    %348 = vector.shape_cast %347 : vector<1x112x30xbf16> to vector<112x30xbf16>
    %349 = arith.truncf %346 : vector<2x112xf32> to vector<2x112xbf16>
    %cst_133 = arith.constant dense<0.000000e+00> : vector<2x30xf32>
    %350 = tpu.matmul %349, %348, %cst_133 {dimension_numbers = #tpu.dot_dimension_numbers<[1], [0], [0], [1], [0, 0, 1, 1], [], []>} : vector<2x112xbf16>, vector<112x30xbf16>, vector<2x30xf32> -> vector<2x30xf32>
    %351 = arith.addf %344, %350 : vector<2x30xf32>
    %c0_134 = arith.constant 0 : index
    %c0_135 = arith.constant 0 : index
    %352 = vector.load %arg11[%c0_134, %c0_135] : memref<1x30xf32, #tpu.memory_space<vmem>>, vector<1x30xf32>
    %353 = vector.broadcast %352 : vector<1x30xf32> to vector<2x30xf32>
    %354 = arith.addf %351, %353 : vector<2x30xf32>
    %c0_136 = arith.constant 0 : index
    %c0_137 = arith.constant 0 : index
    %355 = vector.load %arg19[%c0_136, %c0_137] : memref<2x30xf32, #tpu.memory_space<vmem>>, vector<2x30xf32>
    tpu.vector_store %arg19[%c0_136, %c0_137], %354 {strides = array<i32>} : memref<2x30xf32, #tpu.memory_space<vmem>>, vector<2x30xf32>,
    %cst_138 = arith.constant 0.000000e+00 : f32
    %356 = vector.broadcast %cst_138 : f32 to vector<2x112xf32>
    %c0_139 = arith.constant 0 : index
    %c0_140 = arith.constant 0 : index
    %c0_141 = arith.constant 0 : index
    %357 = vector.load %arg24[%c0_139, %c0_140, %c0_141] : memref<2x9x112xf32, #tpu.memory_space<vmem>>, vector<2x1x112xf32>
    %358 = vector.shape_cast %357 : vector<2x1x112xf32> to vector<2x112xf32>
    %359 = vector.shape_cast %356 : vector<2x112xf32> to vector<2x1x112xf32>
    tpu.vector_store %arg24[%c0_139, %c0_140, %c0_141], %359 {strides = array<i32>} : memref<2x9x112xf32, #tpu.memory_space<vmem>>, vector<2x1x112xf32>,
    %cst_142 = arith.constant 0.000000e+00 : f32
    %360 = vector.broadcast %cst_142 : f32 to vector<2x112xf32>
    %c0_143 = arith.constant 0 : index
    %c8_144 = arith.constant 8 : index
    %c0_145 = arith.constant 0 : index
    %361 = vector.load %arg24[%c0_143, %c8_144, %c0_145] : memref<2x9x112xf32, #tpu.memory_space<vmem>>, vector<2x1x112xf32>
    %362 = vector.shape_cast %361 : vector<2x1x112xf32> to vector<2x112xf32>
    %363 = vector.shape_cast %360 : vector<2x112xf32> to vector<2x1x112xf32>
    tpu.vector_store %arg24[%c0_143, %c8_144, %c0_145], %363 {strides = array<i32>} : memref<2x9x112xf32, #tpu.memory_space<vmem>>, vector<2x1x112xf32>,
    %c0_146 = arith.constant 0 : index
    %c0_147 = arith.constant 0 : index
    %c0_148 = arith.constant 0 : index
    %364 = vector.load %arg12[%c0_146, %c0_147, %c0_148] : memref<7x30x112xbf16, #tpu.memory_space<vmem>>, vector<1x30x112xbf16>
    %365 = vector.shape_cast %364 : vector<1x30x112xbf16> to vector<30x112xbf16>
    %366 = arith.truncf %354 : vector<2x30xf32> to vector<2x30xbf16>
    %cst_149 = arith.constant dense<0.000000e+00> : vector<2x112xf32>
    %367 = tpu.matmul %366, %365, %cst_149 {dimension_numbers = #tpu.dot_dimension_numbers<[1], [0], [0], [1], [0, 0, 1, 1], [], []>} : vector<2x30xbf16>, vector<30x112xbf16>, vector<2x112xf32> -> vector<2x112xf32>
    %c0_150 = arith.constant 0 : index
    %c0_151 = arith.constant 0 : index
    %c0_152 = arith.constant 0 : index
    %368 = vector.load %arg13[%c0_150, %c0_151, %c0_152] : memref<7x1x112xf32, #tpu.memory_space<vmem>>, vector<1x1x112xf32>
    %369 = vector.shape_cast %368 : vector<1x1x112xf32> to vector<1x112xf32>
    %370 = vector.broadcast %369 : vector<1x112xf32> to vector<2x112xf32>
    %371 = arith.addf %367, %370 : vector<2x112xf32>
    %c0_153 = arith.constant 0 : index
    %c1_154 = arith.constant 1 : index
    %c0_155 = arith.constant 0 : index
    %372 = vector.load %arg24[%c0_153, %c1_154, %c0_155] : memref<2x9x112xf32, #tpu.memory_space<vmem>>, vector<2x1x112xf32>
    %373 = vector.shape_cast %372 : vector<2x1x112xf32> to vector<2x112xf32>
    %374 = vector.shape_cast %371 : vector<2x112xf32> to vector<2x1x112xf32>
    tpu.vector_store %arg24[%c0_153, %c1_154, %c0_155], %374 {strides = array<i32>} : memref<2x9x112xf32, #tpu.memory_space<vmem>>, vector<2x1x112xf32>,
    %c1_156 = arith.constant 1 : index
    %c0_157 = arith.constant 0 : index
    %c0_158 = arith.constant 0 : index
    %375 = vector.load %arg12[%c1_156, %c0_157, %c0_158] : memref<7x30x112xbf16, #tpu.memory_space<vmem>>, vector<1x30x112xbf16>
    %376 = vector.shape_cast %375 : vector<1x30x112xbf16> to vector<30x112xbf16>
    %377 = arith.truncf %354 : vector<2x30xf32> to vector<2x30xbf16>
    %cst_159 = arith.constant dense<0.000000e+00> : vector<2x112xf32>
    %378 = tpu.matmul %377, %376, %cst_159 {dimension_numbers = #tpu.dot_dimension_numbers<[1], [0], [0], [1], [0, 0, 1, 1], [], []>} : vector<2x30xbf16>, vector<30x112xbf16>, vector<2x112xf32> -> vector<2x112xf32>
    %c1_160 = arith.constant 1 : index
    %c0_161 = arith.constant 0 : index
    %c0_162 = arith.constant 0 : index
    %379 = vector.load %arg13[%c1_160, %c0_161, %c0_162] : memref<7x1x112xf32, #tpu.memory_space<vmem>>, vector<1x1x112xf32>
    %380 = vector.shape_cast %379 : vector<1x1x112xf32> to vector<1x112xf32>
    %381 = vector.broadcast %380 : vector<1x112xf32> to vector<2x112xf32>
    %382 = arith.addf %378, %381 : vector<2x112xf32>
    %c0_163 = arith.constant 0 : index
    %c2_164 = arith.constant 2 : index
    %c0_165 = arith.constant 0 : index
    %383 = vector.load %arg24[%c0_163, %c2_164, %c0_165] : memref<2x9x112xf32, #tpu.memory_space<vmem>>, vector<2x1x112xf32>
    %384 = vector.shape_cast %383 : vector<2x1x112xf32> to vector<2x112xf32>
    %385 = vector.shape_cast %382 : vector<2x112xf32> to vector<2x1x112xf32>
    tpu.vector_store %arg24[%c0_163, %c2_164, %c0_165], %385 {strides = array<i32>} : memref<2x9x112xf32, #tpu.memory_space<vmem>>, vector<2x1x112xf32>,
    %c2_166 = arith.constant 2 : index
    %c0_167 = arith.constant 0 : index
    %c0_168 = arith.constant 0 : index
    %386 = vector.load %arg12[%c2_166, %c0_167, %c0_168] : memref<7x30x112xbf16, #tpu.memory_space<vmem>>, vector<1x30x112xbf16>
    %387 = vector.shape_cast %386 : vector<1x30x112xbf16> to vector<30x112xbf16>
    %388 = arith.truncf %354 : vector<2x30xf32> to vector<2x30xbf16>
    %cst_169 = arith.constant dense<0.000000e+00> : vector<2x112xf32>
    %389 = tpu.matmul %388, %387, %cst_169 {dimension_numbers = #tpu.dot_dimension_numbers<[1], [0], [0], [1], [0, 0, 1, 1], [], []>} : vector<2x30xbf16>, vector<30x112xbf16>, vector<2x112xf32> -> vector<2x112xf32>
    %c2_170 = arith.constant 2 : index
    %c0_171 = arith.constant 0 : index
    %c0_172 = arith.constant 0 : index
    %390 = vector.load %arg13[%c2_170, %c0_171, %c0_172] : memref<7x1x112xf32, #tpu.memory_space<vmem>>, vector<1x1x112xf32>
    %391 = vector.shape_cast %390 : vector<1x1x112xf32> to vector<1x112xf32>
    %392 = vector.broadcast %391 : vector<1x112xf32> to vector<2x112xf32>
    %393 = arith.addf %389, %392 : vector<2x112xf32>
    %c0_173 = arith.constant 0 : index
    %c3_174 = arith.constant 3 : index
    %c0_175 = arith.constant 0 : index
    %394 = vector.load %arg24[%c0_173, %c3_174, %c0_175] : memref<2x9x112xf32, #tpu.memory_space<vmem>>, vector<2x1x112xf32>
    %395 = vector.shape_cast %394 : vector<2x1x112xf32> to vector<2x112xf32>
    %396 = vector.shape_cast %393 : vector<2x112xf32> to vector<2x1x112xf32>
    tpu.vector_store %arg24[%c0_173, %c3_174, %c0_175], %396 {strides = array<i32>} : memref<2x9x112xf32, #tpu.memory_space<vmem>>, vector<2x1x112xf32>,
    %c3_176 = arith.constant 3 : index
    %c0_177 = arith.constant 0 : index
    %c0_178 = arith.constant 0 : index
    %397 = vector.load %arg12[%c3_176, %c0_177, %c0_178] : memref<7x30x112xbf16, #tpu.memory_space<vmem>>, vector<1x30x112xbf16>
    %398 = vector.shape_cast %397 : vector<1x30x112xbf16> to vector<30x112xbf16>
    %399 = arith.truncf %354 : vector<2x30xf32> to vector<2x30xbf16>
    %cst_179 = arith.constant dense<0.000000e+00> : vector<2x112xf32>
    %400 = tpu.matmul %399, %398, %cst_179 {dimension_numbers = #tpu.dot_dimension_numbers<[1], [0], [0], [1], [0, 0, 1, 1], [], []>} : vector<2x30xbf16>, vector<30x112xbf16>, vector<2x112xf32> -> vector<2x112xf32>
    %c3_180 = arith.constant 3 : index
    %c0_181 = arith.constant 0 : index
    %c0_182 = arith.constant 0 : index
    %401 = vector.load %arg13[%c3_180, %c0_181, %c0_182] : memref<7x1x112xf32, #tpu.memory_space<vmem>>, vector<1x1x112xf32>
    %402 = vector.shape_cast %401 : vector<1x1x112xf32> to vector<1x112xf32>
    %403 = vector.broadcast %402 : vector<1x112xf32> to vector<2x112xf32>
    %404 = arith.addf %400, %403 : vector<2x112xf32>
    %c0_183 = arith.constant 0 : index
    %c4_184 = arith.constant 4 : index
    %c0_185 = arith.constant 0 : index
    %405 = vector.load %arg24[%c0_183, %c4_184, %c0_185] : memref<2x9x112xf32, #tpu.memory_space<vmem>>, vector<2x1x112xf32>
    %406 = vector.shape_cast %405 : vector<2x1x112xf32> to vector<2x112xf32>
    %407 = vector.shape_cast %404 : vector<2x112xf32> to vector<2x1x112xf32>
    tpu.vector_store %arg24[%c0_183, %c4_184, %c0_185], %407 {strides = array<i32>} : memref<2x9x112xf32, #tpu.memory_space<vmem>>, vector<2x1x112xf32>,
    %c4_186 = arith.constant 4 : index
    %c0_187 = arith.constant 0 : index
    %c0_188 = arith.constant 0 : index
    %408 = vector.load %arg12[%c4_186, %c0_187, %c0_188] : memref<7x30x112xbf16, #tpu.memory_space<vmem>>, vector<1x30x112xbf16>
    %409 = vector.shape_cast %408 : vector<1x30x112xbf16> to vector<30x112xbf16>
    %410 = arith.truncf %354 : vector<2x30xf32> to vector<2x30xbf16>
    %cst_189 = arith.constant dense<0.000000e+00> : vector<2x112xf32>
    %411 = tpu.matmul %410, %409, %cst_189 {dimension_numbers = #tpu.dot_dimension_numbers<[1], [0], [0], [1], [0, 0, 1, 1], [], []>} : vector<2x30xbf16>, vector<30x112xbf16>, vector<2x112xf32> -> vector<2x112xf32>
    %c4_190 = arith.constant 4 : index
    %c0_191 = arith.constant 0 : index
    %c0_192 = arith.constant 0 : index
    %412 = vector.load %arg13[%c4_190, %c0_191, %c0_192] : memref<7x1x112xf32, #tpu.memory_space<vmem>>, vector<1x1x112xf32>
    %413 = vector.shape_cast %412 : vector<1x1x112xf32> to vector<1x112xf32>
    %414 = vector.broadcast %413 : vector<1x112xf32> to vector<2x112xf32>
    %415 = arith.addf %411, %414 : vector<2x112xf32>
    %c0_193 = arith.constant 0 : index
    %c5_194 = arith.constant 5 : index
    %c0_195 = arith.constant 0 : index
    %416 = vector.load %arg24[%c0_193, %c5_194, %c0_195] : memref<2x9x112xf32, #tpu.memory_space<vmem>>, vector<2x1x112xf32>
    %417 = vector.shape_cast %416 : vector<2x1x112xf32> to vector<2x112xf32>
    %418 = vector.shape_cast %415 : vector<2x112xf32> to vector<2x1x112xf32>
    tpu.vector_store %arg24[%c0_193, %c5_194, %c0_195], %418 {strides = array<i32>} : memref<2x9x112xf32, #tpu.memory_space<vmem>>, vector<2x1x112xf32>,
    %c5_196 = arith.constant 5 : index
    %c0_197 = arith.constant 0 : index
    %c0_198 = arith.constant 0 : index
    %419 = vector.load %arg12[%c5_196, %c0_197, %c0_198] : memref<7x30x112xbf16, #tpu.memory_space<vmem>>, vector<1x30x112xbf16>
    %420 = vector.shape_cast %419 : vector<1x30x112xbf16> to vector<30x112xbf16>
    %421 = arith.truncf %354 : vector<2x30xf32> to vector<2x30xbf16>
    %cst_199 = arith.constant dense<0.000000e+00> : vector<2x112xf32>
    %422 = tpu.matmul %421, %420, %cst_199 {dimension_numbers = #tpu.dot_dimension_numbers<[1], [0], [0], [1], [0, 0, 1, 1], [], []>} : vector<2x30xbf16>, vector<30x112xbf16>, vector<2x112xf32> -> vector<2x112xf32>
    %c5_200 = arith.constant 5 : index
    %c0_201 = arith.constant 0 : index
    %c0_202 = arith.constant 0 : index
    %423 = vector.load %arg13[%c5_200, %c0_201, %c0_202] : memref<7x1x112xf32, #tpu.memory_space<vmem>>, vector<1x1x112xf32>
    %424 = vector.shape_cast %423 : vector<1x1x112xf32> to vector<1x112xf32>
    %425 = vector.broadcast %424 : vector<1x112xf32> to vector<2x112xf32>
    %426 = arith.addf %422, %425 : vector<2x112xf32>
    %c0_203 = arith.constant 0 : index
    %c6_204 = arith.constant 6 : index
    %c0_205 = arith.constant 0 : index
    %427 = vector.load %arg24[%c0_203, %c6_204, %c0_205] : memref<2x9x112xf32, #tpu.memory_space<vmem>>, vector<2x1x112xf32>
    %428 = vector.shape_cast %427 : vector<2x1x112xf32> to vector<2x112xf32>
    %429 = vector.shape_cast %426 : vector<2x112xf32> to vector<2x1x112xf32>
    tpu.vector_store %arg24[%c0_203, %c6_204, %c0_205], %429 {strides = array<i32>} : memref<2x9x112xf32, #tpu.memory_space<vmem>>, vector<2x1x112xf32>,
    %c6_206 = arith.constant 6 : index
    %c0_207 = arith.constant 0 : index
    %c0_208 = arith.constant 0 : index
    %430 = vector.load %arg12[%c6_206, %c0_207, %c0_208] : memref<7x30x112xbf16, #tpu.memory_space<vmem>>, vector<1x30x112xbf16>
    %431 = vector.shape_cast %430 : vector<1x30x112xbf16> to vector<30x112xbf16>
    %432 = arith.truncf %354 : vector<2x30xf32> to vector<2x30xbf16>
    %cst_209 = arith.constant dense<0.000000e+00> : vector<2x112xf32>
    %433 = tpu.matmul %432, %431, %cst_209 {dimension_numbers = #tpu.dot_dimension_numbers<[1], [0], [0], [1], [0, 0, 1, 1], [], []>} : vector<2x30xbf16>, vector<30x112xbf16>, vector<2x112xf32> -> vector<2x112xf32>
    %c6_210 = arith.constant 6 : index
    %c0_211 = arith.constant 0 : index
    %c0_212 = arith.constant 0 : index
    %434 = vector.load %arg13[%c6_210, %c0_211, %c0_212] : memref<7x1x112xf32, #tpu.memory_space<vmem>>, vector<1x1x112xf32>
    %435 = vector.shape_cast %434 : vector<1x1x112xf32> to vector<1x112xf32>
    %436 = vector.broadcast %435 : vector<1x112xf32> to vector<2x112xf32>
    %437 = arith.addf %433, %436 : vector<2x112xf32>
    %c0_213 = arith.constant 0 : index
    %c7 = arith.constant 7 : index
    %c0_214 = arith.constant 0 : index
    %438 = vector.load %arg24[%c0_213, %c7, %c0_214] : memref<2x9x112xf32, #tpu.memory_space<vmem>>, vector<2x1x112xf32>
    %439 = vector.shape_cast %438 : vector<2x1x112xf32> to vector<2x112xf32>
    %440 = vector.shape_cast %437 : vector<2x112xf32> to vector<2x1x112xf32>
    tpu.vector_store %arg24[%c0_213, %c7, %c0_214], %440 {strides = array<i32>} : memref<2x9x112xf32, #tpu.memory_space<vmem>>, vector<2x1x112xf32>,
    %c0_215 = arith.constant 0 : index
    %c0_216 = arith.constant 0 : index
    %c0_217 = arith.constant 0 : index
    %441 = vector.load %arg24[%c0_215, %c0_216, %c0_217] : memref<2x9x112xf32, #tpu.memory_space<vmem>>, vector<2x9x112xf32>
    %442 = vector.extract_strided_slice %441 {offsets = [0, 1, 0], sizes = [2, 7, 112], strides = [1, 1, 1]} : vector<2x9x112xf32> to vector<2x7x112xf32>
    %443 = vector.shape_cast %442 : vector<2x7x112xf32> to vector<14x112xf32>
    %c0_218 = arith.constant 0 : index
    %c0_219 = arith.constant 0 : index
    %c0_220 = arith.constant 0 : index
    %444 = vector.load %arg14[%c0_218, %c0_219, %c0_220] : memref<4x112x224xbf16, #tpu.memory_space<vmem>>, vector<1x112x224xbf16>
    %445 = vector.shape_cast %444 : vector<1x112x224xbf16> to vector<112x224xbf16>
    %446 = arith.truncf %443 : vector<14x112xf32> to vector<14x112xbf16>
    %cst_221 = arith.constant dense<0.000000e+00> : vector<14x224xf32>
    %447 = tpu.matmul %446, %445, %cst_221 {dimension_numbers = #tpu.dot_dimension_numbers<[1], [0], [0], [1], [0, 0, 1, 1], [], []>} : vector<14x112xbf16>, vector<112x224xbf16>, vector<14x224xf32> -> vector<14x224xf32>
    %448 = vector.extract_strided_slice %441 {offsets = [0, 0, 0], sizes = [2, 7, 112], strides = [1, 1, 1]} : vector<2x9x112xf32> to vector<2x7x112xf32>
    %449 = vector.shape_cast %448 : vector<2x7x112xf32> to vector<14x112xf32>
    %c1_222 = arith.constant 1 : index
    %c0_223 = arith.constant 0 : index
    %c0_224 = arith.constant 0 : index
    %450 = vector.load %arg14[%c1_222, %c0_223, %c0_224] : memref<4x112x224xbf16, #tpu.memory_space<vmem>>, vector<1x112x224xbf16>
    %451 = vector.shape_cast %450 : vector<1x112x224xbf16> to vector<112x224xbf16>
    %452 = arith.truncf %449 : vector<14x112xf32> to vector<14x112xbf16>
    %cst_225 = arith.constant dense<0.000000e+00> : vector<14x224xf32>
    %453 = tpu.matmul %452, %451, %cst_225 {dimension_numbers = #tpu.dot_dimension_numbers<[1], [0], [0], [1], [0, 0, 1, 1], [], []>} : vector<14x112xbf16>, vector<112x224xbf16>, vector<14x224xf32> -> vector<14x224xf32>
    %454 = arith.addf %447, %453 : vector<14x224xf32>
    %455 = vector.extract_strided_slice %441 {offsets = [0, 2, 0], sizes = [2, 7, 112], strides = [1, 1, 1]} : vector<2x9x112xf32> to vector<2x7x112xf32>
    %456 = vector.shape_cast %455 : vector<2x7x112xf32> to vector<14x112xf32>
    %c2_226 = arith.constant 2 : index
    %c0_227 = arith.constant 0 : index
    %c0_228 = arith.constant 0 : index
    %457 = vector.load %arg14[%c2_226, %c0_227, %c0_228] : memref<4x112x224xbf16, #tpu.memory_space<vmem>>, vector<1x112x224xbf16>
    %458 = vector.shape_cast %457 : vector<1x112x224xbf16> to vector<112x224xbf16>
    %459 = arith.truncf %456 : vector<14x112xf32> to vector<14x112xbf16>
    %cst_229 = arith.constant dense<0.000000e+00> : vector<14x224xf32>
    %460 = tpu.matmul %459, %458, %cst_229 {dimension_numbers = #tpu.dot_dimension_numbers<[1], [0], [0], [1], [0, 0, 1, 1], [], []>} : vector<14x112xbf16>, vector<112x224xbf16>, vector<14x224xf32> -> vector<14x224xf32>
    %461 = vector.extract_strided_slice %441 {offsets = [0, 1, 0], sizes = [2, 7, 112], strides = [1, 1, 1]} : vector<2x9x112xf32> to vector<2x7x112xf32>
    %462 = vector.shape_cast %461 : vector<2x7x112xf32> to vector<14x112xf32>
    %c3_230 = arith.constant 3 : index
    %c0_231 = arith.constant 0 : index
    %c0_232 = arith.constant 0 : index
    %463 = vector.load %arg14[%c3_230, %c0_231, %c0_232] : memref<4x112x224xbf16, #tpu.memory_space<vmem>>, vector<1x112x224xbf16>
    %464 = vector.shape_cast %463 : vector<1x112x224xbf16> to vector<112x224xbf16>
    %465 = arith.truncf %462 : vector<14x112xf32> to vector<14x112xbf16>
    %cst_233 = arith.constant dense<0.000000e+00> : vector<14x224xf32>
    %466 = tpu.matmul %465, %464, %cst_233 {dimension_numbers = #tpu.dot_dimension_numbers<[1], [0], [0], [1], [0, 0, 1, 1], [], []>} : vector<14x112xbf16>, vector<112x224xbf16>, vector<14x224xf32> -> vector<14x224xf32>
    %467 = arith.addf %460, %466 : vector<14x224xf32>
    %c0_234 = arith.constant 0 : index
    %c0_235 = arith.constant 0 : index
    %468 = vector.load %arg15[%c0_234, %c0_235] : memref<1x16xf32, #tpu.memory_space<vmem>>, vector<1x16xf32>
    %c0_236 = arith.constant 0 : index
    %c0_237 = arith.constant 0 : index
    %469 = vector.load %arg16[%c0_236, %c0_237] : memref<1x16xf32, #tpu.memory_space<vmem>>, vector<1x16xf32>
    %cst_238 = arith.constant dense<0.000000e+00> : vector<224xf32>
    %470 = vector.multi_reduction <add>, %454, %cst_238 [0] : vector<14x224xf32> to vector<224xf32>
    %471 = vector.shape_cast %470 : vector<224xf32> to vector<1x224xf32>
    %472 = arith.mulf %454, %454 : vector<14x224xf32>
    %cst_239 = arith.constant dense<0.000000e+00> : vector<224xf32>
    %473 = vector.multi_reduction <add>, %472, %cst_239 [0] : vector<14x224xf32> to vector<224xf32>
    %474 = vector.shape_cast %473 : vector<224xf32> to vector<1x224xf32>
    %cst_240 = arith.constant dense<0.000000e+00> : vector<224xf32>
    %475 = vector.multi_reduction <add>, %467, %cst_240 [0] : vector<14x224xf32> to vector<224xf32>
    %476 = vector.shape_cast %475 : vector<224xf32> to vector<1x224xf32>
    %477 = arith.mulf %467, %467 : vector<14x224xf32>
    %cst_241 = arith.constant dense<0.000000e+00> : vector<224xf32>
    %478 = vector.multi_reduction <add>, %477, %cst_241 [0] : vector<14x224xf32> to vector<224xf32>
    %479 = vector.shape_cast %478 : vector<224xf32> to vector<1x224xf32>
    %480 = arith.addf %471, %476 : vector<1x224xf32>
    %481 = arith.addf %474, %479 : vector<1x224xf32>
    %482 = vector.extract_strided_slice %480 {offsets = [0, 0], sizes = [1, 16], strides = [1, 1]} : vector<1x224xf32> to vector<1x16xf32>
    %483 = vector.extract_strided_slice %481 {offsets = [0, 0], sizes = [1, 16], strides = [1, 1]} : vector<1x224xf32> to vector<1x16xf32>
    %484 = vector.extract_strided_slice %480 {offsets = [0, 16], sizes = [1, 16], strides = [1, 1]} : vector<1x224xf32> to vector<1x16xf32>
    %485 = arith.addf %482, %484 : vector<1x16xf32>
    %486 = vector.extract_strided_slice %481 {offsets = [0, 16], sizes = [1, 16], strides = [1, 1]} : vector<1x224xf32> to vector<1x16xf32>
    %487 = arith.addf %483, %486 : vector<1x16xf32>
    %488 = vector.extract_strided_slice %480 {offsets = [0, 32], sizes = [1, 16], strides = [1, 1]} : vector<1x224xf32> to vector<1x16xf32>
    %489 = arith.addf %485, %488 : vector<1x16xf32>
    %490 = vector.extract_strided_slice %481 {offsets = [0, 32], sizes = [1, 16], strides = [1, 1]} : vector<1x224xf32> to vector<1x16xf32>
    %491 = arith.addf %487, %490 : vector<1x16xf32>
    %492 = vector.extract_strided_slice %480 {offsets = [0, 48], sizes = [1, 16], strides = [1, 1]} : vector<1x224xf32> to vector<1x16xf32>
    %493 = arith.addf %489, %492 : vector<1x16xf32>
    %494 = vector.extract_strided_slice %481 {offsets = [0, 48], sizes = [1, 16], strides = [1, 1]} : vector<1x224xf32> to vector<1x16xf32>
    %495 = arith.addf %491, %494 : vector<1x16xf32>
    %496 = vector.extract_strided_slice %480 {offsets = [0, 64], sizes = [1, 16], strides = [1, 1]} : vector<1x224xf32> to vector<1x16xf32>
    %497 = arith.addf %493, %496 : vector<1x16xf32>
    %498 = vector.extract_strided_slice %481 {offsets = [0, 64], sizes = [1, 16], strides = [1, 1]} : vector<1x224xf32> to vector<1x16xf32>
    %499 = arith.addf %495, %498 : vector<1x16xf32>
    %500 = vector.extract_strided_slice %480 {offsets = [0, 80], sizes = [1, 16], strides = [1, 1]} : vector<1x224xf32> to vector<1x16xf32>
    %501 = arith.addf %497, %500 : vector<1x16xf32>
    %502 = vector.extract_strided_slice %481 {offsets = [0, 80], sizes = [1, 16], strides = [1, 1]} : vector<1x224xf32> to vector<1x16xf32>
    %503 = arith.addf %499, %502 : vector<1x16xf32>
    %504 = vector.extract_strided_slice %480 {offsets = [0, 96], sizes = [1, 16], strides = [1, 1]} : vector<1x224xf32> to vector<1x16xf32>
    %505 = arith.addf %501, %504 : vector<1x16xf32>
    %506 = vector.extract_strided_slice %481 {offsets = [0, 96], sizes = [1, 16], strides = [1, 1]} : vector<1x224xf32> to vector<1x16xf32>
    %507 = arith.addf %503, %506 : vector<1x16xf32>
    %508 = vector.extract_strided_slice %480 {offsets = [0, 112], sizes = [1, 16], strides = [1, 1]} : vector<1x224xf32> to vector<1x16xf32>
    %509 = arith.addf %505, %508 : vector<1x16xf32>
    %510 = vector.extract_strided_slice %481 {offsets = [0, 112], sizes = [1, 16], strides = [1, 1]} : vector<1x224xf32> to vector<1x16xf32>
    %511 = arith.addf %507, %510 : vector<1x16xf32>
    %512 = vector.extract_strided_slice %480 {offsets = [0, 128], sizes = [1, 16], strides = [1, 1]} : vector<1x224xf32> to vector<1x16xf32>
    %513 = arith.addf %509, %512 : vector<1x16xf32>
    %514 = vector.extract_strided_slice %481 {offsets = [0, 128], sizes = [1, 16], strides = [1, 1]} : vector<1x224xf32> to vector<1x16xf32>
    %515 = arith.addf %511, %514 : vector<1x16xf32>
    %516 = vector.extract_strided_slice %480 {offsets = [0, 144], sizes = [1, 16], strides = [1, 1]} : vector<1x224xf32> to vector<1x16xf32>
    %517 = arith.addf %513, %516 : vector<1x16xf32>
    %518 = vector.extract_strided_slice %481 {offsets = [0, 144], sizes = [1, 16], strides = [1, 1]} : vector<1x224xf32> to vector<1x16xf32>
    %519 = arith.addf %515, %518 : vector<1x16xf32>
    %520 = vector.extract_strided_slice %480 {offsets = [0, 160], sizes = [1, 16], strides = [1, 1]} : vector<1x224xf32> to vector<1x16xf32>
    %521 = arith.addf %517, %520 : vector<1x16xf32>
    %522 = vector.extract_strided_slice %481 {offsets = [0, 160], sizes = [1, 16], strides = [1, 1]} : vector<1x224xf32> to vector<1x16xf32>
    %523 = arith.addf %519, %522 : vector<1x16xf32>
    %524 = vector.extract_strided_slice %480 {offsets = [0, 176], sizes = [1, 16], strides = [1, 1]} : vector<1x224xf32> to vector<1x16xf32>
    %525 = arith.addf %521, %524 : vector<1x16xf32>
    %526 = vector.extract_strided_slice %481 {offsets = [0, 176], sizes = [1, 16], strides = [1, 1]} : vector<1x224xf32> to vector<1x16xf32>
    %527 = arith.addf %523, %526 : vector<1x16xf32>
    %528 = vector.extract_strided_slice %480 {offsets = [0, 192], sizes = [1, 16], strides = [1, 1]} : vector<1x224xf32> to vector<1x16xf32>
    %529 = arith.addf %525, %528 : vector<1x16xf32>
    %530 = vector.extract_strided_slice %481 {offsets = [0, 192], sizes = [1, 16], strides = [1, 1]} : vector<1x224xf32> to vector<1x16xf32>
    %531 = arith.addf %527, %530 : vector<1x16xf32>
    %532 = vector.extract_strided_slice %480 {offsets = [0, 208], sizes = [1, 16], strides = [1, 1]} : vector<1x224xf32> to vector<1x16xf32>
    %533 = arith.addf %529, %532 : vector<1x16xf32>
    %534 = vector.extract_strided_slice %481 {offsets = [0, 208], sizes = [1, 16], strides = [1, 1]} : vector<1x224xf32> to vector<1x16xf32>
    %535 = arith.addf %531, %534 : vector<1x16xf32>
    %cst_242 = arith.constant 3.920000e+02 : f32
    %536 = vector.broadcast %cst_242 : f32 to vector<1x16xf32>
    %537 = arith.divf %533, %536 : vector<1x16xf32>
    %cst_243 = arith.constant 3.920000e+02 : f32
    %538 = vector.broadcast %cst_243 : f32 to vector<1x16xf32>
    %539 = arith.divf %535, %538 : vector<1x16xf32>
    %540 = arith.mulf %537, %537 : vector<1x16xf32>
    %541 = arith.subf %539, %540 : vector<1x16xf32>
    %cst_244 = arith.constant 9.99999974E-6 : f32
    %542 = vector.broadcast %cst_244 : f32 to vector<1x16xf32>
    %543 = arith.addf %541, %542 : vector<1x16xf32>
    %544 = math.rsqrt %543 : vector<1x16xf32>
    %545 = arith.mulf %468, %544 : vector<1x16xf32>
    %546 = arith.mulf %537, %545 : vector<1x16xf32>
    %547 = arith.subf %469, %546 : vector<1x16xf32>
    %548 = tpu.concatenate %545, %545, %545, %545, %545, %545, %545, %545, %545, %545, %545, %545, %545, %545 in 1 : vector<1x16xf32>, vector<1x16xf32>, vector<1x16xf32>, vector<1x16xf32>, vector<1x16xf32>, vector<1x16xf32>, vector<1x16xf32>, vector<1x16xf32>, vector<1x16xf32>, vector<1x16xf32>, vector<1x16xf32>, vector<1x16xf32>, vector<1x16xf32>, vector<1x16xf32> -> vector<1x224xf32>
    %549 = tpu.concatenate %547, %547, %547, %547, %547, %547, %547, %547, %547, %547, %547, %547, %547, %547 in 1 : vector<1x16xf32>, vector<1x16xf32>, vector<1x16xf32>, vector<1x16xf32>, vector<1x16xf32>, vector<1x16xf32>, vector<1x16xf32>, vector<1x16xf32>, vector<1x16xf32>, vector<1x16xf32>, vector<1x16xf32>, vector<1x16xf32>, vector<1x16xf32>, vector<1x16xf32> -> vector<1x224xf32>
    %550 = vector.broadcast %548 : vector<1x224xf32> to vector<14x224xf32>
    %551 = arith.mulf %454, %550 : vector<14x224xf32>
    %552 = vector.broadcast %549 : vector<1x224xf32> to vector<14x224xf32>
    %553 = arith.addf %551, %552 : vector<14x224xf32>
    %554 = math.tanh %553 : vector<14x224xf32>
    %555 = vector.broadcast %548 : vector<1x224xf32> to vector<14x224xf32>
    %556 = arith.mulf %467, %555 : vector<14x224xf32>
    %557 = vector.broadcast %549 : vector<1x224xf32> to vector<14x224xf32>
    %558 = arith.addf %556, %557 : vector<14x224xf32>
    %559 = math.tanh %558 : vector<14x224xf32>
    %cst_245 = arith.constant 0.000000e+00 : f32
    %560 = vector.broadcast %cst_245 : f32 to vector<2x224xf32>
    %c0_246 = arith.constant 0 : index
    %c0_247 = arith.constant 0 : index
    %c0_248 = arith.constant 0 : index
    %561 = vector.load %arg25[%c0_246, %c0_247, %c0_248] : memref<2x16x224xf32, #tpu.memory_space<vmem>>, vector<2x1x224xf32>
    %562 = vector.shape_cast %561 : vector<2x1x224xf32> to vector<2x224xf32>
    %563 = vector.shape_cast %560 : vector<2x224xf32> to vector<2x1x224xf32>
    tpu.vector_store %arg25[%c0_246, %c0_247, %c0_248], %563 {strides = array<i32>} : memref<2x16x224xf32, #tpu.memory_space<vmem>>, vector<2x1x224xf32>,
    %cst_249 = arith.constant 0.000000e+00 : f32
    %564 = vector.broadcast %cst_249 : f32 to vector<2x224xf32>
    %c0_250 = arith.constant 0 : index
    %c15_251 = arith.constant 15 : index
    %c0_252 = arith.constant 0 : index
    %565 = vector.load %arg25[%c0_250, %c15_251, %c0_252] : memref<2x16x224xf32, #tpu.memory_space<vmem>>, vector<2x1x224xf32>
    %566 = vector.shape_cast %565 : vector<2x1x224xf32> to vector<2x224xf32>
    %567 = vector.shape_cast %564 : vector<2x224xf32> to vector<2x1x224xf32>
    tpu.vector_store %arg25[%c0_250, %c15_251, %c0_252], %567 {strides = array<i32>} : memref<2x16x224xf32, #tpu.memory_space<vmem>>, vector<2x1x224xf32>,
    %568 = vector.shape_cast %554 : vector<14x224xf32> to vector<2x7x224xf32>
    %569 = vector.shape_cast %559 : vector<14x224xf32> to vector<2x7x224xf32>
    %570 = vector.shape_cast %568 : vector<2x7x224xf32> to vector<2x7x1x224xf32>
    %571 = vector.shape_cast %569 : vector<2x7x224xf32> to vector<2x7x1x224xf32>
    %572 = tpu.concatenate %570, %571 in 2 : vector<2x7x1x224xf32>, vector<2x7x1x224xf32> -> vector<2x7x2x224xf32>
    %573 = vector.shape_cast %572 : vector<2x7x2x224xf32> to vector<2x14x224xf32>
    %c0_253 = arith.constant 0 : index
    %c1_254 = arith.constant 1 : index
    %c0_255 = arith.constant 0 : index
    %574 = vector.load %arg25[%c0_253, %c1_254, %c0_255] : memref<2x16x224xf32, #tpu.memory_space<vmem>>, vector<2x14x224xf32>
    tpu.vector_store %arg25[%c0_253, %c1_254, %c0_255], %573 {strides = array<i32>} : memref<2x16x224xf32, #tpu.memory_space<vmem>>, vector<2x14x224xf32>,
    %c0_256 = arith.constant 0 : index
    %c0_257 = arith.constant 0 : index
    %c0_258 = arith.constant 0 : index
    %575 = vector.load %arg25[%c0_256, %c0_257, %c0_258] : memref<2x16x224xf32, #tpu.memory_space<vmem>>, vector<2x16x224xf32>
    %576 = vector.extract_strided_slice %575 {offsets = [0, 1, 0], sizes = [2, 14, 224], strides = [1, 1, 1]} : vector<2x16x224xf32> to vector<2x14x224xf32>
    %577 = vector.shape_cast %576 : vector<2x14x224xf32> to vector<28x224xf32>
    %c0_259 = arith.constant 0 : index
    %c0_260 = arith.constant 0 : index
    %c0_261 = arith.constant 0 : index
    %578 = vector.load %arg17[%c0_259, %c0_260, %c0_261] : memref<4x224x28xbf16, #tpu.memory_space<vmem>>, vector<1x224x28xbf16>
    %579 = vector.shape_cast %578 : vector<1x224x28xbf16> to vector<224x28xbf16>
    %580 = arith.truncf %577 : vector<28x224xf32> to vector<28x224xbf16>
    %cst_262 = arith.constant dense<0.000000e+00> : vector<28x28xf32>
    %581 = tpu.matmul %580, %579, %cst_262 {dimension_numbers = #tpu.dot_dimension_numbers<[1], [0], [0], [1], [0, 0, 1, 1], [], []>} : vector<28x224xbf16>, vector<224x28xbf16>, vector<28x28xf32> -> vector<28x28xf32>
    %582 = vector.extract_strided_slice %575 {offsets = [0, 0, 0], sizes = [2, 14, 224], strides = [1, 1, 1]} : vector<2x16x224xf32> to vector<2x14x224xf32>
    %583 = vector.shape_cast %582 : vector<2x14x224xf32> to vector<28x224xf32>
    %c1_263 = arith.constant 1 : index
    %c0_264 = arith.constant 0 : index
    %c0_265 = arith.constant 0 : index
    %584 = vector.load %arg17[%c1_263, %c0_264, %c0_265] : memref<4x224x28xbf16, #tpu.memory_space<vmem>>, vector<1x224x28xbf16>
    %585 = vector.shape_cast %584 : vector<1x224x28xbf16> to vector<224x28xbf16>
    %586 = arith.truncf %583 : vector<28x224xf32> to vector<28x224xbf16>
    %cst_266 = arith.constant dense<0.000000e+00> : vector<28x28xf32>
    %587 = tpu.matmul %586, %585, %cst_266 {dimension_numbers = #tpu.dot_dimension_numbers<[1], [0], [0], [1], [0, 0, 1, 1], [], []>} : vector<28x224xbf16>, vector<224x28xbf16>, vector<28x28xf32> -> vector<28x28xf32>
    %588 = arith.addf %581, %587 : vector<28x28xf32>
    %c0_267 = arith.constant 0 : index
    %c0_268 = arith.constant 0 : index
    %589 = vector.load %arg18[%c0_267, %c0_268] : memref<1x28xf32, #tpu.memory_space<vmem>>, vector<1x28xf32>
    %590 = vector.broadcast %589 : vector<1x28xf32> to vector<28x28xf32>
    %591 = arith.addf %588, %590 : vector<28x28xf32>
    %592 = arith.negf %591 : vector<28x28xf32>
    %593 = math.exp %592 : vector<28x28xf32>
    %cst_269 = arith.constant 1.000000e+00 : f32
    %594 = vector.broadcast %cst_269 : f32 to vector<28x28xf32>
    %595 = arith.addf %594, %593 : vector<28x28xf32>
    %596 = arith.divf %594, %595 : vector<28x28xf32>
    %597 = vector.extract_strided_slice %575 {offsets = [0, 2, 0], sizes = [2, 14, 224], strides = [1, 1, 1]} : vector<2x16x224xf32> to vector<2x14x224xf32>
    %598 = vector.shape_cast %597 : vector<2x14x224xf32> to vector<28x224xf32>
    %c2_270 = arith.constant 2 : index
    %c0_271 = arith.constant 0 : index
    %c0_272 = arith.constant 0 : index
    %599 = vector.load %arg17[%c2_270, %c0_271, %c0_272] : memref<4x224x28xbf16, #tpu.memory_space<vmem>>, vector<1x224x28xbf16>
    %600 = vector.shape_cast %599 : vector<1x224x28xbf16> to vector<224x28xbf16>
    %601 = arith.truncf %598 : vector<28x224xf32> to vector<28x224xbf16>
    %cst_273 = arith.constant dense<0.000000e+00> : vector<28x28xf32>
    %602 = tpu.matmul %601, %600, %cst_273 {dimension_numbers = #tpu.dot_dimension_numbers<[1], [0], [0], [1], [0, 0, 1, 1], [], []>} : vector<28x224xbf16>, vector<224x28xbf16>, vector<28x28xf32> -> vector<28x28xf32>
    %603 = vector.extract_strided_slice %575 {offsets = [0, 1, 0], sizes = [2, 14, 224], strides = [1, 1, 1]} : vector<2x16x224xf32> to vector<2x14x224xf32>
    %604 = vector.shape_cast %603 : vector<2x14x224xf32> to vector<28x224xf32>
    %c3_274 = arith.constant 3 : index
    %c0_275 = arith.constant 0 : index
    %c0_276 = arith.constant 0 : index
    %605 = vector.load %arg17[%c3_274, %c0_275, %c0_276] : memref<4x224x28xbf16, #tpu.memory_space<vmem>>, vector<1x224x28xbf16>
    %606 = vector.shape_cast %605 : vector<1x224x28xbf16> to vector<224x28xbf16>
    %607 = arith.truncf %604 : vector<28x224xf32> to vector<28x224xbf16>
    %cst_277 = arith.constant dense<0.000000e+00> : vector<28x28xf32>
    %608 = tpu.matmul %607, %606, %cst_277 {dimension_numbers = #tpu.dot_dimension_numbers<[1], [0], [0], [1], [0, 0, 1, 1], [], []>} : vector<28x224xbf16>, vector<224x28xbf16>, vector<28x28xf32> -> vector<28x28xf32>
    %609 = arith.addf %602, %608 : vector<28x28xf32>
    %c0_278 = arith.constant 0 : index
    %c0_279 = arith.constant 0 : index
    %610 = vector.load %arg18[%c0_278, %c0_279] : memref<1x28xf32, #tpu.memory_space<vmem>>, vector<1x28xf32>
    %611 = vector.broadcast %610 : vector<1x28xf32> to vector<28x28xf32>
    %612 = arith.addf %609, %611 : vector<28x28xf32>
    %613 = arith.negf %612 : vector<28x28xf32>
    %614 = math.exp %613 : vector<28x28xf32>
    %cst_280 = arith.constant 1.000000e+00 : f32
    %615 = vector.broadcast %cst_280 : f32 to vector<28x28xf32>
    %616 = arith.addf %615, %614 : vector<28x28xf32>
    %617 = arith.divf %615, %616 : vector<28x28xf32>
    %618 = vector.shape_cast %596 : vector<28x28xf32> to vector<2x14x28xf32>
    %619 = vector.shape_cast %617 : vector<28x28xf32> to vector<2x14x28xf32>
    %620 = vector.shape_cast %618 : vector<2x14x28xf32> to vector<2x14x1x28xf32>
    %621 = vector.shape_cast %619 : vector<2x14x28xf32> to vector<2x14x1x28xf32>
    %622 = tpu.concatenate %620, %621 in 2 : vector<2x14x1x28xf32>, vector<2x14x1x28xf32> -> vector<2x14x2x28xf32>
    %623 = vector.shape_cast %622 : vector<2x14x2x28xf32> to vector<2x28x28xf32>
    %c0_281 = arith.constant 0 : index
    %c0_282 = arith.constant 0 : index
    %c0_283 = arith.constant 0 : index
    %624 = vector.load %arg20[%c0_281, %c0_282, %c0_283] : memref<2x28x28xf32, #tpu.memory_space<vmem>>, vector<2x28x28xf32>
    tpu.vector_store %arg20[%c0_281, %c0_282, %c0_283], %623 {strides = array<i32>} : memref<2x28x28xf32, #tpu.memory_space<vmem>>, vector<2x28x28xf32>,
    return
  }
}

</mosaic_0001>

<bundles_post_ra>
// kernel: autoencoder_forward_impl.1
= control target key start
LH: loop header
LB: loop body
LE: loop exit
PB: predicated region body
PF: predicated region fallthrough
CT: control target
= control target key end

     0   :  { %s15456_s0 = inlined_call_operand.vmem [shape: f32[2,28,28], index: 0, kind: input, shape index: {}]   ;;  %s15457_s1 = inlined_call_operand.vmem [shape: bf16[4,28,224], index: 1, kind: input, shape index: {}]   ;;  %s15458_s2 = inlined_call_operand.vmem [shape: f32[1,16], index: 2, kind: input, shape index: {}]   ;;  %s15459_s3 = inlined_call_operand.vmem [shape: f32[1,16], index: 3, kind: input, shape index: {}]   ;;  %s15460_s4 = inlined_call_operand.vmem [shape: bf16[4,224,224], index: 4, kind: input, shape index: {}]   ;;  %s15461_s5 = inlined_call_operand.vmem [shape: f32[1,32], index: 5, kind: input, shape index: {}]   ;;  %s15462_s6 = inlined_call_operand.vmem [shape: f32[1,32], index: 6, kind: input, shape index: {}]   ;;  %s15463_s7 = inlined_call_operand.hbm [shape: bf16[3,224,112], index: 7, kind: input, shape index: {}]   ;;  %s15464_s8 = inlined_call_operand.vmem [shape: f32[1,16], index: 8, kind: input, shape index: {}]   ;;  %s15465_s9 = inlined_call_operand.vmem [shape: f32[1,16], index: 9, kind: input, shape index: {}]   ;;  %s15466_s10 = inlined_call_operand.vmem [shape: bf16[7,112,30], index: 10, kind: input, shape index: {}]   ;;  %s15467_s11 = inlined_call_operand.vmem [shape: f32[1,30], index: 11, kind: input, shape index: {}]   ;;  %s15468_s12 = inlined_call_operand.hbm [shape: bf16[7,30,112], index: 12, kind: input, shape index: {}]   ;;  %s15469_s13 = inlined_call_operand.vmem [shape: f32[7,1,112], index: 13, kind: input, shape index: {}]   ;;  %s15470_s14 = inlined_call_operand.vmem [shape: bf16[4,112,224], index: 14, kind: input, shape index: {}]   ;;  %s15471_s15 = inlined_call_operand.vmem [shape: f32[1,16], index: 15, kind: input, shape index: {}]   ;;  %s15472_s16 = inlined_call_operand.vmem [shape: f32[1,16], index: 16, kind: input, shape index: {}]   ;;  %s15473_s17 = inlined_call_operand.vmem [shape: bf16[4,224,28], index: 17, kind: input, shape index: {}]   ;;  %s15474_s18 = inlined_call_operand.vmem [shape: f32[1,28], index: 18, kind: input, shape index: {}]   ;;  %s15475_s19 = inlined_call_operand.hbm [shape: f32[2,30], index: 19, kind: output, shape index: {0}]   ;;  %s15476_s20 = inlined_call_operand.vmem [shape: f32[2,28,28], index: 20, kind: output, shape index: {1}]  }
   0x1   :  { %15523 = sst [smem:[#allocation30_spill]] %s15456_s0 }
   0x2   :  { %15524 = sst [smem:[#allocation31_spill]] %s15457_s1 }
   0x3   :  { %15525 = sst [smem:[#allocation32_spill]] %s15458_s2 }
   0x4   :  { %15526 = sst [smem:[#allocation33_spill]] %s15459_s3 }
   0x5   :  { %15527 = sst [smem:[#allocation34_spill]] %s15460_s4 }
   0x6   :  { %26 = vsyncpa [#allocation8], 0 }
   0x7   :  { %27 = vsyncpa [#allocation11], 0 }
   0x8   :  { %28 = vsyncpa [#allocation9], 0  ;;  %s11645_s1 = smov [#allocation7]   ;;  %s11573_s2 = scalar_lea.hbm %s15463_s7, 5376 }
   0x9   :  { %s48_s22 = sshll.u32 %s11645_s1, 4  ;;  %p11574_p0 = scmp.ne.s32.totalorder %s15463_s7, %s11573_s2  ;;  %s49_s22 = int_to_ptr.vmem [resolvable:$true] %s48_s22 }
   0xa   :  { %p11577_p1 = scmp.lt.u32.totalorder %s11573_s2, %s15463_s7 }
   0xc   :  { %p11579_p2 = pnand %p11577_p1, %p11574_p0 }
   0xe   :  { %11582 = shalt.err (!%p11579_p2)
}
   0xf   :  { %s11583_s28 = scalar_lea.vmem %s49_s22, 5376  ;;  %p11588_p4 = scmp.lt.s32.totalorder %s49_s22, %s49_s22 }
  0x10   :  { %p11584_p3 = scmp.ne.s32.totalorder %s49_s22, %s11583_s28  ;;  %p11589_p5 = scmp.lt.s32.totalorder %s11583_s28, %s11583_s28 }
  0x12   :  { %p11590_p6 = por %p11589_p5, %p11588_p4 }
  0x14   :  { %p11591_p7 = pnand %p11590_p6, %p11584_p3 }
  0x16   :  { %11594 = shalt.err (!%p11591_p7)
}
  0x17   :  { %s11646_s4 = smov 64   ;;  %s11647_s29 = smov 4  }
  0x18   :  { %54 = dma.hbm_to_vmem [thread:$0]  %s15463_s7, 5376, %s49_s22, [#allocation8], %s11646_s4, %s11646_s4, %s11647_s29  }
  0x19   :  { %s11648_s21 = smov [#allocation10]   ;;  %s11595_s2 = scalar_lea.hbm %s15468_s12, 1792 }
  0x1a   :  { %s68_s1 = sshll.u32 %s11648_s21, 4  ;;  %p11596_p8 = scmp.ne.s32.totalorder %s15468_s12, %s11595_s2  ;;  %s69_s1 = int_to_ptr.vmem [resolvable:$true] %s68_s1 }
  0x1b   :  { %p11599_p9 = scmp.lt.u32.totalorder %s11595_s2, %s15468_s12 }
  0x1d   :  { %p11601_p10 = pnand %p11599_p9, %p11596_p8 }
  0x1f   :  { %11604 = shalt.err (!%p11601_p10)
}
  0x20   :  { %s11605_s28 = scalar_lea.vmem %s69_s1, 1792  ;;  %p11610_p12 = scmp.lt.s32.totalorder %s69_s1, %s69_s1 }
  0x21   :  { %p11606_p11 = scmp.ne.s32.totalorder %s69_s1, %s11605_s28  ;;  %p11611_p13 = scmp.lt.s32.totalorder %s11605_s28, %s11605_s28 }
  0x23   :  { %p11612_p0 = por %p11611_p13, %p11610_p12 }
  0x25   :  { %p11613_p1 = pnand %p11612_p0, %p11606_p11 }
  0x27   :  { %11616 = shalt.err (!%p11613_p1)
}
  0x28   :  { %74 = dma.hbm_to_vmem [thread:$0]  %s15468_s12, 1792, %s69_s1, [#allocation11], %s11646_s4, %s11646_s4, %s11647_s29  }
  0x29   :  { %11639 = dma.done.wait [#allocation8], 5376  }
  0x2a   :  { %11640 = vsyncadd [#allocation8], 4294961920 }
  0x2b   :  { %11641 = dma.done.wait [#allocation11], 1792  }
  0x2c   :  { %11642 = vsyncadd [#allocation11], 4294965504  ;;  %vm94_vm0 = vcmask 221184   ;;  %v15499_v0 = vmov 0   ;;  %v15480_v1 = vmov 0.0   ;;  %s15528_s12 = sld [smem:[#allocation31_spill]]  ;;  %v15482_v6 = vlaneseq }
  0x2d   :  { %510 = vmatprep.mubr.bf16.mxu0 %v15499_v0  ;;  %95 = vst.msk [vmem:[#allocation2] sm:$0x1] %vm94_vm0, %v15480_v1  ;;  %96 = vst.msk [vmem:[#allocation2 + $0x20] sm:$0x1] %vm94_vm0, %v15480_v1  ;;  %vm471_vm1 = vcmask 1045504   ;;  %vm15496_vm2 = vcmask 228352  }
  0x2e   :  { %97 = vst.msk [vmem:[#allocation2 + $0x1d] sm:$0x1] %vm94_vm0, %v15480_v1  ;;  %98 = vst.msk [vmem:[#allocation2 + $0x3d] sm:$0x1] %vm94_vm0, %v15480_v1  ;;  %v11651_v4 = vmov 1983009808  }
  0x2f   :  { %v135_v5 = vunpack.c.l.s4 %v11651_v4  ;;  %vm15495_vm3 = vcmask 224256   ;;  %s15529_s28 = sld [smem:[#allocation30_spill]]  ;;  %v11834_v17 = vshrl.u32 %v15482_v6, 7  ;;  %vm391_vm4 = vcmask 1041409   ;;  %s11653_s24 = smov 112  }
  0x30   :  { %vm394_vm5 = vcmask 1042434   ;;  %vm397_vm6 = vcmask 1043459   ;;  %vm15517_vm7 = vcmask 1044484   ;;  %vm403_vm8 = vcmask 1045509   ;;  %s11654_s2 = smov 80   ;;  %s11655_s25 = smov 48  }
  0x31   :  { %v136_v16 = vunpack.c.0.s8 %v135_v5  ;;  %15530 = vst [vmem:[#allocation16_spill] sm:$0xff] %v11834_v17  ;;  %vm15516_vm9 = vcmask 1046534   ;;  %vm409_vm10 = vcmask 1047559   ;;  %vm953_vm11 = vcmask 785408   ;;  %s11656_s3 = smov 32   ;;  %s15493_s26 = smov 16  }
  0x32   :  { %v11011_v2 = vld [vmem:[%s15528_s12 + $0x24] ss:$8 sps:$4 sm:$0xff]   ;;  %v11013_v3 = vld [vmem:[%s15528_s12 + $0x20] ss:$8 sps:$4 sm:$0xff]   ;;  %v299_v21 = vld [vmem:[%s15528_s12 + $0x10] sm:$0xff]  ;;  %vm944_vm12 = vcmask 1043456  }
  0x33   :  { %478 = vmatprep.subr.bf16.mxu0 %v11011_v2  ;;  %v11014_v7 = vld [vmem:[%s15528_s12 + $0x34] ss:$8 sps:$4 sm:$0x3f]   ;;  %v11016_v8 = vld [vmem:[%s15528_s12 + $0x30] ss:$8 sps:$4 sm:$0x3f]   ;;  %v11855_v22 = vsub.s32 %v136_v16, %v11834_v17 }
  0x34   :  { %479 = vmatpush1.bf16.msra.mxu0 %v11013_v3  ;;  %v473_v9 = vsel %vm471_vm1, %v11016_v8, 0  ;;  %v11019_v10 = vld [vmem:[%s15528_s12 + $0x4] ss:$8 sps:$4 sm:$0xff]   ;;  %v300_v23 = vld [vmem:[%s15528_s12 + $0x18] sm:$0x33]  ;;  %vm959_vm13 = vcmask 781312  }
  0x35   :  { %9958 = vmatprep.subr.msk.bf16.mxu0 %vm471_vm1, %v11014_v7  ;;  %v99_v11 = vld [vmem:[%s15529_s28] sm:$0xff]  ;;  %v100_v12 = vld [vmem:[%s15529_s28 + $0x8] sm:$0xff]  ;;  %v101_v13 = vld [vmem:[%s15529_s28 + $0x10] sm:$0xff]  ;;  %15531 = vst [vmem:[#allocation17_spill] sm:$0xff] %v11855_v22  ;;  %v9963_v26 = vcombine.low %v299_v21, %v300_v23  ;;  %s15553_s22 = sld [smem:[#allocation32_spill]]  ;;  %s15556_s1 = sld [smem:[#allocation34_spill]] }
  0x36   :  { %v102_v14 = vld [vmem:[%s15529_s28 + $0x18] sm:$0xf]  ;;  %v103_v15 = vld [vmem:[%s15529_s28 + $0x20] sm:$0xff]  ;;  %108 = vst.msk [vmem:[#allocation2 + $0x1] sm:$0xff] %vm15496_vm2, %v99_v11  ;;  %109 = vst.msk [vmem:[#allocation2 + $0x9] sm:$0xff] %vm15496_vm2, %v100_v12  ;;  %vm1137_vm15 = vcmask 130048  }
  0x37   :  { %110 = vst.msk [vmem:[#allocation2 + $0x11] sm:$0xff] %vm15496_vm2, %v101_v13  ;;  %113 = vst.msk [vmem:[#allocation2 + $0x21] sm:$0xff] %vm15496_vm2, %v103_v15  ;;  %v104_v18 = vld [vmem:[%s15529_s28 + $0x28] sm:$0xff]  ;;  %v105_v19 = vld [vmem:[%s15529_s28 + $0x30] sm:$0xff]  ;;  %v11874_v42 = vsel %vm471_vm1, %v9963_v26, 0  ;;  %vm1139_vm0 = vcmask 261120  }
  0x38   :  { %112 = vst.msk [vmem:[#allocation2 + $0x19] sm:$0xf] %vm15495_vm3, %v102_v14  ;;  %481 = vmatpush1.bf16.msra.mxu0 %v473_v9  ;;  %v106_v20 = vld [vmem:[%s15529_s28 + $0x38] sm:$0xf]  ;;  %s15555_s28 = sld [smem:[#allocation33_spill]]  ;;  %s15601_s29 = smov 16  }
  0x39   :  { %611 = vmatprep.subr.bf16.mxu0 %v11019_v10  ;;  %114 = vst.msk [vmem:[#allocation2 + $0x29] sm:$0xff] %vm15496_vm2, %v104_v18  ;;  %115 = vst.msk [vmem:[#allocation2 + $0x31] sm:$0xff] %vm15496_vm2, %v105_v19  ;;  %v11034_v27 = vld [vmem:[%s15528_s12 + $0x50] ss:$8 sps:$4 sm:$0x3f]  }
  0x3a   :  { %116 = vst.msk [vmem:[#allocation2 + $0x39] sm:$0xf] %vm15495_vm3, %v106_v20  ;;  %v11877_v43 = vsel %vm471_vm1, %v11034_v27, 0  ;;  %vm1148_vm3 = vcmask 916480  }
  0x3d   :  { %v117_v24 = vld [vmem:[#allocation2] sm:$0xff]  ;;  %v118_v25 = vld [vmem:[#allocation2 + $0x8] sm:$0xff] }
  0x3e   :  { %v119_v28 = vld [vmem:[#allocation2 + $0x10] sm:$0xff]  ;;  %v133_v30 = vcombine.high %v117_v24, %v117_v24  ;;  %v140_v31 = vrot.slane %v117_v24, %v11855_v22  ;;  %v150_v32 = vcombine.high %v118_v25, %v118_v25  ;;  %v157_v33 = vrot.slane %v118_v25, %v11855_v22  ;;  %v121_v34 = vld [vmem:[#allocation2 + $0x20] sm:$0xff] }
  0x3f   :  { %v11863_v29 = vld [vmem:[#allocation2 + $0x18] sm:$0x3f]  ;;  %v167_v35 = vcombine.high %v119_v28, %v119_v28  ;;  %v174_v36 = vrot.slane %v119_v28, %v11855_v22  ;;  %v200_v46 = vcombine.high %v121_v34, %v121_v34  ;;  %v207_v47 = vrot.slane %v121_v34, %v11855_v22 }
  0x40   :  { %v147_v37 = vrot.slane %v133_v30, %v11855_v22  ;;  %v164_v38 = vrot.slane %v150_v32, %v11855_v22  ;;  %v191_v39 = vrot.slane %v11863_v29, %v11855_v22  ;;  %v148_v40 = vcombine.high %v140_v31, %v140_v31 }
  0x41   :  { %v181_v41 = vrot.slane %v167_v35, %v11855_v22  ;;  %v165_v45 = vcombine.high %v157_v33, %v157_v33  ;;  %v182_v49 = vcombine.high %v174_v36, %v174_v36  ;;  %v184_v51 = vcombine.high %v11863_v29, %v11863_v29 }
  0x42   :  { %v149_v44 = vcombine.high %v147_v37, %v147_v37  ;;  %v166_v48 = vcombine.high %v164_v38, %v164_v38  ;;  %v199_v52 = vcombine.high %v191_v39, %v191_v39  ;;  %v11883_v53 = vrot.slane %v200_v46, %v11855_v22 }
  0x43   :  { %v183_v50 = vcombine.high %v181_v41, %v181_v41  ;;  %v215_v54 = vcombine.high %v207_v47, %v207_v47  ;;  %v301_v55 = vpack.c.bf16 %v140_v31, %v140_v31  ;;  %v302_v56 = vpack.c.bf16 %v148_v40, %v148_v40 }
  0x44   :  { %v303_v57 = vpack.c.bf16 %v147_v37, %v147_v37  ;;  %v304_v58 = vpack.c.bf16 %v149_v44, %v149_v44  ;;  %v305_v59 = vpack.c.bf16 %v157_v33, %v157_v33  ;;  %v216_v60 = vcombine.high %v11883_v53, %v11883_v53 }
  0x45   :  { %v306_v61 = vpack.c.bf16 %v165_v45, %v165_v45  ;;  %v307_v62 = vpack.c.bf16 %v164_v38, %v164_v38  ;;  %v309_v63 = vpack.c.bf16 %v174_v36, %v174_v36  ;;  %v308_v2 = vpack.c.bf16 %v166_v48, %v166_v48 }
  0x46   :  { %v311_v3 = vpack.c.bf16 %v181_v41, %v181_v41  ;;  %v312_v4 = vpack.c.bf16 %v183_v50, %v183_v50  ;;  %v313_v5 = vpack.c.bf16 %v191_v39, %v191_v39  ;;  %v310_v7 = vpack.c.bf16 %v182_v49, %v182_v49 }
  0x47   :  { %v314_v8 = vpack.c.bf16 %v199_v52, %v199_v52  ;;  %v315_v9 = vpack.c.bf16 %v207_v47, %v207_v47  ;;  %v316_v10 = vpack.c.bf16 %v215_v54, %v215_v54  ;;  %v317_v11 = vpack.c.bf16 %v11883_v53, %v11883_v53 }
  0x48   :  { %v11889_v12 = vunpack.c.l.b16 %v301_v55  ;;  %v11891_v13 = vunpack.c.l.b16 %v303_v57  ;;  %v11893_v14 = vunpack.c.l.b16 %v304_v58  ;;  %v318_v15 = vpack.c.bf16 %v216_v60, %v216_v60 }
  0x49   :  { %v11895_v16 = vunpack.c.l.b16 %v305_v59  ;;  %v11897_v18 = vunpack.c.l.b16 %v306_v61  ;;  %v11899_v19 = vunpack.c.l.b16 %v309_v63  ;;  %v11901_v20 = vunpack.c.l.b16 %v302_v56  ;;  %v11017_v61 = vld [vmem:[%s15528_s12] ss:$8 sps:$4 sm:$0xff]  }
  0x4a   :  { %v11903_v21 = vunpack.c.l.b16 %v311_v3  ;;  %v11905_v23 = vunpack.c.l.b16 %v312_v4  ;;  %v11907_v24 = vunpack.c.l.b16 %v313_v5  ;;  %v11909_v25 = vunpack.c.l.b16 %v307_v62 }
  0x4b   :  { %v11911_v26 = vunpack.c.l.b16 %v308_v2  ;;  %v11913_v27 = vunpack.c.l.b16 %v310_v7  ;;  %v11915_v28 = vunpack.c.l.b16 %v314_v8  ;;  %v11917_v30 = vunpack.c.l.b16 %v315_v9  ;;  %v11025_v7 = vld [vmem:[%s15528_s12 + $0x14] ss:$8 sps:$4 sm:$0x3f]  }
  0x4c   :  { %v390_v31 = vrot.slane %v11889_v12, 1  ;;  %v393_v32 = vrot.slane %v11891_v13, 7  ;;  %v396_v33 = vrot.slane %v11893_v14, 6  ;;  %v11922_v34 = vunpack.c.l.b16 %v316_v10 }
  0x4d   :  { %v399_v35 = vrot.slane %v11895_v16, 5  ;;  %v402_v36 = vrot.slane %v11897_v18, 4  ;;  %v15483_v37 = vrot.slane %v11899_v19, 1  ;;  %v413_v39 = vrot.slane %v11903_v21, 7 }
  0x4e   :  { %v392_v38 = vsel %vm391_vm4, %v11901_v20, %v390_v31  ;;  %v415_v40 = vrot.slane %v11905_v23, 6  ;;  %v417_v41 = vrot.slane %v11907_v24, 5  ;;  %v15489_v45 = vrot.slane %v11909_v25, 3 }
  0x4f   :  { %v395_v44 = vsel %vm394_vm5, %v393_v32, %v392_v38  ;;  %v412_v46 = vsel %vm391_vm4, %v11913_v27, %v15483_v37  ;;  %v15486_v47 = vrot.slane %v11915_v28, 4  ;;  %v15485_v49 = vrot.slane %v11911_v26, 2 }
  0x50   :  { %v398_v48 = vsel %vm397_vm6, %v396_v33, %v395_v44  ;;  %v414_v50 = vsel %vm394_vm5, %v413_v39, %v412_v46  ;;  %v421_v52 = vrot.slane %v11917_v30, 3  ;;  %v198_v53 = vrot.slane %v184_v51, %v11855_v22  ;;  %v122_v46 = vld [vmem:[#allocation2 + $0x28] sm:$0xff] }
  0x51   :  { %v401_v54 = vsel %vm15517_vm7, %v399_v35, %v398_v48  ;;  %v416_v55 = vsel %vm397_vm6, %v415_v40, %v414_v50  ;;  %v15484_v56 = vrot.slane %v11922_v34, 2  ;;  %v11950_v57 = vunpack.c.l.b16 %v317_v11 }
  0x52   :  { %v11952_v58 = vunpack.c.l.b16 %v318_v15  ;;  %v404_v59 = vsel %vm403_vm8, %v402_v36, %v401_v54  ;;  %v418_v60 = vsel %vm15517_vm7, %v417_v41, %v416_v55  ;;  %v533_v62 = vrot.slane %v11891_v13, 6  ;;  %v123_v55 = vld [vmem:[#allocation2 + $0x30] sm:$0xff] }
  0x53   :  { %v407_v29 = vsel %vm15516_vm9, %v15489_v45, %v404_v59  ;;  %v420_v51 = vsel %vm403_vm8, %v15486_v47, %v418_v60  ;;  %v535_v63 = vrot.slane %v11893_v14, 5  ;;  %v537_v4 = vrot.slane %v11895_v16, 4  ;;  %v11996_v60 = vld [vmem:[#allocation2 + $0x38] sm:$0x3f] }
  0x54   :  { %v410_v2 = vsel %vm409_vm10, %v15485_v49, %v407_v29  ;;  %v422_v3 = vsel %vm15516_vm9, %v421_v52, %v420_v51  ;;  %v539_v5 = vrot.slane %v11897_v18, 3  ;;  %v541_v9 = vrot.slane %v11909_v25, 2  ;;  %v11031_v29 = vld [vmem:[%s15528_s12 + $0x44] ss:$8 sps:$4 sm:$0xff]  }
  0x55   :  { %v424_v8 = vsel %vm409_vm10, %v15484_v56, %v422_v3  ;;  %v543_v10 = vrot.slane %v11911_v26, 1  ;;  %v547_v11 = vrot.slane %v11903_v21, 6  ;;  %v669_v31 = vpack.c.bf16 %v198_v53, %v198_v53 }
  0x56   :  { %v445_v15 = vpack.c.b16 %v424_v8, %v410_v2  ;;  %v675_v38 = vsel %vm391_vm4, %v393_v32, %v11901_v20  ;;  %v682_v44 = vsel %vm391_vm4, %v413_v39, %v11913_v27  ;;  %v549_v48 = vrot.slane %v11905_v23, 5 }
  0x57   :  { %v551_v50 = vrot.slane %v11907_v24, 4  ;;  %v676_v52 = vsel %vm394_vm5, %v396_v33, %v675_v38  ;;  %v683_v54 = vsel %vm394_vm5, %v415_v40, %v682_v44  ;;  %v553_v53 = vrot.slane %v11915_v28, 3 }
  0x58   :  { %9959 = vmatmul.mubr.msk.bf16.vlgmr.msra.gmra.mrb[0].mxu0 %vm15496_vm2, %v445_v15  ;;  %v555_v59 = vrot.slane %v11917_v30, 2  ;;  %v11993_v32 = vunpack.c.l.b16 %v669_v31  ;;  %v677_v39 = vsel %vm397_vm6, %v399_v35, %v676_v52  ;;  %v12003_v40 = vsel %vm397_vm6, %v417_v41, %v683_v54 }
  0x59   :  { %612 = vmatpush1.bf16.msra.mxu0 %v11017_v61  ;;  %520 = vmatprep.mubr.bf16.mxu0 %v15499_v0  ;;  %v12009_v35 = vsel %vm15517_vm7, %v402_v36, %v677_v39  ;;  %v217_v61 = vcombine.high %v122_v46, %v122_v46  ;;  %v224_v36 = vrot.slane %v122_v46, %v11855_v22  ;;  %v15487_v6 = vrot.slane %v11950_v57, 1 }
  0x5a   :  { %9965 = vmatprep.subr.msk.bf16.mxu0 %vm471_vm1, %v11025_v7  ;;  %v234_v52 = vcombine.high %v123_v55, %v123_v55  ;;  %v241_v54 = vrot.slane %v123_v55, %v11855_v22  ;;  %v258_v7 = vrot.slane %v11996_v60, %v11855_v22 }
  0x5b   :  { %v231_v1 = vrot.slane %v217_v61, %v11855_v22  ;;  %v232_v15 = vcombine.high %v224_v36, %v224_v36  ;;  %v319_v8 = vpack.c.bf16 %v224_v36, %v224_v36 }
  0x5c   :  { %v248_v37 = vrot.slane %v234_v52, %v11855_v22  ;;  %v249_v44 = vcombine.high %v241_v54, %v241_v54  ;;  %v266_v38 = vcombine.high %v258_v7, %v258_v7  ;;  %v323_v3 = vpack.c.bf16 %v241_v54, %v241_v54 }
  0x5d   :  { %614 = vmatpush1.bf16.msra.mxu0 %v11874_v42  ;;  %v233_v46 = vcombine.high %v231_v1, %v231_v1  ;;  %v321_v55 = vpack.c.bf16 %v231_v1, %v231_v1  ;;  %v320_v31 = vpack.c.bf16 %v232_v15, %v232_v15  ;;  %v327_v56 = vpack.c.bf16 %v258_v7, %v258_v7 }
  0x5e   :  { %733 = vmatprep.subr.bf16.mxu0 %v11031_v29  ;;  %v250_v39 = vcombine.high %v248_v37, %v248_v37  ;;  %v324_v61 = vpack.c.bf16 %v249_v44, %v249_v44  ;;  %v325_v2 = vpack.c.bf16 %v248_v37, %v248_v37  ;;  %v328_v41 = vpack.c.bf16 %v266_v38, %v266_v38 }
  0x5f   :  { %v322_v51 = vpack.c.bf16 %v233_v46, %v233_v46  ;;  %v12028_v49 = vunpack.c.l.b16 %v319_v8  ;;  %v12030_v47 = vunpack.c.l.b16 %v320_v31  ;;  %v12032_v52 = vunpack.c.l.b16 %v321_v55 }
  0x60   :  { %v326_v42 = vpack.c.bf16 %v250_v39, %v250_v39  ;;  %v12034_v36 = vunpack.c.l.b16 %v323_v3  ;;  %v12038_v1 = vunpack.c.l.b16 %v324_v61  ;;  %v12040_v54 = vunpack.c.l.b16 %v325_v2 }
  0x61   :  { %v12036_v29 = vunpack.c.l.b16 %v322_v51  ;;  %v12042_v15 = vunpack.c.l.b16 %v327_v56  ;;  %v12046_v38 = vunpack.c.l.b16 %v328_v41  ;;  %v426_v8 = vsel %vm391_vm4, %v11952_v58, %v15487_v6 }
  0x62   :  { %v12044_v37 = vunpack.c.l.b16 %v326_v42  ;;  %v15488_v3 = vrot.slane %v12028_v49, 7  ;;  %v15490_v51 = vrot.slane %v12030_v47, 6  ;;  %v15491_v31 = vrot.slane %v12032_v52, 5 }
  0x63   :  { %v433_v2 = vrot.slane %v12036_v29, 4  ;;  %v435_v56 = vrot.slane %v12034_v36, 3  ;;  %v437_v44 = vrot.slane %v12038_v1, 2  ;;  %v15492_v39 = vrot.slane %v12040_v54, 1 }
  0x64   :  { %v428_v41 = vsel %vm394_vm5, %v15488_v3, %v426_v8  ;;  %v441_v7 = vrot.slane %v12042_v15, 7  ;;  %v443_v55 = vrot.slane %v12046_v38, 6  ;;  %v531_v61 = vrot.slane %v11901_v20, 7 }
  0x65   :  { %v430_v46 = vsel %vm397_vm6, %v15490_v51, %v428_v41  ;;  %v545_v42 = vrot.slane %v11913_v27, 7  ;;  %v440_v6 = vsel %vm391_vm4, %v12044_v37, %v15492_v39  ;;  %v559_v3 = vrot.slane %v11952_v58, 7 }
  0x66   :  { %v432_v8 = vsel %vm15517_vm7, %v15491_v31, %v430_v46  ;;  %v561_v45 = vrot.slane %v12028_v49, 6  ;;  %v442_v51 = vsel %vm394_vm5, %v441_v7, %v440_v6  ;;  %v532_v46 = vsel %vm391_vm4, %v531_v61, %v11889_v12 }
  0x67   :  { %v434_v41 = vsel %vm403_vm8, %v433_v2, %v432_v8  ;;  %v546_v31 = vsel %vm391_vm4, %v545_v42, %v11899_v19  ;;  %v444_v33 = vsel %vm397_vm6, %v443_v55, %v442_v51  ;;  %v534_v8 = vsel %vm394_vm5, %v533_v62, %v532_v46 }
  0x68   :  { %v436_v39 = vsel %vm15516_vm9, %v435_v56, %v434_v41  ;;  %v548_v6 = vsel %vm394_vm5, %v547_v11, %v546_v31  ;;  %v536_v61 = vsel %vm397_vm6, %v535_v63, %v534_v8  ;;  %v560_v42 = vsel %vm391_vm4, %v559_v3, %v11950_v57 }
  0x69   :  { %v438_v12 = vsel %vm409_vm10, %v437_v44, %v436_v39  ;;  %v550_v51 = vsel %vm397_vm6, %v549_v48, %v548_v6  ;;  %v538_v11 = vsel %vm15517_vm7, %v537_v4, %v536_v61  ;;  %v562_v39 = vsel %vm394_vm5, %v561_v45, %v560_v42 }
  0x6a   :  { %v446_v62 = vpack.c.b16 %v444_v33, %v438_v12  ;;  %v552_v31 = vsel %vm15517_vm7, %v551_v50, %v550_v51  ;;  %v540_v63 = vsel %vm403_vm8, %v539_v5, %v538_v11  ;;  %v563_v33 = vrot.slane %v12030_v47, 5 }
  0x6b   :  { %v554_v48 = vsel %vm403_vm8, %v553_v53, %v552_v31  ;;  %v565_v3 = vrot.slane %v12032_v52, 4  ;;  %v542_v4 = vsel %vm15516_vm9, %v541_v9, %v540_v63  ;;  %v567_v5 = vrot.slane %v12036_v29, 3  ;;  %v11032_v63 = vld [vmem:[%s15528_s12 + $0x54] ss:$8 sps:$4 sm:$0x3f]  }
  0x6c   :  { %9960 = vmatmul.mubr.msk.bf16.gmra.mrb[4].mxu0 %vm15496_vm2, %v446_v62  ;;  %v556_v45 = vsel %vm15516_vm9, %v555_v59, %v554_v48  ;;  %v569_v50 = vrot.slane %v12034_v36, 2  ;;  %v544_v53 = vsel %vm409_vm10, %v543_v10, %v542_v4  ;;  %v15532_v41 = vrot.slane %v11922_v34, 1  ;;  %v11041_v59 = vld [vmem:[%s15528_s12 + $0x70] ss:$8 sps:$4 sm:$0x3f]  }
  0x6d   :  { %643 = vmatprep.mubr.bf16.mxu0 %v15499_v0  ;;  %v564_v9 = vsel %vm397_vm6, %v563_v33, %v562_v39  ;;  %v571_v30 = vrot.slane %v12038_v1, 1  ;;  %v573_v6 = vrot.slane %v12044_v37, 7  ;;  %v575_v12 = vrot.slane %v12042_v15, 6  ;;  %v11029_v62 = vld [vmem:[%s15528_s12 + $0x40] ss:$8 sps:$4 sm:$0xff]  }
  0x6e   :  { %v558_v46 = vsel %vm409_vm10, %v15532_v41, %v556_v45  ;;  %v566_v8 = vsel %vm15517_vm7, %v565_v3, %v564_v9  ;;  %v15533_v10 = vrot.slane %v11909_v25, 3  ;;  %v15534_v51 = vrot.slane %v11915_v28, 4 }
  0x6f   :  { %v568_v11 = vsel %vm403_vm8, %v567_v5, %v566_v8  ;;  %v577_v31 = vrot.slane %v12046_v38, 5  ;;  %v579_v39 = vpack.c.b16 %v558_v46, %v544_v53  ;;  %v574_v48 = vsel %vm391_vm4, %v573_v6, %v12040_v54  ;;  %v11037_v6 = vld [vmem:[%s15528_s12 + $0x64] ss:$8 sps:$4 sm:$0xff]  }
  0x70   :  { %v679_v61 = vsel %vm403_vm8, %v15533_v10, %v12009_v35  ;;  %v685_v42 = vsel %vm15517_vm7, %v15534_v51, %v12003_v40  ;;  %v570_v35 = vsel %vm15516_vm9, %v569_v50, %v568_v11  ;;  %v251_v40 = vcombine.high %v11996_v60, %v11996_v60 }
  0x71   :  { %v576_v33 = vsel %vm394_vm5, %v575_v12, %v574_v48  ;;  %v15535_v3 = vrot.slane %v12028_v49, 7  ;;  %v15536_v45 = vrot.slane %v11911_v26, 2  ;;  %v15537_v53 = vrot.slane %v11993_v32, 3 }
  0x72   :  { %v265_v41 = vrot.slane %v251_v40, %v11855_v22  ;;  %v572_v46 = vsel %vm409_vm10, %v571_v30, %v570_v35  ;;  %v578_v60 = vsel %vm397_vm6, %v577_v31, %v576_v33  ;;  %v12186_v9 = vsel %vm471_vm1, %v11041_v59, 0 }
  0x73   :  { %v690_v4 = vsel %vm391_vm4, %v15535_v3, %v11952_v58  ;;  %v680_v5 = vsel %vm15516_vm9, %v15536_v45, %v679_v61  ;;  %v687_v50 = vsel %vm403_vm8, %v15537_v53, %v685_v42  ;;  %v799_v8 = vrot.slane %v11901_v20, 1 }
  0x74   :  { %9966 = vmatmul.mubr.msk.bf16.vlgmr.msra.gmra.mrb[0].mxu0 %vm15496_vm2, %v579_v39  ;;  %v670_v12 = vpack.c.bf16 %v265_v41, %v265_v41  ;;  %v15538_v10 = vrot.slane %v12030_v47, 6  ;;  %v811_v30 = vrot.slane %v11899_v19, 2  ;;  %v813_v51 = vrot.slane %v11913_v27, 1 }
  0x75   :  { %v15539_v59 = vrot.slane %v11922_v34, 2  ;;  %734 = vmatpush1.bf16.msra.mxu0 %v11029_v62  ;;  %653 = vmatprep.mubr.bf16.mxu0 %v15499_v0  ;;  %v800_v20 = vsel %vm391_vm4, %v11891_v13, %v799_v8  ;;  %v821_v11 = vrot.slane %v11993_v32, 4  ;;  %v825_v31 = vrot.slane %v11950_v57, 2 }
  0x76   :  { %v691_v61 = vsel %vm394_vm5, %v15538_v10, %v690_v4  ;;  %9976 = vmatprep.subr.msk.bf16.mxu0 %vm471_vm1, %v11032_v63  ;;  %v580_v39 = vpack.c.b16 %v578_v60, %v572_v46  ;;  %v12207_v35 = vunpack.c.l.b16 %v670_v12  ;;  %v15540_v27 = vrot.slane %v11893_v14, 7 }
  0x77   :  { %v688_v42 = vsel %vm15516_vm9, %v15539_v59, %v687_v50  ;;  %v814_v62 = vsel %vm391_vm4, %v11903_v21, %v813_v51  ;;  %v15541_v40 = vrot.slane %v12032_v52, 5  ;;  %v15542_v32 = vrot.slane %v11895_v16, 6  ;;  %v11035_v59 = vld [vmem:[%s15528_s12 + $0x60] ss:$8 sps:$4 sm:$0xff]  }
  0x78   :  { %v802_v48 = vsel %vm394_vm5, %v15540_v27, %v800_v20  ;;  %v15543_v63 = vrot.slane %v11905_v23, 7  ;;  %v827_v4 = vrot.slane %v11952_v58, 1  ;;  %v699_v14 = vrot.slane %v12207_v35, 5 }
  0x79   :  { %v692_v13 = vsel %vm397_vm6, %v15541_v40, %v691_v61  ;;  %v804_v33 = vsel %vm397_vm6, %v15542_v32, %v802_v48  ;;  %v15544_v45 = vrot.slane %v11897_v18, 5  ;;  %v15545_v53 = vrot.slane %v11907_v24, 6  ;;  %736 = vmatpush1.bf16.msra.mxu0 %v11877_v43 }
  0x7a   :  { %v816_v3 = vsel %vm394_vm5, %v15543_v63, %v814_v62  ;;  %v829_v16 = vrot.slane %v12030_v47, 7  ;;  %v15546_v23 = vrot.slane %v11909_v25, 4  ;;  %v15547_v58 = vrot.slane %v11915_v28, 5  ;;  %879 = vmatprep.subr.bf16.mxu0 %v11037_v6 }
  0x7b   :  { %v806_v21 = vsel %vm15517_vm7, %v15544_v45, %v804_v33  ;;  %v818_v50 = vsel %vm397_vm6, %v15545_v53, %v816_v3  ;;  %v831_v18 = vrot.slane %v12032_v52, 6  ;;  %v15548_v60 = vrot.slane %v11899_v19, 1 }
  0x7c   :  { %v808_v41 = vsel %vm403_vm8, %v15546_v23, %v806_v21  ;;  %v820_v46 = vsel %vm15517_vm7, %v15547_v58, %v818_v50  ;;  %v15549_v8 = vrot.slane %v11911_v26, 3  ;;  %v15550_v25 = vrot.slane %v11950_v57, 1  ;;  %9967 = vmatmul.mubr.msk.bf16.gmra.mrb[4].mxu0 %vm15496_vm2, %v580_v39 }
  0x7d   :  { %v681_v24 = vsel %vm409_vm10, %v15548_v60, %v680_v5  ;;  %v822_v43 = vsel %vm403_vm8, %v821_v11, %v820_v46  ;;  %v693_v28 = vsel %vm15517_vm7, %v433_v2, %v692_v13  ;;  %v15551_v19 = vrot.slane %v11922_v34, 3  ;;  %765 = vmatprep.mubr.bf16.mxu0 %v15499_v0  ;;  %v11038_v11 = vld [vmem:[%s15528_s12 + $0x74] ss:$8 sps:$4 sm:$0x3f]   ;;  %s11652_s12 = smov 96  }
  0x7e   :  { %v810_v47 = vsel %vm15516_vm9, %v15549_v8, %v808_v41  ;;  %v689_v12 = vsel %vm409_vm10, %v15550_v25, %v688_v42  ;;  %v833_v6 = vrot.slane %v12036_v29, 5  ;;  %v835_v57 = vrot.slane %v12034_v36, 4 }
  0x7f   :  { %v812_v52 = vsel %vm409_vm10, %v811_v30, %v810_v47  ;;  %v824_v5 = vsel %vm15516_vm9, %v15551_v19, %v822_v43  ;;  %v837_v10 = vrot.slane %v12038_v1, 3  ;;  %v839_v2 = vrot.slane %v12040_v54, 2 }
  0x80   :  { %v826_v26 = vsel %vm409_vm10, %v825_v31, %v824_v5  ;;  %v841_v30 = vrot.slane %v12044_v37, 1  ;;  %v843_v34 = vrot.slane %v12046_v38, 7  ;;  %v845_v51 = vrot.slane %v12207_v35, 6 }
  0x81   :  { %v847_v61 = vpack.c.b16 %v826_v26, %v812_v52  ;;  %v694_v29 = vsel %vm403_vm8, %v435_v56, %v693_v28  ;;  %v697_v42 = vsel %vm391_vm4, %v441_v7, %v12044_v37  ;;  %v701_v20 = vpack.c.b16 %v689_v12, %v681_v24 }
  0x82   :  { %v695_v31 = vsel %vm15516_vm9, %v437_v44, %v694_v29  ;;  %v698_v36 = vsel %vm394_vm5, %v443_v55, %v697_v42  ;;  %v828_v56 = vsel %vm391_vm4, %v12028_v49, %v827_v4  ;;  %v15552_v37 = vrot.slane %v12040_v54, 1 }
  0x83   :  { %v700_v1 = vsel %vm397_vm6, %v699_v14, %v698_v36  ;;  %v830_v38 = vsel %vm394_vm5, %v829_v16, %v828_v56  ;;  %v842_v39 = vsel %vm391_vm4, %v12042_v15, %v841_v30 }
  0x84   :  { %9977 = vmatmul.mubr.msk.bf16.vlgmr.msra.gmra.mrb[0].mxu0 %vm15496_vm2, %v701_v20  ;;  %v696_v7 = vsel %vm409_vm10, %v15552_v37, %v695_v31  ;;  %v832_v49 = vsel %vm397_vm6, %v831_v18, %v830_v38  ;;  %v844_v27 = vsel %vm394_vm5, %v843_v34, %v842_v39 }
  0x85   :  { %880 = vmatpush1.bf16.msra.mxu0 %v11035_v59  ;;  %775 = vmatprep.mubr.bf16.mxu0 %v15499_v0  ;;  %v702_v44 = vpack.c.b16 %v700_v1, %v696_v7  ;;  %v834_v55 = vsel %vm15517_vm7, %v833_v6, %v832_v49  ;;  %v846_v48 = vsel %vm397_vm6, %v845_v51, %v844_v27 }
  0x86   :  { %9987 = vmatprep.subr.msk.bf16.mxu0 %vm471_vm1, %v11038_v11  ;;  %v836_v54 = vsel %vm403_vm8, %v835_v57, %v834_v55 }
  0x87   :  { %v838_v35 = vsel %vm15516_vm9, %v837_v10, %v836_v54 }
  0x89   :  { %882 = vmatpush1.bf16.msra.mxu0 %v12186_v9  ;;  %v840_v9 = vsel %vm409_vm10, %v839_v2, %v838_v35 }
  0x8a   :  { %4007 = vmatprep.subr.bf16.mxu0 %v15499_v0  ;;  %v848_v62 = vpack.c.b16 %v846_v48, %v840_v9 }
  0x8c   :  { %9978 = vmatmul.mubr.msk.bf16.gmra.mrb[4].mxu0 %vm15496_vm2, %v702_v44 }
  0x8d   :  { %911 = vmatprep.mubr.bf16.mxu0 %v15499_v0 }
  0x94   :  { %9988 = vmatmul.mubr.msk.bf16.vlgmr.msra.gmra.mrb[0].mxu0 %vm15496_vm2, %v847_v61 }
  0x95   :  { %921 = vmatprep.mubr.bf16.mxu0 %v15499_v0 }
  0x9c   :  { %9989 = vmatmul.mubr.msk.bf16.gmra.mrb[4].mxu0 %vm15496_vm2, %v848_v62  ;;  %vm1379_vm2 = vcmask 1040384  }
 0x167   :  { %v12312_v40 = vpop.f32.mrb[0].mxu0 }
 0x168   :  { %v12314_v13 = vpop.f32.mrb[1].mxu0  ;;  %v968_v33 = vmul.f32 %v12312_v40, %v12312_v40 }
 0x169   :  { %v969_v15 = vmul.f32 %v12314_v13, %v12314_v13  ;;  %v12318_v32 = vpop.f32.mrb[2].mxu0  ;;  %v954_v14 = vsel %vm953_vm11, %v12314_v13, 0.0 }
 0x16a   :  { %v942_v63 = vadd.f32 %v12318_v32, %v12312_v40  ;;  %v970_v3 = vmul.f32 %v12318_v32, %v12318_v32  ;;  %v12326_v4 = vpop.f32.mrb[3].mxu0 }
 0x16b   :  { %v955_v45 = vsel %vm953_vm11, %v12326_v4, 0.0  ;;  %v971_v21 = vmul.f32 %v12326_v4, %v12326_v4  ;;  %v986_v16 = vsel %vm953_vm11, %v969_v15, 0.0 }
 0x16c   :  { %v976_v53 = vadd.f32 %v970_v3, %v968_v33  ;;  %v956_v50 = vadd.f32 %v955_v45, %v954_v14 }
 0x16d   :  { %v987_v23 = vsel %vm953_vm11, %v971_v21, 0.0 }
 0x16e   :  { %v988_v41 = vadd.f32 %v987_v23, %v986_v16 }
 0x16f   :  { %v12336_v58 = vpop.f32.mrb[4].mxu0 }
 0x170   :  { %v943_v46 = vadd.f32 %v942_v63, %v12336_v58  ;;  %v972_v18 = vmul.f32 %v12336_v58, %v12336_v58  ;;  %v12341_v60 = vpop.f32.mrb[5].mxu0 }
 0x171   :  { %v957_v24 = vsel %vm953_vm11, %v12341_v60, 0.0  ;;  %v973_v8 = vmul.f32 %v12341_v60, %v12341_v60  ;;  %v12347_v47 = vpop.f32.mrb[6].mxu0 }
 0x172   :  { %v977_v43 = vadd.f32 %v976_v53, %v972_v18  ;;  %v958_v25 = vadd.f32 %v957_v24, %v956_v50  ;;  %v945_v12 = vsel %vm944_vm12, %v12347_v47, 0.0  ;;  %v974_v28 = vmul.f32 %v12347_v47, %v12347_v47  ;;  %v12353_v52 = vpop.f32.mrb[7].mxu0 }
 0x173   :  { %v989_v19 = vsel %vm953_vm11, %v973_v8, 0.0  ;;  %v946_v5 = vadd.f32 %v945_v12, %v943_v46  ;;  %v960_v26 = vsel %vm959_vm13, %v12353_v52, 0.0  ;;  %v975_v6 = vmul.f32 %v12353_v52, %v12353_v52 }
 0x174   :  { %v990_v57 = vadd.f32 %v989_v19, %v988_v41  ;;  %v978_v10 = vsel %vm944_vm12, %v974_v28, 0.0  ;;  %v961_v61 = vadd.f32 %v960_v26, %v958_v25  ;;  %vm15498_vm12 = vcmask 392192  }
 0x175   :  { %v947_v2 = vrot.slane %v946_v5, 4  ;;  %v979_v30 = vadd.f32 %v978_v10, %v977_v43  ;;  %v991_v34 = vsel %vm959_vm13, %v975_v6, 0.0  ;;  %vm1143_vm13 = vcmask 523264  }
 0x176   :  { %v992_v51 = vadd.f32 %v991_v34, %v990_v57  ;;  %v962_v38 = vrot.slane %v961_v61, 4 }
 0x177   :  { %v948_v59 = vadd.f32 %v947_v2, %v946_v5  ;;  %v980_v29 = vrot.slane %v979_v30, 4 }
 0x178   :  { %v993_v44 = vrot.slane %v992_v51, 4  ;;  %v963_v49 = vadd.f32 %v962_v38, %v961_v61 }
 0x179   :  { %v949_v42 = vrot.slane %v948_v59, 2  ;;  %v981_v20 = vadd.f32 %v980_v29, %v979_v30 }
 0x17a   :  { %v994_v55 = vadd.f32 %v993_v44, %v992_v51  ;;  %v964_v54 = vrot.slane %v963_v49, 2 }
 0x17b   :  { %v950_v11 = vadd.f32 %v949_v42, %v948_v59  ;;  %v982_v31 = vrot.slane %v981_v20, 2 }
 0x17c   :  { %v995_v39 = vrot.slane %v994_v55, 2  ;;  %v965_v35 = vadd.f32 %v964_v54, %v963_v49 }
 0x17d   :  { %v951_v36 = vrot.slane %v950_v11, 1  ;;  %v983_v56 = vadd.f32 %v982_v31, %v981_v20 }
 0x17e   :  { %v996_v27 = vadd.f32 %v995_v39, %v994_v55  ;;  %v966_v9 = vrot.slane %v965_v35, 1 }
 0x17f   :  { %v952_v37 = vadd.f32 %v951_v36, %v950_v11  ;;  %v984_v7 = vrot.slane %v983_v56, 1 }
 0x180   :  { %v997_v48 = vrot.slane %v996_v27, 1  ;;  %v967_v62 = vadd.f32 %v966_v9, %v965_v35 }
 0x181   :  { %1009 = vrot.lane.b32.xlu1 %v952_v37, %s11652_s12  ;;  %1000 = vrot.lane.b32.xlu0 %v952_v37, %s11653_s24  ;;  %v985_v1 = vadd.f32 %v984_v7, %v983_v56 }
 0x182   :  { %v998_v15 = vadd.f32 %v997_v48, %v996_v27 }
 0x185   :  { %1013 = vrot.lane.b32.xlu1 %v985_v1, %s11652_s12  ;;  %1017 = vrot.lane.b32.xlu0 %v952_v37, %s11654_s2 }
 0x189   :  { %1021 = vrot.lane.b32.xlu1 %v985_v1, %s11654_s2  ;;  %1025 = vrot.lane.b32.xlu0 %v952_v37, %s11646_s4 }
 0x18d   :  { %1029 = vrot.lane.b32.xlu1 %v985_v1, %s11646_s4  ;;  %1033 = vrot.lane.b32.xlu0 %v952_v37, %s11655_s25 }
 0x191   :  { %1037 = vrot.lane.b32.xlu1 %v985_v1, %s11655_s25  ;;  %1041 = vrot.lane.b32.xlu0 %v952_v37, %s11656_s3 }
 0x195   :  { %1045 = vrot.lane.b32.xlu1 %v985_v1, %s11656_s3  ;;  %1005 = vrot.lane.b32.xlu0 %v985_v1, %s11653_s24 }
 0x199   :  { %1053 = vrot.lane.b32.xlu1 %v985_v1, %s15493_s26  ;;  %1049 = vrot.lane.b32.xlu0 %v952_v37, %s15493_s26 }
 0x19d   :  { %1065 = vrot.lane.b32.xlu1 %v998_v15, %s11653_s24  ;;  %1060 = vrot.lane.b32.xlu0 %v967_v62, %s11653_s24 }
 0x1a1   :  { %1073 = vrot.lane.b32.xlu1 %v998_v15, %s11652_s12  ;;  %1069 = vrot.lane.b32.xlu0 %v967_v62, %s11652_s12 }
 0x1a5   :  { %1081 = vrot.lane.b32.xlu1 %v998_v15, %s11654_s2  ;;  %1077 = vrot.lane.b32.xlu0 %v967_v62, %s11654_s2 }
 0x1a9   :  { %1089 = vrot.lane.b32.xlu1 %v998_v15, %s11646_s4  ;;  %1085 = vrot.lane.b32.xlu0 %v967_v62, %s11646_s4 }
 0x1ad   :  { %1097 = vrot.lane.b32.xlu1 %v998_v15, %s11655_s25  ;;  %1093 = vrot.lane.b32.xlu0 %v967_v62, %s11655_s25 }
 0x1f3   :  { %v1010_v33 = vpop.permute.xlu1 %1009  ;;  %v1001_v63 = vpop.permute.xlu0 %1000 }
 0x1f4   :  { %v1003_v16 = vadd.f32 %v1001_v63, %v952_v37 }
 0x1f6   :  { %v1012_v46 = vadd.f32 %v1010_v33, %v1003_v16 }
 0x1f7   :  { %v1014_v3 = vpop.permute.xlu1 %1013  ;;  %v1018_v14 = vpop.permute.xlu0 %1017 }
 0x1f8   :  { %v1020_v8 = vadd.f32 %v1018_v14, %v1012_v46  ;;  %v12390_v14 = vsub.s32 0, %v11834_v17  ;;  %v11042_v46 = vld [vmem:[%s15556_s1 + $0xe4] ss:$8 sps:$4 sm:$0xff]  }
 0x1f9   :  { %2141 = vmatprep.subr.bf16.mxu1 %v11042_v46 }
 0x1fa   :  { %15554 = vst [vmem:[#allocation18_spill] sm:$0xff] %v12390_v14 }
 0x1fb   :  { %v1022_v45 = vpop.permute.xlu1 %1021  ;;  %v1026_v21 = vpop.permute.xlu0 %1025 }
 0x1fc   :  { %v1028_v25 = vadd.f32 %v1026_v21, %v1020_v8  ;;  %v11047_v8 = vld [vmem:[%s15556_s1 + $0xf0] ss:$8 sps:$4 sm:$0xff]  }
 0x1ff   :  { %v1030_v53 = vpop.permute.xlu1 %1029  ;;  %v1034_v50 = vpop.permute.xlu0 %1033 }
 0x200   :  { %v1036_v5 = vadd.f32 %v1034_v50, %v1028_v25  ;;  %v11050_v25 = vld [vmem:[%s15556_s1 + $0x100] ss:$8 sps:$4 sm:$0xff]  }
 0x203   :  { %v1038_v23 = vpop.permute.xlu1 %1037  ;;  %v1042_v41 = vpop.permute.xlu0 %1041 }
 0x204   :  { %v1044_v6 = vadd.f32 %v1042_v41, %v1036_v5  ;;  %v11056_v5 = vld [vmem:[%s15556_s1 + $0x120] ss:$8 sps:$4 sm:$0xff]  }
 0x207   :  { %v1046_v18 = vpop.permute.xlu1 %1045  ;;  %v1006_v24 = vpop.permute.xlu0 %1005 }
 0x208   :  { %v1008_v43 = vadd.f32 %v1006_v24, %v985_v1  ;;  %v11045_v24 = vld [vmem:[%s15556_s1 + $0xf4] ss:$8 sps:$4 sm:$0xff]  }
 0x20a   :  { %v1016_v12 = vadd.f32 %v1014_v3, %v1008_v43  ;;  %v940_v3 = vld [vmem:[%s15553_s22] sm:$0x1]  ;;  %v11048_v43 = vld [vmem:[%s15556_s1 + $0x104] ss:$8 sps:$4 sm:$0xff]  }
 0x20b   :  { %v1054_v28 = vpop.permute.xlu1 %1053  ;;  %v1050_v19 = vpop.permute.xlu0 %1049 }
 0x20c   :  { %v1024_v26 = vadd.f32 %v1022_v45, %v1016_v12  ;;  %v1052_v30 = vadd.f32 %v1050_v19, %v1044_v6  ;;  %v11051_v12 = vld [vmem:[%s15556_s1 + $0x114] ss:$8 sps:$4 sm:$0xff]   ;;  %v11054_v19 = vld [vmem:[%s15556_s1 + $0x124] ss:$8 sps:$4 sm:$0xff]   ;;  %v11059_v6 = vld [vmem:[%s15556_s1 + $0x130] ss:$8 sps:$4 sm:$0xff]  }
 0x20e   :  { %v1032_v57 = vadd.f32 %v1030_v53, %v1024_v26  ;;  %v1057_v42 = vadd.f32 %v1052_v30, %v967_v62  ;;  %v941_v53 = vld [vmem:[%s15555_s28] sm:$0x1]  ;;  %v11057_v26 = vld [vmem:[%s15556_s1 + $0x134] ss:$8 sps:$4 sm:$0xff]   ;;  %v15557_v30 = vlaneseq }
 0x20f   :  { %v1066_v10 = vpop.permute.xlu1 %1065  ;;  %v1061_v61 = vpop.permute.xlu0 %1060 }
 0x210   :  { %v1040_v2 = vadd.f32 %v1038_v23, %v1032_v57  ;;  %v1063_v56 = vadd.f32 %v1061_v61, %v1057_v42  ;;  %v11060_v57 = vld [vmem:[%s15556_s1 + $0x144] ss:$8 sps:$4 sm:$0xff]   ;;  %v11063_v61 = vld [vmem:[%s15556_s1 + $0x154] ss:$8 sps:$4 sm:$0xff]   ;;  %vm1225_vm14 = vcmp.lt.s32.totalorder %v15557_v30, 224 }
 0x211   :  { %v11071_v42 = vld [vmem:[%s15556_s1 + $0x170] ss:$8 sps:$4 sm:$0xff]  }
 0x212   :  { %v1048_v34 = vadd.f32 %v1046_v18, %v1040_v2  ;;  %v11044_v18 = vld [vmem:[%s15556_s1 + $0xe0] ss:$8 sps:$4 sm:$0xff]   ;;  %v11065_v2 = vld [vmem:[%s15556_s1 + $0x150] ss:$8 sps:$4 sm:$0xff]  }
 0x213   :  { %v1074_v51 = vpop.permute.xlu1 %1073  ;;  %v1070_v59 = vpop.permute.xlu0 %1069  ;;  %2142 = vmatpush1.bf16.msra.mxu1 %v11044_v18 }
 0x214   :  { %v1056_v29 = vadd.f32 %v1054_v28, %v1048_v34  ;;  %v1072_v7 = vadd.f32 %v1070_v59, %v1063_v56  ;;  %2143 = vmatprep.subr.bf16.mxu1 %v11045_v24  ;;  %v11053_v28 = vld [vmem:[%s15556_s1 + $0x110] ss:$8 sps:$4 sm:$0xff]   ;;  %v11066_v34 = vld [vmem:[%s15556_s1 + $0x164] ss:$8 sps:$4 sm:$0xff]   ;;  %v11068_v59 = vld [vmem:[%s15556_s1 + $0x160] ss:$8 sps:$4 sm:$0xff]  }
 0x215   :  { %v11078_v56 = vld [vmem:[%s15556_s1 + $0x1a4] ss:$8 sps:$4 sm:$0xff]  }
 0x216   :  { %v1058_v20 = vadd.f32 %v1056_v29, %v998_v15  ;;  %v11069_v29 = vld [vmem:[%s15556_s1 + $0x174] ss:$8 sps:$4 sm:$0xff]  }
 0x217   :  { %v1082_v11 = vpop.permute.xlu1 %1081  ;;  %v1078_v31 = vpop.permute.xlu0 %1077  ;;  %2144 = vmatpush1.bf16.msra.mxu1 %v11047_v8 }
 0x218   :  { %v1068_v36 = vadd.f32 %v1066_v10, %v1058_v20  ;;  %v1080_v49 = vadd.f32 %v1078_v31, %v1072_v7  ;;  %2145 = vmatprep.subr.bf16.mxu1 %v11048_v43  ;;  %v11062_v10 = vld [vmem:[%s15556_s1 + $0x140] ss:$8 sps:$4 sm:$0xff]   ;;  %v11072_v20 = vld [vmem:[%s15556_s1 + $0x184] ss:$8 sps:$4 sm:$0xff]   ;;  %v11075_v31 = vld [vmem:[%s15556_s1 + $0x194] ss:$8 sps:$4 sm:$0xff]  }
 0x219   :  { %v11081_v7 = vld [vmem:[%s15556_s1 + $0x1b4] ss:$8 sps:$4 sm:$0xff]  }
 0x21a   :  { %v1076_v37 = vadd.f32 %v1074_v51, %v1068_v36  ;;  %v15558_v51 = vmov 0.0   ;;  %v11077_v36 = vld [vmem:[%s15556_s1 + $0x190] ss:$8 sps:$4 sm:$0xff]  }
 0x21b   :  { %v1090_v1 = vpop.permute.xlu1 %1089  ;;  %v1086_v38 = vpop.permute.xlu0 %1085  ;;  %2146 = vmatpush1.bf16.msra.mxu1 %v11050_v25  ;;  %1227 = vst.msk [vmem:[#allocation3] ss:$8 sm:$0x3] %vm1225_vm14, %v15558_v51  ;;  %1230 = vst.msk [vmem:[#allocation3 + $0x20] ss:$8 sm:$0x3] %vm1225_vm14, %v15558_v51 }
 0x21c   :  { %v1084_v44 = vadd.f32 %v1082_v11, %v1076_v37  ;;  %v1088_v54 = vadd.f32 %v1086_v38, %v1080_v49  ;;  %2147 = vmatprep.subr.bf16.mxu1 %v11051_v12  ;;  %1233 = vst.msk [vmem:[#allocation3 + $0x17] ss:$8 sm:$0x3] %vm1225_vm14, %v15558_v51  ;;  %1236 = vst.msk [vmem:[#allocation3 + $0x37] ss:$8 sm:$0x3] %vm1225_vm14, %v15558_v51 }
 0x21d   :  { %3240 = vst.msk [vmem:[#allocation4] ss:$8 sm:$0x3] %vm1225_vm14, %v15558_v51  ;;  %3243 = vst.msk [vmem:[#allocation4 + $0x20] ss:$8 sm:$0x3] %vm1225_vm14, %v15558_v51 }
 0x21e   :  { %v1092_v55 = vadd.f32 %v1090_v1, %v1084_v44  ;;  %3246 = vst.msk [vmem:[#allocation4 + $0x10] ss:$8 sm:$0x3] %vm1225_vm14, %v15558_v51  ;;  %3249 = vst.msk [vmem:[#allocation4 + $0x30] ss:$8 sm:$0x3] %vm1225_vm14, %v15558_v51 }
 0x21f   :  { %v1098_v39 = vpop.permute.xlu1 %1097  ;;  %v1094_v35 = vpop.permute.xlu0 %1093  ;;  %2148 = vmatpush1.bf16.msra.mxu1 %v11053_v28  ;;  %7373 = vst.msk [vmem:[#allocation6] ss:$8 sm:$0x3] %vm1225_vm14, %v15558_v51  ;;  %7376 = vst.msk [vmem:[#allocation6 + $0x20] ss:$8 sm:$0x3] %vm1225_vm14, %v15558_v51 }
 0x220   :  { %v1100_v27 = vadd.f32 %v1098_v39, %v1092_v55  ;;  %v1096_v9 = vadd.f32 %v1094_v35, %v1088_v54  ;;  %2149 = vmatprep.subr.bf16.mxu1 %v11054_v19  ;;  %7379 = vst.msk [vmem:[#allocation6 + $0x17] ss:$8 sm:$0x3] %vm1225_vm14, %v15558_v51  ;;  %7382 = vst.msk [vmem:[#allocation6 + $0x37] ss:$8 sm:$0x3] %vm1225_vm14, %v15558_v51 }
 0x221   :  { %v11074_v11 = vld [vmem:[%s15556_s1 + $0x180] ss:$8 sps:$4 sm:$0xff]   ;;  %v11083_v1 = vld [vmem:[%s15556_s1 + $0x1b0] ss:$8 sps:$4 sm:$0xff]   ;;  %v11098_v38 = vld [vmem:[%s15556_s1 + $0x4] ss:$8 sps:$4 sm:$0xff]  }
 0x222   :  { %v1102_v48 = vmul.f32 0.0025510204, %v1096_v9  ;;  %v1103_v33 = vmul.f32 0.0025510204, %v1100_v27  ;;  %v11080_v37 = vld [vmem:[%s15556_s1 + $0x1a0] ss:$8 sps:$4 sm:$0xff]  }
 0x223   :  { %2150 = vmatpush1.bf16.msra.mxu1 %v11056_v5  ;;  %vm15497_vm14 = vcmask 654336  }
 0x224   :  { %v1104_v62 = vmul.f32 %v1102_v48, %v1102_v48  ;;  %2151 = vmatprep.subr.bf16.mxu1 %v11057_v26 }
 0x226   :  { %v1105_v15 = vsub.f32 %v1103_v33, %v1104_v62 }
 0x227   :  { %2152 = vmatpush1.bf16.msra.mxu1 %v11059_v6 }
 0x228   :  { %v1106_v63 = vadd.f32 1e-05, %v1105_v15  ;;  %2153 = vmatprep.subr.bf16.mxu1 %v11060_v57 }
 0x22a   :  { %11489 = vrsqrt.f32 %v1106_v63 }
 0x22b   :  { %2154 = vmatpush1.bf16.msra.mxu1 %v11062_v10 }
 0x22c   :  { %2155 = vmatprep.subr.bf16.mxu1 %v11063_v61 }
 0x22f   :  { %2156 = vmatpush1.bf16.msra.mxu1 %v11065_v2 }
 0x230   :  { %2157 = vmatprep.subr.bf16.mxu1 %v11066_v34 }
 0x233   :  { %2158 = vmatpush1.bf16.msra.mxu1 %v11068_v59 }
 0x234   :  { %v11490_v45 = vpop.eup %11489  ;;  %2159 = vmatprep.subr.bf16.mxu1 %v11069_v29 }
 0x235   :  { %v12392_v21 = vmul.f32 %v11490_v45, %v940_v3 }
 0x237   :  { %v1109_v50 = vmul.f32 %v12392_v21, %v1102_v48  ;;  %v1115_v16 = vrot.slane %v12392_v21, %v12390_v14  ;;  %2160 = vmatpush1.bf16.msra.mxu1 %v11071_v42 }
 0x238   :  { %2161 = vmatprep.subr.bf16.mxu1 %v11072_v20 }
 0x239   :  { %v12400_v23 = vsub.f32 %v941_v53, %v1109_v50  ;;  %1119 = vrot.lane.b32.xlu1 %v1115_v16, %s11656_s3  ;;  %1116 = vrot.lane.b32.xlu0 %v1115_v16, %s15493_s26 }
 0x23b   :  { %v1154_v41 = vrot.slane %v12400_v23, %v12390_v14  ;;  %2162 = vmatpush1.bf16.msra.mxu1 %v11074_v11 }
 0x23c   :  { %2163 = vmatprep.subr.bf16.mxu1 %v11075_v31 }
 0x23d   :  { %1122 = vrot.lane.b32.xlu0 %v1115_v16, %s11655_s25  ;;  %1155 = vrot.lane.b32.xlu1 %v1154_v41, %s15493_s26 }
 0x23f   :  { %2164 = vmatpush1.bf16.msra.mxu1 %v11077_v36 }
 0x240   :  { %2165 = vmatprep.subr.bf16.mxu1 %v11078_v56 }
 0x241   :  { %1125 = vrot.lane.b32.xlu0 %v1115_v16, %s11646_s4  ;;  %1158 = vrot.lane.b32.xlu1 %v1154_v41, %s11656_s3 }
 0x243   :  { %2166 = vmatpush1.bf16.msra.mxu1 %v11080_v37 }
 0x244   :  { %2167 = vmatprep.subr.bf16.mxu1 %v11081_v7 }
 0x245   :  { %1128 = vrot.lane.b32.xlu0 %v1115_v16, %s11654_s2  ;;  %1161 = vrot.lane.b32.xlu1 %v1154_v41, %s11655_s25 }
 0x247   :  { %2168 = vmatpush1.bf16.msra.mxu1 %v11083_v1 }
 0x248   :  { %2434 = vmatprep.subr.bf16.mxu1 %v11098_v38 }
 0x249   :  { %1131 = vrot.lane.b32.xlu0 %v1115_v16, %s11652_s12  ;;  %1164 = vrot.lane.b32.xlu1 %v1154_v41, %s11646_s4 }
 0x24d   :  { %1134 = vrot.lane.b32.xlu0 %v1115_v16, %s11653_s24  ;;  %1167 = vrot.lane.b32.xlu1 %v1154_v41, %s11654_s2 }
 0x251   :  { %1170 = vrot.lane.b32.xlu0 %v1154_v41, %s11652_s12  ;;  %1173 = vrot.lane.b32.xlu1 %v1154_v41, %s11653_s24 }
 0x2ab   :  { %v1120_v44 = vpop.permute.xlu1 %1119  ;;  %v1117_v49 = vpop.permute.xlu0 %1116 }
 0x2ac   :  { %v1138_v27 = vsel %vm1137_vm15, %v12392_v21, %v1117_v49 }
 0x2ad   :  { %v1140_v33 = vsel %vm1139_vm0, %v1138_v27, %v1120_v44 }
 0x2af   :  { %v1123_v55 = vpop.permute.xlu0 %1122  ;;  %v1156_v54 = vpop.permute.xlu1 %1155 }
 0x2b0   :  { %v1142_v62 = vsel %vm15498_vm12, %v1140_v33, %v1123_v55  ;;  %v1176_v53 = vsel %vm1137_vm15, %v12400_v23, %v1156_v54 }
 0x2b3   :  { %v1126_v39 = vpop.permute.xlu0 %1125  ;;  %v1159_v35 = vpop.permute.xlu1 %1158 }
 0x2b4   :  { %v1144_v15 = vsel %vm1143_vm13, %v1142_v62, %v1126_v39  ;;  %v1177_v21 = vsel %vm1139_vm0, %v1176_v53, %v1159_v35 }
 0x2b7   :  { %v1129_v9 = vpop.permute.xlu0 %1128  ;;  %v1162_v48 = vpop.permute.xlu1 %1161 }
 0x2b8   :  { %v1146_v63 = vsel %vm15497_vm14, %v1144_v15, %v1129_v9  ;;  %v1178_v16 = vsel %vm15498_vm12, %v1177_v21, %v1162_v48  ;;  %vm1404_vm12 = vcmask 784384  }
 0x2b9   :  { %v1190_v50 = vrot.slane %v1146_v63, %v12390_v14 }
 0x2bb   :  { %v1132_v3 = vpop.permute.xlu0 %1131  ;;  %v1165_v45 = vpop.permute.xlu1 %1164  ;;  %v1192_v23 = vmul.f32 %v1190_v50, %v12314_v13  ;;  %v1194_v12 = vmul.f32 %v1190_v50, %v12326_v4  ;;  %v1196_v19 = vmul.f32 %v1190_v50, %v12341_v60  ;;  %v1198_v6 = vmul.f32 %v1190_v50, %v12353_v52 }
 0x2bc   :  { %v1147_v41 = vsel %vm953_vm11, %v1146_v63, %v1132_v3  ;;  %v1179_v46 = vsel %vm1143_vm13, %v1178_v16, %v1165_v45 }
 0x2bf   :  { %v1135_v18 = vpop.permute.xlu0 %1134  ;;  %v1168_v24 = vpop.permute.xlu1 %1167 }
 0x2c0   :  { %v1149_v8 = vsel %vm1148_vm3, %v1147_v41, %v1135_v18  ;;  %v1180_v43 = vsel %vm15497_vm14, %v1179_v46, %v1168_v24  ;;  %vm1401_vm14 = vcmask 785409  }
 0x2c1   :  { %v1206_v25 = vrot.slane %v1180_v43, %v12390_v14  ;;  %v1186_v28 = vrot.slane %v1149_v8, %v12390_v14 }
 0x2c3   :  { %v1171_v5 = vpop.permute.xlu0 %1170  ;;  %v1174_v26 = vpop.permute.xlu1 %1173  ;;  %v1208_v57 = vadd.f32 %v1206_v25, %v1192_v23  ;;  %v1210_v10 = vadd.f32 %v1206_v25, %v1194_v12  ;;  %v1212_v61 = vadd.f32 %v1206_v25, %v1196_v19  ;;  %v1191_v30 = vmul.f32 %v1186_v28, %v12312_v40 }
 0x2c4   :  { %v1181_v2 = vsel %vm953_vm11, %v1180_v43, %v1171_v5  ;;  %v1214_v34 = vadd.f32 %v1206_v25, %v1198_v6  ;;  %v1193_v4 = vmul.f32 %v1186_v28, %v12318_v32  ;;  %v1195_v59 = vmul.f32 %v1186_v28, %v12336_v58 }
 0x2c5   :  { %v1182_v13 = vsel %vm1148_vm3, %v1181_v2, %v1174_v26  ;;  %11491 = vtanh.f32 %v1208_v57  ;;  %v1197_v29 = vmul.f32 %v1186_v28, %v12347_v47 }
 0x2c6   :  { %v1202_v60 = vrot.slane %v1182_v13, %v12390_v14  ;;  %11493 = vtanh.f32 %v1210_v10 }
 0x2c7   :  { %11495 = vtanh.f32 %v1212_v61 }
 0x2c8   :  { %v1207_v52 = vadd.f32 %v1202_v60, %v1191_v30  ;;  %v1209_v42 = vadd.f32 %v1202_v60, %v1193_v4  ;;  %v1211_v20 = vadd.f32 %v1202_v60, %v1195_v59  ;;  %11497 = vtanh.f32 %v1214_v34 }
 0x2c9   :  { %v1213_v11 = vadd.f32 %v1202_v60, %v1197_v29 }
 0x2ca   :  { %11499 = vtanh.f32 %v1207_v52 }
 0x2cb   :  { %11501 = vtanh.f32 %v1209_v42 }
 0x2cc   :  { %11503 = vtanh.f32 %v1211_v20 }
 0x2cd   :  { %11505 = vtanh.f32 %v1213_v11 }
 0x2cf   :  { %v11492_v40 = vpop.eup %11491 }
 0x2d0   :  { %v11494_v32 = vpop.eup %11493 }
 0x2d1   :  { %v11496_v31 = vpop.eup %11495 }
 0x2d2   :  { %v11498_v58 = vpop.eup %11497 }
 0x2d4   :  { %v11500_v36 = vpop.eup %11499 }
 0x2d5   :  { %v11502_v56 = vpop.eup %11501  ;;  %v1246_v37 = vcombine.low %v11500_v36, %v11492_v40  ;;  %v1247_v7 = vcombine.high %v11500_v36, %v11492_v40 }
 0x2d6   :  { %v11504_v47 = vpop.eup %11503  ;;  %v1264_v1 = vcombine.low %v11502_v56, %v11494_v32  ;;  %v1265_v38 = vcombine.high %v11502_v56, %v11494_v32  ;;  %v12570_v56 = vsub.s32 3, %v11834_v17 }
 0x2d7   :  { %v11506_v44 = vpop.eup %11505  ;;  %v1254_v49 = vrot.slane %v1246_v37, %v11855_v22  ;;  %v1261_v55 = vrot.slane %v1247_v7, %v11855_v22  ;;  %v1282_v54 = vcombine.low %v11504_v47, %v11496_v31  ;;  %v1283_v39 = vcombine.high %v11504_v47, %v11496_v31 }
 0x2d8   :  { %v1272_v35 = vrot.slane %v1264_v1, %v11855_v22  ;;  %v1279_v27 = vrot.slane %v1265_v38, %v11855_v22  ;;  %v1300_v9 = vcombine.low %v11506_v44, %v11498_v58  ;;  %v12573_v37 = vsub.s32 1, %v11834_v17 }
 0x2d9   :  { %v1262_v48 = vcombine.high %v1254_v49, %v1254_v49  ;;  %v1263_v33 = vcombine.high %v1261_v55, %v1261_v55  ;;  %v1290_v62 = vrot.slane %v1282_v54, %v11855_v22  ;;  %v1297_v15 = vrot.slane %v1283_v39, %v11855_v22 }
 0x2da   :  { %v1280_v63 = vcombine.high %v1272_v35, %v1272_v35  ;;  %v1281_v3 = vcombine.high %v1279_v27, %v1279_v27  ;;  %v1307_v45 = vrot.slane %v1300_v9, %v11855_v22  ;;  %v1341_v12 = vrot.slane %v1279_v27, %v11855_v22 }
 0x2db   :  { %v1298_v53 = vcombine.high %v1290_v62, %v1290_v62  ;;  %v1299_v21 = vcombine.high %v1297_v15, %v1297_v15  ;;  %v1309_v50 = vcombine.low %v1254_v49, %v1262_v48  ;;  %v1310_v16 = vcombine.low %v1261_v55, %v1263_v33 }
 0x2dc   :  { %v1308_v41 = vcombine.high %v1307_v45, %v1307_v45  ;;  %v1327_v46 = vcombine.low %v1272_v35, %v1280_v63  ;;  %v1344_v18 = vcombine.low %v1281_v3, %v1290_v62  ;;  %v12579_v47 = vsub.s32 2, %v11834_v17 }
 0x2dd   :  { %v1317_v24 = vrot.slane %v1309_v50, %v11855_v22  ;;  %v1324_v8 = vrot.slane %v1310_v16, %v11855_v22  ;;  %v1345_v43 = vcombine.low %v1298_v53, %v1297_v15  ;;  %v1362_v25 = vcombine.low %v1299_v21, %v1307_v45 }
 0x2de   :  { %v1334_v23 = vrot.slane %v1327_v46, %v11855_v22  ;;  %v1352_v28 = vrot.slane %v1344_v18, %v11855_v22  ;;  %v1376_v19 = vrot.slane %v1308_v41, %v11855_v22 }
 0x2df   :  { %v1325_v5 = vcombine.low %v1317_v24, %v1324_v8  ;;  %v1326_v26 = vcombine.high %v1317_v24, %v1324_v8  ;;  %v1359_v6 = vrot.slane %v1345_v43, %v11855_v22  ;;  %v1369_v57 = vrot.slane %v1362_v25, %v11855_v22 }
 0x2e0   :  { %v1342_v10 = vcombine.low %v1334_v23, %v1341_v12  ;;  %v1343_v61 = vcombine.high %v1334_v23, %v1341_v12 }
 0x2e1   :  { %v1360_v2 = vcombine.low %v1352_v28, %v1359_v6  ;;  %v1361_v30 = vcombine.high %v1352_v28, %v1359_v6  ;;  %v1377_v34 = vcombine.low %v1369_v57, %v1376_v19  ;;  %v1378_v13 = vcombine.high %v1369_v57, %v1376_v19 }
 0x2e2   :  { %v1380_v4 = vrot.slane %v1325_v5, 7  ;;  %v1381_v59 = vrot.slane %v1326_v26, 7  ;;  %v1382_v60 = vrot.slane %v1342_v10, 7  ;;  %v1384_v29 = vrot.slane %v1343_v61, 7 }
 0x2e3   :  { %v1386_v52 = vrot.slane %v1360_v2, 7  ;;  %v1387_v42 = vrot.slane %v1361_v30, 7  ;;  %v1388_v20 = vrot.slane %v1377_v34, 7  ;;  %v1390_v11 = vrot.slane %v1378_v13, 7 }
 0x2e4   :  { %v1383_v40 = vsel %vm1379_vm2, %v1380_v4, %v1382_v60  ;;  %v1385_v32 = vsel %vm1379_vm2, %v1381_v59, %v1384_v29  ;;  %1400 = vst [vmem:[#allocation3] sm:$0xfe] %v1380_v4  ;;  %1402 = vst.msk [vmem:[#allocation3 + $0x8] sm:$0xfe] %vm1401_vm14, %v1381_v59 }
 0x2e5   :  { %v1389_v31 = vsel %vm1379_vm2, %v1386_v52, %v1388_v20  ;;  %v1391_v58 = vsel %vm1379_vm2, %v1387_v42, %v1390_v11  ;;  %1403 = vst [vmem:[#allocation3 + $0x10] sm:$0x7f] %v1383_v40  ;;  %1405 = vst.msk [vmem:[#allocation3 + $0x18] sm:$0x7f] %vm1404_vm12, %v1385_v32 }
 0x2e6   :  { %1406 = vst [vmem:[#allocation3 + $0x20] sm:$0xfe] %v1386_v52  ;;  %1407 = vst.msk [vmem:[#allocation3 + $0x28] sm:$0xfe] %vm1401_vm14, %v1387_v42 }
 0x2e7   :  { %1408 = vst [vmem:[#allocation3 + $0x30] sm:$0x7f] %v1389_v31  ;;  %1409 = vst.msk [vmem:[#allocation3 + $0x38] sm:$0x7f] %vm1404_vm12, %v1391_v58 }
 0x2eb   :  { %v11084_v36 = vld [vmem:[#allocation3] ss:$8 sps:$4 sm:$0xff]   ;;  %v11086_v1 = vld [vmem:[#allocation3 + $0x4] ss:$8 sps:$4 sm:$0xff]  }
 0x2ec   :  { %v12576_v7 = vrot.slane %v11084_v36, %v11855_v22  ;;  %v11087_v38 = vld [vmem:[#allocation3 + $0x10] ss:$8 sps:$4 sm:$0xff]   ;;  %v11089_v44 = vld [vmem:[#allocation3 + $0x14] ss:$8 sps:$4 sm:$0xff]   ;;  %v12588_v27 = vrot.slane %v11086_v1, %v11855_v22 }
 0x2ed   :  { %v11090_v55 = vld [vmem:[#allocation3 + $0x20] ss:$8 sps:$4 sm:$0xff]   ;;  %v11092_v54 = vld [vmem:[#allocation3 + $0x24] ss:$8 sps:$4 sm:$0xff]   ;;  %v12591_v9 = vrot.slane %v11087_v38, %v11855_v22  ;;  %v12594_v48 = vrot.slane %v11089_v44, %v11855_v22 }
 0x2ee   :  { %v12583_v49 = vcombine.high %v12576_v7, %v12576_v7  ;;  %v11093_v39 = vld [vmem:[#allocation3 + $0x30] ss:$8 sps:$4 sm:$0xff]   ;;  %v1730_v35 = vrot.slane %v12576_v7, %v12570_v56  ;;  %v11095_v33 = vld [vmem:[#allocation3 + $0x34] ss:$8 sps:$4 sm:$0xff]   ;;  %v12598_v62 = vrot.slane %v12576_v7, %v12573_v37  ;;  %v12601_v15 = vrot.slane %v11090_v55, %v11855_v22 }
 0x2ef   :  { %v12604_v63 = vrot.slane %v11092_v54, %v11855_v22  ;;  %v12607_v3 = vrot.slane %v11093_v39, %v11855_v22  ;;  %v12613_v53 = vcombine.high %v12588_v27, %v12588_v27  ;;  %v12617_v21 = vcombine.high %v12591_v9, %v12591_v9 }
 0x2f0   :  { %v1738_v45 = vrot.slane %v12583_v49, %v12570_v56  ;;  %v12620_v50 = vrot.slane %v11095_v33, %v11855_v22  ;;  %v1746_v16 = vrot.slane %v12588_v27, %v12570_v56  ;;  %v12626_v41 = vcombine.high %v12601_v15, %v12601_v15 }
 0x2f1   :  { %v12630_v46 = vcombine.high %v12604_v63, %v12604_v63  ;;  %v12634_v18 = vcombine.high %v12607_v3, %v12607_v3  ;;  %v1762_v24 = vrot.slane %v12591_v9, %v12570_v56  ;;  %v1754_v8 = vrot.slane %v12613_v53, %v12570_v56 }
 0x2f2   :  { %v1770_v43 = vrot.slane %v12617_v21, %v12570_v56  ;;  %v1778_v25 = vrot.slane %v12594_v48, %v12570_v56  ;;  %v1786_v23 = vrot.slane %v12601_v15, %v12570_v56  ;;  %v1794_v12 = vrot.slane %v12626_v41, %v12570_v56 }
 0x2f3   :  { %v1802_v28 = vrot.slane %v12604_v63, %v12570_v56  ;;  %v1810_v19 = vrot.slane %v12630_v46, %v12570_v56  ;;  %v1818_v5 = vrot.slane %v12607_v3, %v12570_v56  ;;  %v1826_v26 = vrot.slane %v12634_v18, %v12570_v56 }
 0x2f4   :  { %v1834_v6 = vrot.slane %v12620_v50, %v12570_v56  ;;  %v1864_v57 = vpack.c.bf16 %v1730_v35, %v1730_v35  ;;  %v1866_v10 = vpack.c.bf16 %v1738_v45, %v1738_v45  ;;  %v1868_v61 = vpack.c.bf16 %v1746_v16, %v1746_v16 }
 0x2f5   :  { %v1870_v2 = vpack.c.bf16 %v1754_v8, %v1754_v8  ;;  %v1872_v30 = vpack.c.bf16 %v1762_v24, %v1762_v24  ;;  %v1874_v34 = vpack.c.bf16 %v1770_v43, %v1770_v43  ;;  %v1876_v13 = vpack.c.bf16 %v1778_v25, %v1778_v25 }
 0x2f6   :  { %v1878_v4 = vpack.c.bf16 %v1786_v23, %v1786_v23  ;;  %v1880_v59 = vpack.c.bf16 %v1794_v12, %v1794_v12  ;;  %v12660_v60 = vrot.slane %v12576_v7, %v12579_v47  ;;  %v1884_v29 = vpack.c.bf16 %v1810_v19, %v1810_v19 }
 0x2f7   :  { %v1886_v52 = vpack.c.bf16 %v1818_v5, %v1818_v5  ;;  %v1888_v42 = vpack.c.bf16 %v1826_v26, %v1826_v26  ;;  %v1890_v20 = vpack.c.bf16 %v1834_v6, %v1834_v6  ;;  %v1882_v11 = vpack.c.bf16 %v1802_v28, %v1802_v28 }
 0x2f8   :  { %v1920_v40 = vunpack.c.l.b16 %v1864_v57  ;;  %v12662_v32 = vunpack.c.l.b16 %v1868_v61  ;;  %v12664_v31 = vunpack.c.l.b16 %v1870_v2  ;;  %v12666_v58 = vunpack.c.l.b16 %v1866_v10 }
 0x2f9   :  { %v12668_v36 = vunpack.c.l.b16 %v1872_v30  ;;  %v12670_v1 = vunpack.c.l.b16 %v1874_v34  ;;  %v12672_v38 = vunpack.c.l.b16 %v1876_v13  ;;  %v1934_v44 = vunpack.c.l.b16 %v1878_v4 }
 0x2fa   :  { %v12674_v55 = vunpack.c.l.b16 %v1880_v59  ;;  %v12676_v54 = vunpack.c.l.b16 %v1884_v29  ;;  %v12678_v39 = vunpack.c.l.b16 %v1886_v52  ;;  %v12680_v35 = vunpack.c.l.b16 %v1888_v42 }
 0x2fb   :  { %v12682_v33 = vunpack.c.l.b16 %v1890_v20  ;;  %v1961_v45 = vrot.slane %v1920_v40, 1  ;;  %v1963_v16 = vrot.slane %v12662_v32, 7  ;;  %v12685_v24 = vunpack.c.l.b16 %v1882_v11 }
 0x2fc   :  { %v1965_v8 = vrot.slane %v12664_v31, 6  ;;  %v1967_v43 = vrot.slane %v12668_v36, 5  ;;  %v12691_v25 = vrot.slane %v12576_v7, %v12390_v14  ;;  %v1969_v12 = vrot.slane %v12670_v1, 4 }
 0x2fd   :  { %15559 = vst [vmem:[#allocation19_spill] sm:$0xff] %v12682_v33  ;;  %v1962_v23 = vsel %vm391_vm4, %v12666_v58, %v1961_v45  ;;  %v1985_v28 = vrot.slane %v12674_v55, 1  ;;  %v1987_v19 = vrot.slane %v12676_v54, 7  ;;  %v1971_v26 = vrot.slane %v12672_v38, 3 }
 0x2fe   :  { %v1964_v5 = vsel %vm394_vm5, %v1963_v16, %v1962_v23  ;;  %v1973_v6 = vrot.slane %v1934_v44, 2  ;;  %v1989_v57 = vrot.slane %v12678_v39, 6  ;;  %v1991_v61 = vrot.slane %v12680_v35, 5 }
 0x2ff   :  { %v1966_v10 = vsel %vm397_vm6, %v1965_v8, %v1964_v5  ;;  %v1986_v7 = vsel %vm391_vm4, %v12685_v24, %v1985_v28  ;;  %v1993_v2 = vrot.slane %v12682_v33, 4  ;;  %v1750_v28 = vrot.slane %v12613_v53, %v12573_v37 }
 0x300   :  { %v1968_v30 = vsel %vm15517_vm7, %v1967_v43, %v1966_v10  ;;  %v1988_v34 = vsel %vm394_vm5, %v1987_v19, %v1986_v7  ;;  %v1734_v43 = vrot.slane %v12583_v49, %v12573_v37  ;;  %v1758_v19 = vrot.slane %v12591_v9, %v12573_v37 }
 0x301   :  { %v1970_v59 = vsel %vm403_vm8, %v1969_v12, %v1968_v30  ;;  %v1990_v29 = vsel %vm397_vm6, %v1989_v57, %v1988_v34  ;;  %v1742_v12 = vrot.slane %v12588_v27, %v12573_v37  ;;  %v1766_v5 = vrot.slane %v12617_v21, %v12573_v37 }
 0x302   :  { %v1972_v20 = vsel %vm15516_vm9, %v1971_v26, %v1970_v59  ;;  %v1992_v11 = vsel %vm15517_vm7, %v1991_v61, %v1990_v29  ;;  %v1774_v26 = vrot.slane %v12594_v48, %v12573_v37  ;;  %v1790_v57 = vrot.slane %v12626_v41, %v12573_v37 }
 0x303   :  { %v1974_v45 = vsel %vm409_vm10, %v1973_v6, %v1972_v20  ;;  %v1994_v16 = vsel %vm403_vm8, %v1993_v2, %v1992_v11  ;;  %v1782_v6 = vrot.slane %v12601_v15, %v12573_v37  ;;  %v1798_v10 = vrot.slane %v12604_v63, %v12573_v37 }
 0x304   :  { %v1996_v23 = vpack.c.b16 %v1994_v16, %v1974_v45  ;;  %v1806_v7 = vrot.slane %v12630_v46, %v12573_v37  ;;  %v1814_v61 = vrot.slane %v12607_v3, %v12573_v37  ;;  %v1822_v2 = vrot.slane %v12634_v18, %v12573_v37 }
 0x305   :  { %v1830_v30 = vrot.slane %v12620_v50, %v12573_v37  ;;  %v1863_v34 = vpack.c.bf16 %v12598_v62, %v12598_v62  ;;  %v1865_v59 = vpack.c.bf16 %v1734_v43, %v1734_v43  ;;  %v1867_v29 = vpack.c.bf16 %v1742_v12, %v1742_v12 }
 0x306   :  { %10046 = vmatprep.mubr.msk.bf16.mxu1 %vm953_vm11, %v1996_v23  ;;  %v1869_v20 = vpack.c.bf16 %v1750_v28, %v1750_v28  ;;  %v1871_v11 = vpack.c.bf16 %v1758_v19, %v1758_v19  ;;  %v1873_v45 = vpack.c.bf16 %v1766_v5, %v1766_v5  ;;  %v1875_v16 = vpack.c.bf16 %v1774_v26, %v1774_v26 }
 0x307   :  { %v1877_v0 = vpack.c.bf16 %v1782_v6, %v1782_v6  ;;  %v1879_v8 = vpack.c.bf16 %v1790_v57, %v1790_v57  ;;  %v1883_v40 = vpack.c.bf16 %v1806_v7, %v1806_v7  ;;  %v1885_v42 = vpack.c.bf16 %v1814_v61, %v1814_v61 }
 0x308   :  { %v1887_v44 = vpack.c.bf16 %v1822_v2, %v1822_v2  ;;  %v1889_v52 = vpack.c.bf16 %v1830_v30, %v1830_v30  ;;  %v1919_v4 = vunpack.c.l.b16 %v1863_v34  ;;  %v1881_v13 = vpack.c.bf16 %v1798_v10, %v1798_v10 }
 0x309   :  { %v12751_v22 = vunpack.c.l.b16 %v1867_v29  ;;  %v12753_v17 = vunpack.c.l.b16 %v1869_v20  ;;  %v12755_v62 = vunpack.c.l.b16 %v1871_v11  ;;  %v12757_v43 = vunpack.c.l.b16 %v1865_v59 }
 0x30a   :  { %v12759_v12 = vunpack.c.l.b16 %v1873_v45  ;;  %v12761_v28 = vunpack.c.l.b16 %v1875_v16  ;;  %v12763_v19 = vunpack.c.l.b16 %v1879_v8  ;;  %v1933_v5 = vunpack.c.l.b16 %v1877_v0 }
 0x30b   :  { %15560 = vst [vmem:[#allocation20_spill] sm:$0xff] %v12751_v22  ;;  %15561 = vst [vmem:[#allocation21_spill] sm:$0xff] %v12753_v17  ;;  %v12765_v26 = vunpack.c.l.b16 %v1883_v40  ;;  %v12767_v6 = vunpack.c.l.b16 %v1885_v42  ;;  %v12769_v57 = vunpack.c.l.b16 %v1887_v44  ;;  %v12771_v10 = vunpack.c.l.b16 %v1889_v52 }
 0x30c   :  { %15562 = vst [vmem:[#allocation22_spill] sm:$0xff] %v12755_v62  ;;  %15563 = vst [vmem:[#allocation23_spill] sm:$0xff] %v12759_v12  ;;  %v1947_v7 = vrot.slane %v1919_v4, 1  ;;  %v1949_v61 = vrot.slane %v12751_v22, 7  ;;  %v1951_v2 = vrot.slane %v12753_v17, 6  ;;  %v12776_v34 = vunpack.c.l.b16 %v1881_v13 }
 0x30d   :  { %15564 = vst [vmem:[#allocation24_spill] sm:$0xff] %v12761_v28  ;;  %15565 = vst [vmem:[#allocation25_spill] sm:$0xff] %v12763_v19  ;;  %v1953_v8 = vrot.slane %v12755_v62, 5  ;;  %v1955_v0 = vrot.slane %v12759_v12, 4  ;;  %v1957_v40 = vrot.slane %v12761_v28, 3  ;;  %v1975_v52 = vrot.slane %v12763_v19, 1 }
 0x30e   :  { %15566 = vst [vmem:[#allocation26_spill] sm:$0xff] %v12765_v26  ;;  %15567 = vst [vmem:[#allocation27_spill] sm:$0xff] %v12767_v6  ;;  %v1948_v42 = vsel %vm391_vm4, %v12757_v43, %v1947_v7  ;;  %v1977_v4 = vrot.slane %v12765_v26, 7  ;;  %v1959_v59 = vrot.slane %v1933_v5, 2  ;;  %v1979_v29 = vrot.slane %v12767_v6, 6 }
 0x30f   :  { %15568 = vst [vmem:[#allocation28_spill] sm:$0xff] %v12771_v10  ;;  %15569 = vst [vmem:[#allocation29_spill] sm:$0xff] %v12776_v34  ;;  %v1950_v44 = vsel %vm394_vm5, %v1949_v61, %v1948_v42  ;;  %v1981_v13 = vrot.slane %v12769_v57, 5  ;;  %v1976_v11 = vsel %vm391_vm4, %v12776_v34, %v1975_v52  ;;  %v1983_v45 = vrot.slane %v12771_v10, 4  ;;  %v11104_v34 = vld [vmem:[%s15556_s1 + $0x24] ss:$8 sps:$4 sm:$0xff]  }
 0x310   :  { %v1952_v20 = vsel %vm397_vm6, %v1951_v2, %v1950_v44  ;;  %v1978_v30 = vsel %vm394_vm5, %v1977_v4, %v1976_v11  ;;  %v1629_v4 = vrot.slane %v12634_v18, %v12579_v47  ;;  %v1667_v52 = vpack.c.bf16 %v12660_v60, %v12660_v60 }
 0x311   :  { %v1954_v7 = vsel %vm15517_vm7, %v1953_v8, %v1952_v20  ;;  %v1980_v23 = vsel %vm397_vm6, %v1979_v29, %v1978_v30  ;;  %v11096_v20 = vld [vmem:[%s15556_s1] ss:$8 sps:$4 sm:$0xff]   ;;  %v1541_v29 = vrot.slane %v12583_v49, %v12579_v47  ;;  %v1637_v8 = vrot.slane %v12620_v50, %v12579_v47 }
 0x312   :  { %v1956_v42 = vsel %vm403_vm8, %v1955_v0, %v1954_v7  ;;  %v1982_v16 = vsel %vm15517_vm7, %v1981_v13, %v1980_v23  ;;  %v1557_v23 = vrot.slane %v12613_v53, %v12579_v47  ;;  %v1565_v13 = vrot.slane %v12591_v9, %v12579_v47 }
 0x313   :  { %v1958_v44 = vsel %vm15516_vm9, %v1957_v40, %v1956_v42  ;;  %v1984_v30 = vsel %vm403_vm8, %v1983_v45, %v1982_v16  ;;  %v1549_v40 = vrot.slane %v12588_v27, %v12579_v47  ;;  %v1573_v7 = vrot.slane %v12617_v21, %v12579_v47 }
 0x314   :  { %v1960_v0 = vsel %vm409_vm10, %v1959_v59, %v1958_v44  ;;  %v11101_v59 = vld [vmem:[%s15556_s1 + $0x14] ss:$8 sps:$4 sm:$0xff]   ;;  %v1581_v45 = vrot.slane %v12594_v48, %v12579_v47  ;;  %v1589_v16 = vrot.slane %v12601_v15, %v12579_v47  ;;  %v1597_v42 = vrot.slane %v12626_v41, %v12579_v47 }
 0x315   :  { %v1995_v11 = vpack.c.b16 %v1984_v30, %v1960_v0  ;;  %v1605_v44 = vrot.slane %v12604_v63, %v12579_v47  ;;  %v1613_v0 = vrot.slane %v12630_v46, %v12579_v47  ;;  %v1621_v30 = vrot.slane %v12607_v3, %v12579_v47 }
 0x316   :  { %v1669_v2 = vpack.c.bf16 %v1541_v29, %v1541_v29  ;;  %v1671_v5 = vpack.c.bf16 %v1549_v40, %v1549_v40  ;;  %v1673_v61 = vpack.c.bf16 %v1557_v23, %v1557_v23  ;;  %v1675_v51 = vpack.c.bf16 %v1565_v13, %v1565_v13 }
 0x317   :  { %2174 = vmatmul.mubr.bf16.vlgmr.msra.gmra.mrb[0].mxu1 %v1995_v11  ;;  %v11099_v11 = vld [vmem:[%s15556_s1 + $0x10] ss:$8 sps:$4 sm:$0xff]   ;;  %v1677_v6 = vpack.c.bf16 %v1573_v7, %v1573_v7  ;;  %v1679_v10 = vpack.c.bf16 %v1581_v45, %v1581_v45  ;;  %v1681_v26 = vpack.c.bf16 %v1589_v16, %v1589_v16  ;;  %v1685_v19 = vpack.c.bf16 %v1605_v44, %v1605_v44  ;;  %v11102_v45 = vld [vmem:[%s15556_s1 + $0x20] ss:$8 sps:$4 sm:$0xff]  }
 0x318   :  { %2435 = vmatpush1.bf16.msra.mxu1 %v11096_v20  ;;  %v1683_v20 = vpack.c.bf16 %v1597_v42, %v1597_v42  ;;  %v1687_v28 = vpack.c.bf16 %v1613_v0, %v1613_v0  ;;  %v1689_v60 = vpack.c.bf16 %v1621_v30, %v1621_v30  ;;  %v1691_v29 = vpack.c.bf16 %v1629_v4, %v1629_v4  ;;  %v11105_v30 = vld [vmem:[%s15556_s1 + $0x30] ss:$8 sps:$4 sm:$0xff]  }
 0x319   :  { %2436 = vmatprep.subr.bf16.mxu1 %v11101_v59  ;;  %v1693_v40 = vpack.c.bf16 %v1637_v8, %v1637_v8  ;;  %v2213_v23 = vunpack.c.l.b16 %v1667_v52  ;;  %v12847_v12 = vunpack.c.l.b16 %v1669_v2  ;;  %v12849_v62 = vunpack.c.l.b16 %v1671_v5 }
 0x31a   :  { %v12851_v13 = vunpack.c.l.b16 %v1673_v61  ;;  %v12853_v7 = vunpack.c.l.b16 %v1675_v51  ;;  %v12855_v59 = vunpack.c.l.b16 %v1677_v6  ;;  %v12860_v16 = vunpack.c.l.b16 %v1679_v10  ;;  %v11107_v51 = vld [vmem:[%s15556_s1 + $0x34] ss:$8 sps:$4 sm:$0xff]  }
 0x31b   :  { %v2227_v4 = vunpack.c.l.b16 %v1681_v26  ;;  %v12862_v8 = vunpack.c.l.b16 %v1683_v20  ;;  %v12864_v2 = vunpack.c.l.b16 %v1685_v19  ;;  %v12869_v61 = vunpack.c.l.b16 %v1687_v28 }
 0x31c   :  { %2437 = vmatpush1.bf16.msra.mxu1 %v11099_v11  ;;  %v12871_v6 = vunpack.c.l.b16 %v1689_v60  ;;  %v12873_v5 = vunpack.c.l.b16 %v1691_v29  ;;  %v12875_v52 = vunpack.c.l.b16 %v1693_v40  ;;  %v2254_v10 = vrot.slane %v12847_v12, 7  ;;  %v11110_v40 = vld [vmem:[%s15556_s1 + $0x44] ss:$8 sps:$4 sm:$0xff]  }
 0x31d   :  { %2438 = vmatprep.subr.bf16.mxu1 %v11104_v34  ;;  %v2256_v26 = vrot.slane %v12849_v62, 6  ;;  %v2258_v19 = vrot.slane %v12851_v13, 5  ;;  %v2260_v34 = vrot.slane %v12853_v7, 4  ;;  %v2262_v42 = vrot.slane %v12855_v59, 3 }
 0x31e   :  { %v2264_v44 = vrot.slane %v12860_v16, 2  ;;  %v2266_v28 = vrot.slane %v2227_v4, 1  ;;  %v2278_v0 = vrot.slane %v12864_v2, 7  ;;  %v2255_v11 = vsel %vm391_vm4, %v2254_v10, %v2213_v23 }
 0x31f   :  { %v2280_v20 = vrot.slane %v12869_v61, 6  ;;  %v2282_v60 = vrot.slane %v12871_v6, 5  ;;  %v2284_v29 = vrot.slane %v12873_v5, 4  ;;  %v2257_v4 = vsel %vm394_vm5, %v2256_v26, %v2255_v11 }
 0x320   :  { %2439 = vmatpush1.bf16.msra.mxu1 %v11102_v45  ;;  %v2279_v45 = vsel %vm391_vm4, %v2278_v0, %v12862_v8  ;;  %v2286_v17 = vrot.slane %v12875_v52, 3  ;;  %v1537_v23 = vrot.slane %v12583_v49, %v12390_v14  ;;  %v2259_v10 = vsel %vm397_vm6, %v2258_v19, %v2257_v4  ;;  %v11108_v0 = vld [vmem:[%s15556_s1 + $0x40] ss:$8 sps:$4 sm:$0xff]  }
 0x321   :  { %2440 = vmatprep.subr.bf16.mxu1 %v11107_v51  ;;  %v2281_v33 = vsel %vm394_vm5, %v2280_v20, %v2279_v45  ;;  %v1545_v51 = vrot.slane %v12588_v27, %v12390_v14  ;;  %v1553_v22 = vrot.slane %v12613_v53, %v12390_v14  ;;  %v2261_v26 = vsel %vm15517_vm7, %v2260_v34, %v2259_v10  ;;  %v11113_v53 = vld [vmem:[%s15556_s1 + $0x54] ss:$8 sps:$4 sm:$0xff]  }
 0x322   :  { %v2283_v11 = vsel %vm397_vm6, %v2282_v60, %v2281_v33  ;;  %v1561_v49 = vrot.slane %v12591_v9, %v12390_v14  ;;  %v1569_v19 = vrot.slane %v12617_v21, %v12390_v14  ;;  %v2263_v27 = vsel %vm403_vm8, %v2262_v42, %v2261_v26 }
 0x323   :  { %v2285_v20 = vsel %vm15517_vm7, %v2284_v29, %v2283_v11  ;;  %v1577_v33 = vrot.slane %v12594_v48, %v12390_v14  ;;  %v1585_v34 = vrot.slane %v12601_v15, %v12390_v14  ;;  %v2265_v9 = vsel %vm15516_vm9, %v2264_v44, %v2263_v27 }
 0x324   :  { %2441 = vmatpush1.bf16.msra.mxu1 %v11105_v30  ;;  %v2287_v30 = vsel %vm403_vm8, %v2286_v17, %v2285_v20  ;;  %v1593_v21 = vrot.slane %v12626_v41, %v12390_v14  ;;  %v1601_v42 = vrot.slane %v12604_v63, %v12390_v14  ;;  %v2267_v60 = vsel %vm409_vm10, %v2266_v28, %v2265_v9  ;;  %v11111_v17 = vld [vmem:[%s15556_s1 + $0x50] ss:$8 sps:$4 sm:$0xff]  }
 0x325   :  { %2442 = vmatprep.subr.bf16.mxu1 %v11110_v40  ;;  %v1609_v29 = vrot.slane %v12630_v46, %v12390_v14  ;;  %v1617_v40 = vrot.slane %v12607_v3, %v12390_v14  ;;  %v1625_v15 = vrot.slane %v12634_v18, %v12390_v14  ;;  %v2289_v44 = vpack.c.b16 %v2287_v30, %v2267_v60  ;;  %v11116_v3 = vld [vmem:[%s15556_s1 + $0x64] ss:$8 sps:$4 sm:$0xff]  }
 0x326   :  { %v1633_v63 = vrot.slane %v12620_v50, %v12390_v14  ;;  %v1666_v41 = vpack.c.bf16 %v12691_v25, %v12691_v25  ;;  %v1668_v28 = vpack.c.bf16 %v1537_v23, %v1537_v23  ;;  %v1670_v46 = vpack.c.bf16 %v1545_v51, %v1545_v51  ;;  %v11114_v23 = vld [vmem:[%s15556_s1 + $0x60] ss:$8 sps:$4 sm:$0xff]  }
 0x327   :  { %v1672_v18 = vpack.c.bf16 %v1553_v22, %v1553_v22  ;;  %v1674_v4 = vpack.c.bf16 %v1561_v49, %v1561_v49  ;;  %v1676_v45 = vpack.c.bf16 %v1569_v19, %v1569_v19  ;;  %10075 = vmatprep.mubr.msk.bf16.mxu1 %vm953_vm11, %v2289_v44  ;;  %v1678_v10 = vpack.c.bf16 %v1577_v33, %v1577_v33  ;;  %v11119_v19 = vld [vmem:[%s15556_s1 + $0x74] ss:$8 sps:$4 sm:$0xff]  }
 0x328   :  { %2443 = vmatpush1.bf16.msra.mxu1 %v11108_v0  ;;  %v1680_v26 = vpack.c.bf16 %v1585_v34, %v1585_v34  ;;  %v1682_v11 = vpack.c.bf16 %v1593_v21, %v1593_v21  ;;  %v1684_v0 = vpack.c.bf16 %v1601_v42, %v1601_v42  ;;  %v1686_v27 = vpack.c.bf16 %v1609_v29, %v1609_v29 }
 0x329   :  { %2444 = vmatprep.subr.bf16.mxu1 %v11113_v53  ;;  %v1688_v20 = vpack.c.bf16 %v1617_v40, %v1617_v40  ;;  %v1690_v9 = vpack.c.bf16 %v1625_v15, %v1625_v15  ;;  %v1692_v25 = vpack.c.bf16 %v1633_v63, %v1633_v63  ;;  %v2212_v53 = vunpack.c.l.b16 %v1666_v41  ;;  %v11117_v41 = vld [vmem:[%s15556_s1 + $0x70] ss:$8 sps:$4 sm:$0xff]  }
 0x32a   :  { %v12951_v51 = vunpack.c.l.b16 %v1668_v28  ;;  %v12953_v22 = vunpack.c.l.b16 %v1670_v46  ;;  %v12955_v49 = vunpack.c.l.b16 %v1672_v18  ;;  %v12960_v33 = vunpack.c.l.b16 %v1674_v4  ;;  %v11122_v4 = vld [vmem:[%s15556_s1 + $0x84] ss:$8 sps:$4 sm:$0xff]  }
 0x32b   :  { %v12962_v34 = vunpack.c.l.b16 %v1676_v45  ;;  %v12964_v30 = vunpack.c.l.b16 %v1678_v10  ;;  %v2226_v21 = vunpack.c.l.b16 %v1680_v26  ;;  %v12966_v42 = vunpack.c.l.b16 %v1682_v11 }
 0x32c   :  { %2445 = vmatpush1.bf16.msra.mxu1 %v11111_v17  ;;  %v12968_v60 = vunpack.c.l.b16 %v1684_v0  ;;  %v12970_v29 = vunpack.c.l.b16 %v1686_v27  ;;  %v12972_v40 = vunpack.c.l.b16 %v1688_v20  ;;  %v12974_v15 = vunpack.c.l.b16 %v1690_v9 }
 0x32d   :  { %2446 = vmatprep.subr.bf16.mxu1 %v11116_v3  ;;  %v12976_v44 = vunpack.c.l.b16 %v1692_v25  ;;  %v2240_v17 = vrot.slane %v12951_v51, 7  ;;  %v2242_v63 = vrot.slane %v12953_v22, 6  ;;  %v2244_v28 = vrot.slane %v12955_v49, 5 }
 0x32e   :  { %v2246_v3 = vrot.slane %v12960_v33, 4  ;;  %v2248_v46 = vrot.slane %v12962_v34, 3  ;;  %v2250_v18 = vrot.slane %v12964_v30, 2  ;;  %v2252_v10 = vrot.slane %v2226_v21, 1  ;;  %v11120_v21 = vld [vmem:[%s15556_s1 + $0x80] ss:$8 sps:$4 sm:$0xff]  }
 0x32f   :  { %v2241_v45 = vsel %vm391_vm4, %v2240_v17, %v2212_v53  ;;  %v2268_v26 = vrot.slane %v12968_v60, 7  ;;  %v2270_v11 = vrot.slane %v12970_v29, 6  ;;  %v2272_v27 = vrot.slane %v12972_v40, 5 }
 0x330   :  { %2447 = vmatpush1.bf16.msra.mxu1 %v11114_v23  ;;  %v2243_v0 = vsel %vm394_vm5, %v2242_v63, %v2241_v45  ;;  %v2274_v20 = vrot.slane %v12974_v15, 4  ;;  %v2276_v9 = vrot.slane %v12976_v44, 3  ;;  %v13002_v53 = vcombine.high %v12594_v48, %v12594_v48  ;;  %v11125_v48 = vld [vmem:[%s15556_s1 + $0x94] ss:$8 sps:$4 sm:$0xff]  }
 0x331   :  { %2448 = vmatprep.subr.bf16.mxu1 %v11119_v19  ;;  %v2245_v25 = vsel %vm397_vm6, %v2244_v28, %v2243_v0  ;;  %v2269_v23 = vsel %vm391_vm4, %v2268_v26, %v12966_v42  ;;  %v13006_v19 = vcombine.high %v12620_v50, %v12620_v50  ;;  %v2552_v28 = vrot.slane %v12849_v62, 7 }
 0x332   :  { %v2247_v17 = vsel %vm15517_vm7, %v2246_v3, %v2245_v25  ;;  %v2271_v63 = vsel %vm394_vm5, %v2270_v11, %v2269_v23  ;;  %v2554_v45 = vrot.slane %v12851_v13, 6  ;;  %v2513_v26 = vrot.slane %v13002_v53, %v12579_v47 }
 0x333   :  { %v2249_v50 = vsel %vm403_vm8, %v2248_v46, %v2247_v17  ;;  %v2521_v3 = vrot.slane %v13006_v19, %v12579_v47  ;;  %v2553_v13 = vsel %vm391_vm4, %v2552_v28, %v12847_v12  ;;  %v2872_v23 = vrot.slane %v12769_v57, 6  ;;  %v11123_v47 = vld [vmem:[%s15556_s1 + $0x90] ss:$8 sps:$4 sm:$0xff]   ;;  %v11144_v57 = vld [vmem:[%s15556_s1 + $0x1e0] ss:$8 sps:$4 sm:$0xff]  }
 0x334   :  { %2449 = vmatpush1.bf16.msra.mxu1 %v11117_v41  ;;  %v2273_v41 = vsel %vm397_vm6, %v2272_v27, %v2271_v63  ;;  %v2251_v11 = vsel %vm15516_vm9, %v2250_v18, %v2249_v50  ;;  %v2527_v27 = vpack.c.bf16 %v2513_v26, %v2513_v26  ;;  %v2558_v18 = vrot.slane %v12855_v59, 4 }
 0x335   :  { %2450 = vmatprep.subr.bf16.mxu1 %v11122_v4  ;;  %v2275_v62 = vsel %vm15517_vm7, %v2274_v20, %v2273_v41  ;;  %v2556_v4 = vrot.slane %v12853_v7, 5  ;;  %v13030_v0 = vsel %vm409_vm10, %v2252_v10, %v2251_v11  ;;  %v2529_v25 = vpack.c.bf16 %v2521_v3, %v2521_v3  ;;  %v11128_v10 = vld [vmem:[%s15556_s1 + $0xa4] ss:$8 sps:$4 sm:$0xff]  }
 0x336   :  { %v13033_v46 = vsel %vm403_vm8, %v2276_v9, %v2275_v62  ;;  %v2555_v7 = vsel %vm394_vm5, %v2554_v45, %v2553_v13  ;;  %v2535_v20 = vunpack.c.l.b16 %v2527_v27  ;;  %v2560_v17 = vrot.slane %v12860_v16, 3  ;;  %v11126_v16 = vld [vmem:[%s15556_s1 + $0xa0] ss:$8 sps:$4 sm:$0xff]  }
 0x337   :  { %v2288_v12 = vpack.c.b16 %v13033_v46, %v13030_v0  ;;  %v2537_v9 = vunpack.c.l.b16 %v2529_v25  ;;  %v2564_v28 = vrot.slane %v12862_v8, 1  ;;  %v2576_v50 = vrot.slane %v12869_v61, 7 }
 0x338   :  { %2451 = vmatpush1.bf16.msra.mxu1 %v11120_v21  ;;  %v2557_v21 = vsel %vm397_vm6, %v2556_v4, %v2555_v7  ;;  %v2580_v45 = vrot.slane %v12873_v5, 5  ;;  %v2578_v41 = vrot.slane %v12871_v6, 6  ;;  %v2582_v26 = vrot.slane %v12875_v52, 4  ;;  %v11131_v6 = vld [vmem:[%s15556_s1 + $0xb4] ss:$8 sps:$4 sm:$0xff]  }
 0x339   :  { %2452 = vmatprep.subr.bf16.mxu1 %v11125_v48  ;;  %v2559_v63 = vsel %vm15517_vm7, %v2558_v18, %v2557_v21  ;;  %v2562_v48 = vrot.slane %v2535_v20, 2  ;;  %v2577_v3 = vsel %vm391_vm4, %v2576_v50, %v12864_v2  ;;  %v2509_v8 = vrot.slane %v13002_v53, %v12390_v14  ;;  %v11134_v21 = vld [vmem:[%s15556_s1 + $0xc4] ss:$8 sps:$4 sm:$0xff]  }
 0x33a   :  { %v2561_v59 = vsel %vm403_vm8, %v2560_v17, %v2559_v63  ;;  %v2517_v61 = vrot.slane %v13006_v19, %v12390_v14  ;;  %v2538_v5 = vrot.slane %v12953_v22, 7  ;;  %v2579_v11 = vsel %vm394_vm5, %v2578_v41, %v2577_v3 }
 0x33b   :  { %v2563_v52 = vsel %vm15516_vm9, %v2562_v48, %v2561_v59  ;;  %v2584_v62 = vrot.slane %v2537_v9, 3  ;;  %v2540_v2 = vrot.slane %v12955_v49, 6  ;;  %v2581_v13 = vsel %vm397_vm6, %v2580_v45, %v2579_v11  ;;  %v11129_v49 = vld [vmem:[%s15556_s1 + $0xb0] ss:$8 sps:$4 sm:$0xff]  }
 0x33c   :  { %2453 = vmatpush1.bf16.msra.mxu1 %v11123_v47  ;;  %v2526_v4 = vpack.c.bf16 %v2509_v8, %v2509_v8  ;;  %v2528_v27 = vpack.c.bf16 %v2517_v61, %v2517_v61  ;;  %v2542_v25 = vrot.slane %v12960_v33, 5  ;;  %v13074_v22 = vsel %vm409_vm10, %v2564_v28, %v2563_v52 }
 0x33d   :  { %2454 = vmatprep.subr.bf16.mxu1 %v11128_v10  ;;  %v2583_v47 = vsel %vm15517_vm7, %v2582_v26, %v2581_v13  ;;  %v2539_v7 = vsel %vm391_vm4, %v2538_v5, %v12951_v51  ;;  %v2544_v18 = vrot.slane %v12962_v34, 4  ;;  %v2546_v33 = vrot.slane %v12964_v30, 3 }
 0x33e   :  { %v2534_v10 = vunpack.c.l.b16 %v2526_v4  ;;  %v2536_v20 = vunpack.c.l.b16 %v2528_v27  ;;  %v2541_v9 = vsel %vm394_vm5, %v2540_v2, %v2539_v7  ;;  %v13089_v51 = vsel %vm403_vm8, %v2584_v62, %v2583_v47 }
 0x33f   :  { %v2543_v34 = vsel %vm397_vm6, %v2542_v25, %v2541_v9  ;;  %v2550_v17 = vrot.slane %v12966_v42, 1  ;;  %v2566_v63 = vrot.slane %v12970_v29, 7  ;;  %v2568_v45 = vrot.slane %v12972_v40, 6  ;;  %v11132_v42 = vld [vmem:[%s15556_s1 + $0xc0] ss:$8 sps:$4 sm:$0xff]  }
 0x340   :  { %2455 = vmatpush1.bf16.msra.mxu1 %v11126_v16  ;;  %v2545_v28 = vsel %vm15517_vm7, %v2544_v18, %v2543_v34  ;;  %v2548_v50 = vrot.slane %v2534_v10, 2  ;;  %v2570_v30 = vrot.slane %v12974_v15, 5  ;;  %v2572_v41 = vrot.slane %v12976_v44, 4 }
 0x341   :  { %2456 = vmatprep.subr.bf16.mxu1 %v11131_v6  ;;  %v2547_v59 = vsel %vm403_vm8, %v2546_v33, %v2545_v28  ;;  %v2567_v48 = vsel %vm391_vm4, %v2566_v63, %v12968_v60  ;;  %v2574_v26 = vrot.slane %v2536_v20, 3  ;;  %v2815_v40 = vrot.slane %v13002_v53, %v12570_v56  ;;  %v11137_v60 = vld [vmem:[%s15556_s1 + $0xd4] ss:$8 sps:$4 sm:$0xff]  }
 0x342   :  { %v2549_v29 = vsel %vm15516_vm9, %v2548_v50, %v2547_v59  ;;  %v2569_v16 = vsel %vm394_vm5, %v2568_v45, %v2567_v48  ;;  %v2823_v15 = vrot.slane %v13006_v19, %v12570_v56  ;;  %v15570_v8 = vrot.slane %v12666_v58, 1  ;;  %v15580_v63 = vld [vmem:[#allocation19_spill] sm:$0xff] }
 0x343   :  { %v13114_v44 = vsel %vm409_vm10, %v2550_v17, %v2549_v29  ;;  %v2571_v3 = vsel %vm397_vm6, %v2570_v30, %v2569_v16  ;;  %v2866_v5 = vrot.slane %v12674_v55, 2  ;;  %v2829_v56 = vpack.c.bf16 %v2815_v40, %v2815_v40  ;;  %v15579_v17 = vld [vmem:[#allocation20_spill] sm:$0xff]  ;;  %v15582_v30 = vld [vmem:[#allocation21_spill] sm:$0xff]  ;;  %v11143_v16 = vld [vmem:[%s15556_s1 + $0x1d4] ss:$8 sps:$4 sm:$0xff]  }
 0x344   :  { %2457 = vmatpush1.bf16.msra.mxu1 %v11129_v49  ;;  %v2855_v61 = vsel %vm391_vm4, %v12662_v32, %v15570_v8  ;;  %v2573_v6 = vsel %vm15517_vm7, %v2572_v41, %v2571_v3  ;;  %v2831_v52 = vpack.c.bf16 %v2823_v15, %v2823_v15  ;;  %v15571_v11 = vrot.slane %v12664_v31, 7  ;;  %v11135_v31 = vld [vmem:[%s15556_s1 + $0xd0] ss:$8 sps:$4 sm:$0xff]  }
 0x345   :  { %2458 = vmatprep.subr.bf16.mxu1 %v11134_v21  ;;  %v13127_v2 = vsel %vm403_vm8, %v2574_v26, %v2573_v6  ;;  %v15572_v13 = vrot.slane %v12668_v36, 6  ;;  %v15573_v4 = vrot.slane %v12685_v24, 1  ;;  %v2811_v55 = vrot.slane %v13002_v53, %v12573_v37  ;;  %v15584_v26 = vld [vmem:[#allocation22_spill] sm:$0xff] }
 0x346   :  { %v2857_v62 = vsel %vm394_vm5, %v15571_v11, %v2855_v61  ;;  %v2586_v27 = vpack.c.b16 %v13127_v2, %v13114_v44  ;;  %v2837_v25 = vunpack.c.l.b16 %v2829_v56  ;;  %v2839_v36 = vunpack.c.l.b16 %v2831_v52  ;;  %v15588_v61 = vld [vmem:[#allocation24_spill] sm:$0xff]  ;;  %v15590_v52 = vld [vmem:[#allocation25_spill] sm:$0xff]  ;;  %v11191_v2 = vld [vmem:[%s15556_s1 + $0x2d4] ss:$8 sps:$4 sm:$0xff]  }
 0x347   :  { %v2859_v58 = vsel %vm397_vm6, %v15572_v13, %v2857_v62  ;;  %v2879_v32 = vsel %vm391_vm4, %v12676_v54, %v15573_v4  ;;  %v15574_v47 = vrot.slane %v12670_v1, 5  ;;  %v11140_v54 = vld [vmem:[%s15556_s1 + $0x1c4] ss:$8 sps:$4 sm:$0xff]   ;;  %v15575_v53 = vrot.slane %v12672_v38, 4  ;;  %v11186_v44 = vld [vmem:[%s15556_s1 + $0x2c0] ss:$8 sps:$4 sm:$0xff]  }
 0x348   :  { %2459 = vmatpush1.bf16.msra.mxu1 %v11132_v42  ;;  %v15576_v18 = vrot.slane %v12678_v39, 7  ;;  %v2819_v10 = vrot.slane %v13006_v19, %v12573_v37  ;;  %v2828_v20 = vpack.c.bf16 %v2811_v55, %v2811_v55  ;;  %v2864_v1 = vrot.slane %v2837_v25, 3  ;;  %v15591_v62 = vld [vmem:[#allocation29_spill] sm:$0xff]  ;;  %v15594_v4 = vld [vmem:[#allocation28_spill] sm:$0xff] }
 0x349   :  { %v2861_v24 = vsel %vm15517_vm7, %v15574_v47, %v2859_v58  ;;  %2460 = vmatprep.subr.bf16.mxu1 %v11137_v60  ;;  %v15577_v9 = vrot.slane %v12680_v35, 6  ;;  %v2886_v21 = vrot.slane %v2839_v36, 4  ;;  %v15578_v34 = vrot.slane %v12757_v43, 1  ;;  %v11138_v35 = vld [vmem:[%s15556_s1 + $0x1c0] ss:$8 sps:$4 sm:$0xff]   ;;  %v15593_v58 = vld [vmem:[#allocation26_spill] sm:$0xff] }
 0x34a   :  { %v2863_v7 = vsel %vm403_vm8, %v15575_v53, %v2861_v24  ;;  %v2881_v49 = vsel %vm394_vm5, %v15576_v18, %v2879_v32  ;;  %v15581_v28 = vrot.slane %v15580_v63, 5  ;;  %v2830_v50 = vpack.c.bf16 %v2819_v10, %v2819_v10  ;;  %v15586_v60 = vld [vmem:[#allocation23_spill] sm:$0xff] }
 0x34b   :  { %v2883_v33 = vsel %vm397_vm6, %v15577_v9, %v2881_v49  ;;  %v2841_v38 = vsel %vm391_vm4, %v15579_v17, %v15578_v34  ;;  %v2836_v45 = vunpack.c.l.b16 %v2828_v20  ;;  %v15583_v19 = vrot.slane %v15582_v30, 7  ;;  %v11141_v47 = vld [vmem:[%s15556_s1 + $0x1d0] ss:$8 sps:$4 sm:$0xff]   ;;  %v11152_v49 = vld [vmem:[%s15556_s1 + $0x204] ss:$8 sps:$4 sm:$0xff]  }
 0x34c   :  { %v2885_v39 = vsel %vm15517_vm7, %v15581_v28, %v2883_v33  ;;  %2461 = vmatpush1.bf16.msra.mxu1 %v11135_v31  ;;  %v2587_v43 = vpack.c.b16 %v13089_v51, %v13074_v22  ;;  %v2865_v48 = vsel %vm15516_vm9, %v2864_v1, %v2863_v7  ;;  %v15585_v42 = vrot.slane %v15584_v26, 6  ;;  %v15595_v31 = vld [vmem:[#allocation27_spill] sm:$0xff]  ;;  %v11158_v9 = vld [vmem:[%s15556_s1 + $0x224] ss:$8 sps:$4 sm:$0xff]  }
 0x34d   :  { %v2843_v59 = vsel %vm394_vm5, %v15583_v19, %v2841_v38  ;;  %v13177_v41 = vsel %vm403_vm8, %v2886_v21, %v2885_v39  ;;  %2732 = vmatprep.subr.bf16.mxu1 %v11140_v54  ;;  %v13186_v40 = vsel %vm409_vm10, %v2866_v5, %v2865_v48  ;;  %v2838_v15 = vunpack.c.l.b16 %v2830_v50  ;;  %v11147_v18 = vld [vmem:[%s15556_s1 + $0x1f0] ss:$8 sps:$4 sm:$0xff]   ;;  %v11150_v10 = vld [vmem:[%s15556_s1 + $0x200] ss:$8 sps:$4 sm:$0xff]   ;;  %v11155_v20 = vld [vmem:[%s15556_s1 + $0x214] ss:$8 sps:$4 sm:$0xff]  }
 0x34e   :  { %v2845_v29 = vsel %vm397_vm6, %v15585_v42, %v2843_v59  ;;  %v15587_v22 = vrot.slane %v15586_v60, 5  ;;  %v2850_v3 = vrot.slane %v2836_v45, 3  ;;  %v2889_v8 = vpack.c.b16 %v13177_v41, %v13186_v40  ;;  %v11153_v1 = vld [vmem:[%s15556_s1 + $0x210] ss:$8 sps:$4 sm:$0xff]   ;;  %v11156_v33 = vld [vmem:[%s15556_s1 + $0x220] ss:$8 sps:$4 sm:$0xff]  }
 0x34f   :  { %v15589_v6 = vrot.slane %v15588_v61, 4  ;;  %v2852_v11 = vrot.slane %v15590_v52, 2  ;;  %v15592_v13 = vrot.slane %v15591_v62, 1  ;;  %v2874_v32 = vrot.slane %v15594_v4, 5  ;;  %2467 = vmatmul.mubr.bf16.vlgmr.msra.gmra.mrb[0].mxu1 %v2288_v12  ;;  %v11146_v12 = vld [vmem:[%s15556_s1 + $0x1e4] ss:$8 sps:$4 sm:$0xff]  }
 0x350   :  { %v2847_v51 = vsel %vm15517_vm7, %v15587_v22, %v2845_v29  ;;  %v15596_v25 = vrot.slane %v15595_v31, 7  ;;  %2733 = vmatpush1.bf16.msra.mxu1 %v11138_v35  ;;  %10132 = vmatprep.mubr.msk.bf16.mxu1 %vm953_vm11, %v2587_v43  ;;  %v2876_v46 = vrot.slane %v2838_v15, 4  ;;  %v11161_v21 = vld [vmem:[%s15556_s1 + $0x234] ss:$8 sps:$4 sm:$0xff]   ;;  %v11159_v34 = vld [vmem:[%s15556_s1 + $0x230] ss:$8 sps:$4 sm:$0xff]  }
 0x351   :  { %v2849_v56 = vsel %vm403_vm8, %v15589_v6, %v2847_v51  ;;  %v2869_v5 = vsel %vm391_vm4, %v15593_v58, %v15592_v13  ;;  %2734 = vmatprep.subr.bf16.mxu1 %v11143_v16  ;;  %v11164_v17 = vld [vmem:[%s15556_s1 + $0x244] ss:$8 sps:$4 sm:$0xff]   ;;  %v11162_v38 = vld [vmem:[%s15556_s1 + $0x240] ss:$8 sps:$4 sm:$0xff]   ;;  %v11167_v63 = vld [vmem:[%s15556_s1 + $0x254] ss:$8 sps:$4 sm:$0xff]  }
 0x352   :  { %v2851_v55 = vsel %vm15516_vm9, %v2850_v3, %v2849_v56  ;;  %v2871_v36 = vsel %vm394_vm5, %v15596_v25, %v2869_v5  ;;  %v11165_v28 = vld [vmem:[%s15556_s1 + $0x250] ss:$8 sps:$4 sm:$0xff]   ;;  %v11170_v39 = vld [vmem:[%s15556_s1 + $0x264] ss:$8 sps:$4 sm:$0xff]   ;;  %v11168_v50 = vld [vmem:[%s15556_s1 + $0x260] ss:$8 sps:$4 sm:$0xff]  }
 0x353   :  { %v13214_v24 = vsel %vm409_vm10, %v2852_v11, %v2851_v55  ;;  %v2873_v0 = vsel %vm397_vm6, %v2872_v23, %v2871_v36  ;;  %v11149_v23 = vld [vmem:[%s15556_s1 + $0x1f4] ss:$8 sps:$4 sm:$0xff]   ;;  %v11171_v30 = vld [vmem:[%s15556_s1 + $0x270] ss:$8 sps:$4 sm:$0xff]   ;;  %v11176_v19 = vld [vmem:[%s15556_s1 + $0x284] ss:$8 sps:$4 sm:$0xff]  }
 0x354   :  { %v2875_v54 = vsel %vm15517_vm7, %v2874_v32, %v2873_v0  ;;  %2735 = vmatpush1.bf16.msra.mxu1 %v11141_v47  ;;  %v11173_v45 = vld [vmem:[%s15556_s1 + $0x274] ss:$8 sps:$4 sm:$0xff]   ;;  %v11174_v59 = vld [vmem:[%s15556_s1 + $0x280] ss:$8 sps:$4 sm:$0xff]   ;;  %v11177_v43 = vld [vmem:[%s15556_s1 + $0x290] ss:$8 sps:$4 sm:$0xff]  }
 0x355   :  { %v13224_v53 = vsel %vm403_vm8, %v2876_v46, %v2875_v54  ;;  %2736 = vmatprep.subr.bf16.mxu1 %v11146_v12  ;;  %v11179_v35 = vld [vmem:[%s15556_s1 + $0x294] ss:$8 sps:$4 sm:$0xff]   ;;  %v11182_v48 = vld [vmem:[%s15556_s1 + $0x2a4] ss:$8 sps:$4 sm:$0xff]   ;;  %v11180_v26 = vld [vmem:[%s15556_s1 + $0x2a0] ss:$8 sps:$4 sm:$0xff]  }
 0x356   :  { %v2888_v7 = vpack.c.b16 %v13224_v53, %v13214_v24  ;;  %v11185_v42 = vld [vmem:[%s15556_s1 + $0x2b4] ss:$8 sps:$4 sm:$0xff]   ;;  %v11183_v29 = vld [vmem:[%s15556_s1 + $0x2b0] ss:$8 sps:$4 sm:$0xff]   ;;  %v11188_v16 = vld [vmem:[%s15556_s1 + $0x2c4] ss:$8 sps:$4 sm:$0xff]  }
 0x357   :  { %v11194_v41 = vld [vmem:[%s15556_s1 + $0x2e4] ss:$8 sps:$4 sm:$0xff]   ;;  %v11192_v40 = vld [vmem:[%s15556_s1 + $0x2e0] ss:$8 sps:$4 sm:$0xff]   ;;  %v11197_v15 = vld [vmem:[%s15556_s1 + $0x2f4] ss:$8 sps:$4 sm:$0xff]  }
 0x358   :  { %2737 = vmatpush1.bf16.msra.mxu1 %v11144_v57  ;;  %v11195_v60 = vld [vmem:[%s15556_s1 + $0x2f0] ss:$8 sps:$4 sm:$0xff]   ;;  %v11200_v22 = vld [vmem:[%s15556_s1 + $0x304] ss:$8 sps:$4 sm:$0xff]   ;;  %v11198_v51 = vld [vmem:[%s15556_s1 + $0x300] ss:$8 sps:$4 sm:$0xff]  }
 0x359   :  { %2738 = vmatprep.subr.bf16.mxu1 %v11149_v23  ;;  %v11203_v3 = vld [vmem:[%s15556_s1 + $0x314] ss:$8 sps:$4 sm:$0xff]   ;;  %v11206_v61 = vld [vmem:[%s15556_s1 + $0x324] ss:$8 sps:$4 sm:$0xff]   ;;  %v11204_v6 = vld [vmem:[%s15556_s1 + $0x320] ss:$8 sps:$4 sm:$0xff]  }
 0x35a   :  { %v11209_v56 = vld [vmem:[%s15556_s1 + $0x334] ss:$8 sps:$4 sm:$0xff]   ;;  %v11207_v52 = vld [vmem:[%s15556_s1 + $0x330] ss:$8 sps:$4 sm:$0xff]   ;;  %v11212_v11 = vld [vmem:[%s15556_s1 + $0x344] ss:$8 sps:$4 sm:$0xff]  }
 0x35b   :  { %v11210_v62 = vld [vmem:[%s15556_s1 + $0x340] ss:$8 sps:$4 sm:$0xff]   ;;  %v11215_v13 = vld [vmem:[%s15556_s1 + $0x354] ss:$8 sps:$4 sm:$0xff]   ;;  %v11213_v58 = vld [vmem:[%s15556_s1 + $0x350] ss:$8 sps:$4 sm:$0xff]  }
 0x35c   :  { %2739 = vmatpush1.bf16.msra.mxu1 %v11147_v18  ;;  %v11218_v5 = vld [vmem:[%s15556_s1 + $0x364] ss:$8 sps:$4 sm:$0xff]   ;;  %v11216_v4 = vld [vmem:[%s15556_s1 + $0x360] ss:$8 sps:$4 sm:$0xff]   ;;  %v11221_v32 = vld [vmem:[%s15556_s1 + $0x374] ss:$8 sps:$4 sm:$0xff]  }
 0x35d   :  { %2740 = vmatprep.subr.bf16.mxu1 %v11152_v49  ;;  %v11219_v55 = vld [vmem:[%s15556_s1 + $0x370] ss:$8 sps:$4 sm:$0xff]   ;;  %v15597_v31 = vmov 0.0   ;;  %vm3092_vm6 = vcmask 783360   ;;  %vm4469_vm8 = vcmask 914432   ;;  %vm11659_vm10 = vmmov 0  }
 0x35e   :  { %vm15603_vm9 = vcmask 654336  }
 0x360   :  { %2741 = vmatpush1.bf16.msra.mxu1 %v11150_v10 }
 0x361   :  { %2742 = vmatprep.subr.bf16.mxu1 %v11155_v20 }
 0x364   :  { %2743 = vmatpush1.bf16.msra.mxu1 %v11153_v1 }
 0x365   :  { %2744 = vmatprep.subr.bf16.mxu1 %v11158_v9 }
 0x368   :  { %2745 = vmatpush1.bf16.msra.mxu1 %v11156_v33 }
 0x369   :  { %2746 = vmatprep.subr.bf16.mxu1 %v11161_v21 }
 0x36c   :  { %2747 = vmatpush1.bf16.msra.mxu1 %v11159_v34 }
 0x36d   :  { %2748 = vmatprep.subr.bf16.mxu1 %v11164_v17 }
 0x370   :  { %2749 = vmatpush1.bf16.msra.mxu1 %v11162_v38 }
 0x371   :  { %2750 = vmatprep.subr.bf16.mxu1 %v11167_v63 }
 0x374   :  { %2751 = vmatpush1.bf16.msra.mxu1 %v11165_v28 }
 0x375   :  { %2752 = vmatprep.subr.bf16.mxu1 %v11170_v39 }
 0x378   :  { %2753 = vmatpush1.bf16.msra.mxu1 %v11168_v50 }
 0x379   :  { %2754 = vmatprep.subr.bf16.mxu1 %v11173_v45 }
 0x37c   :  { %2755 = vmatpush1.bf16.msra.mxu1 %v11171_v30 }
 0x37d   :  { %2756 = vmatprep.subr.bf16.mxu1 %v11176_v19 }
 0x380   :  { %2757 = vmatpush1.bf16.msra.mxu1 %v11174_v59 }
 0x381   :  { %2758 = vmatprep.subr.bf16.mxu1 %v11179_v35 }
 0x384   :  { %2759 = vmatpush1.bf16.msra.mxu1 %v11177_v43 }
 0x385   :  { %3034 = vmatprep.subr.bf16.mxu1 %v11182_v48 }
 0x387   :  { %2765 = vmatmul.mubr.bf16.vlgmr.msra.gmra.mrb[0].mxu1 %v2586_v27  ;;  %v11189_v27 = vld [vmem:[%s15556_s1 + $0x2d0] ss:$8 sps:$4 sm:$0xff]  }
 0x388   :  { %3035 = vmatpush1.bf16.msra.mxu1 %v11180_v26  ;;  %10189 = vmatprep.mubr.msk.bf16.mxu1 %vm953_vm11, %v2889_v8  ;;  %v11201_v8 = vld [vmem:[%s15556_s1 + $0x310] ss:$8 sps:$4 sm:$0xff]  }
 0x389   :  { %3036 = vmatprep.subr.bf16.mxu1 %v11185_v42 }
 0x38c   :  { %3037 = vmatpush1.bf16.msra.mxu1 %v11183_v29 }
 0x38d   :  { %3038 = vmatprep.subr.bf16.mxu1 %v11188_v16 }
 0x390   :  { %3039 = vmatpush1.bf16.msra.mxu1 %v11186_v44 }
 0x391   :  { %3040 = vmatprep.subr.bf16.mxu1 %v11191_v2 }
 0x394   :  { %3041 = vmatpush1.bf16.msra.mxu1 %v11189_v27 }
 0x395   :  { %3042 = vmatprep.subr.bf16.mxu1 %v11194_v41 }
 0x398   :  { %3043 = vmatpush1.bf16.msra.mxu1 %v11192_v40 }
 0x399   :  { %3044 = vmatprep.subr.bf16.mxu1 %v11197_v15 }
 0x39c   :  { %3045 = vmatpush1.bf16.msra.mxu1 %v11195_v60 }
 0x39d   :  { %3046 = vmatprep.subr.bf16.mxu1 %v11200_v22 }
 0x3a0   :  { %3047 = vmatpush1.bf16.msra.mxu1 %v11198_v51 }
 0x3a1   :  { %3048 = vmatprep.subr.bf16.mxu1 %v11203_v3 }
 0x3a4   :  { %3049 = vmatpush1.bf16.msra.mxu1 %v11201_v8 }
 0x3a5   :  { %3050 = vmatprep.subr.bf16.mxu1 %v11206_v61 }
 0x3a8   :  { %3051 = vmatpush1.bf16.msra.mxu1 %v11204_v6 }
 0x3a9   :  { %3052 = vmatprep.subr.bf16.mxu1 %v11209_v56 }
 0x3ac   :  { %3053 = vmatpush1.bf16.msra.mxu1 %v11207_v52 }
 0x3ad   :  { %3054 = vmatprep.subr.bf16.mxu1 %v11212_v11 }
 0x3b0   :  { %3055 = vmatpush1.bf16.msra.mxu1 %v11210_v62 }
 0x3b1   :  { %3056 = vmatprep.subr.bf16.mxu1 %v11215_v13 }
 0x3b4   :  { %3057 = vmatpush1.bf16.msra.mxu1 %v11213_v58 }
 0x3b5   :  { %3058 = vmatprep.subr.bf16.mxu1 %v11218_v5 }
 0x3b8   :  { %3059 = vmatpush1.bf16.msra.mxu1 %v11216_v4 }
 0x3b9   :  { %3060 = vmatprep.subr.bf16.mxu1 %v11221_v32 }
 0x3bc   :  { %3061 = vmatpush1.bf16.msra.mxu1 %v11219_v55 }
 0x3bd   :  { %10779 = vmatprep.subr.bf16.mxu1 %v15597_v31 }
 0x3bf   :  { %3067 = vmatmul.mubr.bf16.vlgmr.msra.gmra.mrb[0].mxu1 %v2888_v7 }
 0x3c0   :  { %10793 = vmatprep.mubr.msk.bf16.mxu1 %vm11659_vm10, %v15597_v31 }
 0x492   :  { %v13392_v25 = vpop.f32.mrb[0].mxu1 }
 0x493   :  { %v13394_v36 = vpop.f32.mrb[1].mxu1  ;;  %v3101_v46 = vmul.f32 %v13392_v25, %v13392_v25 }
 0x494   :  { %v3102_v47 = vmul.f32 %v13394_v36, %v13394_v36  ;;  %v13398_v0 = vpop.f32.mrb[2].mxu1  ;;  %v3091_v53 = vsel %vm953_vm11, %v13394_v36, 0.0 }
 0x495   :  { %v3083_v12 = vsel %vm471_vm1, %v13398_v0, 0.0  ;;  %v3103_v24 = vmul.f32 %v13398_v0, %v13398_v0  ;;  %v13406_v54 = vpop.f32.mrb[3].mxu1 }
 0x496   :  { %v3084_v7 = vadd.f32 %v3083_v12, %v13392_v25  ;;  %v3093_v57 = vsel %vm3092_vm6, %v13406_v54, 0.0  ;;  %v3104_v23 = vmul.f32 %v13406_v54, %v13406_v54  ;;  %v3113_v10 = vsel %vm953_vm11, %v3102_v47, 0.0 }
 0x497   :  { %v3105_v18 = vsel %vm471_vm1, %v3103_v24, 0.0  ;;  %v3094_v49 = vadd.f32 %v3093_v57, %v3091_v53 }
 0x498   :  { %v3085_v20 = vrot.slane %v3084_v7, 4  ;;  %v3106_v1 = vadd.f32 %v3105_v18, %v3101_v46  ;;  %v3114_v9 = vsel %vm3092_vm6, %v3104_v23, 0.0  ;;  %v3081_v18 = vld [vmem:[%s15461_s5] sm:$0x1] }
 0x499   :  { %v3115_v33 = vadd.f32 %v3114_v9, %v3113_v10  ;;  %v3095_v17 = vrot.slane %v3094_v49, 4 }
 0x49a   :  { %v3086_v21 = vadd.f32 %v3085_v20, %v3084_v7  ;;  %v3107_v34 = vrot.slane %v3106_v1, 4  ;;  %v3082_v20 = vld [vmem:[%s15462_s6] sm:$0x1] }
 0x49b   :  { %v3116_v28 = vrot.slane %v3115_v33, 4  ;;  %v3096_v45 = vadd.f32 %v3095_v17, %v3094_v49  ;;  %v11223_v17 = vld [vmem:[#allocation7 + $0x78] sm:$0xff]  }
 0x49c   :  { %v3087_v38 = vrot.slane %v3086_v21, 2  ;;  %v3108_v63 = vadd.f32 %v3107_v34, %v3106_v1  ;;  %v11222_v34 = vld [vmem:[#allocation7 + $0x70] sm:$0xff]  }
 0x49d   :  { %v3117_v59 = vadd.f32 %v3116_v28, %v3115_v33  ;;  %v3097_v48 = vrot.slane %v3096_v45, 2  ;;  %4008 = vmatpush1.bf16.msra.mxu0 %v11222_v34  ;;  %v11225_v28 = vld [vmem:[#allocation7 + $0x88] sm:$0xff]  }
 0x49e   :  { %v3088_v39 = vadd.f32 %v3087_v38, %v3086_v21  ;;  %v3109_v50 = vrot.slane %v3108_v63, 2  ;;  %v15598_v38 = vmov 0  }
 0x49f   :  { %v3118_v42 = vrot.slane %v3117_v59, 2  ;;  %v3098_v29 = vadd.f32 %v3097_v48, %v3096_v45  ;;  %4009 = vmatprep.subr.bf16.mxu0 %v15598_v38  ;;  %v11228_v45 = vld [vmem:[#allocation7 + $0xa0] sm:$0xff]   ;;  %v11234_v48 = vld [vmem:[#allocation7 + $0xd0] sm:$0xff]  }
 0x4a0   :  { %v3089_v30 = vrot.slane %v3088_v39, 1  ;;  %v3110_v19 = vadd.f32 %v3109_v50, %v3108_v63  ;;  %v11224_v63 = vld [vmem:[#allocation7 + $0x80] sm:$0xff]   ;;  %v11227_v50 = vld [vmem:[#allocation7 + $0x98] sm:$0xff]  }
 0x4a1   :  { %v3119_v16 = vadd.f32 %v3118_v42, %v3117_v59  ;;  %v3099_v44 = vrot.slane %v3098_v29, 1  ;;  %4010 = vmatpush1.bf16.msra.mxu0 %v11223_v17  ;;  %v11231_v59 = vld [vmem:[#allocation7 + $0xb8] sm:$0xff]  }
 0x4a2   :  { %v3090_v35 = vadd.f32 %v3089_v30, %v3088_v39  ;;  %v3111_v43 = vrot.slane %v3110_v19, 1  ;;  %4011 = vmatprep.subr.bf16.mxu0 %v15598_v38  ;;  %v11226_v39 = vld [vmem:[#allocation7 + $0x90] sm:$0xff]   ;;  %v11229_v30 = vld [vmem:[#allocation7 + $0xa8] sm:$0xff]  }
 0x4a3   :  { %v3120_v2 = vrot.slane %v3119_v16, 1  ;;  %v3100_v27 = vadd.f32 %v3099_v44, %v3098_v29 }
 0x4a4   :  { %3123 = vrot.lane.b32.xlu0 %v3090_v35, %s11652_s12  ;;  %v3112_v26 = vadd.f32 %v3111_v43, %v3110_v19  ;;  %v11230_v19 = vld [vmem:[#allocation7 + $0xb0] sm:$0xff]   ;;  %v11233_v43 = vld [vmem:[#allocation7 + $0xc8] sm:$0xff]  }
 0x4a5   :  { %v3121_v41 = vadd.f32 %v3120_v2, %v3119_v16  ;;  %4012 = vmatpush1.bf16.msra.mxu0 %v11224_v63 }
 0x4a6   :  { %3128 = vrot.lane.b32.xlu1 %v3112_v26, %s11652_s12  ;;  %4013 = vmatprep.subr.bf16.mxu0 %v15598_v38 }
 0x4a8   :  { %3132 = vrot.lane.b32.xlu0 %v3090_v35, %s11646_s4 }
 0x4a9   :  { %4014 = vmatpush1.bf16.msra.mxu0 %v11225_v28 }
 0x4aa   :  { %3136 = vrot.lane.b32.xlu1 %v3112_v26, %s11646_s4  ;;  %4015 = vmatprep.subr.bf16.mxu0 %v15598_v38 }
 0x4ac   :  { %3140 = vrot.lane.b32.xlu0 %v3090_v35, %s11656_s3 }
 0x4ad   :  { %4016 = vmatpush1.bf16.msra.mxu0 %v11226_v39 }
 0x4ae   :  { %3144 = vrot.lane.b32.xlu1 %v3112_v26, %s11656_s3  ;;  %4017 = vmatprep.subr.bf16.mxu0 %v15598_v38 }
 0x4b0   :  { %3151 = vrot.lane.b32.xlu0 %v3100_v27, %s11652_s12 }
 0x4b1   :  { %4018 = vmatpush1.bf16.msra.mxu0 %v11227_v50 }
 0x4b2   :  { %3156 = vrot.lane.b32.xlu1 %v3121_v41, %s11652_s12  ;;  %4019 = vmatprep.subr.bf16.mxu0 %v15598_v38 }
 0x4b4   :  { %3160 = vrot.lane.b32.xlu0 %v3100_v27, %s11646_s4 }
 0x4b5   :  { %4020 = vmatpush1.bf16.msra.mxu0 %v11228_v45 }
 0x4b6   :  { %3164 = vrot.lane.b32.xlu1 %v3121_v41, %s11646_s4  ;;  %4021 = vmatprep.subr.bf16.mxu0 %v15598_v38 }
 0x4b9   :  { %4022 = vmatpush1.bf16.msra.mxu0 %v11229_v30 }
 0x4ba   :  { %4023 = vmatprep.subr.bf16.mxu0 %v15598_v38 }
 0x4bd   :  { %4024 = vmatpush1.bf16.msra.mxu0 %v11230_v19 }
 0x4be   :  { %4025 = vmatprep.subr.bf16.mxu0 %v15598_v38 }
 0x4c1   :  { %4026 = vmatpush1.bf16.msra.mxu0 %v11231_v59 }
 0x4c2   :  { %4027 = vmatprep.subr.bf16.mxu0 %v15598_v38 }
 0x516   :  { %v3124_v40 = vpop.permute.xlu0 %3123 }
 0x517   :  { %v3126_v22 = vadd.f32 %v3124_v40, %v3090_v35  ;;  %v11232_v35 = vld [vmem:[#allocation7 + $0xc0] sm:$0xff]  }
 0x518   :  { %v3129_v15 = vpop.permute.xlu1 %3128  ;;  %4028 = vmatpush1.bf16.msra.mxu0 %v11232_v35 }
 0x519   :  { %v3131_v3 = vadd.f32 %v3129_v15, %v3112_v26  ;;  %4029 = vmatprep.subr.bf16.mxu0 %v15598_v38  ;;  %v11235_v26 = vld [vmem:[#allocation7 + $0xd8] sm:$0xff]  }
 0x51a   :  { %v3133_v60 = vpop.permute.xlu0 %3132 }
 0x51b   :  { %v3135_v8 = vadd.f32 %v3133_v60, %v3126_v22 }
 0x51c   :  { %v3137_v51 = vpop.permute.xlu1 %3136  ;;  %4030 = vmatpush1.bf16.msra.mxu0 %v11233_v43 }
 0x51d   :  { %v3139_v6 = vadd.f32 %v3137_v51, %v3131_v3  ;;  %4031 = vmatprep.subr.bf16.mxu0 %v15598_v38 }
 0x51e   :  { %v3141_v61 = vpop.permute.xlu0 %3140 }
 0x51f   :  { %v3143_v56 = vadd.f32 %v3141_v61, %v3135_v8 }
 0x520   :  { %v3145_v52 = vpop.permute.xlu1 %3144  ;;  %4032 = vmatpush1.bf16.msra.mxu0 %v11234_v48 }
 0x521   :  { %v3147_v11 = vadd.f32 %v3145_v52, %v3139_v6  ;;  %v3148_v62 = vadd.f32 %v3143_v56, %v3100_v27  ;;  %4033 = vmatprep.subr.bf16.mxu0 %v15598_v38 }
 0x522   :  { %v3152_v13 = vpop.permute.xlu0 %3151 }
 0x523   :  { %v3149_v58 = vadd.f32 %v3147_v11, %v3121_v41  ;;  %v3154_v4 = vadd.f32 %v3152_v13, %v3148_v62 }
 0x524   :  { %v3157_v5 = vpop.permute.xlu1 %3156  ;;  %4034 = vmatpush1.bf16.msra.mxu0 %v11235_v26 }
 0x525   :  { %v3159_v55 = vadd.f32 %v3157_v5, %v3149_v58  ;;  %4135 = vmatprep.subr.bf16.mxu0 %v15598_v38 }
 0x526   :  { %v3161_v32 = vpop.permute.xlu0 %3160 }
 0x527   :  { %v3163_v47 = vadd.f32 %v3161_v32, %v3154_v4 }
 0x528   :  { %v3165_v46 = vpop.permute.xlu1 %3164 }
 0x529   :  { %v3169_v12 = vmul.f32 0.010204081, %v3163_v47  ;;  %v3167_v24 = vadd.f32 %v3165_v46, %v3159_v55  ;;  %v15599_v46 = vld [vmem:[#allocation16_spill] sm:$0xff] }
 0x52b   :  { %v3171_v53 = vmul.f32 %v3169_v12, %v3169_v12  ;;  %v3170_v7 = vmul.f32 0.010204081, %v3167_v24 }
 0x52d   :  { %v3172_v57 = vsub.f32 %v3170_v7, %v3171_v53 }
 0x52f   :  { %v3173_v23 = vadd.f32 1e-05, %v3172_v57 }
 0x531   :  { %11507 = vrsqrt.f32 %v3173_v23 }
 0x53b   :  { %v11508_v49 = vpop.eup %11507 }
 0x53c   :  { %v3175_v10 = vmul.f32 %v11508_v49, %v3081_v18 }
 0x53e   :  { %v3182_v1 = vrot.slane %v3175_v10, %v12390_v14  ;;  %v3176_v9 = vmul.f32 %v3175_v10, %v3169_v12 }
 0x540   :  { %3186 = vrot.lane.b32.xlu1 %v3182_v1, %s11646_s4  ;;  %3183 = vrot.lane.b32.xlu0 %v3182_v1, %s11656_s3  ;;  %v3177_v33 = vsub.f32 %v3082_v20, %v3176_v9 }
 0x542   :  { %v3199_v21 = vrot.slane %v3177_v33, %v12390_v14 }
 0x544   :  { %3189 = vrot.lane.b32.xlu0 %v3182_v1, %s11652_s12  ;;  %3200 = vrot.lane.b32.xlu1 %v3199_v21, %s11656_s3 }
 0x548   :  { %3203 = vrot.lane.b32.xlu0 %v3199_v21, %s11646_s4  ;;  %3206 = vrot.lane.b32.xlu1 %v3199_v21, %s11652_s12 }
 0x5b2   :  { %v3187_v42 = vpop.permute.xlu1 %3186  ;;  %v3184_v29 = vpop.permute.xlu0 %3183 }
 0x5b3   :  { %v3192_v16 = vsel %vm1139_vm0, %v3175_v10, %v3184_v29 }
 0x5b4   :  { %v3193_v44 = vsel %vm1143_vm13, %v3192_v16, %v3187_v42 }
 0x5b5   :  { %v3219_v40 = vrot.slane %v3193_v44, %v12390_v14 }
 0x5b6   :  { %v3190_v2 = vpop.permute.xlu0 %3189  ;;  %v3201_v27 = vpop.permute.xlu1 %3200 }
 0x5b7   :  { %v3194_v41 = vsel %vm953_vm11, %v3193_v44, %v3190_v2  ;;  %v3209_v60 = vsel %vm1139_vm0, %v3177_v33, %v3201_v27  ;;  %v3221_v8 = vmul.f32 %v3219_v40, %v13394_v36  ;;  %v3223_v61 = vmul.f32 %v3219_v40, %v13406_v54 }
 0x5b8   :  { %v3215_v15 = vrot.slane %v3194_v41, %v12390_v14  ;;  %v11658_v36 = vmov 1966171168  }
 0x5b9   :  { %v3258_v32 = vunpack.c.l.s4 %v11658_v36 }
 0x5ba   :  { %v3204_v22 = vpop.permute.xlu0 %3203  ;;  %v3207_v51 = vpop.permute.xlu1 %3206  ;;  %v3220_v52 = vmul.f32 %v3215_v15, %v13392_v25  ;;  %v3222_v11 = vmul.f32 %v3215_v15, %v13398_v0 }
 0x5bb   :  { %v3210_v3 = vsel %vm1143_vm13, %v3209_v60, %v3204_v22  ;;  %v3259_v54 = vunpack.c.0.s8 %v3258_v32 }
 0x5bc   :  { %v3231_v6 = vrot.slane %v3210_v3, %v12390_v14  ;;  %v3211_v56 = vsel %vm953_vm11, %v3210_v3, %v3207_v51 }
 0x5bd   :  { %v3227_v62 = vrot.slane %v3211_v56, %v12390_v14  ;;  %v13471_v12 = vsub.s32 %v3259_v54, %v15599_v46 }
 0x5be   :  { %v3233_v13 = vadd.f32 %v3231_v6, %v3221_v8  ;;  %v3235_v58 = vadd.f32 %v3231_v6, %v3223_v61 }
 0x5bf   :  { %v3232_v5 = vadd.f32 %v3227_v62, %v3220_v52  ;;  %v3234_v4 = vadd.f32 %v3227_v62, %v3222_v11  ;;  %15600 = vst [vmem:[#allocation20_spill] sm:$0xff] %v13471_v12 }
 0x5c0   :  { %11509 = vtanh.f32 %v3233_v13 }
 0x5c1   :  { %11511 = vtanh.f32 %v3235_v58 }
 0x5c2   :  { %11513 = vtanh.f32 %v3232_v5 }
 0x5c3   :  { %11515 = vtanh.f32 %v3234_v4 }
 0x5ca   :  { %v11510_v55 = vpop.eup %11509 }
 0x5cb   :  { %v11512_v47 = vpop.eup %11511 }
 0x5cc   :  { %v11514_v25 = vpop.eup %11513 }
 0x5cd   :  { %v11516_v0 = vpop.eup %11515  ;;  %v3255_v24 = vcombine.low %v11514_v25, %v11510_v55  ;;  %v3256_v53 = vcombine.high %v11514_v25, %v11510_v55 }
 0x5ce   :  { %v3305_v7 = vcombine.low %v11516_v0, %v11512_v47  ;;  %v3306_v57 = vcombine.high %v11516_v0, %v11512_v47 }
 0x5cf   :  { %v3263_v23 = vrot.slane %v3255_v24, %v13471_v12  ;;  %v3270_v18 = vrot.slane %v3256_v53, %v13471_v12  ;;  %v13503_v24 = vld [vmem:[#allocation4 + $0x10] ss:$8 sps:$4 sm:$0x11]  }
 0x5d0   :  { %v3313_v49 = vrot.slane %v3305_v7, %v13471_v12  ;;  %v3320_v10 = vrot.slane %v3306_v57, %v13471_v12  ;;  %v13505_v53 = vld [vmem:[#allocation4 + $0x30] ss:$8 sps:$4 sm:$0x11]  }
 0x5d1   :  { %v3271_v20 = vcombine.high %v3263_v23, %v3263_v23  ;;  %v3272_v1 = vcombine.high %v3270_v18, %v3270_v18  ;;  %v3279_v9 = vrot.slane %v3263_v23, %v13471_v12  ;;  %v3286_v33 = vrot.slane %v3270_v18, %v13471_v12 }
 0x5d2   :  { %v3321_v21 = vcombine.high %v3313_v49, %v3313_v49  ;;  %v3322_v34 = vcombine.high %v3320_v10, %v3320_v10  ;;  %v3329_v17 = vrot.slane %v3313_v49, %v13471_v12  ;;  %v3336_v45 = vrot.slane %v3320_v10, %v13471_v12 }
 0x5d3   :  { %v3293_v63 = vrot.slane %v3271_v20, %v13471_v12  ;;  %v3300_v28 = vrot.slane %v3272_v1, %v13471_v12  ;;  %v3301_v39 = vcombine.high %v3279_v9, %v3279_v9  ;;  %v3302_v50 = vcombine.high %v3286_v33, %v3286_v33 }
 0x5d4   :  { %v3343_v30 = vrot.slane %v3321_v21, %v13471_v12  ;;  %v3350_v19 = vrot.slane %v3322_v34, %v13471_v12  ;;  %v3353_v59 = vcombine.low %v3279_v9, %v3279_v9 }
 0x5d5   :  { %v3303_v35 = vcombine.high %v3293_v63, %v3293_v63  ;;  %v3354_v43 = vcombine.low %v3293_v63, %v3301_v39  ;;  %v3356_v48 = vcombine.low %v3300_v28, %v3302_v50  ;;  %v10190_v26 = vcombine.high %v3300_v28, %v3300_v28 }
 0x5d6   :  { %v3420_v42 = vcombine.low %v3329_v17, %v3343_v30  ;;  %v10191_v29 = vcombine.high %v3329_v17, %v3343_v30  ;;  %v3422_v16 = vcombine.low %v3336_v45, %v3350_v19  ;;  %v3363_v2 = vrot.slane %v3353_v59, %v13471_v12 }
 0x5d7   :  { %v3355_v44 = vcombine.low %v3303_v35, %v3286_v33  ;;  %v3370_v27 = vrot.slane %v3354_v43, %v13471_v12  ;;  %v3429_v41 = vrot.slane %v10190_v26, %v13471_v12  ;;  %v3384_v51 = vrot.slane %v3356_v48, %v13471_v12 }
 0x5d8   :  { %v3436_v40 = vrot.slane %v3420_v42, %v13471_v12  ;;  %v3443_v15 = vrot.slane %v10191_v29, %v13471_v12  ;;  %v3450_v60 = vrot.slane %v3422_v16, %v13471_v12  ;;  %v4187_v17 = vrot.slane %v13503_v24, %v13471_v12 }
 0x5d9   :  { %v3377_v22 = vrot.slane %v3355_v44, %v13471_v12  ;;  %v3385_v3 = vcombine.low %v3363_v2, %v3370_v27  ;;  %v3386_v8 = vcombine.high %v3363_v2, %v3370_v27  ;;  %v4202_v63 = vrot.slane %v13505_v53, %v13471_v12 }
 0x5da   :  { %v3451_v61 = vcombine.low %v3429_v41, %v3436_v40  ;;  %v3452_v6 = vcombine.high %v3429_v41, %v3436_v40  ;;  %v3453_v56 = vcombine.low %v3443_v15, %v3450_v60  ;;  %v3454_v52 = vcombine.high %v3443_v15, %v3450_v60 }
 0x5db   :  { %v3387_v11 = vcombine.low %v3377_v22, %v3384_v51  ;;  %v3388_v62 = vcombine.high %v3377_v22, %v3384_v51  ;;  %v3395_v36 = vrot.slane %v3385_v3, %v13471_v12  ;;  %v3402_v32 = vrot.slane %v3386_v8, %v13471_v12 }
 0x5dc   :  { %v3461_v13 = vrot.slane %v3451_v61, %v13471_v12  ;;  %v3468_v58 = vrot.slane %v3452_v6, %v13471_v12  ;;  %v3475_v5 = vrot.slane %v3453_v56, %v13471_v12  ;;  %v3482_v4 = vrot.slane %v3454_v52, %v13471_v12 }
 0x5dd   :  { %v3409_v54 = vrot.slane %v3387_v11, %v13471_v12  ;;  %v3416_v55 = vrot.slane %v3388_v62, %v13471_v12  ;;  %v4209_v24 = vrot.slane %v4202_v63, %v13471_v12  ;;  %v11243_v63 = vld [vmem:[#allocation7 + $0x8] sm:$0xff]  }
 0x5de   :  { %v3483_v47 = vcombine.low %v3461_v13, %v3475_v5  ;;  %v3484_v46 = vcombine.low %v3468_v58, %v3482_v4 }
 0x5df   :  { %v3417_v25 = vcombine.low %v3395_v36, %v3409_v54  ;;  %v3418_v0 = vcombine.low %v3402_v32, %v3416_v55 }
 0x5e0   :  { %3491 = vst [vmem:[#allocation4 + $0x20] sm:$0xfe] %v3483_v47  ;;  %3492 = vst.msk [vmem:[#allocation4 + $0x28] sm:$0xfe] %vm1401_vm14, %v3484_v46 }
 0x5e1   :  { %3489 = vst [vmem:[#allocation4] sm:$0xfe] %v3417_v25  ;;  %3490 = vst.msk [vmem:[#allocation4 + $0x8] sm:$0xfe] %vm1401_vm14, %v3418_v0 }
 0x5e7   :  { %v11239_v7 = vld [vmem:[#allocation4 + $0x20] ss:$8 sps:$4 sm:$0xff]   ;;  %v11241_v18 = vld [vmem:[#allocation4 + $0x24] ss:$8 sps:$4 sm:$0xff]  }
 0x5e8   :  { %v11236_v57 = vld [vmem:[#allocation4] ss:$8 sps:$4 sm:$0xff]   ;;  %v11238_v23 = vld [vmem:[#allocation4 + $0x4] ss:$8 sps:$4 sm:$0xff]   ;;  %v3562_v49 = vrot.slane %v11239_v7, %v13471_v12  ;;  %v3569_v1 = vrot.slane %v11241_v18, %v13471_v12 }
 0x5e9   :  { %v3513_v10 = vrot.slane %v11236_v57, %v13471_v12  ;;  %v3520_v20 = vrot.slane %v11238_v23, %v13471_v12 }
 0x5ea   :  { %v3570_v9 = vcombine.high %v3562_v49, %v3562_v49  ;;  %v3578_v33 = vrot.slane %v3562_v49, %v13471_v12  ;;  %v3571_v50 = vcombine.high %v3569_v1, %v3569_v1  ;;  %v3585_v45 = vrot.slane %v3569_v1, %v13471_v12 }
 0x5eb   :  { %v3521_v21 = vcombine.high %v3513_v10, %v3513_v10  ;;  %v3529_v34 = vrot.slane %v3513_v10, %v13471_v12  ;;  %v3522_v28 = vcombine.high %v3520_v20, %v3520_v20  ;;  %v13518_v39 = vrot.slane %v3520_v20, %v13471_v12 }
 0x5ec   :  { %v3592_v59 = vrot.slane %v3570_v9, %v13471_v12  ;;  %v13523_v35 = vcombine.high %v3578_v33, %v3578_v33  ;;  %v13531_v26 = vrot.slane %v3571_v50, %v13471_v12  ;;  %v3601_v42 = vcombine.high %v3585_v45, %v3585_v45 }
 0x5ed   :  { %v3543_v30 = vrot.slane %v3521_v21, %v13471_v12  ;;  %v3551_v19 = vcombine.high %v3529_v34, %v3529_v34  ;;  %v13526_v43 = vrot.slane %v3522_v28, %v13471_v12  ;;  %v3552_v48 = vcombine.high %v13518_v39, %v13518_v39 }
 0x5ee   :  { %v10193_v44 = vcombine.high %v3578_v33, %v3592_v59  ;;  %v3602_v2 = vcombine.high %v3592_v59, %v3592_v59  ;;  %v3858_v40 = vcombine.low %v3585_v45, %v13531_v26  ;;  %v10194_v15 = vcombine.high %v3585_v45, %v13531_v26 }
 0x5ef   :  { %v3553_v29 = vcombine.high %v3543_v30, %v3543_v30  ;;  %v3791_v16 = vcombine.low %v3543_v30, %v3551_v19  ;;  %v3760_v27 = vcombine.high %v13526_v43, %v13526_v43  ;;  %v3793_v41 = vcombine.low %v13526_v43, %v3552_v48 }
 0x5f0   :  { %v3866_v51 = vrot.slane %v10193_v44, %v13471_v12  ;;  %v3631_v3 = vcombine.low %v3529_v34, %v3543_v30  ;;  %v3873_v6 = vrot.slane %v3858_v40, %v13471_v12  ;;  %v3880_v56 = vrot.slane %v10194_v15, %v13471_v12  ;;  %v11242_v40 = vld [vmem:[#allocation7] sm:$0xff]  }
 0x5f1   :  { %v3792_v60 = vcombine.low %v3553_v29, %v13518_v39  ;;  %v3801_v22 = vrot.slane %v3791_v16, %v13471_v12  ;;  %v3794_v8 = vcombine.low %v3760_v27, %v3592_v59  ;;  %v3815_v61 = vrot.slane %v3793_v41, %v13471_v12 }
 0x5f2   :  { %v10192_v11 = vcombine.high %v3529_v34, %v3543_v30  ;;  %v3633_v62 = vcombine.low %v13518_v39, %v13526_v43  ;;  %v3634_v13 = vcombine.low %v3552_v48, %v3578_v33  ;;  %v3881_v5 = vcombine.low %v3866_v51, %v3873_v6 }
 0x5f3   :  { %v3808_v52 = vrot.slane %v3792_v60, %v13471_v12  ;;  %v3822_v58 = vrot.slane %v3794_v8, %v13471_v12  ;;  %v3882_v4 = vcombine.high %v3866_v51, %v3873_v6  ;;  %v3883_v36 = vcombine.high %v3880_v56, %v3880_v56 }
 0x5f4   :  { %v3904_v55 = vrot.slane %v3880_v56, %v13471_v12  ;;  %v13550_v47 = vrot.slane %v3631_v3, %v13471_v12  ;;  %v3890_v18 = vrot.slane %v3881_v5, %v13471_v12  ;;  %v13558_v49 = vrot.slane %v10192_v11, %v13471_v12  ;;  %v11244_v11 = vld [vmem:[#allocation7 + $0x10] sm:$0xff]  }
 0x5f5   :  { %v3823_v32 = vcombine.low %v3801_v22, %v3808_v52  ;;  %v3824_v54 = vcombine.high %v3801_v22, %v3808_v52  ;;  %v3825_v46 = vcombine.low %v3815_v61, %v3822_v58  ;;  %v3826_v25 = vcombine.high %v3815_v61, %v3822_v58 }
 0x5f6   :  { %v3897_v0 = vrot.slane %v3882_v4, %v13471_v12  ;;  %v3911_v7 = vrot.slane %v3883_v36, %v13471_v12  ;;  %v13563_v9 = vrot.slane %v3633_v62, %v13471_v12  ;;  %v3912_v33 = vcombine.low %v3890_v18, %v3904_v55  ;;  %v11252_v18 = vld [vmem:[#allocation7 + $0x50] sm:$0xff]  }
 0x5f7   :  { %v3840_v57 = vrot.slane %v3824_v54, %v13471_v12  ;;  %v3833_v23 = vrot.slane %v3823_v32, %v13471_v12  ;;  %v3854_v10 = vrot.slane %v3826_v25, %v13471_v12  ;;  %v3847_v1 = vrot.slane %v3825_v46, %v13471_v12  ;;  %v11245_v32 = vld [vmem:[#allocation7 + $0x18] sm:$0xff]   ;;  %v11246_v46 = vld [vmem:[#allocation7 + $0x20] sm:$0xff]   ;;  %v11247_v25 = vld [vmem:[#allocation7 + $0x28] sm:$0xff]  }
 0x5f8   :  { %v3913_v20 = vcombine.low %v3897_v0, %v3911_v7  ;;  %v13566_v21 = vrot.slane %v3634_v13, %v13471_v12  ;;  %v3664_v34 = vcombine.high %v13550_v47, %v13558_v49  ;;  %v3697_v28 = vcombine.low %v3592_v59, %v13523_v35  ;;  %v11248_v0 = vld [vmem:[#allocation7 + $0x30] sm:$0xff]   ;;  %v11249_v7 = vld [vmem:[#allocation7 + $0x38] sm:$0xff]  }
 0x5f9   :  { %v3856_v50 = vcombine.low %v3840_v57, %v3854_v10  ;;  %v3855_v30 = vcombine.low %v3833_v23, %v3847_v1  ;;  %v3698_v19 = vcombine.low %v3602_v2, %v3585_v45  ;;  %v3699_v48 = vcombine.low %v13531_v26, %v3601_v42  ;;  %v11250_v57 = vld [vmem:[#allocation7 + $0x40] sm:$0xff]   ;;  %v11251_v23 = vld [vmem:[#allocation7 + $0x48] sm:$0xff]   ;;  %v11253_v10 = vld [vmem:[#allocation7 + $0x58] sm:$0xff]  }
 0x5fa   :  { %v3666_v29 = vcombine.high %v13563_v9, %v13566_v21  ;;  %v3680_v16 = vrot.slane %v3664_v34, %v13471_v12  ;;  %v13576_v44 = vrot.slane %v3697_v28, %v13471_v12  ;;  %v4194_v27 = vrot.slane %v4187_v17, %v13471_v12 }
 0x5fb   :  { %v3919_v41 = vpack.c.bf16 %v3913_v20, %v3856_v50  ;;  %v3918_v59 = vpack.c.bf16 %v3912_v33, %v3855_v30  ;;  %v13583_v45 = vrot.slane %v3698_v19, %v13471_v12  ;;  %v13586_v42 = vrot.slane %v3699_v48, %v13471_v12  ;;  %v11254_v19 = vld [vmem:[#allocation7 + $0x60] sm:$0xff]  }
 0x5fc   :  { %v3694_v2 = vrot.slane %v3666_v29, %v13471_v12  ;;  %v3761_v15 = vcombine.high %v13531_v26, %v13531_v26  ;;  %v10225_v22 = vcombine.high %v13518_v39, %v13526_v43  ;;  %v4240_v51 = vcombine.low %v4194_v27, %v13523_v35  ;;  %v11255_v27 = vld [vmem:[#allocation7 + $0x68] sm:$0xff]  }
 0x5fd   :  { %10209 = vmatprep.mubr.msk.bf16.mxu0 %vm953_vm11, %v3919_v41  ;;  %v3722_v17 = vcombine.high %v13576_v44, %v13583_v45  ;;  %v3723_v60 = vcombine.high %v13586_v42, %v13586_v42  ;;  %v4255_v39 = vcombine.low %v13558_v49, %v13563_v9  ;;  %v4297_v62 = vcombine.low %v13583_v45, %v13586_v42 }
 0x5fe   :  { %4040 = vmatmul.mubr.bf16.vlgmr.msra.gmra.mrb[8].mxu0 %v3918_v59  ;;  %v3696_v26 = vcombine.low %v3680_v16, %v3694_v2  ;;  %v4247_v8 = vrot.slane %v10225_v22, %v13471_v12  ;;  %v4254_v61 = vrot.slane %v4240_v51, %v13471_v12  ;;  %v4289_v6 = vcombine.low %v3761_v15, %v4209_v24  ;;  %v11256_v2 = vld [vmem:[#allocation7 + $0xe0] sm:$0xff]   ;;  %v11263_v51 = vld [vmem:[#allocation7 + $0x108] sm:$0xff]  }
 0x5ff   :  { %4136 = vmatpush1.bf16.msra.mxu0 %v11242_v40  ;;  %v3737_v3 = vrot.slane %v3722_v17, %v13471_v12  ;;  %v3751_v53 = vrot.slane %v3723_v60, %v13471_v12  ;;  %v4265_v13 = vrot.slane %v4255_v39, %v13471_v12  ;;  %v4306_v5 = vrot.slane %v4297_v62, %v13471_v12  ;;  %v11259_v17 = vld [vmem:[#allocation7 + $0xe8] sm:$0xff]   ;;  %v11261_v60 = vld [vmem:[#allocation7 + $0xf8] sm:$0xff]   ;;  %v11262_v22 = vld [vmem:[#allocation7 + $0x100] sm:$0xff]  }
 0x600   :  { %4137 = vmatprep.subr.bf16.mxu0 %v15598_v38  ;;  %v4296_v52 = vrot.slane %v4289_v6, %v13471_v12  ;;  %v4257_v35 = vcombine.low %v4247_v8, %v4254_v61  ;;  %v3663_v20 = vcombine.low %v13550_v47, %v13558_v49  ;;  %v3665_v1 = vcombine.low %v13563_v9, %v13566_v21  ;;  %v11270_v6 = vld [vmem:[#allocation7 + $0x140] sm:$0xff]  }
 0x601   :  { %v3753_v56 = vcombine.low %v3737_v3, %v3751_v53  ;;  %v3721_v33 = vcombine.low %v13576_v44, %v13583_v45  ;;  %v4256_v34 = vcombine.high %v13558_v49, %v13563_v9  ;;  %v4258_v28 = vcombine.high %v4247_v8, %v4254_v61  ;;  %v11265_v3 = vld [vmem:[#allocation7 + $0x118] sm:$0xff]   ;;  %v11266_v53 = vld [vmem:[#allocation7 + $0x120] sm:$0xff]   ;;  %v11268_v8 = vld [vmem:[#allocation7 + $0x130] sm:$0xff]  }
 0x602   :  { %v4279_v58 = vrot.slane %v4257_v35, %v13471_v12  ;;  %v4320_v4 = vrot.slane %v4296_v52, %v13471_v12  ;;  %v4298_v50 = vcombine.high %v13583_v45, %v13586_v42  ;;  %v4299_v30 = vcombine.high %v4296_v52, %v4296_v52  ;;  %v11269_v61 = vld [vmem:[#allocation7 + $0x138] sm:$0xff]  }
 0x603   :  { %v3759_v43 = vpack.c.bf16 %v3753_v56, %v3696_v26  ;;  %4138 = vmatpush1.bf16.msra.mxu0 %v11243_v63  ;;  %v3673_v47 = vrot.slane %v3663_v20, %v13471_v12  ;;  %v3687_v48 = vrot.slane %v3665_v1, %v13471_v12  ;;  %v3730_v21 = vrot.slane %v3721_v33, %v13471_v12  ;;  %v11264_v26 = vld [vmem:[#allocation7 + $0x110] sm:$0xff]   ;;  %v11267_v63 = vld [vmem:[#allocation7 + $0x128] sm:$0xff]  }
 0x604   :  { %4139 = vmatprep.subr.bf16.mxu0 %v15598_v38  ;;  %v4287_v36 = vcombine.low %v4265_v13, %v4279_v58  ;;  %v4328_v54 = vcombine.low %v4306_v5, %v4320_v4  ;;  %v4272_v29 = vrot.slane %v4256_v34, %v13471_v12  ;;  %v4286_v16 = vrot.slane %v4258_v28, %v13471_v12  ;;  %v11271_v56 = vld [vmem:[#allocation7 + $0x148] sm:$0xff]  }
 0x605   :  { %10224 = vmatprep.mubr.msk.bf16.mxu0 %vm953_vm11, %v3759_v43  ;;  %v4313_v49 = vrot.slane %v4298_v50, %v13471_v12  ;;  %v4327_v9 = vrot.slane %v4299_v30, %v13471_v12  ;;  %v3744_v44 = vrot.slane %v13586_v42, %v13471_v12  ;;  %v3695_v41 = vcombine.low %v3673_v47, %v3687_v48  ;;  %v11260_v42 = vld [vmem:[#allocation7 + $0xf0] sm:$0xff]  }
 0x606   :  { %v13620_v55 = vpack.c.bf16 %v4328_v54, %v4287_v36  ;;  %v4288_v40 = vcombine.low %v4272_v29, %v4286_v16 }
 0x607   :  { %4140 = vmatpush1.bf16.msra.mxu0 %v11244_v11  ;;  %v3752_v59 = vcombine.low %v3730_v21, %v3744_v44  ;;  %v4329_v45 = vcombine.low %v4313_v49, %v4327_v9 }
 0x608   :  { %4141 = vmatprep.subr.bf16.mxu0 %v15598_v38 }
 0x609   :  { %v3758_v15 = vpack.c.bf16 %v3752_v59, %v3695_v41  ;;  %v4335_v24 = vpack.c.bf16 %v4329_v45, %v4288_v40 }
 0x60b   :  { %4142 = vmatpush1.bf16.msra.mxu0 %v11245_v32 }
 0x60c   :  { %4143 = vmatprep.subr.bf16.mxu0 %v15598_v38 }
 0x60f   :  { %4144 = vmatpush1.bf16.msra.mxu0 %v11246_v46 }
 0x610   :  { %4145 = vmatprep.subr.bf16.mxu0 %v15598_v38 }
 0x613   :  { %4146 = vmatpush1.bf16.msra.mxu0 %v11247_v25 }
 0x614   :  { %4147 = vmatprep.subr.bf16.mxu0 %v15598_v38 }
 0x617   :  { %4148 = vmatpush1.bf16.msra.mxu0 %v11248_v0 }
 0x618   :  { %4149 = vmatprep.subr.bf16.mxu0 %v15598_v38 }
 0x61b   :  { %4150 = vmatpush1.bf16.msra.mxu0 %v11249_v7 }
 0x61c   :  { %4151 = vmatprep.subr.bf16.mxu0 %v15598_v38 }
 0x61f   :  { %4152 = vmatpush1.bf16.msra.mxu0 %v11250_v57 }
 0x620   :  { %4153 = vmatprep.subr.bf16.mxu0 %v15598_v38 }
 0x623   :  { %4154 = vmatpush1.bf16.msra.mxu0 %v11251_v23 }
 0x624   :  { %4155 = vmatprep.subr.bf16.mxu0 %v15598_v38 }
 0x627   :  { %4156 = vmatpush1.bf16.msra.mxu0 %v11252_v18 }
 0x628   :  { %4157 = vmatprep.subr.bf16.mxu0 %v15598_v38 }
 0x62b   :  { %4158 = vmatpush1.bf16.msra.mxu0 %v11253_v10 }
 0x62c   :  { %4159 = vmatprep.subr.bf16.mxu0 %v15598_v38 }
 0x62f   :  { %4160 = vmatpush1.bf16.msra.mxu0 %v11254_v19 }
 0x630   :  { %4161 = vmatprep.subr.bf16.mxu0 %v15598_v38 }
 0x633   :  { %4162 = vmatpush1.bf16.msra.mxu0 %v11255_v27 }
 0x634   :  { %4423 = vmatprep.subr.bf16.mxu0 %v15598_v38 }
 0x636   :  { %4168 = vmatmul.mubr.bf16.vlgmr.msra.gmra.mrb[8].mxu0 %v3758_v15 }
 0x637   :  { %4424 = vmatpush1.bf16.msra.mxu0 %v11256_v2  ;;  %10240 = vmatprep.mubr.msk.bf16.mxu0 %vm953_vm11, %v4335_v24 }
 0x638   :  { %4425 = vmatprep.subr.bf16.mxu0 %v15598_v38 }
 0x63b   :  { %4426 = vmatpush1.bf16.msra.mxu0 %v11259_v17 }
 0x63c   :  { %4427 = vmatprep.subr.bf16.mxu0 %v15598_v38 }
 0x63f   :  { %4428 = vmatpush1.bf16.msra.mxu0 %v11260_v42 }
 0x640   :  { %4429 = vmatprep.subr.bf16.mxu0 %v15598_v38 }
 0x643   :  { %4430 = vmatpush1.bf16.msra.mxu0 %v11261_v60 }
 0x644   :  { %4431 = vmatprep.subr.bf16.mxu0 %v15598_v38 }
 0x647   :  { %4432 = vmatpush1.bf16.msra.mxu0 %v11262_v22 }
 0x648   :  { %4433 = vmatprep.subr.bf16.mxu0 %v15598_v38 }
 0x64b   :  { %4434 = vmatpush1.bf16.msra.mxu0 %v11263_v51 }
 0x64c   :  { %4435 = vmatprep.subr.bf16.mxu0 %v15598_v38 }
 0x64f   :  { %4436 = vmatpush1.bf16.msra.mxu0 %v11264_v26 }
 0x650   :  { %4437 = vmatprep.subr.bf16.mxu0 %v15598_v38 }
 0x653   :  { %4438 = vmatpush1.bf16.msra.mxu0 %v11265_v3 }
 0x654   :  { %4439 = vmatprep.subr.bf16.mxu0 %v15598_v38 }
 0x657   :  { %4440 = vmatpush1.bf16.msra.mxu0 %v11266_v53  ;;  %v4466_v53 = vld [vmem:[%s15464_s8] sm:$0x1] }
 0x658   :  { %4441 = vmatprep.subr.bf16.mxu0 %v15598_v38 }
 0x65b   :  { %4442 = vmatpush1.bf16.msra.mxu0 %v11267_v63 }
 0x65c   :  { %4443 = vmatprep.subr.bf16.mxu0 %v15598_v38 }
 0x65f   :  { %4444 = vmatpush1.bf16.msra.mxu0 %v11268_v8 }
 0x660   :  { %4445 = vmatprep.subr.bf16.mxu0 %v15598_v38 }
 0x663   :  { %4446 = vmatpush1.bf16.msra.mxu0 %v11269_v61  ;;  %v4467_v61 = vld [vmem:[%s15465_s9] sm:$0x1] }
 0x664   :  { %4447 = vmatprep.subr.bf16.mxu0 %v15598_v38 }
 0x667   :  { %4448 = vmatpush1.bf16.msra.mxu0 %v11270_v6 }
 0x668   :  { %4449 = vmatprep.subr.bf16.mxu0 %v15598_v38 }
 0x66b   :  { %4450 = vmatpush1.bf16.msra.mxu0 %v11271_v56 }
 0x66c   :  { %10761 = vmatprep.subr.bf16.mxu0 %v15597_v31 }
 0x66e   :  { %4456 = vmatmul.mubr.bf16.vlgmr.msra.gmra.mrb[8].mxu0 %v13620_v55 }
 0x66f   :  { %10775 = vmatprep.mubr.msk.bf16.mxu0 %vm11659_vm10, %v15597_v31 }
 0x741   :  { %v13668_v52 = vpop.f32.mrb[8].mxu0 }
 0x742   :  { %v4478_v39 = vmul.f32 %v13668_v52, %v13668_v52  ;;  %v4459_v35 = vpop.f32.mrb[9].mxu0  ;;  %v4468_v11 = vsel %vm1148_vm3, %v13668_v52, 0.0 }
 0x743   :  { %v13672_v43 = vpop.f32.mrb[10].mxu0 }
 0x744   :  { %v4470_v62 = vsel %vm4469_vm8, %v13672_v43, 0.0  ;;  %v4479_v13 = vmul.f32 %v13672_v43, %v13672_v43  ;;  %v4462_v58 = vpop.f32.mrb[11].mxu0  ;;  %v4480_v4 = vsel %vm1148_vm3, %v4478_v39, 0.0 }
 0x745   :  { %v4471_v5 = vadd.f32 %v4470_v62, %v4468_v11  ;;  %v11272_v11 = vld [vmem:[%s15466_s10 + $0x38] sm:$0xff]   ;;  %v11274_v62 = vld [vmem:[%s15466_s10] sm:$0xff]   ;;  %v11276_v58 = vld [vmem:[%s15466_s10 + $0x8] sm:$0xff]  }
 0x746   :  { %v4481_v36 = vsel %vm4469_vm8, %v4479_v13, 0.0  ;;  %10762 = vmatpush3.bf16.msra.mxu0 %v11272_v11  ;;  %v11273_v13 = vld [vmem:[%s15466_s10 + $0x40] sm:$0xff]   ;;  %10780 = vmatpush3.bf16.msra.mxu1 %v11274_v62  ;;  %vm15602_vm8 = vcmask 392192  }
 0x747   :  { %v4472_v32 = vrot.slane %v4471_v5, 4  ;;  %v4482_v54 = vadd.f32 %v4481_v36, %v4480_v4  ;;  %10763 = vmatprep.subr.bf16.mxu0 %v15597_v31  ;;  %10781 = vmatprep.subr.bf16.mxu1 %v15597_v31  ;;  %v11278_v4 = vld [vmem:[%s15466_s10 + $0x10] sm:$0xff]   ;;  %vm15604_vm7 = vmmov %vm15602_vm8 }
 0x748   :  { %v11277_v36 = vld [vmem:[%s15466_s10 + $0x50] sm:$0xff]  }
 0x749   :  { %v4473_v55 = vadd.f32 %v4472_v32, %v4471_v5  ;;  %v4483_v46 = vrot.slane %v4482_v54, 4  ;;  %v11275_v5 = vld [vmem:[%s15466_s10 + $0x48] sm:$0xff]   ;;  %v11280_v32 = vld [vmem:[%s15466_s10 + $0x18] sm:$0xff]  }
 0x74a   :  { %10764 = vmatpush3.bf16.msra.mxu0 %v11273_v13  ;;  %10782 = vmatpush3.bf16.msra.mxu1 %v11276_v58 }
 0x74b   :  { %v4474_v25 = vrot.slane %v4473_v55, 2  ;;  %v4484_v0 = vadd.f32 %v4483_v46, %v4482_v54  ;;  %10765 = vmatprep.subr.bf16.mxu0 %v15597_v31  ;;  %10783 = vmatprep.subr.bf16.mxu1 %v15597_v31  ;;  %v11279_v54 = vld [vmem:[%s15466_s10 + $0x58] sm:$0xff]   ;;  %v11281_v46 = vld [vmem:[%s15466_s10 + $0x60] sm:$0xff]  }
 0x74d   :  { %v4475_v7 = vadd.f32 %v4474_v25, %v4473_v55  ;;  %v4485_v57 = vrot.slane %v4484_v0, 2  ;;  %v11282_v55 = vld [vmem:[%s15466_s10 + $0x20] sm:$0xff]   ;;  %v11284_v25 = vld [vmem:[%s15466_s10 + $0x28] sm:$0xff]  }
 0x74e   :  { %10766 = vmatpush3.bf16.msra.mxu0 %v11275_v5  ;;  %10784 = vmatpush3.bf16.msra.mxu1 %v11278_v4 }
 0x74f   :  { %v4476_v23 = vrot.slane %v4475_v7, 1  ;;  %v4486_v18 = vadd.f32 %v4485_v57, %v4484_v0  ;;  %10767 = vmatprep.subr.bf16.mxu0 %v15597_v31  ;;  %10785 = vmatprep.subr.bf16.mxu1 %v15597_v31  ;;  %v11283_v0 = vld [vmem:[%s15466_s10 + $0x68] sm:$0xff]  }
 0x751   :  { %v4477_v10 = vadd.f32 %v4476_v23, %v4475_v7  ;;  %v4487_v20 = vrot.slane %v4486_v18, 1  ;;  %v11286_v7 = vld [vmem:[%s15466_s10 + $0x30] sm:$0xff]  }
 0x752   :  { %10768 = vmatpush3.bf16.msra.mxu0 %v11277_v36  ;;  %10786 = vmatpush3.bf16.msra.mxu1 %v11280_v32 }
 0x753   :  { %v4488_v1 = vadd.f32 %v4487_v20, %v4486_v18  ;;  %4490 = vrot.lane.b32.xlu0 %v4477_v10, %s11653_s24  ;;  %10769 = vmatprep.subr.bf16.mxu0 %v15597_v31 }
 0x754   :  { %10787 = vmatprep.subr.bf16.mxu1 %v15597_v31 }
 0x755   :  { %4495 = vrot.lane.b32.xlu1 %v4488_v1, %s11653_s24 }
 0x756   :  { %10770 = vmatpush3.bf16.msra.mxu0 %v11279_v54  ;;  %10788 = vmatpush3.bf16.msra.mxu1 %v11282_v55 }
 0x757   :  { %4499 = vrot.lane.b32.xlu0 %v4477_v10, %s11652_s12  ;;  %10771 = vmatprep.subr.bf16.mxu0 %v15597_v31 }
 0x758   :  { %10789 = vmatprep.subr.bf16.mxu1 %v15597_v31 }
 0x759   :  { %4503 = vrot.lane.b32.xlu1 %v4488_v1, %s11652_s12 }
 0x75a   :  { %10772 = vmatpush3.bf16.msra.mxu0 %v11281_v46  ;;  %10790 = vmatpush3.bf16.msra.mxu1 %v11284_v25 }
 0x75b   :  { %4507 = vrot.lane.b32.xlu0 %v4477_v10, %s11654_s2  ;;  %10773 = vmatprep.subr.bf16.mxu0 %v15597_v31 }
 0x75c   :  { %10791 = vmatprep.subr.bf16.mxu1 %v15597_v31 }
 0x75d   :  { %4511 = vrot.lane.b32.xlu1 %v4488_v1, %s11654_s2 }
 0x75e   :  { %10774 = vmatpush3.bf16.msra.mxu0 %v11283_v0  ;;  %10792 = vmatpush3.bf16.msra.mxu1 %v11286_v7 }
 0x75f   :  { %4515 = vrot.lane.b32.xlu0 %v4477_v10, %s11646_s4  ;;  %10797 = vmatprep.subr.bf16.mxu0 %v15597_v31 }
 0x760   :  { %10815 = vmatprep.subr.bf16.mxu1 %v15597_v31 }
 0x761   :  { %4519 = vrot.lane.b32.xlu1 %v4488_v1, %s11646_s4 }
 0x763   :  { %4523 = vrot.lane.b32.xlu0 %v4477_v10, %s11655_s25 }
 0x765   :  { %4527 = vrot.lane.b32.xlu1 %v4488_v1, %s11655_s25 }
 0x767   :  { %4531 = vrot.lane.b32.xlu0 %v4477_v10, %s11656_s3 }
 0x769   :  { %4535 = vrot.lane.b32.xlu1 %v4488_v1, %s11656_s3 }
 0x7c5   :  { %v4491_v33 = vpop.permute.xlu0 %4490 }
 0x7c6   :  { %v4493_v47 = vadd.f32 %v4491_v33, %v4477_v10 }
 0x7c7   :  { %v4496_v34 = vpop.permute.xlu1 %4495 }
 0x7c8   :  { %v4498_v21 = vadd.f32 %v4496_v34, %v4488_v1 }
 0x7c9   :  { %v4500_v28 = vpop.permute.xlu0 %4499 }
 0x7ca   :  { %v4502_v29 = vadd.f32 %v4500_v28, %v4493_v47 }
 0x7cb   :  { %v4504_v50 = vpop.permute.xlu1 %4503 }
 0x7cc   :  { %v4506_v49 = vadd.f32 %v4504_v50, %v4498_v21 }
 0x7cd   :  { %v4508_v30 = vpop.permute.xlu0 %4507 }
 0x7ce   :  { %v4510_v9 = vadd.f32 %v4508_v30, %v4502_v29 }
 0x7cf   :  { %v4512_v19 = vpop.permute.xlu1 %4511 }
 0x7d0   :  { %v4514_v27 = vadd.f32 %v4512_v19, %v4506_v49 }
 0x7d1   :  { %v4516_v48 = vpop.permute.xlu0 %4515 }
 0x7d2   :  { %v4518_v41 = vadd.f32 %v4516_v48, %v4510_v9 }
 0x7d3   :  { %v4520_v16 = vpop.permute.xlu1 %4519 }
 0x7d4   :  { %v4522_v40 = vadd.f32 %v4520_v16, %v4514_v27 }
 0x7d5   :  { %v4524_v44 = vpop.permute.xlu0 %4523 }
 0x7d6   :  { %v4526_v45 = vadd.f32 %v4524_v44, %v4518_v41 }
 0x7d7   :  { %v4528_v59 = vpop.permute.xlu1 %4527 }
 0x7d8   :  { %v4530_v15 = vadd.f32 %v4528_v59, %v4522_v40 }
 0x7d9   :  { %v4532_v2 = vpop.permute.xlu0 %4531 }
 0x7da   :  { %v4534_v24 = vadd.f32 %v4532_v2, %v4526_v45 }
 0x7db   :  { %v4536_v17 = vpop.permute.xlu1 %4535 }
 0x7dc   :  { %v4539_v42 = vmul.f32 0.010204081, %v4534_v24  ;;  %v4538_v60 = vadd.f32 %v4536_v17, %v4530_v15 }
 0x7de   :  { %v4541_v22 = vmul.f32 %v4539_v42, %v4539_v42  ;;  %v4540_v51 = vmul.f32 0.010204081, %v4538_v60 }
 0x7e0   :  { %v4542_v26 = vsub.f32 %v4540_v51, %v4541_v22 }
 0x7e2   :  { %v4543_v3 = vadd.f32 1e-05, %v4542_v26 }
 0x7e4   :  { %11517 = vrsqrt.f32 %v4543_v3 }
 0x7ee   :  { %v11518_v63 = vpop.eup %11517 }
 0x7ef   :  { %v13695_v8 = vmul.f32 %v11518_v63, %v4466_v53 }
 0x7f1   :  { %v4546_v6 = vmul.f32 %v13695_v8, %v4539_v42  ;;  %v4552_v56 = vrot.slane %v13695_v8, %v12390_v14 }
 0x7f3   :  { %4556 = vrot.lane.b32.xlu1 %v4552_v56, %s11656_s3  ;;  %4553 = vrot.lane.b32.xlu0 %v4552_v56, %s15601_s29  ;;  %v13705_v39 = vsub.f32 %v4467_v61, %v4546_v6 }
 0x7f5   :  { %v4581_v35 = vrot.slane %v13705_v39, %v12390_v14 }
 0x7f7   :  { %4559 = vrot.lane.b32.xlu0 %v4552_v56, %s11655_s25  ;;  %4582 = vrot.lane.b32.xlu1 %v4581_v35, %s15601_s29 }
 0x7fb   :  { %4562 = vrot.lane.b32.xlu0 %v4552_v56, %s11646_s4  ;;  %4585 = vrot.lane.b32.xlu1 %v4581_v35, %s11656_s3 }
 0x7ff   :  { %4565 = vrot.lane.b32.xlu0 %v4552_v56, %s11654_s2  ;;  %4588 = vrot.lane.b32.xlu1 %v4581_v35, %s11655_s25 }
 0x803   :  { %4568 = vrot.lane.b32.xlu0 %v4552_v56, %s11652_s12  ;;  %4591 = vrot.lane.b32.xlu1 %v4581_v35, %s11646_s4 }
 0x807   :  { %4594 = vrot.lane.b32.xlu0 %v4581_v35, %s11654_s2  ;;  %4597 = vrot.lane.b32.xlu1 %v4581_v35, %s11652_s12 }
 0x865   :  { %v4557_v57 = vpop.permute.xlu1 %4556  ;;  %v4554_v23 = vpop.permute.xlu0 %4553 }
 0x866   :  { %v4571_v33 = vsel %vm1137_vm15, %v13695_v8, %v4554_v23 }
 0x867   :  { %v4572_v50 = vsel %vm1139_vm0, %v4571_v33, %v4557_v57 }
 0x869   :  { %v4560_v18 = vpop.permute.xlu0 %4559  ;;  %v4583_v10 = vpop.permute.xlu1 %4582 }
 0x86a   :  { %v4573_v30 = vsel %vm15602_vm8, %v4572_v50, %v4560_v18  ;;  %v4600_v29 = vsel %vm1137_vm15, %v13705_v39, %v4583_v10  ;;  %vm15605_vm8 = vmmov %vm15603_vm9 }
 0x86d   :  { %v4563_v20 = vpop.permute.xlu0 %4562  ;;  %v4586_v1 = vpop.permute.xlu1 %4585 }
 0x86e   :  { %v4574_v19 = vsel %vm1143_vm13, %v4573_v30, %v4563_v20  ;;  %v4601_v49 = vsel %vm1139_vm0, %v4600_v29, %v4586_v1 }
 0x871   :  { %v4566_v34 = vpop.permute.xlu0 %4565  ;;  %v4589_v28 = vpop.permute.xlu1 %4588 }
 0x872   :  { %v4575_v47 = vsel %vm15603_vm9, %v4574_v19, %v4566_v34  ;;  %v4602_v9 = vsel %vm15604_vm7, %v4601_v49, %v4589_v28  ;;  %v11285_v19 = vld [vmem:[%s15466_s10 + $0x70] sm:$0xff]   ;;  %vm5509_vm7 = vcmask 909312   ;;  %vm5507_vm9 = vcmask 238592  }
 0x873   :  { %5510 = vst.msk [vmem:[#allocation5] sm:$0x1] %vm5509_vm7, %v15597_v31  ;;  %5511 = vst.msk [vmem:[#allocation5 + $0x10] sm:$0x1] %vm5509_vm7, %v15597_v31 }
 0x874   :  { %5512 = vst.msk [vmem:[#allocation5 + $0x8] sm:$0x1] %vm5509_vm7, %v15597_v31  ;;  %5513 = vst.msk [vmem:[#allocation5 + $0x18] sm:$0x1] %vm5509_vm7, %v15597_v31 }
 0x875   :  { %v4569_v48 = vpop.permute.xlu0 %4568  ;;  %v4592_v21 = vpop.permute.xlu1 %4591 }
 0x876   :  { %v4576_v16 = vsel %vm953_vm11, %v4575_v47, %v4569_v48  ;;  %v4603_v27 = vsel %vm1143_vm13, %v4602_v9, %v4592_v21 }
 0x877   :  { %v4609_v44 = vrot.slane %v4576_v16, %v12390_v14 }
 0x879   :  { %v4595_v41 = vpop.permute.xlu0 %4594  ;;  %v4598_v59 = vpop.permute.xlu1 %4597  ;;  %v4610_v2 = vmul.f32 %v4609_v44, %v13668_v52  ;;  %v4611_v15 = vmul.f32 %v4609_v44, %v13672_v43 }
 0x87a   :  { %v4604_v40 = vsel %vm15605_vm8, %v4603_v27, %v4595_v41  ;;  %vm5537_vm8 = vcmask 244736  }
 0x87b   :  { %v4605_v45 = vsel %vm953_vm11, %v4604_v40, %v4598_v59 }
 0x87c   :  { %v4615_v24 = vrot.slane %v4605_v45, %v12390_v14 }
 0x87e   :  { %v4616_v17 = vadd.f32 %v4615_v24, %v4610_v2  ;;  %v4617_v42 = vadd.f32 %v4615_v24, %v4611_v15  ;;  %v11287_v15 = vld [vmem:[%s15466_s10 + $0x78] sm:$0xff]  }
 0x880   :  { %11519 = vtanh.f32 %v4616_v17 }
 0x881   :  { %11521 = vtanh.f32 %v4617_v42 }
 0x88a   :  { %v11520_v60 = vpop.eup %11519 }
 0x88b   :  { %v11522_v22 = vpop.eup %11521  ;;  %v4622_v51 = vcombine.high %v11520_v60, %v11520_v60  ;;  %v4629_v26 = vrot.slane %v11520_v60, %v13471_v12 }
 0x88c   :  { %v4671_v3 = vcombine.high %v11522_v22, %v11522_v22  ;;  %v4678_v53 = vrot.slane %v11522_v22, %v13471_v12 }
 0x88d   :  { %v4636_v63 = vrot.slane %v4622_v51, %v13471_v12  ;;  %v4637_v8 = vcombine.high %v4629_v26, %v4629_v26  ;;  %v4645_v52 = vrot.slane %v4629_v26, %v13471_v12  ;;  %v11288_v51 = vld [vmem:[%s15466_s10 + $0xa8] sm:$0xff]  }
 0x88e   :  { %v4686_v43 = vcombine.high %v4678_v53, %v4678_v53  ;;  %v4694_v61 = vrot.slane %v4678_v53, %v13471_v12  ;;  %v4685_v56 = vrot.slane %v4671_v3, %v13471_v12 }
 0x88f   :  { %v4638_v6 = vcombine.high %v4636_v63, %v4636_v63  ;;  %v4659_v39 = vrot.slane %v4637_v8, %v13471_v12  ;;  %v4667_v35 = vcombine.high %v4645_v52, %v4645_v52  ;;  %v4746_v62 = vpack.c.bf16 %v4645_v52, %v4645_v52  ;;  %v11289_v8 = vld [vmem:[%s15466_s10 + $0x80] sm:$0xff]  }
 0x890   :  { %v4764_v11 = vpack.c.bf16 %v4694_v61, %v4694_v61  ;;  %v4708_v13 = vrot.slane %v4686_v43, %v13471_v12  ;;  %v4716_v58 = vcombine.high %v4694_v61, %v4694_v61  ;;  %v4652_v32 = vrot.slane %v4636_v63, %v13471_v12 }
 0x891   :  { %v4763_v5 = vpack.c.bf16 %v4659_v39, %v4659_v39  ;;  %v4666_v4 = vrot.slane %v4638_v6, %v13471_v12  ;;  %v4964_v36 = vpack.c.bf16 %v4667_v35, %v4667_v35  ;;  %v4669_v46 = vcombine.high %v4659_v39, %v4659_v39  ;;  %v11290_v6 = vld [vmem:[%s15466_s10 + $0xb0] sm:$0xff]   ;;  %v11291_v39 = vld [vmem:[%s15466_s10 + $0x88] sm:$0xff]  }
 0x892   :  { %v4768_v54 = vunpack.c.l.b16 %v4764_v11  ;;  %v4965_v55 = vpack.c.bf16 %v4708_v13, %v4708_v13  ;;  %v5075_v25 = vpack.c.bf16 %v4716_v58, %v4716_v58  ;;  %v4717_v23 = vcombine.high %v4708_v13, %v4708_v13  ;;  %v11293_v58 = vld [vmem:[%s15466_s10 + $0x90] sm:$0xff]  }
 0x893   :  { %v4767_v0 = vunpack.c.l.b16 %v4763_v5  ;;  %v4670_v7 = vcombine.high %v4666_v4, %v4666_v4  ;;  %v4968_v57 = vunpack.c.l.b16 %v4964_v36  ;;  %v5074_v20 = vpack.c.bf16 %v4669_v46, %v4669_v46  ;;  %v11294_v5 = vld [vmem:[%s15466_s10 + $0xc0] sm:$0xff]   ;;  %v11296_v36 = vld [vmem:[%s15466_s10 + $0xc8] sm:$0xff]  }
 0x894   :  { %v4769_v18 = vrot.slane %v4768_v54, 7  ;;  %v4969_v10 = vunpack.c.l.b16 %v4965_v55  ;;  %v5079_v1 = vunpack.c.l.b16 %v5075_v25  ;;  %v5184_v34 = vpack.c.bf16 %v4652_v32, %v4652_v32  ;;  %v11298_v54 = vld [vmem:[%s15466_s10 + $0xd0] sm:$0xff]   ;;  %v11299_v55 = vld [vmem:[%s15466_s10 + $0xe0] sm:$0xff]   ;;  %v11300_v25 = vld [vmem:[%s15466_s10 + $0xd8] sm:$0xff]  }
 0x895   :  { %v4747_v33 = vpack.c.bf16 %v4670_v7, %v4670_v7  ;;  %v5185_v28 = vpack.c.bf16 %v4717_v23, %v4717_v23  ;;  %v4701_v50 = vrot.slane %v4685_v56, %v13471_v12  ;;  %v5078_v48 = vunpack.c.l.b16 %v5074_v20  ;;  %v11302_v7 = vld [vmem:[%s15466_s10 + $0x118] sm:$0xff]   ;;  %v11303_v23 = vld [vmem:[%s15466_s10 + $0xf0] sm:$0xff]   ;;  %v11306_v20 = vld [vmem:[%s15466_s10 + $0x128] sm:$0xff]  }
 0x896   :  { %v4770_v30 = vsel %vm391_vm4, %v4769_v18, %v4767_v0  ;;  %v4970_v47 = vrot.slane %v4969_v10, 7  ;;  %v5080_v21 = vrot.slane %v5079_v1, 7  ;;  %v5294_v27 = vpack.c.bf16 %v4666_v4, %v4666_v4  ;;  %v11295_v4 = vld [vmem:[%s15466_s10 + $0x98] sm:$0xff]   ;;  %v11301_v0 = vld [vmem:[%s15466_s10 + $0xe8] sm:$0xff]   ;;  %v11304_v18 = vld [vmem:[%s15466_s10 + $0x120] sm:$0xff]  }
 0x897   :  { %v4771_v29 = vpack.c.b16 %v4770_v30, %v4770_v30  ;;  %v4860_v16 = vunpack.c.l.b16 %v4747_v33  ;;  %v5189_v49 = vunpack.c.l.b16 %v5185_v28  ;;  %v5295_v41 = vpack.c.bf16 %v4701_v50, %v4701_v50  ;;  %v11305_v10 = vld [vmem:[%s15466_s10 + $0xf8] sm:$0xff]   ;;  %v11307_v1 = vld [vmem:[%s15466_s10 + $0x100] sm:$0xff]   ;;  %v11308_v33 = vld [vmem:[%s15466_s10 + $0x130] sm:$0xff]  }
 0x898   :  { %v13813_v9 = vsel %vm391_vm4, %v4970_v47, %v4968_v57  ;;  %v13816_v44 = vsel %vm391_vm4, %v5080_v21, %v5078_v48  ;;  %v4859_v59 = vunpack.c.l.b16 %v4746_v62  ;;  %v5188_v45 = vunpack.c.l.b16 %v5184_v34  ;;  %v11292_v62 = vld [vmem:[%s15466_s10 + $0xb8] sm:$0xff]   ;;  %v11309_v34 = vld [vmem:[%s15466_s10 + $0x108] sm:$0xff]   ;;  %v11311_v50 = vld [vmem:[%s15466_s10 + $0x110] sm:$0xff]  }
 0x899   :  { %10776 = vmatmul.mubr.msk.bf16.vlgmr.msra.gmra.mrb[12].mxu0 %vm1148_vm3, %v4771_v29  ;;  %v4861_v40 = vrot.slane %v4860_v16, 7  ;;  %v5190_v2 = vrot.slane %v5189_v49, 7  ;;  %v5298_v24 = vunpack.c.l.b16 %v5294_v27  ;;  %v5299_v17 = vunpack.c.l.b16 %v5295_v41  ;;  %v11310_v28 = vld [vmem:[%s15466_s10 + $0x138] sm:$0xff]   ;;  %v11312_v30 = vld [vmem:[%s15466_s10 + $0x140] sm:$0xff]   ;;  %v11314_v48 = vld [vmem:[%s15466_s10 + $0x148] sm:$0xff]  }
 0x89a   :  { %10798 = vmatpush3.bf16.msra.mxu0 %v11285_v19  ;;  %10811 = vmatprep.mubr.msk.bf16.mxu0 %vm11659_vm10, %v15597_v31  ;;  %v4668_v42 = vcombine.high %v4652_v32, %v4652_v32  ;;  %v4687_v60 = vcombine.high %v4685_v56, %v4685_v56  ;;  %v11297_v32 = vld [vmem:[%s15466_s10 + $0xa0] sm:$0xff]   ;;  %v4972_v46 = vpack.c.b16 %v13813_v9, %v13813_v9  ;;  %v11313_v19 = vld [vmem:[%s15466_s10 + $0x150] sm:$0xff]   ;;  %v11315_v21 = vld [vmem:[%s15466_s10 + $0x158] sm:$0xff]  }
 0x89b   :  { %10799 = vmatprep.subr.bf16.mxu0 %v15597_v31  ;;  %v4862_v22 = vsel %vm391_vm4, %v4861_v40, %v4859_v59  ;;  %v13830_v26 = vsel %vm391_vm4, %v5190_v2, %v5188_v45  ;;  %v5300_v53 = vrot.slane %v5299_v17, 7  ;;  %v5082_v57 = vpack.c.b16 %v13816_v44, %v13816_v44  ;;  %v11316_v16 = vld [vmem:[%s15466_s10 + $0x160] sm:$0xff]   ;;  %v11317_v49 = vld [vmem:[%s15466_s10 + $0x168] sm:$0xff]   ;;  %v11318_v9 = vld [vmem:[%s15466_s10 + $0x170] sm:$0xff]  }
 0x89c   :  { %v4863_v3 = vpack.c.b16 %v4862_v22, %v4862_v22  ;;  %v4715_v63 = vrot.slane %v4687_v60, %v13471_v12  ;;  %v5404_v43 = vpack.c.bf16 %v4668_v42, %v4668_v42  ;;  %v5192_v47 = vpack.c.b16 %v13830_v26, %v13830_v26  ;;  %v11319_v44 = vld [vmem:[%s15466_s10 + $0x178] sm:$0xff]   ;;  %v11320_v27 = vld [vmem:[%s15466_s10 + $0x180] sm:$0xff]   ;;  %v11321_v59 = vld [vmem:[#allocation10] sm:$0xff]  }
 0x89d   :  { %v13838_v52 = vsel %vm391_vm4, %v5300_v53, %v5298_v24  ;;  %v11322_v40 = vld [vmem:[#allocation10 + $0x40] sm:$0xff]   ;;  %v11323_v45 = vld [vmem:[#allocation10 + $0x8] sm:$0x7f]  }
 0x89e   :  { %10800 = vmatpush3.bf16.msra.mxu0 %v11287_v15  ;;  %10794 = vmatmul.mubr.msk.bf16.vlgmr.msra.gmra.mrb[4].mxu1 %vm1148_vm3, %v4863_v3  ;;  %v5405_v61 = vpack.c.bf16 %v4715_v63, %v4715_v63  ;;  %v5408_v35 = vunpack.c.l.b16 %v5404_v43  ;;  %v5302_v29 = vpack.c.b16 %v13838_v52, %v13838_v52  ;;  %v11324_v2 = vld [vmem:[#allocation10 + $0x48] sm:$0x7f]  }
 0x89f   :  { %10816 = vmatpush3.bf16.msra.mxu1 %v11288_v51  ;;  %10801 = vmatprep.subr.bf16.mxu0 %v15597_v31 }
 0x8a0   :  { %10817 = vmatprep.subr.bf16.mxu1 %v15597_v31  ;;  %10829 = vmatprep.mubr.msk.bf16.mxu1 %vm11659_vm10, %v15597_v31  ;;  %v5409_v56 = vunpack.c.l.b16 %v5405_v61 }
 0x8a2   :  { %10802 = vmatpush3.bf16.msra.mxu0 %v11289_v8  ;;  %v5410_v11 = vrot.slane %v5409_v56, 7 }
 0x8a3   :  { %10818 = vmatpush3.bf16.msra.mxu1 %v11290_v6  ;;  %10803 = vmatprep.subr.bf16.mxu0 %v15597_v31 }
 0x8a4   :  { %10819 = vmatprep.subr.bf16.mxu1 %v15597_v31  ;;  %v13856_v13 = vsel %vm391_vm4, %v5410_v11, %v5408_v35  ;;  %vm5541_vm4 = vcmask 1046528  }
 0x8a5   :  { %v5412_v41 = vpack.c.b16 %v13856_v13, %v13856_v13  ;;  %v5543_v15 = vsel %vm5541_vm4, %v11323_v45, 0  ;;  %v5919_v24 = vsel %vm5541_vm4, %v11324_v2, 0  ;;  %v11343_v45 = vld [vmem:[%s15470_s14 + $0x84] ss:$8 sps:$4 sm:$0xff]  }
 0x8a6   :  { %10804 = vmatpush3.bf16.msra.mxu0 %v11291_v39  ;;  %v11346_v2 = vld [vmem:[%s15470_s14 + $0x164] ss:$8 sps:$4 sm:$0xff]  }
 0x8a7   :  { %10820 = vmatpush3.bf16.msra.mxu1 %v11292_v62  ;;  %10805 = vmatprep.subr.bf16.mxu0 %v15597_v31 }
 0x8a8   :  { %10821 = vmatprep.subr.bf16.mxu1 %v15597_v31 }
 0x8aa   :  { %10806 = vmatpush3.bf16.msra.mxu0 %v11293_v58 }
 0x8ab   :  { %10822 = vmatpush3.bf16.msra.mxu1 %v11294_v5  ;;  %10807 = vmatprep.subr.bf16.mxu0 %v15597_v31 }
 0x8ac   :  { %10823 = vmatprep.subr.bf16.mxu1 %v15597_v31 }
 0x8ae   :  { %10808 = vmatpush3.bf16.msra.mxu0 %v11295_v4 }
 0x8af   :  { %10824 = vmatpush3.bf16.msra.mxu1 %v11296_v36  ;;  %10809 = vmatprep.subr.bf16.mxu0 %v15597_v31 }
 0x8b0   :  { %10825 = vmatprep.subr.bf16.mxu1 %v15597_v31 }
 0x8b2   :  { %10810 = vmatpush3.bf16.msra.mxu0 %v11297_v32 }
 0x8b3   :  { %10826 = vmatpush3.bf16.msra.mxu1 %v11298_v54  ;;  %10833 = vmatprep.subr.bf16.mxu0 %v15597_v31 }
 0x8b4   :  { %10827 = vmatprep.subr.bf16.mxu1 %v15597_v31 }
 0x8b5   :  { %10812 = vmatmul.mubr.msk.bf16.vlgmr.msra.gmra.mrb[16].mxu0 %vm1148_vm3, %v4972_v46 }
 0x8b6   :  { %10834 = vmatpush3.bf16.msra.mxu0 %v11299_v55  ;;  %10847 = vmatprep.mubr.msk.bf16.mxu0 %vm11659_vm10, %v15597_v31 }
 0x8b7   :  { %10828 = vmatpush3.bf16.msra.mxu1 %v11300_v25  ;;  %10835 = vmatprep.subr.bf16.mxu0 %v15597_v31 }
 0x8b8   :  { %10851 = vmatprep.subr.bf16.mxu1 %v15597_v31 }
 0x8ba   :  { %10836 = vmatpush3.bf16.msra.mxu0 %v11301_v0  ;;  %10830 = vmatmul.mubr.msk.bf16.vlgmr.msra.gmra.mrb[8].mxu1 %vm1148_vm3, %v5082_v57 }
 0x8bb   :  { %10852 = vmatpush3.bf16.msra.mxu1 %v11302_v7  ;;  %10837 = vmatprep.subr.bf16.mxu0 %v15597_v31  ;;  %v10381_v7 = vld [vmem:[%s15467_s11] ss:$0 sm:$0xff] }
 0x8bc   :  { %10853 = vmatprep.subr.bf16.mxu1 %v15597_v31  ;;  %10865 = vmatprep.mubr.msk.bf16.mxu1 %vm11659_vm10, %v15597_v31 }
 0x8be   :  { %10838 = vmatpush3.bf16.msra.mxu0 %v11303_v23 }
 0x8bf   :  { %10854 = vmatpush3.bf16.msra.mxu1 %v11304_v18  ;;  %10839 = vmatprep.subr.bf16.mxu0 %v15597_v31 }
 0x8c0   :  { %10855 = vmatprep.subr.bf16.mxu1 %v15597_v31 }
 0x8c2   :  { %10840 = vmatpush3.bf16.msra.mxu0 %v11305_v10 }
 0x8c3   :  { %10856 = vmatpush3.bf16.msra.mxu1 %v11306_v20  ;;  %10841 = vmatprep.subr.bf16.mxu0 %v15597_v31 }
 0x8c4   :  { %10857 = vmatprep.subr.bf16.mxu1 %v15597_v31 }
 0x8c6   :  { %10842 = vmatpush3.bf16.msra.mxu0 %v11307_v1  ;;  %v11325_v1 = vld [vmem:[#allocation10 + $0x10] sm:$0xff]  }
 0x8c7   :  { %10858 = vmatpush3.bf16.msra.mxu1 %v11308_v33  ;;  %10843 = vmatprep.subr.bf16.mxu0 %v15597_v31  ;;  %v11326_v33 = vld [vmem:[#allocation10 + $0x60] sm:$0xff]  }
 0x8c8   :  { %10859 = vmatprep.subr.bf16.mxu1 %v15597_v31 }
 0x8ca   :  { %10844 = vmatpush3.bf16.msra.mxu0 %v11309_v34 }
 0x8cb   :  { %10860 = vmatpush3.bf16.msra.mxu1 %v11310_v28  ;;  %10845 = vmatprep.subr.bf16.mxu0 %v15597_v31  ;;  %v11327_v28 = vld [vmem:[#allocation10 + $0x18] sm:$0x7f]  }
 0x8cc   :  { %10861 = vmatprep.subr.bf16.mxu1 %v15597_v31 }
 0x8ce   :  { %10846 = vmatpush3.bf16.msra.mxu0 %v11311_v50  ;;  %v11328_v50 = vld [vmem:[#allocation10 + $0x68] sm:$0x7f]  }
 0x8cf   :  { %10862 = vmatpush3.bf16.msra.mxu1 %v11312_v30  ;;  %10869 = vmatprep.subr.bf16.mxu0 %v15597_v31  ;;  %v5637_v30 = vsel %vm5541_vm4, %v11327_v28, 0 }
 0x8d0   :  { %10863 = vmatprep.subr.bf16.mxu1 %v15597_v31 }
 0x8d1   :  { %10848 = vmatmul.mubr.msk.bf16.vlgmr.msra.gmra.mrb[20].mxu0 %vm1148_vm3, %v5192_v47  ;;  %v11329_v47 = vld [vmem:[#allocation10 + $0x20] sm:$0xff]  }
 0x8d2   :  { %10870 = vmatpush3.bf16.msra.mxu0 %v11313_v19  ;;  %10883 = vmatprep.mubr.msk.bf16.mxu0 %vm11659_vm10, %v15597_v31  ;;  %v6107_v19 = vsel %vm5541_vm4, %v11328_v50, 0  ;;  %v10387_v50 = vld [vmem:[%s15469_s13 + $0x1] ss:$0 sm:$0xff] }
 0x8d3   :  { %10864 = vmatpush3.bf16.msra.mxu1 %v11314_v48  ;;  %10871 = vmatprep.subr.bf16.mxu0 %v15597_v31  ;;  %v11330_v48 = vld [vmem:[#allocation10 + $0x28] sm:$0x7f]  }
 0x8d4   :  { %10887 = vmatprep.subr.bf16.mxu1 %v15597_v31 }
 0x8d6   :  { %10872 = vmatpush3.bf16.msra.mxu0 %v11315_v21  ;;  %10866 = vmatmul.mubr.msk.bf16.vlgmr.msra.gmra.mrb[12].mxu1 %vm1148_vm3, %v5302_v29  ;;  %v5731_v21 = vsel %vm5541_vm4, %v11330_v48, 0  ;;  %v11331_v29 = vld [vmem:[#allocation10 + $0x30] sm:$0xff]  }
 0x8d7   :  { %10873 = vmatprep.subr.bf16.mxu0 %v15597_v31  ;;  %10891 = vmatprep.mubr.msk.bf16.mxu1 %vm11659_vm10, %v15597_v31 }
 0x8d8   :  { %10888 = vmatpush3.bf16.msra.mxu1 %v11321_v59  ;;  %v11337_v59 = vld [vmem:[%s15470_s14 + $0x74] ss:$8 sps:$4 sm:$0xff]  }
 0x8d9   :  { %10889 = vmatprep.subr.bf16.mxu1 %v15597_v31 }
 0x8da   :  { %10874 = vmatpush3.bf16.msra.mxu0 %v11316_v16  ;;  %v11332_v16 = vld [vmem:[#allocation10 + $0x38] sm:$0x7f]  }
 0x8db   :  { %10875 = vmatprep.subr.bf16.mxu0 %v15597_v31 }
 0x8dc   :  { %10890 = vmatpush3.bf16.msra.mxu1 %v5543_v15  ;;  %v11341_v15 = vld [vmem:[%s15470_s14 + $0x80] ss:$8 sps:$4 sm:$0xff]  }
 0x8dd   :  { %10895 = vmatprep.subr.bf16.mxu1 %v15597_v31 }
 0x8de   :  { %10876 = vmatpush3.bf16.msra.mxu0 %v11317_v49  ;;  %v5825_v49 = vsel %vm5541_vm4, %v11332_v16, 0 }
 0x8df   :  { %10877 = vmatprep.subr.bf16.mxu0 %v15597_v31 }
 0x8e2   :  { %10878 = vmatpush3.bf16.msra.mxu0 %v11318_v9  ;;  %v11333_v9 = vld [vmem:[#allocation10 + $0x50] sm:$0xff]  }
 0x8e3   :  { %10879 = vmatprep.subr.bf16.mxu0 %v15597_v31 }
 0x8e6   :  { %10880 = vmatpush3.bf16.msra.mxu0 %v11319_v44  ;;  %v11334_v44 = vld [vmem:[#allocation10 + $0x58] sm:$0x7f]  }
 0x8e7   :  { %10881 = vmatprep.subr.bf16.mxu0 %v15597_v31 }
 0x8ea   :  { %10882 = vmatpush3.bf16.msra.mxu0 %v11320_v27  ;;  %v6013_v27 = vsel %vm5541_vm4, %v11334_v44, 0 }
 0x8eb   :  { %10919 = vmatprep.subr.bf16.mxu0 %v15597_v31 }
 0x8ed   :  { %10884 = vmatmul.mubr.msk.bf16.vlgmr.msra.gmra.mrb[24].mxu0 %vm1148_vm3, %v5412_v41  ;;  %v11335_v41 = vld [vmem:[%s15470_s14 + $0x70] ss:$8 sps:$4 sm:$0xff]  }
 0x8ee   :  { %10923 = vmatprep.mubr.msk.bf16.mxu0 %vm11659_vm10, %v15597_v31  ;;  %10920 = vmatpush3.bf16.msra.mxu0 %v11322_v40  ;;  %v11338_v40 = vld [vmem:[%s15470_s14 + $0x150] ss:$8 sps:$4 sm:$0xff]  }
 0x8ef   :  { %10921 = vmatprep.subr.bf16.mxu0 %v15597_v31 }
 0x8f2   :  { %10922 = vmatpush3.bf16.msra.mxu0 %v5919_v24  ;;  %v11344_v24 = vld [vmem:[%s15470_s14 + $0x160] ss:$8 sps:$4 sm:$0xff]  }
 0x8f3   :  { %10935 = vmatprep.subr.bf16.mxu0 %v15597_v31 }
 0x96c   :  { %v4851_v17 = vpop.f32.mrb[12].mxu0 }
 0x96d   :  { %v10777_v42 = vpop.f32.mrb[13].mxu0 }
 0x96e   :  { %v4854_v60 = vpop.f32.mrb[14].mxu0  ;;  %v11352_v42 = vld [vmem:[%s15470_s14 + $0x174] ss:$8 sps:$4 sm:$0xff]  }
 0x96f   :  { %v10778_v22 = vpop.f32.mrb[15].mxu0  ;;  %v11347_v60 = vld [vmem:[%s15470_s14 + $0x90] ss:$8 sps:$4 sm:$0xff]  }
 0x970   :  { %v11350_v22 = vld [vmem:[%s15470_s14 + $0x170] ss:$8 sps:$4 sm:$0xff]  }
 0x971   :  { %v4943_v51 = vpop.f32.mrb[4].mxu1 }
 0x972   :  { %v4944_v26 = vadd.f32 %v4943_v51, %v4851_v17  ;;  %v10795_v3 = vpop.f32.mrb[5].mxu1  ;;  %v11349_v17 = vld [vmem:[%s15470_s14 + $0x94] ss:$8 sps:$4 sm:$0xff]   ;;  %v11355_v51 = vld [vmem:[%s15470_s14 + $0xa4] ss:$8 sps:$4 sm:$0xff]  }
 0x973   :  { %v4946_v53 = vpop.f32.mrb[6].mxu1  ;;  %v11353_v3 = vld [vmem:[%s15470_s14 + $0xa0] ss:$8 sps:$4 sm:$0xff]  }
 0x974   :  { %v10796_v63 = vpop.f32.mrb[7].mxu1  ;;  %v11356_v53 = vld [vmem:[%s15470_s14 + $0x180] ss:$8 sps:$4 sm:$0xff]  }
 0x975   :  { %v11361_v63 = vld [vmem:[%s15470_s14 + $0xb4] ss:$8 sps:$4 sm:$0xff]  }
 0x988   :  { %v5052_v8 = vpop.f32.mrb[16].mxu0 }
 0x989   :  { %v5058_v52 = vadd.f32 %v5052_v8, %v4944_v26  ;;  %v10813_v43 = vpop.f32.mrb[17].mxu0  ;;  %v11358_v26 = vld [vmem:[%s15470_s14 + $0x184] ss:$8 sps:$4 sm:$0xff]   ;;  %v11364_v8 = vld [vmem:[%s15470_s14 + $0x194] ss:$8 sps:$4 sm:$0xff]  }
 0x98a   :  { %v5055_v61 = vpop.f32.mrb[18].mxu0  ;;  %v11362_v43 = vld [vmem:[%s15470_s14 + $0x190] ss:$8 sps:$4 sm:$0xff]  }
 0x98b   :  { %v10814_v6 = vpop.f32.mrb[19].mxu0  ;;  %v11367_v61 = vld [vmem:[%s15470_s14 + $0xc4] ss:$8 sps:$4 sm:$0xff]  }
 0x98c   :  { %v11370_v6 = vld [vmem:[%s15470_s14 + $0x1a4] ss:$8 sps:$4 sm:$0xff]  }
 0x98d   :  { %v5162_v56 = vpop.f32.mrb[8].mxu1 }
 0x98e   :  { %v5168_v39 = vadd.f32 %v5162_v56, %v5058_v52  ;;  %v10831_v35 = vpop.f32.mrb[9].mxu1  ;;  %v11359_v52 = vld [vmem:[%s15470_s14 + $0xb0] ss:$8 sps:$4 sm:$0xff]   ;;  %v11365_v56 = vld [vmem:[%s15470_s14 + $0xc0] ss:$8 sps:$4 sm:$0xff]  }
 0x98f   :  { %v5165_v11 = vpop.f32.mrb[10].mxu1  ;;  %v11373_v35 = vld [vmem:[%s15470_s14 + $0xd4] ss:$8 sps:$4 sm:$0xff]  }
 0x990   :  { %v10832_v62 = vpop.f32.mrb[11].mxu1  ;;  %v11376_v11 = vld [vmem:[%s15470_s14 + $0x1b4] ss:$8 sps:$4 sm:$0xff]  }
 0x991   :  { %v11371_v62 = vld [vmem:[%s15470_s14 + $0xd0] ss:$8 sps:$4 sm:$0xff]  }
 0x9a4   :  { %v5272_v13 = vpop.f32.mrb[20].mxu0 }
 0x9a5   :  { %v5278_v58 = vadd.f32 %v5272_v13, %v5168_v39  ;;  %v10849_v5 = vpop.f32.mrb[21].mxu0  ;;  %v11368_v39 = vld [vmem:[%s15470_s14 + $0x1a0] ss:$8 sps:$4 sm:$0xff]   ;;  %v11374_v13 = vld [vmem:[%s15470_s14 + $0x1b0] ss:$8 sps:$4 sm:$0xff]  }
 0x9a6   :  { %v5275_v4 = vpop.f32.mrb[22].mxu0  ;;  %v11382_v5 = vld [vmem:[%s15470_s14 + $0xe4] ss:$8 sps:$4 sm:$0xff]  }
 0x9a7   :  { %v10850_v36 = vpop.f32.mrb[23].mxu0  ;;  %v10382_v4 = vld [vmem:[%s15469_s13] ss:$0 sm:$0xff] }
 0x9a8   :  { %v10402_v36 = vld [vmem:[%s15469_s13 + $0x4] ss:$0 sm:$0xff] }
 0x9a9   :  { %v5382_v32 = vpop.f32.mrb[12].mxu1 }
 0x9aa   :  { %v5388_v54 = vadd.f32 %v5382_v32, %v5278_v58  ;;  %v10867_v55 = vpop.f32.mrb[13].mxu1  ;;  %v11379_v58 = vld [vmem:[%s15470_s14 + $0x4] ss:$8 sps:$4 sm:$0xff]  }
 0x9ab   :  { %v5385_v46 = vpop.f32.mrb[14].mxu1 }
 0x9ac   :  { %v10868_v25 = vpop.f32.mrb[15].mxu1 }
 0x9c0   :  { %v5492_v0 = vpop.f32.mrb[24].mxu0 }
 0x9c1   :  { %v5498_v57 = vadd.f32 %v5492_v0, %v5388_v54  ;;  %v10885_v23 = vpop.f32.mrb[25].mxu0 }
 0x9c2   :  { %v5495_v18 = vpop.f32.mrb[26].mxu0 }
 0x9c3   :  { %v5506_v10 = vadd.f32 %v10381_v7, %v5498_v57  ;;  %v10886_v20 = vpop.f32.mrb[27].mxu0 }
 0x9c5   :  { %v5518_v34 = vpack.c.bf16 %v5506_v10, %v5506_v10  ;;  %5508 = vst.msk [vmem:[#allocation12] sm:$0x3] %vm5507_vm9, %v5506_v10 }
 0x9c7   :  { %10892 = vmatmul.mubr.msk.bf16.vlgmr.msra.gmra.mrb[16].mxu1 %vm5537_vm8, %v5518_v34  ;;  %10924 = vmatmul.mubr.msk.bf16.vlgmr.msra.gmra.mrb[28].mxu0 %vm5537_vm8, %v5518_v34 }
 0x9c8   :  { %10896 = vmatpush3.bf16.msra.mxu1 %v11325_v1  ;;  %10936 = vmatpush3.bf16.msra.mxu0 %v11326_v33 }
 0x9c9   :  { %10897 = vmatprep.subr.bf16.mxu1 %v15597_v31  ;;  %10937 = vmatprep.subr.bf16.mxu0 %v15597_v31 }
 0x9ca   :  { %10899 = vmatprep.mubr.msk.bf16.mxu1 %vm11659_vm10, %v15597_v31  ;;  %10939 = vmatprep.mubr.msk.bf16.mxu0 %vm11659_vm10, %v15597_v31 }
 0x9cc   :  { %10898 = vmatpush3.bf16.msra.mxu1 %v5637_v30  ;;  %10938 = vmatpush3.bf16.msra.mxu0 %v6107_v19  ;;  %v10412_v30 = vld [vmem:[%s15469_s13 + $0x6] ss:$0 sm:$0xff] }
 0x9cd   :  { %10903 = vmatprep.subr.bf16.mxu1 %v15597_v31 }
 0x9cf   :  { %10900 = vmatmul.mubr.msk.bf16.vlgmr.msra.gmra.mrb[20].mxu1 %vm5537_vm8, %v5518_v34  ;;  %10940 = vmatmul.mubr.msk.bf16.vlgmr.msra.gmra.mrb[32].mxu0 %vm5537_vm8, %v5518_v34 }
 0x9d0   :  { %10904 = vmatpush3.bf16.msra.mxu1 %v11329_v47  ;;  %10907 = vmatprep.mubr.msk.bf16.mxu1 %vm11659_vm10, %v15597_v31 }
 0x9d1   :  { %10905 = vmatprep.subr.bf16.mxu1 %v15597_v31  ;;  %6947 = vmatprep.mubr.bf16.mxu0 %v15598_v38 }
 0x9d4   :  { %10906 = vmatpush3.bf16.msra.mxu1 %v5731_v21 }
 0x9d5   :  { %10911 = vmatprep.subr.bf16.mxu1 %v15597_v31 }
 0x9d7   :  { %10908 = vmatmul.mubr.msk.bf16.vlgmr.msra.gmra.mrb[24].mxu1 %vm5537_vm8, %v5518_v34 }
 0x9d8   :  { %10912 = vmatpush3.bf16.msra.mxu1 %v11331_v29  ;;  %10915 = vmatprep.mubr.msk.bf16.mxu1 %vm11659_vm10, %v15597_v31 }
 0x9d9   :  { %10913 = vmatprep.subr.bf16.mxu1 %v15597_v31 }
 0x9dc   :  { %10914 = vmatpush3.bf16.msra.mxu1 %v5825_v49 }
 0x9dd   :  { %10927 = vmatprep.subr.bf16.mxu1 %v15597_v31 }
 0x9df   :  { %10916 = vmatmul.mubr.msk.bf16.vlgmr.msra.gmra.mrb[28].mxu1 %vm5537_vm8, %v5518_v34 }
 0x9e0   :  { %10928 = vmatpush3.bf16.msra.mxu1 %v11333_v9  ;;  %10931 = vmatprep.mubr.msk.bf16.mxu1 %vm11659_vm10, %v15597_v31 }
 0x9e1   :  { %10929 = vmatprep.subr.bf16.mxu1 %v15597_v31  ;;  %v11340_v31 = vld [vmem:[%s15470_s14 + $0x154] ss:$8 sps:$4 sm:$0xff]  }
 0x9e2   :  { %6915 = vmatprep.subr.bf16.mxu0 %v11340_v31 }
 0x9e3   :  { %6916 = vmatpush1.bf16.msra.mxu0 %v11338_v40 }
 0x9e4   :  { %10930 = vmatpush3.bf16.msra.mxu1 %v6013_v27  ;;  %6917 = vmatprep.subr.bf16.mxu0 %v11346_v2 }
 0x9e5   :  { %6566 = vmatprep.subr.bf16.mxu1 %v11337_v59 }
 0x9e7   :  { %10932 = vmatmul.mubr.msk.bf16.vlgmr.msra.gmra.mrb[32].mxu1 %vm5537_vm8, %v5518_v34  ;;  %6918 = vmatpush1.bf16.msra.mxu0 %v11344_v24 }
 0x9e8   :  { %6598 = vmatprep.mubr.bf16.mxu1 %v15598_v38  ;;  %6567 = vmatpush1.bf16.msra.mxu1 %v11335_v41 }
 0x9e9   :  { %6568 = vmatprep.subr.bf16.mxu1 %v11343_v45  ;;  %6919 = vmatprep.subr.bf16.mxu0 %v11352_v42 }
 0x9eb   :  { %6920 = vmatpush1.bf16.msra.mxu0 %v11350_v22 }
 0x9ec   :  { %6569 = vmatpush1.bf16.msra.mxu1 %v11341_v15  ;;  %6921 = vmatprep.subr.bf16.mxu0 %v11358_v26 }
 0x9ed   :  { %6570 = vmatprep.subr.bf16.mxu1 %v11349_v17  ;;  %v10392_v17 = vld [vmem:[%s15469_s13 + $0x2] ss:$0 sm:$0xff] }
 0x9ef   :  { %6922 = vmatpush1.bf16.msra.mxu0 %v11356_v53 }
 0x9f0   :  { %6571 = vmatpush1.bf16.msra.mxu1 %v11347_v60  ;;  %6923 = vmatprep.subr.bf16.mxu0 %v11364_v8 }
 0x9f1   :  { %6572 = vmatprep.subr.bf16.mxu1 %v11355_v51 }
 0x9f3   :  { %6924 = vmatpush1.bf16.msra.mxu0 %v11362_v43  ;;  %v10397_v43 = vld [vmem:[%s15469_s13 + $0x3] ss:$0 sm:$0xff] }
 0x9f4   :  { %6573 = vmatpush1.bf16.msra.mxu1 %v11353_v3  ;;  %6925 = vmatprep.subr.bf16.mxu0 %v11370_v6 }
 0x9f5   :  { %6574 = vmatprep.subr.bf16.mxu1 %v11361_v63 }
 0x9f7   :  { %6926 = vmatpush1.bf16.msra.mxu0 %v11368_v39 }
 0x9f8   :  { %6575 = vmatpush1.bf16.msra.mxu1 %v11359_v52  ;;  %6927 = vmatprep.subr.bf16.mxu0 %v11376_v11 }
 0x9f9   :  { %6576 = vmatprep.subr.bf16.mxu1 %v11367_v61 }
 0x9fb   :  { %6928 = vmatpush1.bf16.msra.mxu0 %v11374_v13 }
 0x9fc   :  { %6577 = vmatpush1.bf16.msra.mxu1 %v11365_v56  ;;  %7031 = vmatprep.subr.bf16.mxu0 %v11382_v5  ;;  %v10407_v5 = vld [vmem:[%s15469_s13 + $0x5] ss:$0 sm:$0xff] }
 0x9fd   :  { %6578 = vmatprep.subr.bf16.mxu1 %v11373_v35 }
 0xa00   :  { %6579 = vmatpush1.bf16.msra.mxu1 %v11371_v62 }
 0xa01   :  { %6682 = vmatprep.subr.bf16.mxu1 %v11379_v58 }
 0xa9a   :  { %v5579_v32 = vpop.f32.mrb[16].mxu1  ;;  %v5955_v54 = vpop.f32.mrb[28].mxu0 }
 0xa9b   :  { %v5580_v55 = vadd.f32 %v10382_v4, %v5579_v32  ;;  %v5956_v46 = vadd.f32 %v10402_v36, %v5955_v54  ;;  %v10893_v25 = vpop.f32.mrb[17].mxu1  ;;  %v10925_v0 = vpop.f32.mrb[29].mxu0 }
 0xa9c   :  { %v5582_v7 = vpop.f32.mrb[18].mxu1  ;;  %v5958_v57 = vpop.f32.mrb[30].mxu0 }
 0xa9d   :  { %v5592_v23 = vrot.slane %v5580_v55, %v13471_v12  ;;  %v5968_v18 = vrot.slane %v5956_v46, %v13471_v12  ;;  %v10894_v10 = vpop.f32.mrb[19].mxu1  ;;  %v10926_v20 = vpop.f32.mrb[31].mxu0 }
 0xa9f   :  { %v5593_v1 = vcombine.high %v5592_v23, %v5592_v23  ;;  %v5600_v33 = vrot.slane %v5592_v23, %v13471_v12  ;;  %v5969_v34 = vcombine.high %v5968_v18, %v5968_v18  ;;  %v5976_v28 = vrot.slane %v5968_v18, %v13471_v12 }
 0xaa1   :  { %v5607_v19 = vrot.slane %v5593_v1, %v13471_v12  ;;  %5610 = vst.msk [vmem:[#allocation5 + $0x1] sm:$0x1] %vm5509_vm7, %v5600_v33  ;;  %v5983_v47 = vrot.slane %v5969_v34, %v13471_v12  ;;  %5986 = vst.msk [vmem:[#allocation5 + $0x5] sm:$0x1] %vm5509_vm7, %v5976_v28 }
 0xaa2   :  { %v5673_v48 = vpop.f32.mrb[20].mxu1  ;;  %v6143_v21 = vpop.f32.mrb[32].mxu0 }
 0xaa3   :  { %5611 = vst.msk [vmem:[#allocation5 + $0x11] sm:$0x1] %vm5509_vm7, %v5607_v19  ;;  %5987 = vst.msk [vmem:[#allocation5 + $0x15] sm:$0x1] %vm5509_vm7, %v5983_v47  ;;  %v5674_v29 = vadd.f32 %v10387_v50, %v5673_v48  ;;  %v6144_v16 = vadd.f32 %v10412_v30, %v6143_v21  ;;  %v10901_v49 = vpop.f32.mrb[21].mxu1  ;;  %v10941_v9 = vpop.f32.mrb[33].mxu0 }
 0xaa4   :  { %v5676_v44 = vpop.f32.mrb[22].mxu1  ;;  %v6146_v27 = vpop.f32.mrb[34].mxu0 }
 0xaa5   :  { %v5686_v41 = vrot.slane %v5674_v29, %v13471_v12  ;;  %v6156_v59 = vrot.slane %v6144_v16, %v13471_v12  ;;  %v10902_v40 = vpop.f32.mrb[23].mxu1  ;;  %v10942_v31 = vpop.f32.mrb[35].mxu0 }
 0xaa7   :  { %v5687_v45 = vcombine.high %v5686_v41, %v5686_v41  ;;  %v5694_v2 = vrot.slane %v5686_v41, %v13471_v12  ;;  %v6157_v15 = vcombine.high %v6156_v59, %v6156_v59  ;;  %v6164_v24 = vrot.slane %v6156_v59, %v13471_v12 }
 0xaa9   :  { %v5701_v42 = vrot.slane %v5687_v45, %v13471_v12  ;;  %5704 = vst.msk [vmem:[#allocation5 + $0x2] sm:$0x1] %vm5509_vm7, %v5694_v2  ;;  %v6171_v60 = vrot.slane %v6157_v15, %v13471_v12  ;;  %6174 = vst.msk [vmem:[#allocation5 + $0x7] sm:$0x1] %vm5509_vm7, %v6164_v24 }
 0xaaa   :  { %v5767_v22 = vpop.f32.mrb[24].mxu1 }
 0xaab   :  { %5705 = vst.msk [vmem:[#allocation5 + $0x12] sm:$0x1] %vm5509_vm7, %v5701_v42  ;;  %6175 = vst.msk [vmem:[#allocation5 + $0x17] sm:$0x1] %vm5509_vm7, %v6171_v60  ;;  %v5768_v51 = vadd.f32 %v10392_v17, %v5767_v22  ;;  %v10909_v26 = vpop.f32.mrb[25].mxu1 }
 0xaac   :  { %v5770_v3 = vpop.f32.mrb[26].mxu1 }
 0xaad   :  { %v5780_v53 = vrot.slane %v5768_v51, %v13471_v12  ;;  %v10910_v63 = vpop.f32.mrb[27].mxu1 }
 0xaaf   :  { %v5781_v8 = vcombine.high %v5780_v53, %v5780_v53  ;;  %v5788_v52 = vrot.slane %v5780_v53, %v13471_v12 }
 0xab1   :  { %v5795_v61 = vrot.slane %v5781_v8, %v13471_v12  ;;  %5798 = vst.msk [vmem:[#allocation5 + $0x3] sm:$0x1] %vm5509_vm7, %v5788_v52 }
 0xab2   :  { %v5861_v6 = vpop.f32.mrb[28].mxu1 }
 0xab3   :  { %5799 = vst.msk [vmem:[#allocation5 + $0x13] sm:$0x1] %vm5509_vm7, %v5795_v61  ;;  %v5862_v56 = vadd.f32 %v10397_v43, %v5861_v6  ;;  %v10917_v39 = vpop.f32.mrb[29].mxu1 }
 0xab4   :  { %v5864_v35 = vpop.f32.mrb[30].mxu1 }
 0xab5   :  { %v5874_v11 = vrot.slane %v5862_v56, %v13471_v12  ;;  %v10918_v62 = vpop.f32.mrb[31].mxu1 }
 0xab7   :  { %v5875_v13 = vcombine.high %v5874_v11, %v5874_v11  ;;  %v5882_v58 = vrot.slane %v5874_v11, %v13471_v12 }
 0xab9   :  { %v5889_v4 = vrot.slane %v5875_v13, %v13471_v12  ;;  %5892 = vst.msk [vmem:[#allocation5 + $0x4] sm:$0x1] %vm5509_vm7, %v5882_v58 }
 0xaba   :  { %v6049_v36 = vpop.f32.mrb[32].mxu1 }
 0xabb   :  { %5893 = vst.msk [vmem:[#allocation5 + $0x14] sm:$0x1] %vm5509_vm7, %v5889_v4  ;;  %v6050_v32 = vadd.f32 %v10407_v5, %v6049_v36  ;;  %v10933_v54 = vpop.f32.mrb[33].mxu1 }
 0xabc   :  { %v6052_v55 = vpop.f32.mrb[34].mxu1 }
 0xabd   :  { %v6062_v46 = vrot.slane %v6050_v32, %v13471_v12  ;;  %v10934_v25 = vpop.f32.mrb[35].mxu1 }
 0xabf   :  { %v6063_v0 = vcombine.high %v6062_v46, %v6062_v46  ;;  %v6070_v7 = vrot.slane %v6062_v46, %v13471_v12 }
 0xac1   :  { %v6077_v57 = vrot.slane %v6063_v0, %v13471_v12  ;;  %6080 = vst.msk [vmem:[#allocation5 + $0x6] sm:$0x1] %vm5509_vm7, %v6070_v7 }
 0xac3   :  { %6081 = vst.msk [vmem:[#allocation5 + $0x16] sm:$0x1] %vm5509_vm7, %v6077_v57 }
 0xac8   :  { %v6176_v23 = vld [vmem:[#allocation5] sm:$0xff] }
 0xac9   :  { %v6182_v18 = vcombine.high %v6176_v23, %v6176_v23  ;;  %v6189_v10 = vrot.slane %v6176_v23, %v13471_v12 }
 0xaca   :  { %v6178_v20 = vld [vmem:[#allocation5 + $0x10] sm:$0xff] }
 0xacb   :  { %v6196_v1 = vrot.slane %v6182_v18, %v13471_v12  ;;  %v6197_v33 = vcombine.high %v6189_v10, %v6189_v10  ;;  %v6205_v34 = vrot.slane %v6189_v10, %v13471_v12  ;;  %v6231_v28 = vcombine.high %v6178_v20, %v6178_v20 }
 0xacc   :  { %v6238_v50 = vrot.slane %v6178_v20, %v13471_v12 }
 0xacd   :  { %v6198_v30 = vcombine.high %v6196_v1, %v6196_v1  ;;  %v14197_v19 = vrot.slane %v6196_v1, %v13471_v12  ;;  %v6219_v47 = vrot.slane %v6197_v33, %v13471_v12  ;;  %v6245_v48 = vrot.slane %v6231_v28, %v13471_v12  ;;  %v11377_v28 = vld [vmem:[%s15470_s14] ss:$8 sps:$4 sm:$0xff]  }
 0xace   :  { %v6246_v21 = vcombine.high %v6238_v50, %v6238_v50  ;;  %v6254_v29 = vrot.slane %v6238_v50, %v13471_v12  ;;  %v6227_v16 = vcombine.high %v6205_v34, %v6205_v34 }
 0xacf   :  { %v14203_v49 = vrot.slane %v6198_v30, %v13471_v12  ;;  %v6228_v9 = vcombine.high %v14197_v19, %v14197_v19  ;;  %v6247_v44 = vcombine.high %v6245_v48, %v6245_v48  ;;  %v6261_v27 = vrot.slane %v6245_v48, %v13471_v12  ;;  %v11387_v48 = vld [vmem:[%s15470_s14 + $0x14] ss:$8 sps:$4 sm:$0xff]  }
 0xad0   :  { %v6268_v41 = vrot.slane %v6246_v21, %v13471_v12  ;;  %v14209_v59 = vcombine.high %v6254_v29, %v6254_v29  ;;  %v6401_v40 = vcombine.low %v6205_v34, %v6219_v47  ;;  %v10432_v31 = vcombine.high %v6205_v34, %v6219_v47 }
 0xad1   :  { %v14212_v45 = vrot.slane %v6247_v44, %v13471_v12  ;;  %v6277_v2 = vcombine.high %v6261_v27, %v6261_v27  ;;  %v6403_v15 = vcombine.low %v14197_v19, %v14203_v49  ;;  %v6404_v24 = vcombine.low %v6228_v9, %v6254_v29  ;;  %v11385_v44 = vld [vmem:[%s15470_s14 + $0x10] ss:$8 sps:$4 sm:$0xff]  }
 0xad2   :  { %v6278_v17 = vcombine.high %v6268_v41, %v6268_v41  ;;  %v6411_v42 = vrot.slane %v6401_v40, %v13471_v12  ;;  %v14218_v60 = vrot.slane %v10432_v31, %v13471_v12  ;;  %v6450_v22 = vcombine.low %v6268_v41, %v14209_v59  ;;  %v11390_v31 = vld [vmem:[%s15470_s14 + $0xf4] ss:$8 sps:$4 sm:$0xff]  }
 0xad3   :  { %v14222_v51 = vrot.slane %v6403_v15, %v13471_v12  ;;  %v6432_v26 = vrot.slane %v6404_v24, %v13471_v12  ;;  %v6452_v3 = vcombine.low %v14212_v45, %v6277_v2  ;;  %v6229_v53 = vcombine.high %v6219_v47, %v6219_v47  ;;  %v11388_v2 = vld [vmem:[%s15470_s14 + $0xf0] ss:$8 sps:$4 sm:$0xff]   ;;  %v11391_v15 = vld [vmem:[%s15470_s14 + $0x20] ss:$8 sps:$4 sm:$0xff]   ;;  %v11399_v24 = vld [vmem:[%s15470_s14 + $0x34] ss:$8 sps:$4 sm:$0xff]  }
 0xad4   :  { %v6433_v63 = vcombine.low %v6411_v42, %v14218_v60  ;;  %v6451_v8 = vcombine.low %v6278_v17, %v6261_v27  ;;  %v6230_v52 = vcombine.high %v14203_v49, %v14203_v49  ;;  %v6459_v61 = vrot.slane %v6450_v22, %v13471_v12  ;;  %v10463_v17 = vld.sshfl [vmem:[#allocation5 + $0x8] sm:$0x1 pattern:$0x75316420]  ;;  %v11396_v42 = vld [vmem:[%s15470_s14 + $0x104] ss:$8 sps:$4 sm:$0xff]  }
 0xad5   :  { %v6434_v43 = vcombine.low %v14222_v51, %v6432_v26  ;;  %v6294_v6 = vcombine.low %v6219_v47, %v6227_v16  ;;  %v6295_v56 = vcombine.low %v6229_v53, %v14197_v19  ;;  %v14236_v35 = vrot.slane %v6452_v3, %v13471_v12  ;;  %v10464_v22 = vld.sshfl [vmem:[#allocation5 + $0x18] sm:$0x1 pattern:$0x75316420]  ;;  %v11394_v53 = vld [vmem:[%s15470_s14 + $0x100] ss:$8 sps:$4 sm:$0xff]  }
 0xad6   :  { %v14233_v39 = vrot.slane %v6451_v8, %v13471_v12  ;;  %v6296_v11 = vcombine.low %v14203_v49, %v6228_v9  ;;  %v6297_v62 = vcombine.low %v6230_v52, %v6268_v41  ;;  %v10416_v54 = vcombine.high %v6254_v29, %v6268_v41  ;;  %v11393_v41 = vld [vmem:[%s15470_s14 + $0x24] ss:$8 sps:$4 sm:$0xff]   ;;  %v11397_v26 = vld [vmem:[%s15470_s14 + $0x30] ss:$8 sps:$4 sm:$0xff]   ;;  %v11402_v8 = vld [vmem:[%s15470_s14 + $0x114] ss:$8 sps:$4 sm:$0xff]  }
 0xad7   :  { %v6448_v13 = vrot.slane %v6434_v43, %v13471_v12  ;;  %v6304_v58 = vrot.slane %v6294_v6, %v13471_v12  ;;  %v6311_v5 = vrot.slane %v6295_v56, %v13471_v12  ;;  %v6344_v46 = vcombine.low %v6261_v27, %v14212_v45 }
 0xad8   :  { %v6474_v4 = vcombine.low %v6459_v61, %v14233_v39  ;;  %v6318_v36 = vrot.slane %v6296_v11, %v13471_v12  ;;  %v6325_v32 = vrot.slane %v6297_v62, %v13471_v12  ;;  %v10417_v25 = vcombine.high %v6261_v27, %v14212_v45  ;;  %v11380_v27 = vld [vmem:[%s15470_s14 + $0xe0] ss:$8 sps:$4 sm:$0xff]   ;;  %v11400_v11 = vld [vmem:[%s15470_s14 + $0x110] ss:$8 sps:$4 sm:$0xff]   ;;  %v11408_v62 = vld [vmem:[%s15470_s14 + $0x124] ss:$8 sps:$4 sm:$0xff]  }
 0xad9   :  { %v6326_v55 = vcombine.low %v6304_v58, %v6311_v5  ;;  %v6441_v0 = vrot.slane %v6433_v63, %v13471_v12  ;;  %v6488_v57 = vrot.slane %v14236_v35, %v13471_v12  ;;  %v6352_v18 = vrot.slane %v10416_v54, %v13471_v12  ;;  %v11405_v63 = vld [vmem:[%s15470_s14 + $0x44] ss:$8 sps:$4 sm:$0xff]   ;;  %v11403_v61 = vld [vmem:[%s15470_s14 + $0x40] ss:$8 sps:$4 sm:$0xff]  }
 0xada   :  { %v6481_v7 = vrot.slane %v6474_v4, %v13471_v12  ;;  %v6327_v23 = vcombine.low %v6318_v36, %v6325_v32  ;;  %v6359_v10 = vrot.slane %v6344_v46, %v13471_v12  ;;  %v6366_v20 = vrot.slane %v10417_v25, %v13471_v12  ;;  %v11406_v58 = vld [vmem:[%s15470_s14 + $0x120] ss:$8 sps:$4 sm:$0xff]   ;;  %v11417_v5 = vld [vmem:[%s15470_s14 + $0x64] ss:$8 sps:$4 sm:$0xff]   ;;  %v11414_v4 = vld [vmem:[%s15470_s14 + $0x134] ss:$8 sps:$4 sm:$0xff]  }
 0xadb   :  { %v6449_v1 = vcombine.low %v6441_v0, %v6448_v13  ;;  %v6334_v50 = vrot.slane %v6326_v55, %v13471_v12  ;;  %v6740_v3 = vrot.slane %v10463_v17, %v13471_v12  ;;  %v6279_v52 = vcombine.high %v14212_v45, %v14212_v45  ;;  %v11411_v45 = vld [vmem:[%s15470_s14 + $0x54] ss:$8 sps:$4 sm:$0xff]   ;;  %v11415_v54 = vld [vmem:[%s15470_s14 + $0x60] ss:$8 sps:$4 sm:$0xff]   ;;  %v11412_v25 = vld [vmem:[%s15470_s14 + $0x130] ss:$8 sps:$4 sm:$0xff]  }
 0xadc   :  { %v6489_v33 = vcombine.low %v6481_v7, %v6488_v57  ;;  %v6341_v34 = vrot.slane %v6327_v23, %v13471_v12  ;;  %v6367_v30 = vcombine.low %v6352_v18, %v6359_v10  ;;  %v6381_v16 = vrot.slane %v6366_v20, %v13471_v12 }
 0xadd   :  { %v6754_v43 = vrot.slane %v10464_v22, %v13471_v12  ;;  %v10479_v6 = vcombine.high %v14197_v19, %v14203_v49  ;;  %v6771_v56 = vcombine.low %v6740_v3, %v14209_v59  ;;  %v11409_v19 = vld [vmem:[%s15470_s14 + $0x50] ss:$8 sps:$4 sm:$0xff]   ;;  %v6811_v32 = vcombine.low %v14233_v39, %v14236_v35  ;;  %v11420_v39 = vld [vmem:[%s15470_s14 + $0x144] ss:$8 sps:$4 sm:$0xff]  }
 0xade   :  { %v6492_v47 = vpack.c.bf16 %v6489_v33, %v6449_v1  ;;  %v6342_v21 = vcombine.low %v6334_v50, %v6341_v34  ;;  %v6374_v29 = vrot.slane %v6367_v30, %v13471_v12  ;;  %v6786_v55 = vcombine.low %v14218_v60, %v14222_v51  ;;  %v11418_v51 = vld [vmem:[%s15470_s14 + $0x140] ss:$8 sps:$4 sm:$0xff]  }
 0xadf   :  { %v6803_v13 = vcombine.low %v6279_v52, %v6754_v43  ;;  %v6778_v49 = vrot.slane %v10479_v6, %v13471_v12  ;;  %v6785_v59 = vrot.slane %v6771_v56, %v13471_v12  ;;  %v6818_v35 = vrot.slane %v6811_v32, %v13471_v12 }
 0xae0   :  { %10447 = vmatmul.mubr.msk.bf16.vlgmr.msra.gmra.mrb[36].mxu1 %vm1148_vm3, %v6492_v47  ;;  %v6382_v9 = vcombine.low %v6374_v29, %v6381_v16  ;;  %v6794_v7 = vrot.slane %v6786_v55, %v13471_v12 }
 0xae1   :  { %6683 = vmatpush1.bf16.msra.mxu1 %v11377_v28  ;;  %6714 = vmatprep.mubr.bf16.mxu1 %v15598_v38  ;;  %v6810_v36 = vrot.slane %v6803_v13, %v13471_v12  ;;  %v6787_v46 = vcombine.low %v6778_v49, %v6785_v59 }
 0xae2   :  { %6684 = vmatprep.subr.bf16.mxu1 %v11387_v48  ;;  %v14275_v40 = vpack.c.bf16 %v6382_v9, %v6342_v21 }
 0xae3   :  { %v6825_v0 = vrot.slane %v6810_v36, %v13471_v12  ;;  %v6801_v60 = vrot.slane %v6787_v46, %v13471_v12 }
 0xae4   :  { %10508 = vmatmul.mubr.msk.bf16.vlgmr.msra.gmra.mrb[36].mxu0 %vm1148_vm3, %v14275_v40 }
 0xae5   :  { %6685 = vmatpush1.bf16.msra.mxu1 %v11385_v44  ;;  %7032 = vmatpush1.bf16.msra.mxu0 %v11380_v27  ;;  %v6826_v57 = vcombine.low %v6818_v35, %v6825_v0  ;;  %v6802_v23 = vcombine.low %v6794_v7, %v6801_v60 }
 0xae6   :  { %6686 = vmatprep.subr.bf16.mxu1 %v11393_v41  ;;  %7033 = vmatprep.subr.bf16.mxu0 %v11390_v31 }
 0xae7   :  { %7063 = vmatprep.mubr.bf16.mxu0 %v15598_v38  ;;  %v6829_v18 = vpack.c.bf16 %v6826_v57, %v6802_v23 }
 0xae9   :  { %6687 = vmatpush1.bf16.msra.mxu1 %v11391_v15  ;;  %7034 = vmatpush1.bf16.msra.mxu0 %v11388_v2 }
 0xaea   :  { %6688 = vmatprep.subr.bf16.mxu1 %v11399_v24  ;;  %7035 = vmatprep.subr.bf16.mxu0 %v11396_v42 }
 0xaed   :  { %6689 = vmatpush1.bf16.msra.mxu1 %v11397_v26  ;;  %7036 = vmatpush1.bf16.msra.mxu0 %v11394_v53 }
 0xaee   :  { %6690 = vmatprep.subr.bf16.mxu1 %v11405_v63  ;;  %7037 = vmatprep.subr.bf16.mxu0 %v11402_v8 }
 0xaf1   :  { %6691 = vmatpush1.bf16.msra.mxu1 %v11403_v61  ;;  %7038 = vmatpush1.bf16.msra.mxu0 %v11400_v11 }
 0xaf2   :  { %6692 = vmatprep.subr.bf16.mxu1 %v11411_v45  ;;  %7039 = vmatprep.subr.bf16.mxu0 %v11408_v62 }
 0xaf5   :  { %6693 = vmatpush1.bf16.msra.mxu1 %v11409_v19  ;;  %7040 = vmatpush1.bf16.msra.mxu0 %v11406_v58 }
 0xaf6   :  { %6694 = vmatprep.subr.bf16.mxu1 %v11417_v5  ;;  %7041 = vmatprep.subr.bf16.mxu0 %v11414_v4 }
 0xaf9   :  { %6695 = vmatpush1.bf16.msra.mxu1 %v11415_v54  ;;  %7042 = vmatpush1.bf16.msra.mxu0 %v11412_v25 }
 0xafa   :  { %8566 = vmatprep.subr.bf16.mxu1 %v15598_v38  ;;  %7043 = vmatprep.subr.bf16.mxu0 %v11420_v39 }
 0xafc   :  { %10462 = vmatmul.mubr.msk.bf16.vlgmr.msra.gmra.mrb[36].mxu1 %vm1148_vm3, %v14275_v40 }
 0xafd   :  { %7044 = vmatpush1.bf16.msra.mxu0 %v11418_v51 }
 0xafe   :  { %8705 = vmatprep.subr.bf16.mxu0 %v15598_v38 }
 0xb00   :  { %10523 = vmatmul.mubr.msk.bf16.vlgmr.msra.gmra.mrb[36].mxu0 %vm1148_vm3, %v6829_v18 }
 0xbcf   :  { %v14366_v10 = vpop.f32.mrb[36].mxu1 }
 0xbd0   :  { %v14368_v20 = vpop.f32.mrb[37].mxu1  ;;  %v7093_v34 = vmul.f32 %v14366_v10, %v14366_v10 }
 0xbd1   :  { %v7094_v1 = vmul.f32 %v14368_v20, %v14368_v20  ;;  %v14372_v33 = vpop.f32.mrb[38].mxu1  ;;  %v7084_v47 = vsel %vm953_vm11, %v14368_v20, 0.0 }
 0xbd2   :  { %v7076_v28 = vsel %vm471_vm1, %v14372_v33, 0.0  ;;  %v7095_v50 = vmul.f32 %v14372_v33, %v14372_v33  ;;  %v14380_v30 = vpop.f32.mrb[39].mxu1 }
 0xbd3   :  { %v7077_v48 = vadd.f32 %v7076_v28, %v14366_v10  ;;  %v7085_v21 = vsel %vm3092_vm6, %v14380_v30, 0.0  ;;  %v7096_v29 = vmul.f32 %v14380_v30, %v14380_v30  ;;  %v14389_v16 = vpop.f32.mrb[36].mxu0  ;;  %v7105_v27 = vsel %vm953_vm11, %v7094_v1, 0.0 }
 0xbd4   :  { %v7097_v9 = vsel %vm471_vm1, %v7095_v50, 0.0  ;;  %v7086_v44 = vadd.f32 %v7085_v21, %v7084_v47  ;;  %v14393_v41 = vpop.f32.mrb[37].mxu0  ;;  %v7131_v15 = vmul.f32 %v14389_v16, %v14389_v16 }
 0xbd5   :  { %v7078_v40 = vrot.slane %v7077_v48, 4  ;;  %v7098_v31 = vadd.f32 %v7097_v9, %v7093_v34  ;;  %v7106_v2 = vsel %vm3092_vm6, %v7096_v29, 0.0  ;;  %v7122_v24 = vsel %vm953_vm11, %v14393_v41, 0.0  ;;  %v14400_v17 = vpop.f32.mrb[38].mxu0 }
 0xbd6   :  { %v7087_v42 = vrot.slane %v7086_v44, 4  ;;  %v7107_v22 = vadd.f32 %v7106_v2, %v7105_v27  ;;  %v7114_v53 = vsel %vm471_vm1, %v14400_v17, 0.0  ;;  %v7133_v63 = vmul.f32 %v14400_v17, %v14400_v17  ;;  %v14406_v8 = vpop.f32.mrb[39].mxu0 }
 0xbd7   :  { %v7079_v26 = vadd.f32 %v7078_v40, %v7077_v48  ;;  %v7099_v3 = vrot.slane %v7098_v31, 4  ;;  %v7132_v52 = vmul.f32 %v14393_v41, %v14393_v41  ;;  %v7115_v43 = vadd.f32 %v7114_v53, %v14389_v16 }
 0xbd8   :  { %v7088_v61 = vadd.f32 %v7087_v42, %v7086_v44  ;;  %v7108_v6 = vrot.slane %v7107_v22, 4  ;;  %v7135_v45 = vsel %vm471_vm1, %v7133_v63, 0.0  ;;  %v7123_v62 = vsel %vm3092_vm6, %v14406_v8, 0.0 }
 0xbd9   :  { %v7080_v56 = vrot.slane %v7079_v26, 2  ;;  %v7100_v11 = vadd.f32 %v7099_v3, %v7098_v31  ;;  %v7116_v13 = vrot.slane %v7115_v43, 4  ;;  %v7136_v19 = vadd.f32 %v7135_v45, %v7131_v15 }
 0xbda   :  { %v7089_v49 = vrot.slane %v7088_v61, 2  ;;  %v7109_v59 = vadd.f32 %v7108_v6, %v7107_v22  ;;  %v7124_v4 = vadd.f32 %v7123_v62, %v7122_v24  ;;  %v7134_v36 = vmul.f32 %v14406_v8, %v14406_v8 }
 0xbdb   :  { %v7081_v58 = vadd.f32 %v7080_v56, %v7079_v26  ;;  %v7101_v5 = vrot.slane %v7100_v11, 2  ;;  %v7117_v32 = vadd.f32 %v7116_v13, %v7115_v43  ;;  %v7137_v54 = vrot.slane %v7136_v19, 4 }
 0xbdc   :  { %v7090_v55 = vadd.f32 %v7089_v49, %v7088_v61  ;;  %v7110_v25 = vrot.slane %v7109_v59, 2  ;;  %v7125_v39 = vrot.slane %v7124_v4, 4  ;;  %v7144_v35 = vsel %vm3092_vm6, %v7134_v36, 0.0 }
 0xbdd   :  { %v7102_v46 = vadd.f32 %v7101_v5, %v7100_v11  ;;  %v7143_v0 = vsel %vm953_vm11, %v7132_v52, 0.0  ;;  %v7082_v7 = vrot.slane %v7081_v58, 1  ;;  %v7118_v60 = vrot.slane %v7117_v32, 2 }
 0xbde   :  { %v7138_v51 = vadd.f32 %v7137_v54, %v7136_v19  ;;  %v7126_v57 = vadd.f32 %v7125_v39, %v7124_v4  ;;  %v7145_v23 = vadd.f32 %v7144_v35, %v7143_v0  ;;  %v7091_v28 = vrot.slane %v7090_v55, 1 }
 0xbdf   :  { %v7103_v18 = vrot.slane %v7102_v46, 1  ;;  %v7119_v1 = vadd.f32 %v7118_v60, %v7117_v32  ;;  %v7111_v50 = vadd.f32 %v7110_v25, %v7109_v59  ;;  %v7083_v21 = vadd.f32 %v7082_v7, %v7081_v58 }
 0xbe0   :  { %v7139_v34 = vrot.slane %v7138_v51, 2  ;;  %v7127_v47 = vrot.slane %v7126_v57, 2  ;;  %v7146_v48 = vrot.slane %v7145_v23, 4  ;;  %v7092_v15 = vadd.f32 %v7091_v28, %v7090_v55 }
 0xbe1   :  { %v7120_v29 = vrot.slane %v7119_v1, 1  ;;  %v7104_v40 = vadd.f32 %v7103_v18, %v7102_v46  ;;  %v7112_v24 = vrot.slane %v7111_v50, 1  ;;  %vm15606_vm1 = vcmask 392192  }
 0xbe2   :  { %v7140_v9 = vadd.f32 %v7139_v34, %v7138_v51  ;;  %v7128_v44 = vadd.f32 %v7127_v47, %v7126_v57  ;;  %v7147_v27 = vadd.f32 %v7146_v48, %v7145_v23  ;;  %vm15607_vm6 = vcmask 654336   ;;  %vm15608_vm10 = vmmov %vm15606_vm1 }
 0xbe3   :  { %v7121_v31 = vadd.f32 %v7120_v29, %v7119_v1  ;;  %v7113_v43 = vadd.f32 %v7112_v24, %v7111_v50  ;;  %vm15609_vm4 = vmmov %vm15607_vm6 }
 0xbe4   :  { %v7141_v2 = vrot.slane %v7140_v9, 1  ;;  %v7129_v42 = vrot.slane %v7128_v44, 1  ;;  %v7148_v22 = vrot.slane %v7147_v27, 2 }
 0xbe5   :  { %v7152_v3 = vadd.f32 %v7121_v31, %v7083_v21 }
 0xbe6   :  { %v7142_v26 = vadd.f32 %v7141_v2, %v7140_v9  ;;  %v7130_v53 = vadd.f32 %v7129_v42, %v7128_v44  ;;  %v7149_v63 = vadd.f32 %v7148_v22, %v7147_v27 }
 0xbe7   :  { %7157 = vrot.lane.b32.xlu0 %v7152_v3, %s11653_s24 }
 0xbe8   :  { %v7154_v52 = vadd.f32 %v7142_v26, %v7104_v40  ;;  %v7150_v61 = vrot.slane %v7149_v63, 1  ;;  %v7153_v6 = vadd.f32 %v7130_v53, %v7092_v15 }
 0xbea   :  { %7162 = vrot.lane.b32.xlu1 %v7154_v52, %s11653_s24  ;;  %v7151_v56 = vadd.f32 %v7150_v61, %v7149_v63 }
 0xbeb   :  { %7166 = vrot.lane.b32.xlu0 %v7152_v3, %s11652_s12 }
 0xbec   :  { %v7155_v11 = vadd.f32 %v7151_v56, %v7113_v43 }
 0xbee   :  { %7170 = vrot.lane.b32.xlu1 %v7154_v52, %s11652_s12 }
 0xbef   :  { %7174 = vrot.lane.b32.xlu0 %v7152_v3, %s11654_s2 }
 0xbf2   :  { %7178 = vrot.lane.b32.xlu1 %v7154_v52, %s11654_s2 }
 0xbf3   :  { %7182 = vrot.lane.b32.xlu0 %v7152_v3, %s11646_s4 }
 0xbf6   :  { %7186 = vrot.lane.b32.xlu1 %v7154_v52, %s11646_s4 }
 0xbf7   :  { %7190 = vrot.lane.b32.xlu0 %v7152_v3, %s11655_s25 }
 0xbfa   :  { %7194 = vrot.lane.b32.xlu1 %v7154_v52, %s11655_s25 }
 0xbfb   :  { %7198 = vrot.lane.b32.xlu0 %v7152_v3, %s11656_s3 }
 0xbfe   :  { %7202 = vrot.lane.b32.xlu1 %v7154_v52, %s11656_s3 }
 0xbff   :  { %7206 = vrot.lane.b32.xlu0 %v7152_v3, %s15601_s29 }
 0xc02   :  { %7210 = vrot.lane.b32.xlu1 %v7154_v52, %s15601_s29 }
 0xc03   :  { %7217 = vrot.lane.b32.xlu0 %v7153_v6, %s11653_s24 }
 0xc06   :  { %7222 = vrot.lane.b32.xlu1 %v7155_v11, %s11653_s24 }
 0xc07   :  { %7226 = vrot.lane.b32.xlu0 %v7153_v6, %s11652_s12 }
 0xc0a   :  { %7230 = vrot.lane.b32.xlu1 %v7155_v11, %s11652_s12 }
 0xc0b   :  { %7234 = vrot.lane.b32.xlu0 %v7153_v6, %s11654_s2 }
 0xc0e   :  { %7238 = vrot.lane.b32.xlu1 %v7155_v11, %s11654_s2 }
 0xc0f   :  { %7242 = vrot.lane.b32.xlu0 %v7153_v6, %s11646_s4 }
 0xc12   :  { %7246 = vrot.lane.b32.xlu1 %v7155_v11, %s11646_s4 }
 0xc13   :  { %7250 = vrot.lane.b32.xlu0 %v7153_v6, %s11655_s25 }
 0xc16   :  { %7254 = vrot.lane.b32.xlu1 %v7155_v11, %s11655_s25 }
 0xc59   :  { %v7158_v45 = vpop.permute.xlu0 %7157 }
 0xc5a   :  { %v7160_v36 = vadd.f32 %v7158_v45, %v7152_v3 }
 0xc5c   :  { %v7163_v62 = vpop.permute.xlu1 %7162 }
 0xc5d   :  { %v7167_v13 = vpop.permute.xlu0 %7166  ;;  %v7165_v54 = vadd.f32 %v7163_v62, %v7154_v52 }
 0xc5e   :  { %v7169_v55 = vadd.f32 %v7167_v13, %v7160_v36 }
 0xc60   :  { %v7171_v19 = vpop.permute.xlu1 %7170 }
 0xc61   :  { %v7175_v49 = vpop.permute.xlu0 %7174  ;;  %v7173_v25 = vadd.f32 %v7171_v19, %v7165_v54  ;;  %v7074_v19 = vld [vmem:[%s15471_s15] sm:$0x1]  ;;  %v11421_v54 = vld [vmem:[%s15473_s17 + $0x70] sm:$0xff]  }
 0xc62   :  { %v7177_v39 = vadd.f32 %v7175_v49, %v7169_v55  ;;  %8567 = vmatpush1.bf16.msra.mxu1 %v11421_v54  ;;  %v11422_v55 = vld [vmem:[%s15473_s17 + $0x78] sm:$0xff]  }
 0xc63   :  { %8568 = vmatprep.subr.bf16.mxu1 %v15598_v38 }
 0xc64   :  { %v7179_v59 = vpop.permute.xlu1 %7178 }
 0xc65   :  { %v7183_v58 = vpop.permute.xlu0 %7182  ;;  %v7181_v0 = vadd.f32 %v7179_v59, %v7173_v25  ;;  %v11424_v25 = vld [vmem:[%s15473_s17 + $0x80] sm:$0xff]  }
 0xc66   :  { %v7185_v7 = vadd.f32 %v7183_v58, %v7177_v39  ;;  %v7075_v58 = vld [vmem:[%s15472_s16] sm:$0x1]  ;;  %8569 = vmatpush1.bf16.msra.mxu1 %v11422_v55  ;;  %v11425_v39 = vld [vmem:[%s15473_s17 + $0x8] sm:$0xff]  }
 0xc67   :  { %8570 = vmatprep.subr.bf16.mxu1 %v15598_v38 }
 0xc68   :  { %v7187_v5 = vpop.permute.xlu1 %7186 }
 0xc69   :  { %v7191_v4 = vpop.permute.xlu0 %7190  ;;  %v7189_v51 = vadd.f32 %v7187_v5, %v7181_v0  ;;  %v11427_v0 = vld [vmem:[%s15473_s17 + $0x10] sm:$0xff]  }
 0xc6a   :  { %v7193_v57 = vadd.f32 %v7191_v4, %v7185_v7  ;;  %8571 = vmatpush1.bf16.msra.mxu1 %v11424_v25  ;;  %v11428_v7 = vld [vmem:[%s15473_s17 + $0x90] sm:$0xff]  }
 0xc6b   :  { %8572 = vmatprep.subr.bf16.mxu1 %v15598_v38 }
 0xc6c   :  { %v7195_v32 = vpop.permute.xlu1 %7194 }
 0xc6d   :  { %v7199_v46 = vpop.permute.xlu0 %7198  ;;  %v7197_v18 = vadd.f32 %v7195_v32, %v7189_v51  ;;  %v11430_v51 = vld [vmem:[%s15473_s17 + $0x98] sm:$0xff]  }
 0xc6e   :  { %v7201_v1 = vadd.f32 %v7199_v46, %v7193_v57  ;;  %v11423_v46 = vld [vmem:[%s15473_s17] sm:$0xff]  }
 0xc6f   :  { %8706 = vmatpush1.bf16.msra.mxu0 %v11423_v46  ;;  %v11431_v57 = vld [vmem:[%s15473_s17 + $0x20] sm:$0xff]  }
 0xc70   :  { %v7203_v35 = vpop.permute.xlu1 %7202  ;;  %8707 = vmatprep.subr.bf16.mxu0 %v15598_v38 }
 0xc71   :  { %v7207_v60 = vpop.permute.xlu0 %7206  ;;  %v7205_v28 = vadd.f32 %v7203_v35, %v7197_v18  ;;  %v11426_v35 = vld [vmem:[%s15473_s17 + $0x88] sm:$0xff]  }
 0xc72   :  { %v7209_v50 = vadd.f32 %v7207_v60, %v7201_v1  ;;  %8573 = vmatpush1.bf16.msra.mxu1 %v11426_v35  ;;  %v11429_v60 = vld [vmem:[%s15473_s17 + $0x18] sm:$0xff]   ;;  %v11433_v18 = vld [vmem:[%s15473_s17 + $0x28] sm:$0xff]  }
 0xc73   :  { %8708 = vmatpush1.bf16.msra.mxu0 %v11425_v39  ;;  %8574 = vmatprep.subr.bf16.mxu1 %v15598_v38  ;;  %v11434_v1 = vld [vmem:[%s15473_s17 + $0xa8] sm:$0xff]  }
 0xc74   :  { %v7211_v23 = vpop.permute.xlu1 %7210  ;;  %v7214_v29 = vadd.f32 %v7209_v50, %v7153_v6  ;;  %8709 = vmatprep.subr.bf16.mxu0 %v15598_v38  ;;  %v11437_v50 = vld [vmem:[%s15473_s17 + $0x38] sm:$0xff]  }
 0xc75   :  { %v7218_v34 = vpop.permute.xlu0 %7217  ;;  %v7213_v48 = vadd.f32 %v7211_v23, %v7205_v28  ;;  %v11432_v23 = vld [vmem:[%s15473_s17 + $0xa0] sm:$0xff]   ;;  %v11436_v28 = vld [vmem:[%s15473_s17 + $0xb0] sm:$0xff]  }
 0xc76   :  { %v7220_v40 = vadd.f32 %v7218_v34, %v7214_v29  ;;  %8575 = vmatpush1.bf16.msra.mxu1 %v11428_v7  ;;  %v11435_v34 = vld [vmem:[%s15473_s17 + $0x30] sm:$0xff]   ;;  %v11441_v29 = vld [vmem:[%s15473_s17 + $0x48] sm:$0xff]  }
 0xc77   :  { %v7215_v44 = vadd.f32 %v7213_v48, %v7155_v11  ;;  %8710 = vmatpush1.bf16.msra.mxu0 %v11427_v0  ;;  %8576 = vmatprep.subr.bf16.mxu1 %v15598_v38  ;;  %v11439_v48 = vld [vmem:[%s15473_s17 + $0x40] sm:$0xff]  }
 0xc78   :  { %v7223_v47 = vpop.permute.xlu1 %7222  ;;  %8711 = vmatprep.subr.bf16.mxu0 %v15598_v38 }
 0xc79   :  { %v7227_v21 = vpop.permute.xlu0 %7226  ;;  %v7225_v2 = vadd.f32 %v7223_v47, %v7215_v44  ;;  %v11438_v47 = vld [vmem:[%s15473_s17 + $0xb8] sm:$0xff]   ;;  %v11443_v44 = vld [vmem:[%s15473_s17 + $0x50] sm:$0xff]  }
 0xc7a   :  { %v7229_v15 = vadd.f32 %v7227_v21, %v7220_v40  ;;  %8577 = vmatpush1.bf16.msra.mxu1 %v11430_v51  ;;  %v11440_v21 = vld [vmem:[%s15473_s17 + $0xc0] sm:$0xff]  }
 0xc7b   :  { %8712 = vmatpush1.bf16.msra.mxu0 %v11429_v60  ;;  %8578 = vmatprep.subr.bf16.mxu1 %v15598_v38 }
 0xc7c   :  { %v7231_v9 = vpop.permute.xlu1 %7230  ;;  %8713 = vmatprep.subr.bf16.mxu0 %v15598_v38 }
 0xc7d   :  { %v7235_v27 = vpop.permute.xlu0 %7234  ;;  %v7233_v42 = vadd.f32 %v7231_v9, %v7225_v2  ;;  %v11442_v9 = vld [vmem:[%s15473_s17 + $0xc8] sm:$0xff]   ;;  %v11445_v2 = vld [vmem:[%s15473_s17 + $0x58] sm:$0xff]  }
 0xc7e   :  { %v7237_v22 = vadd.f32 %v7235_v27, %v7229_v15  ;;  %8579 = vmatpush1.bf16.msra.mxu1 %v11432_v23 }
 0xc7f   :  { %8714 = vmatpush1.bf16.msra.mxu0 %v11431_v57  ;;  %8580 = vmatprep.subr.bf16.mxu1 %v15598_v38 }
 0xc80   :  { %v7239_v31 = vpop.permute.xlu1 %7238  ;;  %8715 = vmatprep.subr.bf16.mxu0 %v15598_v38 }
 0xc81   :  { %v7243_v24 = vpop.permute.xlu0 %7242  ;;  %v7241_v3 = vadd.f32 %v7239_v31, %v7233_v42  ;;  %v11444_v31 = vld [vmem:[%s15473_s17 + $0xd0] sm:$0xff]   ;;  %v11446_v42 = vld [vmem:[%s15473_s17 + $0xd8] sm:$0xff]  }
 0xc82   :  { %v7245_v53 = vadd.f32 %v7243_v24, %v7237_v22  ;;  %8581 = vmatpush1.bf16.msra.mxu1 %v11434_v1  ;;  %v11447_v22 = vld [vmem:[%s15473_s17 + $0x60] sm:$0xff]  }
 0xc83   :  { %8716 = vmatpush1.bf16.msra.mxu0 %v11433_v18  ;;  %8582 = vmatprep.subr.bf16.mxu1 %v15598_v38 }
 0xc84   :  { %v7247_v26 = vpop.permute.xlu1 %7246  ;;  %8717 = vmatprep.subr.bf16.mxu0 %v15598_v38 }
 0xc85   :  { %v7251_v63 = vpop.permute.xlu0 %7250  ;;  %v7249_v52 = vadd.f32 %v7247_v26, %v7241_v3 }
 0xc86   :  { %v7253_v43 = vadd.f32 %v7251_v63, %v7245_v53  ;;  %8583 = vmatpush1.bf16.msra.mxu1 %v11436_v28  ;;  %v11461_v63 = vld [vmem:[%s15473_s17 + $0x68] sm:$0xff]  }
 0xc87   :  { %8718 = vmatpush1.bf16.msra.mxu0 %v11435_v34  ;;  %8584 = vmatprep.subr.bf16.mxu1 %v15598_v38 }
 0xc88   :  { %v7255_v61 = vpop.permute.xlu1 %7254  ;;  %v7258_v56 = vmul.f32 0.0025510204, %v7253_v43  ;;  %8719 = vmatprep.subr.bf16.mxu0 %v15598_v38 }
 0xc89   :  { %v7257_v45 = vadd.f32 %v7255_v61, %v7249_v52 }
 0xc8a   :  { %v7260_v6 = vmul.f32 %v7258_v56, %v7258_v56  ;;  %8585 = vmatpush1.bf16.msra.mxu1 %v11438_v47 }
 0xc8b   :  { %v7259_v62 = vmul.f32 0.0025510204, %v7257_v45  ;;  %8720 = vmatpush1.bf16.msra.mxu0 %v11437_v50  ;;  %8586 = vmatprep.subr.bf16.mxu1 %v15598_v38 }
 0xc8c   :  { %8721 = vmatprep.subr.bf16.mxu0 %v15598_v38 }
 0xc8d   :  { %v7261_v11 = vsub.f32 %v7259_v62, %v7260_v6 }
 0xc8e   :  { %8587 = vmatpush1.bf16.msra.mxu1 %v11440_v21 }
 0xc8f   :  { %v7262_v13 = vadd.f32 1e-05, %v7261_v11  ;;  %8722 = vmatpush1.bf16.msra.mxu0 %v11439_v48  ;;  %8588 = vmatprep.subr.bf16.mxu1 %v15598_v38 }
 0xc90   :  { %8723 = vmatprep.subr.bf16.mxu0 %v15598_v38 }
 0xc91   :  { %11523 = vrsqrt.f32 %v7262_v13 }
 0xc92   :  { %8589 = vmatpush1.bf16.msra.mxu1 %v11442_v9 }
 0xc93   :  { %8724 = vmatpush1.bf16.msra.mxu0 %v11441_v29  ;;  %8590 = vmatprep.subr.bf16.mxu1 %v15598_v38 }
 0xc94   :  { %8725 = vmatprep.subr.bf16.mxu0 %v15598_v38 }
 0xc96   :  { %8591 = vmatpush1.bf16.msra.mxu1 %v11444_v31 }
 0xc97   :  { %8726 = vmatpush1.bf16.msra.mxu0 %v11443_v44  ;;  %8592 = vmatprep.subr.bf16.mxu1 %v15598_v38 }
 0xc98   :  { %8727 = vmatprep.subr.bf16.mxu0 %v15598_v38 }
 0xc9a   :  { %8593 = vmatpush1.bf16.msra.mxu1 %v11446_v42 }
 0xc9b   :  { %v11524_v49 = vpop.eup %11523  ;;  %8728 = vmatpush1.bf16.msra.mxu0 %v11445_v2  ;;  %9006 = vmatprep.subr.bf16.mxu1 %v15598_v38 }
 0xc9c   :  { %v14445_v59 = vmul.f32 %v11524_v49, %v7074_v19  ;;  %8729 = vmatprep.subr.bf16.mxu0 %v15598_v38 }
 0xc9e   :  { %v7265_v5 = vmul.f32 %v14445_v59, %v7258_v56  ;;  %v7271_v4 = vrot.slane %v14445_v59, %v12390_v14 }
 0xc9f   :  { %8730 = vmatpush1.bf16.msra.mxu0 %v11447_v22 }
 0xca0   :  { %v14453_v36 = vsub.f32 %v7075_v58, %v7265_v5  ;;  %7275 = vrot.lane.b32.xlu1 %v7271_v4, %s11656_s3  ;;  %7272 = vrot.lane.b32.xlu0 %v7271_v4, %s15601_s29 }
 0xca1   :  { %8731 = vmatprep.subr.bf16.mxu0 %v15598_v38 }
 0xca2   :  { %v7304_v32 = vrot.slane %v14453_v36, %v12390_v14 }
 0xca3   :  { %8732 = vmatpush1.bf16.msra.mxu0 %v11461_v63 }
 0xca4   :  { %7278 = vrot.lane.b32.xlu0 %v7271_v4, %s11655_s25  ;;  %7305 = vrot.lane.b32.xlu1 %v7304_v32, %s15601_s29 }
 0xca5   :  { %9145 = vmatprep.subr.bf16.mxu0 %v15598_v38 }
 0xca8   :  { %7281 = vrot.lane.b32.xlu0 %v7271_v4, %s11646_s4  ;;  %7308 = vrot.lane.b32.xlu1 %v7304_v32, %s11656_s3 }
 0xcac   :  { %7284 = vrot.lane.b32.xlu0 %v7271_v4, %s11654_s2  ;;  %7311 = vrot.lane.b32.xlu1 %v7304_v32, %s11655_s25 }
 0xcb0   :  { %7287 = vrot.lane.b32.xlu0 %v7271_v4, %s11652_s12  ;;  %7314 = vrot.lane.b32.xlu1 %v7304_v32, %s11646_s4 }
 0xcb4   :  { %7290 = vrot.lane.b32.xlu0 %v7271_v4, %s11653_s24  ;;  %7317 = vrot.lane.b32.xlu1 %v7304_v32, %s11654_s2 }
 0xcb8   :  { %7320 = vrot.lane.b32.xlu0 %v7304_v32, %s11652_s12  ;;  %7323 = vrot.lane.b32.xlu1 %v7304_v32, %s11653_s24 }
 0xd12   :  { %v7276_v27 = vpop.permute.xlu1 %7275  ;;  %v7273_v40 = vpop.permute.xlu0 %7272 }
 0xd13   :  { %v7293_v53 = vsel %vm1137_vm15, %v14445_v59, %v7273_v40 }
 0xd14   :  { %v7294_v61 = vsel %vm1139_vm0, %v7293_v53, %v7276_v27 }
 0xd16   :  { %v7279_v15 = vpop.permute.xlu0 %7278  ;;  %v7306_v24 = vpop.permute.xlu1 %7305 }
 0xd17   :  { %v7295_v56 = vsel %vm15606_vm1, %v7294_v61, %v7279_v15  ;;  %v7326_v13 = vsel %vm1137_vm15, %v14453_v36, %v7306_v24 }
 0xd1a   :  { %v7282_v26 = vpop.permute.xlu0 %7281  ;;  %v7309_v3 = vpop.permute.xlu1 %7308 }
 0xd1b   :  { %v7296_v45 = vsel %vm1143_vm13, %v7295_v56, %v7282_v26  ;;  %v7327_v19 = vsel %vm1139_vm0, %v7326_v13, %v7309_v3  ;;  %vm15614_vm0 = vcmask 1046534  }
 0xd1e   :  { %v7285_v52 = vpop.permute.xlu0 %7284  ;;  %v7312_v43 = vpop.permute.xlu1 %7311 }
 0xd1f   :  { %v7297_v6 = vsel %vm15607_vm6, %v7296_v45, %v7285_v52  ;;  %v7328_v59 = vsel %vm15608_vm10, %v7327_v19, %v7312_v43 }
 0xd20   :  { %v7340_v49 = vrot.slane %v7297_v6, %v12390_v14 }
 0xd22   :  { %v7288_v62 = vpop.permute.xlu0 %7287  ;;  %v7315_v11 = vpop.permute.xlu1 %7314  ;;  %v7342_v36 = vmul.f32 %v7340_v49, %v14368_v20  ;;  %v7344_v25 = vmul.f32 %v7340_v49, %v14380_v30  ;;  %v7362_v35 = vmul.f32 %v7340_v49, %v14393_v41  ;;  %v7364_v60 = vmul.f32 %v7340_v49, %v14406_v8 }
 0xd23   :  { %v7298_v58 = vsel %vm953_vm11, %v7297_v6, %v7288_v62  ;;  %v7329_v5 = vsel %vm1143_vm13, %v7328_v59, %v7315_v11 }
 0xd26   :  { %v7291_v4 = vpop.permute.xlu0 %7290  ;;  %v7318_v32 = vpop.permute.xlu1 %7317 }
 0xd27   :  { %v7299_v54 = vsel %vm1148_vm3, %v7298_v58, %v7291_v4  ;;  %v7330_v55 = vsel %vm15609_vm4, %v7329_v5, %v7318_v32 }
 0xd28   :  { %v7352_v46 = vrot.slane %v7330_v55, %v12390_v14  ;;  %v7336_v39 = vrot.slane %v7299_v54, %v12390_v14 }
 0xd2a   :  { %v7321_v0 = vpop.permute.xlu0 %7320  ;;  %v7324_v7 = vpop.permute.xlu1 %7323  ;;  %v7354_v51 = vadd.f32 %v7352_v46, %v7342_v36  ;;  %v7356_v57 = vadd.f32 %v7352_v46, %v7344_v25  ;;  %v7366_v23 = vadd.f32 %v7362_v35, %v7352_v46  ;;  %v7341_v1 = vmul.f32 %v7336_v39, %v14366_v10 }
 0xd2b   :  { %v7331_v18 = vsel %vm953_vm11, %v7330_v55, %v7321_v0  ;;  %v7368_v34 = vadd.f32 %v7364_v60, %v7352_v46  ;;  %v7343_v30 = vmul.f32 %v7336_v39, %v14372_v33  ;;  %v7361_v28 = vmul.f32 %v7336_v39, %v14389_v16 }
 0xd2c   :  { %v7332_v20 = vsel %vm1148_vm3, %v7331_v18, %v7324_v7  ;;  %11525 = vtanh.f32 %v7354_v51  ;;  %v7363_v50 = vmul.f32 %v7336_v39, %v14400_v17  ;;  %vm14888_vm3 = vmor %vm1379_vm2, %vm394_vm5  ;;  %vm15613_vm5 = vcmask 1044484  }
 0xd2d   :  { %v7348_v41 = vrot.slane %v7332_v20, %v12390_v14  ;;  %11527 = vtanh.f32 %v7356_v57  ;;  %vm8223_vm15 = vmor %vm14888_vm3, %vm15613_vm5 }
 0xd2e   :  { %11529 = vtanh.f32 %v7366_v23 }
 0xd2f   :  { %v7353_v8 = vadd.f32 %v7348_v41, %v7341_v1  ;;  %v7355_v47 = vadd.f32 %v7348_v41, %v7343_v30  ;;  %v7365_v48 = vadd.f32 %v7361_v28, %v7348_v41  ;;  %11531 = vtanh.f32 %v7368_v34 }
 0xd30   :  { %v7367_v21 = vadd.f32 %v7363_v50, %v7348_v41 }
 0xd31   :  { %11533 = vtanh.f32 %v7353_v8 }
 0xd32   :  { %11535 = vtanh.f32 %v7355_v47 }
 0xd33   :  { %11537 = vtanh.f32 %v7365_v48 }
 0xd34   :  { %11539 = vtanh.f32 %v7367_v21 }
 0xd36   :  { %v11526_v10 = vpop.eup %11525 }
 0xd37   :  { %v11528_v33 = vpop.eup %11527 }
 0xd38   :  { %v11530_v29 = vpop.eup %11529 }
 0xd39   :  { %v11532_v16 = vpop.eup %11531 }
 0xd3b   :  { %v11534_v9 = vpop.eup %11533 }
 0xd3c   :  { %v11536_v44 = vpop.eup %11535  ;;  %v7388_v27 = vcombine.low %v11534_v9, %v11526_v10  ;;  %v7389_v40 = vcombine.high %v11534_v9, %v11526_v10 }
 0xd3d   :  { %v11538_v17 = vpop.eup %11537  ;;  %v7438_v31 = vcombine.low %v11536_v44, %v11528_v33  ;;  %v7439_v2 = vcombine.high %v11536_v44, %v11528_v33 }
 0xd3e   :  { %v11540_v15 = vpop.eup %11539  ;;  %v7396_v24 = vrot.slane %v7388_v27, %v13471_v12  ;;  %v7403_v42 = vrot.slane %v7389_v40, %v13471_v12  ;;  %v7490_v22 = vcombine.low %v11538_v17, %v11530_v29  ;;  %v7491_v26 = vcombine.high %v11538_v17, %v11530_v29 }
 0xd3f   :  { %v7446_v3 = vrot.slane %v7438_v31, %v13471_v12  ;;  %v7453_v53 = vrot.slane %v7439_v2, %v13471_v12  ;;  %v7540_v63 = vcombine.low %v11540_v15, %v11532_v16  ;;  %v7541_v52 = vcombine.high %v11540_v15, %v11532_v16 }
 0xd40   :  { %v7404_v43 = vcombine.high %v7396_v24, %v7396_v24  ;;  %v7405_v61 = vcombine.high %v7403_v42, %v7403_v42  ;;  %v14616_v56 = vrot.slane %v7396_v24, %v13471_v12  ;;  %v14619_v45 = vrot.slane %v7403_v42, %v13471_v12 }
 0xd41   :  { %v7454_v6 = vcombine.high %v7446_v3, %v7446_v3  ;;  %v7455_v62 = vcombine.high %v7453_v53, %v7453_v53  ;;  %v14622_v11 = vrot.slane %v7446_v3, %v13471_v12  ;;  %v14625_v13 = vrot.slane %v7453_v53, %v13471_v12 }
 0xd42   :  { %v14628_v19 = vrot.slane %v7404_v43, %v13471_v12  ;;  %v14631_v49 = vrot.slane %v7405_v61, %v13471_v12  ;;  %v14635_v59 = vcombine.high %v14616_v56, %v14616_v56  ;;  %v14639_v58 = vcombine.high %v14619_v45, %v14619_v45 }
 0xd43   :  { %v14642_v5 = vrot.slane %v7454_v6, %v13471_v12  ;;  %v14645_v4 = vrot.slane %v7455_v62, %v13471_v12  ;;  %v14649_v32 = vcombine.high %v14622_v11, %v14622_v11  ;;  %v7498_v54 = vrot.slane %v7490_v22, %v13471_v12 }
 0xd44   :  { %v14654_v55 = vcombine.high %v14628_v19, %v14628_v19  ;;  %v14658_v46 = vcombine.high %v14631_v49, %v14631_v49  ;;  %v7505_v36 = vrot.slane %v7491_v26, %v13471_v12  ;;  %v7548_v25 = vrot.slane %v7540_v63, %v13471_v12 }
 0xd45   :  { %v14664_v39 = vcombine.high %v14642_v5, %v14642_v5  ;;  %v7506_v35 = vcombine.high %v7498_v54, %v7498_v54  ;;  %v14667_v0 = vrot.slane %v7498_v54, %v13471_v12  ;;  %v7555_v7 = vrot.slane %v7541_v52, %v13471_v12 }
 0xd46   :  { %v7507_v60 = vcombine.high %v7505_v36, %v7505_v36  ;;  %v14671_v51 = vrot.slane %v7505_v36, %v13471_v12  ;;  %v7556_v57 = vcombine.high %v7548_v25, %v7548_v25  ;;  %v14674_v23 = vrot.slane %v7548_v25, %v13471_v12 }
 0xd47   :  { %v14677_v18 = vrot.slane %v7506_v35, %v13471_v12  ;;  %v14681_v1 = vcombine.high %v14667_v0, %v14667_v0  ;;  %v7557_v34 = vcombine.high %v7555_v7, %v7555_v7  ;;  %v14684_v20 = vrot.slane %v7555_v7, %v13471_v12 }
 0xd48   :  { %v14687_v30 = vrot.slane %v7507_v60, %v13471_v12  ;;  %v14691_v28 = vcombine.high %v14671_v51, %v14671_v51  ;;  %v14694_v41 = vrot.slane %v7556_v57, %v13471_v12  ;;  %v14698_v50 = vcombine.high %v14674_v23, %v14674_v23 }
 0xd49   :  { %v14702_v8 = vcombine.high %v14677_v18, %v14677_v18  ;;  %v14705_v47 = vrot.slane %v7557_v34, %v13471_v12  ;;  %v7591_v48 = vrot.slane %v14616_v56, %v12390_v14  ;;  %v7595_v21 = vrot.slane %v14616_v56, %v12573_v37 }
 0xd4a   :  { %v14713_v10 = vcombine.high %v14687_v30, %v14687_v30  ;;  %v14717_v33 = vcombine.high %v14694_v41, %v14694_v41  ;;  %v7599_v29 = vrot.slane %v14628_v19, %v12390_v14  ;;  %v7603_v16 = vrot.slane %v14628_v19, %v12573_v37 }
 0xd4b   :  { %v7607_v9 = vrot.slane %v14635_v59, %v12390_v14  ;;  %v7611_v44 = vrot.slane %v14635_v59, %v12573_v37  ;;  %v7615_v27 = vrot.slane %v14654_v55, %v12390_v14  ;;  %v7619_v40 = vrot.slane %v14654_v55, %v12573_v37 }
 0xd4c   :  { %v7623_v17 = vrot.slane %v14619_v45, %v12390_v14  ;;  %v7627_v31 = vrot.slane %v14619_v45, %v12573_v37  ;;  %v7631_v2 = vrot.slane %v14631_v49, %v12390_v14  ;;  %v7635_v15 = vrot.slane %v14631_v49, %v12573_v37 }
 0xd4d   :  { %v7639_v24 = vrot.slane %v14639_v58, %v12390_v14  ;;  %v7643_v42 = vrot.slane %v14639_v58, %v12573_v37  ;;  %v7647_v22 = vrot.slane %v14658_v46, %v12390_v14  ;;  %v7651_v26 = vrot.slane %v14658_v46, %v12573_v37 }
 0xd4e   :  { %v7655_v3 = vrot.slane %v14622_v11, %v12390_v14  ;;  %v7659_v53 = vrot.slane %v14622_v11, %v12573_v37  ;;  %v7663_v63 = vrot.slane %v14642_v5, %v12390_v14  ;;  %v7667_v52 = vrot.slane %v14642_v5, %v12573_v37 }
 0xd4f   :  { %v7671_v43 = vrot.slane %v14649_v32, %v12390_v14  ;;  %v7675_v61 = vrot.slane %v14649_v32, %v12573_v37  ;;  %v7679_v56 = vrot.slane %v14664_v39, %v12390_v14  ;;  %v7683_v45 = vrot.slane %v14664_v39, %v12573_v37 }
 0xd50   :  { %v7687_v6 = vrot.slane %v14625_v13, %v12390_v14  ;;  %v7691_v62 = vrot.slane %v14625_v13, %v12573_v37  ;;  %v7695_v11 = vrot.slane %v14645_v4, %v12390_v14  ;;  %v7699_v19 = vrot.slane %v14645_v4, %v12573_v37 }
 0xd51   :  { %v7731_v49 = vrot.slane %v14667_v0, %v12390_v14  ;;  %v7735_v59 = vrot.slane %v14667_v0, %v12573_v37  ;;  %v7739_v58 = vrot.slane %v14677_v18, %v12390_v14  ;;  %v7743_v5 = vrot.slane %v14677_v18, %v12573_v37 }
 0xd52   :  { %v7747_v13 = vrot.slane %v14681_v1, %v12390_v14  ;;  %v7751_v32 = vrot.slane %v14681_v1, %v12573_v37  ;;  %v7755_v4 = vrot.slane %v14702_v8, %v12390_v14  ;;  %v7759_v54 = vrot.slane %v14702_v8, %v12573_v37 }
 0xd53   :  { %v7763_v55 = vrot.slane %v14671_v51, %v12390_v14  ;;  %v7767_v46 = vrot.slane %v14671_v51, %v12573_v37  ;;  %v7771_v36 = vrot.slane %v14687_v30, %v12390_v14  ;;  %v7775_v25 = vrot.slane %v14687_v30, %v12573_v37 }
 0xd54   :  { %v7779_v39 = vrot.slane %v14691_v28, %v12390_v14  ;;  %v7783_v35 = vrot.slane %v14691_v28, %v12573_v37  ;;  %v7787_v0 = vrot.slane %v14713_v10, %v12390_v14  ;;  %v7791_v7 = vrot.slane %v14713_v10, %v12573_v37 }
 0xd55   :  { %v7795_v60 = vrot.slane %v14674_v23, %v12390_v14  ;;  %v7799_v51 = vrot.slane %v14674_v23, %v12573_v37  ;;  %v7803_v57 = vrot.slane %v14694_v41, %v12390_v14  ;;  %v7807_v18 = vrot.slane %v14694_v41, %v12573_v37 }
 0xd56   :  { %v7811_v1 = vrot.slane %v14698_v50, %v12390_v14  ;;  %v7815_v34 = vrot.slane %v14698_v50, %v12573_v37  ;;  %v7819_v30 = vrot.slane %v14717_v33, %v12390_v14  ;;  %v7823_v28 = vrot.slane %v14717_v33, %v12573_v37 }
 0xd57   :  { %v7827_v23 = vrot.slane %v14684_v20, %v12390_v14  ;;  %v7831_v8 = vrot.slane %v14684_v20, %v12573_v37  ;;  %v7835_v41 = vrot.slane %v14705_v47, %v12390_v14  ;;  %v7839_v10 = vrot.slane %v14705_v47, %v12573_v37 }
 0xd58   :  { %v7868_v50 = vsel %vm1379_vm2, %v7591_v48, %v7731_v49  ;;  %v7869_v12 = vsel %vm1379_vm2, %v7595_v21, %v7735_v59  ;;  %v7870_v38 = vsel %vm1379_vm2, %v7599_v29, %v7739_v58  ;;  %v7871_v33 = vsel %vm1379_vm2, %v7603_v16, %v7743_v5 }
 0xd59   :  { %v7872_v20 = vsel %vm1379_vm2, %v7607_v9, %v7747_v13  ;;  %v7873_v14 = vsel %vm1379_vm2, %v7611_v44, %v7751_v32  ;;  %v7874_v37 = vsel %vm1379_vm2, %v7615_v27, %v7755_v4  ;;  %v7875_v47 = vsel %vm1379_vm2, %v7619_v40, %v7759_v54  ;;  %v15610_v4 = vld [vmem:[#allocation17_spill] sm:$0xff] }
 0xd5a   :  { %v7876_v48 = vsel %vm1379_vm2, %v7623_v17, %v7763_v55  ;;  %v7877_v49 = vsel %vm1379_vm2, %v7627_v31, %v7767_v46  ;;  %v7878_v21 = vsel %vm1379_vm2, %v7631_v2, %v7771_v36  ;;  %v7879_v59 = vsel %vm1379_vm2, %v7635_v15, %v7775_v25 }
 0xd5b   :  { %v7880_v29 = vsel %vm1379_vm2, %v7639_v24, %v7779_v39  ;;  %v7881_v16 = vsel %vm1379_vm2, %v7643_v42, %v7783_v35  ;;  %v7882_v9 = vsel %vm1379_vm2, %v7647_v22, %v7787_v0  ;;  %v7883_v44 = vsel %vm1379_vm2, %v7651_v26, %v7791_v7 }
 0xd5c   :  { %v7884_v27 = vsel %vm1379_vm2, %v7655_v3, %v7795_v60  ;;  %v7885_v40 = vsel %vm1379_vm2, %v7659_v53, %v7799_v51  ;;  %v7886_v17 = vsel %vm1379_vm2, %v7663_v63, %v7803_v57  ;;  %v7887_v31 = vsel %vm1379_vm2, %v7667_v52, %v7807_v18 }
 0xd5d   :  { %v7888_v2 = vsel %vm1379_vm2, %v7671_v43, %v7811_v1  ;;  %v7889_v15 = vsel %vm1379_vm2, %v7675_v61, %v7815_v34  ;;  %v7890_v24 = vsel %vm1379_vm2, %v7679_v56, %v7819_v30  ;;  %v7891_v42 = vsel %vm1379_vm2, %v7683_v45, %v7823_v28 }
 0xd5e   :  { %v7892_v22 = vsel %vm1379_vm2, %v7687_v6, %v7827_v23  ;;  %v7893_v26 = vsel %vm1379_vm2, %v7691_v62, %v7831_v8  ;;  %v7894_v3 = vsel %vm1379_vm2, %v7695_v11, %v7835_v41  ;;  %v7895_v53 = vsel %vm1379_vm2, %v7699_v19, %v7839_v10 }
 0xd5f   :  { %v7924_v58 = vcombine.low %v7868_v50, %v7869_v12  ;;  %v7932_v63 = vcombine.low %v7870_v38, %v7871_v33  ;;  %v7940_v5 = vcombine.low %v7872_v20, %v7873_v14  ;;  %v7948_v52 = vcombine.low %v7874_v37, %v7875_v47 }
 0xd60   :  { %v7956_v13 = vcombine.low %v7876_v48, %v7877_v49  ;;  %v7964_v43 = vcombine.low %v7878_v21, %v7879_v59  ;;  %v7972_v32 = vcombine.low %v7880_v29, %v7881_v16  ;;  %v7980_v61 = vcombine.low %v7882_v9, %v7883_v44 }
 0xd61   :  { %v7931_v56 = vrot.slane %v7924_v58, %v15610_v4  ;;  %v7939_v45 = vrot.slane %v7932_v63, %v15610_v4  ;;  %v7947_v6 = vrot.slane %v7940_v5, %v15610_v4  ;;  %v7955_v62 = vrot.slane %v7948_v52, %v15610_v4 }
 0xd62   :  { %v7963_v11 = vrot.slane %v7956_v13, %v15610_v4  ;;  %v7971_v19 = vrot.slane %v7964_v43, %v15610_v4  ;;  %v7979_v38 = vrot.slane %v7972_v32, %v15610_v4  ;;  %v7987_v14 = vrot.slane %v7980_v61, %v15610_v4 }
 0xd63   :  { %v7988_v12 = vcombine.low %v7884_v27, %v7885_v40  ;;  %v7996_v54 = vcombine.low %v7886_v17, %v7887_v31  ;;  %v8004_v55 = vcombine.low %v7888_v2, %v7889_v15  ;;  %v8012_v46 = vcombine.low %v7890_v24, %v7891_v42 }
 0xd64   :  { %v8020_v36 = vcombine.low %v7892_v22, %v7893_v26  ;;  %v8028_v25 = vcombine.low %v7894_v3, %v7895_v53  ;;  %v8036_v39 = vcombine.low %v7931_v56, %v7939_v45  ;;  %v8037_v35 = vcombine.low %v7947_v6, %v7955_v62 }
 0xd65   :  { %v7995_v0 = vrot.slane %v7988_v12, %v15610_v4  ;;  %v8003_v7 = vrot.slane %v7996_v54, %v15610_v4  ;;  %v8011_v60 = vrot.slane %v8004_v55, %v15610_v4  ;;  %v8019_v51 = vrot.slane %v8012_v46, %v15610_v4 }
 0xd66   :  { %v8027_v57 = vrot.slane %v8020_v36, %v15610_v4  ;;  %v8035_v18 = vrot.slane %v8028_v25, %v15610_v4  ;;  %v8044_v1 = vrot.slane %v8036_v39, %v15610_v4  ;;  %v8051_v34 = vrot.slane %v8037_v35, %v15610_v4 }
 0xd67   :  { %v8054_v30 = vcombine.low %v7963_v11, %v7971_v19  ;;  %v8071_v28 = vcombine.low %v7987_v14, %v7995_v0  ;;  %v8072_v23 = vcombine.low %v8003_v7, %v8011_v60  ;;  %v8068_v33 = vrot.slane %v7979_v38, %v15610_v4 }
 0xd68   :  { %v8052_v8 = vcombine.low %v8044_v1, %v8051_v34  ;;  %v8053_v41 = vcombine.high %v8044_v1, %v8051_v34  ;;  %v8089_v10 = vcombine.low %v8019_v51, %v8027_v57  ;;  %v8103_v48 = vrot.slane %v8035_v18, %v15610_v4 }
 0xd69   :  { %v8061_v50 = vrot.slane %v8054_v30, %v15610_v4  ;;  %v8079_v20 = vrot.slane %v8071_v28, %v15610_v4  ;;  %v8086_v37 = vrot.slane %v8072_v23, %v15610_v4 }
 0xd6a   :  { %v8096_v47 = vrot.slane %v8089_v10, %v15610_v4  ;;  %v8106_v49 = vrot.slane %v8052_v8, 7  ;;  %v8107_v21 = vrot.slane %v8053_v41, 7 }
 0xd6b   :  { %v8069_v59 = vcombine.low %v8061_v50, %v8068_v33  ;;  %v8070_v29 = vcombine.high %v8061_v50, %v8068_v33  ;;  %v8087_v16 = vcombine.low %v8079_v20, %v8086_v37  ;;  %v8088_v9 = vcombine.high %v8079_v20, %v8086_v37 }
 0xd6c   :  { %v8104_v44 = vcombine.low %v8096_v47, %v8103_v48  ;;  %v8105_v27 = vcombine.high %v8096_v47, %v8103_v48  ;;  %8126 = vst [vmem:[#allocation6] sm:$0xfe] %v8106_v49  ;;  %8127 = vst.msk [vmem:[#allocation6 + $0x8] sm:$0xfe] %vm1401_vm14, %v8107_v21 }
 0xd6d   :  { %v8108_v40 = vrot.slane %v8069_v59, 7  ;;  %v8110_v17 = vrot.slane %v8070_v29, 7  ;;  %v8112_v31 = vrot.slane %v8087_v16, 7  ;;  %v8113_v2 = vrot.slane %v8088_v9, 7 }
 0xd6e   :  { %v8114_v15 = vrot.slane %v8104_v44, 7  ;;  %v8116_v24 = vrot.slane %v8105_v27, 7 }
 0xd6f   :  { %v8109_v42 = vsel %vm1379_vm2, %v8106_v49, %v8108_v40  ;;  %v8111_v22 = vsel %vm1379_vm2, %v8107_v21, %v8110_v17  ;;  %8130 = vst [vmem:[#allocation6 + $0x20] sm:$0xfe] %v8112_v31  ;;  %8131 = vst.msk [vmem:[#allocation6 + $0x28] sm:$0xfe] %vm1401_vm14, %v8113_v2 }
 0xd70   :  { %v8115_v26 = vsel %vm1379_vm2, %v8112_v31, %v8114_v15  ;;  %v8117_v3 = vsel %vm1379_vm2, %v8113_v2, %v8116_v24  ;;  %8128 = vst [vmem:[#allocation6 + $0x10] sm:$0x7f] %v8109_v42  ;;  %8129 = vst.msk [vmem:[#allocation6 + $0x18] sm:$0x7f] %vm1404_vm12, %v8111_v22  ;;  %v11456_v24 = vld [vmem:[%s15473_s17 + $0x150] sm:$0xff]  }
 0xd71   :  { %8132 = vst [vmem:[#allocation6 + $0x30] sm:$0x7f] %v8115_v26  ;;  %8133 = vst.msk [vmem:[#allocation6 + $0x38] sm:$0x7f] %vm1404_vm12, %v8117_v3 }
 0xd72   :  { %vm14951_vm12 = vmor %vm8223_vm15, %vm15614_vm0 }
 0xd73   :  { %v11448_v53 = vld [vmem:[#allocation6] ss:$8 sps:$4 sm:$0xff]   ;;  %v11450_v58 = vld [vmem:[#allocation6 + $0x4] ss:$8 sps:$4 sm:$0xff]  }
 0xd74   :  { %v8158_v63 = vrot.slane %v11448_v53, %v15610_v4  ;;  %v14893_v52 = vrot.slane %v11450_v58, %v15610_v4 }
 0xd76   :  { %v11454_v13 = vld [vmem:[#allocation6 + $0x20] ss:$8 sps:$4 sm:$0xff]   ;;  %v14895_v43 = vcombine.high %v8158_v63, %v8158_v63  ;;  %v14899_v61 = vcombine.high %v14893_v52, %v14893_v52  ;;  %v10524_v6 = vrot.slane %v8158_v63, 9  ;;  %v8230_v62 = vrot.slane %v14893_v52, 7  ;;  %v11457_v38 = vld [vmem:[#allocation6 + $0x24] ss:$8 sps:$4 sm:$0xff]  }
 0xd77   :  { %v11451_v32 = vld [vmem:[#allocation6 + $0x10] ss:$8 sps:$4 sm:$0xff]   ;;  %v11453_v56 = vld [vmem:[#allocation6 + $0x14] ss:$8 sps:$4 sm:$0xff]   ;;  %v14902_v45 = vrot.slane %v11454_v13, %v15610_v4  ;;  %v14928_v0 = vrot.slane %v11457_v38, %v15610_v4 }
 0xd78   :  { %v14906_v11 = vrot.slane %v11451_v32, %v15610_v4  ;;  %v8401_v19 = vcombine.low %v8158_v63, %v14895_v43  ;;  %v11458_v14 = vld [vmem:[#allocation6 + $0x30] ss:$8 sps:$4 sm:$0xff]   ;;  %v11460_v12 = vld [vmem:[#allocation6 + $0x34] ss:$8 sps:$4 sm:$0xff]   ;;  %v8818_v54 = vcombine.low %v14895_v43, %v14893_v52  ;;  %v14912_v55 = vrot.slane %v11453_v56, %v15610_v4 }
 0xd79   :  { %v8402_v46 = vcombine.low %v14893_v52, %v14899_v61  ;;  %v8202_v36 = vcombine.high %v14902_v45, %v14902_v45  ;;  %v8227_v25 = vrot.slane %v14895_v43, 7  ;;  %v14931_v7 = vrot.slane %v11458_v14, %v15610_v4  ;;  %v11465_v43 = vld [vmem:[%s15473_s17 + $0xe8] sm:$0xff]  }
 0xd7a   :  { %v14924_v39 = vcombine.high %v14906_v11, %v14906_v11  ;;  %v8409_v35 = vrot.slane %v8401_v19, %v15610_v4  ;;  %v8420_v51 = vcombine.low %v14912_v55, %v14902_v45  ;;  %v14937_v57 = vrot.slane %v11460_v12, %v15610_v4  ;;  %v11462_v12 = vld [vmem:[%s15473_s17 + $0x158] sm:$0xff]  }
 0xd7b   :  { %v8416_v60 = vrot.slane %v8402_v46, %v15610_v4  ;;  %v8249_v18 = vrot.slane %v8202_v36, 7  ;;  %v14943_v34 = vcombine.high %v14928_v0, %v14928_v0  ;;  %v14947_v30 = vcombine.high %v14931_v7, %v14931_v7 }
 0xd7c   :  { %v8419_v1 = vcombine.low %v14906_v11, %v14924_v39  ;;  %v8437_v28 = vcombine.low %v8202_v36, %v14928_v0  ;;  %v8434_v41 = vrot.slane %v8420_v51, %v15610_v4  ;;  %v8185_v50 = vcombine.high %v14912_v55, %v14912_v55 }
 0xd7d   :  { %v8418_v8 = vcombine.high %v8409_v35, %v8416_v60  ;;  %v8417_v10 = vcombine.low %v8409_v35, %v8416_v60  ;;  %v8438_v20 = vcombine.low %v14943_v34, %v14931_v7  ;;  %v8455_v47 = vcombine.low %v14947_v30, %v14937_v57 }
 0xd7e   :  { %v8427_v33 = vrot.slane %v8419_v1, %v15610_v4  ;;  %v14962_v37 = vrot.slane %v8437_v28, %v15610_v4  ;;  %v8228_v48 = vsel %vm14951_vm12, %v10524_v6, %v8227_v25  ;;  %v8229_v49 = vrot.slane %v8227_v25, 2 }
 0xd7f   :  { %v8232_v21 = vrot.slane %v8230_v62, 2  ;;  %v8233_v59 = vrot.slane %v14899_v61, 7  ;;  %v14970_v9 = vrot.slane %v8438_v20, %v15610_v4  ;;  %v14973_v44 = vrot.slane %v8455_v47, %v15610_v4 }
 0xd80   :  { %v8436_v29 = vcombine.high %v8427_v33, %v8434_v41  ;;  %v8435_v16 = vcombine.low %v8427_v33, %v8434_v41  ;;  %v8231_v27 = vsel %vm14951_vm12, %v8229_v49, %v8230_v62  ;;  %v8236_v31 = vrot.slane %v14906_v11, 7 }
 0xd81   :  { %v8234_v40 = vsel %vm14951_vm12, %v8232_v21, %v8233_v59  ;;  %v8235_v17 = vrot.slane %v8233_v59, 2  ;;  %v8454_v42 = vcombine.high %v14962_v37, %v14970_v9  ;;  %v8463_v22 = vcombine.high %v14973_v44, %v14973_v44  ;;  %v11464_v59 = vld [vmem:[%s15473_s17 + $0x160] sm:$0xff]  }
 0xd82   :  { %v8473_v2 = vpack.c.bf16 %v8436_v29, %v8418_v8  ;;  %v8472_v15 = vpack.c.bf16 %v8435_v16, %v8417_v10  ;;  %v8238_v3 = vrot.slane %v8236_v31, 2  ;;  %v8239_v53 = vrot.slane %v14924_v39, 7 }
 0xd83   :  { %v8237_v26 = vsel %vm14951_vm12, %v8235_v17, %v8236_v31  ;;  %v8242_v58 = vrot.slane %v14912_v55, 7  ;;  %v8475_v63 = vpack.c.bf16 %v8463_v22, %v8454_v42  ;;  %v8245_v5 = vrot.slane %v8185_v50, 7 }
 0xd84   :  { %10568 = vmatprep.mubr.msk.bf16.mxu1 %vm953_vm11, %v8473_v2  ;;  %v10525_v13 = vrot.slane %v14902_v45, 9  ;;  %v8297_v32 = vcombine.low %v8228_v48, %v8231_v27  ;;  %v8240_v56 = vsel %vm14951_vm12, %v8238_v3, %v8239_v53  ;;  %v8241_v6 = vrot.slane %v8239_v53, 2 }
 0xd85   :  { %8599 = vmatmul.mubr.bf16.vlgmr.msra.gmra.mrb[40].mxu1 %v8472_v15  ;;  %v8244_v62 = vrot.slane %v8242_v58, 2  ;;  %v8298_v19 = vcombine.low %v8234_v40, %v8237_v26  ;;  %v15004_v46 = vcombine.high %v14937_v57, %v14937_v57  ;;  %v8251_v36 = vrot.slane %v8249_v18, 2 }
 0xd86   :  { %9007 = vmatpush1.bf16.msra.mxu1 %v11456_v24  ;;  %10569 = vmatprep.mubr.msk.bf16.mxu1 %vm953_vm11, %v8475_v63  ;;  %v8250_v38 = vsel %vm14951_vm12, %v10525_v13, %v8249_v18  ;;  %v8305_v14 = vrot.slane %v8297_v32, %v15610_v4  ;;  %v15617_v25 = vmov 0   ;;  %v8243_v35 = vsel %vm14951_vm12, %v8241_v6, %v8242_v58  ;;  %v11463_v58 = vld [vmem:[%s15473_s17 + $0xe0] sm:$0xff]  }
 0xd87   :  { %9008 = vmatprep.subr.bf16.mxu1 %v15617_v25  ;;  %v8246_v60 = vsel %vm14951_vm12, %v8244_v62, %v8245_v5  ;;  %v8312_v51 = vrot.slane %v8298_v19, %v15610_v4  ;;  %v8252_v1 = vrot.slane %v14928_v0, 7  ;;  %v8315_v28 = vcombine.low %v8240_v56, %v8243_v35 }
 0xd88   :  { %v8316_v8 = vcombine.low %v8246_v60, %v8250_v38  ;;  %v8255_v41 = vrot.slane %v14943_v34, 7  ;;  %v8258_v10 = vrot.slane %v14931_v7, 7  ;;  %v8261_v16 = vrot.slane %v14947_v30, 7  ;;  %v11467_v60 = vld [vmem:[%s15473_s17 + $0xf0] sm:$0xff]  }
 0xd89   :  { %v8314_v50 = vcombine.high %v8305_v14, %v8312_v51  ;;  %v8313_v18 = vcombine.low %v8305_v14, %v8312_v51  ;;  %v8253_v33 = vsel %vm14951_vm12, %v8251_v36, %v8252_v1  ;;  %v8254_v20 = vrot.slane %v8252_v1, 2 }
 0xd8a   :  { %v8323_v47 = vrot.slane %v8315_v28, %v15610_v4  ;;  %v8330_v48 = vrot.slane %v8316_v8, %v15610_v4  ;;  %9009 = vmatpush1.bf16.msra.mxu1 %v11462_v12  ;;  %v8257_v49 = vrot.slane %v8255_v41, 2  ;;  %v8260_v21 = vrot.slane %v8258_v10, 2 }
 0xd8b   :  { %v8256_v29 = vsel %vm14951_vm12, %v8254_v20, %v8255_v41  ;;  %v8264_v27 = vrot.slane %v14937_v57, 7  ;;  %v8267_v40 = vrot.slane %v15004_v46, 7  ;;  %9010 = vmatprep.subr.bf16.mxu1 %v15617_v25  ;;  %v8263_v42 = vrot.slane %v8261_v16, 2  ;;  %v11471_v20 = vld [vmem:[%s15473_s17 + $0x100] sm:$0xff]  }
 0xd8c   :  { %v8332_v17 = vcombine.high %v8323_v47, %v8330_v48  ;;  %v8331_v31 = vcombine.low %v8323_v47, %v8330_v48  ;;  %v8259_v2 = vsel %vm14951_vm12, %v8257_v49, %v8258_v10  ;;  %v8333_v15 = vcombine.low %v8253_v33, %v8256_v29  ;;  %v11469_v10 = vld [vmem:[%s15473_s17 + $0xf8] sm:$0xff]   ;;  %v11474_v47 = vld [vmem:[%s15473_s17 + $0x188] sm:$0xff]   ;;  %v11476_v49 = vld [vmem:[%s15473_s17 + $0x190] sm:$0xff]  }
 0xd8d   :  { %v8262_v24 = vsel %vm14951_vm12, %v8260_v21, %v8261_v16  ;;  %v8266_v22 = vrot.slane %v8264_v27, 2  ;;  %v8453_v26 = vcombine.low %v14962_v37, %v14970_v9  ;;  %v8265_v13 = vsel %vm14951_vm12, %v8263_v42, %v8264_v27  ;;  %v11466_v37 = vld [vmem:[%s15473_s17 + $0x168] sm:$0xff]   ;;  %v11475_v21 = vld [vmem:[%s15473_s17 + $0x110] sm:$0xff]   ;;  %v11477_v29 = vld [vmem:[%s15473_s17 + $0x118] sm:$0xff]  }
 0xd8e   :  { %v8369_v3 = vpack.c.bf16 %v8332_v17, %v8314_v50  ;;  %v15034_v53 = vpack.c.bf16 %v8331_v31, %v8313_v18  ;;  %v8334_v63 = vcombine.low %v8259_v2, %v8262_v24  ;;  %v8341_v5 = vrot.slane %v8333_v15, %v15610_v4  ;;  %9011 = vmatpush1.bf16.msra.mxu1 %v11464_v59  ;;  %v11472_v50 = vld [vmem:[%s15473_s17 + $0x180] sm:$0xff]   ;;  %v11473_v48 = vld [vmem:[%s15473_s17 + $0x108] sm:$0xff]   ;;  %v11478_v59 = vld [vmem:[%s15473_s17 + $0x198] sm:$0xff]  }
 0xd8f   :  { %v8268_v32 = vsel %vm14951_vm12, %v8266_v22, %v8267_v40  ;;  %v8474_v56 = vpack.c.bf16 %v14973_v44, %v8453_v26  ;;  %9012 = vmatprep.subr.bf16.mxu1 %v15617_v25  ;;  %v8819_v9 = vcombine.low %v14899_v61, %v14906_v11  ;;  %v15057_v23 = vrot.slane %v8818_v54, %v15610_v4  ;;  %v11480_v16 = vld [vmem:[%s15473_s17 + $0x1a0] sm:$0xff]   ;;  %v11482_v40 = vld [vmem:[%s15473_s17 + $0x1a8] sm:$0xff]   ;;  %v11484_v31 = vld [vmem:[%s15473_s17 + $0x1b0] sm:$0xff]  }
 0xd90   :  { %10584 = vmatprep.mubr.msk.bf16.mxu0 %vm953_vm11, %v8369_v3  ;;  %v8348_v6 = vrot.slane %v8334_v63, %v15610_v4  ;;  %v8351_v62 = vcombine.low %v8265_v13, %v8268_v32  ;;  %v8836_v44 = vcombine.low %v14924_v39, %v14912_v55  ;;  %v10619_v61 = vcombine.high %v14912_v55, %v14902_v45  ;;  %v11468_v45 = vld [vmem:[%s15473_s17 + $0x170] sm:$0xff]   ;;  %v11479_v27 = vld [vmem:[%s15473_s17 + $0x120] sm:$0xff]   ;;  %v11481_v17 = vld [vmem:[%s15473_s17 + $0x128] sm:$0xff]  }
 0xd91   :  { %8738 = vmatmul.mubr.bf16.vlgmr.msra.gmra.mrb[40].mxu0 %v15034_v53  ;;  %8607 = vmatmul.mubr.bf16.gmra.mrb[44].mxu1 %v8474_v56  ;;  %v15063_v19 = vrot.slane %v8819_v9, %v15610_v4  ;;  %v8854_v11 = vcombine.low %v14928_v0, %v14943_v34  ;;  %v8855_v14 = vcombine.low %v14931_v7, %v14947_v30  ;;  %v11483_v2 = vld [vmem:[%s15473_s17 + $0x130] sm:$0xff]   ;;  %v11486_v15 = vld [vmem:[%s15473_s17 + $0x1b8] sm:$0xff]   ;;  %v11487_v42 = vld [vmem:[%s15473_s17 + $0x140] sm:$0xff]  }
 0xd92   :  { %9146 = vmatpush1.bf16.msra.mxu0 %v11463_v58  ;;  %v8350_v38 = vcombine.high %v8341_v5, %v8348_v6  ;;  %v8358_v52 = vrot.slane %v8351_v62, %v15610_v4  ;;  %10662 = vmatprep.mubr.msk.bf16.mxu1 %vm953_vm11, %v8369_v3  ;;  %v8349_v54 = vcombine.low %v8341_v5, %v8348_v6  ;;  %v11485_v24 = vld [vmem:[%s15473_s17 + $0x138] sm:$0xff]   ;;  %v11488_v22 = vld [vmem:[%s15473_s17 + $0x148] sm:$0xff]  }
 0xd93   :  { %9147 = vmatprep.subr.bf16.mxu0 %v15617_v25  ;;  %9013 = vmatpush1.bf16.msra.mxu1 %v11466_v37  ;;  %v15076_v39 = vrot.slane %v8836_v44, %v15610_v4  ;;  %v8835_v0 = vcombine.high %v15057_v23, %v15063_v19  ;;  %v15084_v34 = vrot.slane %v10619_v61, %v15610_v4 }
 0xd94   :  { %v8359_v55 = vcombine.high %v8358_v52, %v8358_v52  ;;  %9014 = vmatprep.subr.bf16.mxu1 %v15617_v25  ;;  %v8862_v12 = vrot.slane %v8854_v11, %v15610_v4  ;;  %v8872_v36 = vcombine.low %v14937_v57, %v15004_v46  ;;  %v8869_v1 = vrot.slane %v8855_v14, %v15610_v4  ;;  %v11470_v57 = vld [vmem:[%s15473_s17 + $0x178] sm:$0xff]   ;;  %s11660_s17 = smov [#allocation12]  }
 0xd95   :  { %v8853_v51 = vcombine.high %v15076_v39, %v15084_v34  ;;  %v15101_v7 = vpack.c.bf16 %v8358_v52, %v8349_v54  ;;  %v8834_v26 = vcombine.low %v15057_v23, %v15063_v19  ;;  %v8852_v3 = vcombine.low %v15076_v39, %v15084_v34  ;;  %s9936_s4 = sshll.u32 %s11660_s17, 4  ;;  %s9937_s4 = int_to_ptr.vmem [resolvable:$true] %s9936_s4 }
 0xd96   :  { %v15092_v35 = vpack.c.bf16 %v8359_v55, %v8350_v38  ;;  %9148 = vmatpush1.bf16.msra.mxu0 %v11465_v43  ;;  %v8879_v30 = vrot.slane %v8872_v36, %v15610_v4  ;;  %v8871_v28 = vcombine.high %v8862_v12, %v8869_v1  ;;  %v8870_v41 = vcombine.low %v8862_v12, %v8869_v1  ;;  %s11617_s29 = scalar_lea.vmem %s9937_s4, 32  ;;  %p11622_p3 = scmp.lt.s32.totalorder %s9937_s4, %s9937_s4 }
 0xd97   :  { %9149 = vmatprep.subr.bf16.mxu0 %v15617_v25  ;;  %9015 = vmatpush1.bf16.msra.mxu1 %v11468_v45  ;;  %v8890_v46 = vpack.c.bf16 %v8853_v51, %v8835_v0  ;;  %p11618_p2 = scmp.ne.s32.totalorder %s9937_s4, %s11617_s29  ;;  %p11623_p4 = scmp.lt.s32.totalorder %s11617_s29, %s11617_s29 }
 0xd98   :  { %10585 = vmatprep.mubr.msk.bf16.mxu0 %vm953_vm11, %v15092_v35  ;;  %9016 = vmatprep.subr.bf16.mxu1 %v15617_v25  ;;  %v8880_v8 = vcombine.high %v8879_v30, %v8879_v30  ;;  %v15121_v33 = vpack.c.bf16 %v8879_v30, %v8870_v41 }
 0xd99   :  { %8746 = vmatmul.mubr.bf16.gmra.mrb[44].mxu0 %v15101_v7  ;;  %p11624_p5 = por %p11623_p4, %p11622_p3 }
 0xd9a   :  { %9150 = vmatpush1.bf16.msra.mxu0 %v11467_v60  ;;  %10678 = vmatprep.mubr.msk.bf16.mxu0 %vm953_vm11, %v8890_v46  ;;  %v15119_v18 = vpack.c.bf16 %v8880_v8, %v8871_v28 }
 0xd9b   :  { %9151 = vmatprep.subr.bf16.mxu0 %v15617_v25  ;;  %9017 = vmatpush1.bf16.msra.mxu1 %v11470_v57  ;;  %p11625_p6 = pnand %p11624_p5, %p11618_p2 }
 0xd9c   :  { %9018 = vmatprep.subr.bf16.mxu1 %v15617_v25 }
 0xd9e   :  { %9152 = vmatpush1.bf16.msra.mxu0 %v11469_v10 }
 0xd9f   :  { %9153 = vmatprep.subr.bf16.mxu0 %v15617_v25  ;;  %9019 = vmatpush1.bf16.msra.mxu1 %v11472_v50 }
 0xda0   :  { %9020 = vmatprep.subr.bf16.mxu1 %v15617_v25 }
 0xda2   :  { %9154 = vmatpush1.bf16.msra.mxu0 %v11471_v20 }
 0xda3   :  { %9155 = vmatprep.subr.bf16.mxu0 %v15617_v25  ;;  %9021 = vmatpush1.bf16.msra.mxu1 %v11474_v47 }
 0xda4   :  { %9022 = vmatprep.subr.bf16.mxu1 %v15617_v25 }
 0xda6   :  { %9156 = vmatpush1.bf16.msra.mxu0 %v11473_v48 }
 0xda7   :  { %9157 = vmatprep.subr.bf16.mxu0 %v15617_v25  ;;  %9023 = vmatpush1.bf16.msra.mxu1 %v11476_v49 }
 0xda8   :  { %9024 = vmatprep.subr.bf16.mxu1 %v15617_v25 }
 0xdaa   :  { %9158 = vmatpush1.bf16.msra.mxu0 %v11475_v21 }
 0xdab   :  { %9159 = vmatprep.subr.bf16.mxu0 %v15617_v25  ;;  %9025 = vmatpush1.bf16.msra.mxu1 %v11478_v59 }
 0xdac   :  { %9026 = vmatprep.subr.bf16.mxu1 %v15617_v25 }
 0xdae   :  { %9160 = vmatpush1.bf16.msra.mxu0 %v11477_v29 }
 0xdaf   :  { %9161 = vmatprep.subr.bf16.mxu0 %v15617_v25  ;;  %9027 = vmatpush1.bf16.msra.mxu1 %v11480_v16 }
 0xdb0   :  { %9028 = vmatprep.subr.bf16.mxu1 %v15617_v25 }
 0xdb2   :  { %9162 = vmatpush1.bf16.msra.mxu0 %v11479_v27 }
 0xdb3   :  { %9163 = vmatprep.subr.bf16.mxu0 %v15617_v25  ;;  %9029 = vmatpush1.bf16.msra.mxu1 %v11482_v40 }
 0xdb4   :  { %9030 = vmatprep.subr.bf16.mxu1 %v15617_v25 }
 0xdb6   :  { %9164 = vmatpush1.bf16.msra.mxu0 %v11481_v17 }
 0xdb7   :  { %9165 = vmatprep.subr.bf16.mxu0 %v15617_v25  ;;  %9031 = vmatpush1.bf16.msra.mxu1 %v11484_v31 }
 0xdb8   :  { %9032 = vmatprep.subr.bf16.mxu1 %v15617_v25 }
 0xdba   :  { %9166 = vmatpush1.bf16.msra.mxu0 %v11483_v2 }
 0xdbb   :  { %9167 = vmatprep.subr.bf16.mxu0 %v15617_v25  ;;  %9033 = vmatpush1.bf16.msra.mxu1 %v11486_v15 }
 0xdbe   :  { %9168 = vmatpush1.bf16.msra.mxu0 %v11485_v24  ;;  %9039 = vmatmul.mubr.bf16.vlgmr.msra.gmra.mrb[48].mxu1 %v15034_v53  ;;  %v8889_v53 = vpack.c.bf16 %v8852_v3, %v8834_v26 }
 0xdbf   :  { %9169 = vmatprep.subr.bf16.mxu0 %v15617_v25  ;;  %10663 = vmatprep.mubr.msk.bf16.mxu1 %vm953_vm11, %v15092_v35 }
 0xdc2   :  { %9170 = vmatpush1.bf16.msra.mxu0 %v11487_v42 }
 0xdc3   :  { %9171 = vmatprep.subr.bf16.mxu0 %v15617_v25 }
 0xdc6   :  { %9172 = vmatpush1.bf16.msra.mxu0 %v11488_v22  ;;  %9047 = vmatmul.mubr.bf16.gmra.mrb[52].mxu1 %v15101_v7 }
 0xdc9   :  { %9178 = vmatmul.mubr.bf16.vlgmr.msra.gmra.mrb[48].mxu0 %v8889_v53 }
 0xdca   :  { %10679 = vmatprep.mubr.msk.bf16.mxu0 %vm953_vm11, %v15119_v18 }
 0xdd1   :  { %9186 = vmatmul.mubr.bf16.gmra.mrb[52].mxu0 %v15121_v33 }
 0xe58   :  { %v8600_v58 = vpop.f32.mrb[40].mxu1 }
 0xe59   :  { %v8602_v63 = vpop.f32.mrb[41].mxu1 }
 0xe5a   :  { %v8603_v5 = vpop.f32.mrb[42].mxu1 }
 0xe5b   :  { %v8605_v13 = vpop.f32.mrb[43].mxu1 }
 0xe64   :  { %v8739_v32 = vpop.f32.mrb[40].mxu0  ;;  %v8608_v56 = vpop.f32.mrb[44].mxu1 }
 0xe65   :  { %v8740_v37 = vadd.f32 %v8739_v32, %v8600_v58  ;;  %v8741_v25 = vpop.f32.mrb[41].mxu0  ;;  %v8610_v9 = vpop.f32.mrb[45].mxu1 }
 0xe66   :  { %v8742_v6 = vpop.f32.mrb[42].mxu0  ;;  %v8611_v62 = vpop.f32.mrb[46].mxu1 }
 0xe67   :  { %11628 = shalt.err (!%p11625_p6)
}
 0xe68   :  { %s11629_s2 = scalar_lea.hbm %s15475_s19, 32 }
 0xe69   :  { %p11630_p7 = scmp.ne.s32.totalorder %s15475_s19, %s11629_s2  ;;  %p11633_p8 = scmp.lt.u32.totalorder %s11629_s2, %s15475_s19 }
 0xe6b   :  { %p11635_p9 = pnand %p11633_p8, %p11630_p7 }
 0xe6d   :  { %11638 = shalt.err (!%p11635_p9)
}
 0xe6e   :  { %9939 = dma.vmem_to_hbm [thread:$0]  %s9937_s4, 32, %s15475_s19, [#allocation9]   ;;  %v8743_v23 = vadd.f32 %v8742_v6, %v8603_v5  ;;  %v8744_v44 = vpop.f32.mrb[43].mxu0  ;;  %v8613_v19 = vpop.f32.mrb[47].mxu1  ;;  %v10586_v39 = vld [vmem:[%s15474_s18] ss:$0 sm:$0xff] }
 0xe6f   :  { %v8747_v61 = vpop.f32.mrb[44].mxu0  ;;  %v8761_v45 = vadd.f32 %v10586_v39, %v8740_v37  ;;  %v15618_v9 = vld [vmem:[#allocation20_spill] sm:$0xff]  ;;  %vm15620_vm11 = vcmask 228352   ;;  %vm15622_vm14 = vcmask 224256  }
 0xe70   :  { %v8748_v11 = vadd.f32 %v8747_v61, %v8608_v56  ;;  %v8749_v38 = vpop.f32.mrb[45].mxu0  ;;  %v8762_v55 = vadd.f32 %v10586_v39, %v8743_v23  ;;  %vm15621_vm13 = vmmov %vm15620_vm11 }
 0xe71   :  { %v8750_v52 = vpop.f32.mrb[46].mxu0  ;;  %v10587_v0 = vmul.f32 -1.442695, %v8761_v45  ;;  %vm15623_vm7 = vmmov %vm15620_vm11 }
 0xe72   :  { %v8751_v43 = vadd.f32 %v8750_v52, %v8611_v62  ;;  %v8752_v54 = vpop.f32.mrb[47].mxu0  ;;  %v10588_v34 = vmul.f32 -1.442695, %v8762_v55  ;;  %v8763_v14 = vadd.f32 %v10586_v39, %v8748_v11  ;;  %vm15624_vm9 = vmmov %vm15623_vm7 }
 0xe73   :  { %11541 = vpow2.f32 %v10587_v0  ;;  %vm15625_vm8 = vmmov %vm15623_vm7 }
 0xe74   :  { %11543 = vpow2.f32 %v10588_v34  ;;  %v10589_v12 = vmul.f32 -1.442695, %v8763_v14  ;;  %v8764_v36 = vadd.f32 %v10586_v39, %v8751_v43  ;;  %vm15627_vm1 = vmmov %vm15623_vm7 }
 0xe76   :  { %11545 = vpow2.f32 %v10589_v12  ;;  %v10590_v1 = vmul.f32 -1.442695, %v8764_v36 }
 0xe78   :  { %11547 = vpow2.f32 %v10590_v1 }
 0xe7d   :  { %v11542_v57 = vpop.eup %11541 }
 0xe7e   :  { %v11544_v30 = vpop.eup %11543  ;;  %v8777_v46 = vadd.f32 1.0, %v11542_v57 }
 0xe7f   :  { %v8778_v8 = vadd.f32 1.0, %v11544_v30 }
 0xe80   :  { %v11546_v10 = vpop.eup %11545  ;;  %11549 = vrcp.f32 %v8777_v46 }
 0xe81   :  { %11551 = vrcp.f32 %v8778_v8  ;;  %v8779_v48 = vadd.f32 1.0, %v11546_v10 }
 0xe82   :  { %v11548_v40 = vpop.eup %11547 }
 0xe83   :  { %11553 = vrcp.f32 %v8779_v48  ;;  %v8780_v2 = vadd.f32 1.0, %v11548_v40 }
 0xe8a   :  { %v11550_v42 = vpop.eup %11549 }
 0xe8b   :  { %v11552_v58 = vpop.eup %11551  ;;  %v9226_v63 = vcombine.high %v11550_v42, %v11550_v42  ;;  %v9233_v6 = vrot.slane %v11550_v42, %v15618_v9 }
 0xe8c   :  { %v9275_v32 = vcombine.high %v11552_v58, %v11552_v58  ;;  %v9282_v23 = vrot.slane %v11552_v58, %v15618_v9 }
 0xe8d   :  { %v11554_v37 = vpop.eup %11553  ;;  %v9240_v62 = vrot.slane %v9226_v63, %v15618_v9  ;;  %v9241_v43 = vcombine.high %v9233_v6, %v9233_v6  ;;  %v15224_v55 = vrot.slane %v9233_v6, %v15618_v9  ;;  %v15619_v6 = vld [vmem:[#allocation18_spill] sm:$0xff] }
 0xe8e   :  { %v9289_v61 = vrot.slane %v9275_v32, %v15618_v9  ;;  %v9324_v11 = vcombine.high %v11554_v37, %v11554_v37  ;;  %v9331_v38 = vrot.slane %v11554_v37, %v15618_v9 }
 0xe8f   :  { %v9242_v54 = vcombine.high %v9240_v62, %v9240_v62  ;;  %v15227_v0 = vrot.slane %v9240_v62, %v15618_v9  ;;  %v9271_v46 = vcombine.high %v15224_v55, %v15224_v55 }
 0xe90   :  { %v9291_v34 = vcombine.high %v9289_v61, %v9289_v61  ;;  %v9338_v14 = vrot.slane %v9324_v11, %v15618_v9  ;;  %v9339_v12 = vcombine.high %v9331_v38, %v9331_v38  ;;  %v15240_v1 = vrot.slane %v9289_v61, %v15618_v9 }
 0xe91   :  { %v9040_v35 = vpop.f32.mrb[48].mxu1 }
 0xe92   :  { %v9042_v60 = vpop.f32.mrb[49].mxu1  ;;  %v15251_v8 = vrot.slane %v9291_v34, %v15618_v9  ;;  %v9340_v10 = vcombine.high %v9338_v14, %v9338_v14 }
 0xe93   :  { %v9043_v51 = vpop.f32.mrb[50].mxu1  ;;  %v15234_v60 = vrot.slane %v9242_v54, %v15618_v9 }
 0xe94   :  { %v9045_v7 = vpop.f32.mrb[51].mxu1  ;;  %v9323_v40 = vcombine.high %v15251_v8, %v15251_v8 }
 0xe99   :  { %v9048_v28 = vpop.f32.mrb[52].mxu1 }
 0xe9a   :  { %v9050_v41 = vpop.f32.mrb[53].mxu1 }
 0xe9b   :  { %v9051_v50 = vpop.f32.mrb[54].mxu1  ;;  %v15254_v41 = vrot.slane %v9331_v38, %v15618_v9 }
 0xe9c   :  { %v9179_v18 = vpop.f32.mrb[48].mxu0  ;;  %v9053_v33 = vpop.f32.mrb[55].mxu1 }
 0xe9d   :  { %v9180_v20 = vadd.f32 %v9179_v18, %v9040_v35  ;;  %v9181_v47 = vpop.f32.mrb[49].mxu0  ;;  %v15231_v35 = vrot.slane %v9241_v43, %v15618_v9  ;;  %v15260_v18 = vrot.slane %v9339_v12, %v15618_v9 }
 0xe9e   :  { %v9182_v49 = vpop.f32.mrb[50].mxu0  ;;  %v9274_v47 = vcombine.high %v15234_v60, %v15234_v60 }
 0xe9f   :  { %v9194_v21 = vadd.f32 %v10586_v39, %v9180_v20  ;;  %v9183_v59 = vadd.f32 %v9182_v49, %v9043_v51  ;;  %v9184_v29 = vpop.f32.mrb[51].mxu0  ;;  %v15237_v51 = vrot.slane %v9282_v23, %v15618_v9  ;;  %v9273_v20 = vcombine.high %v15231_v35, %v15231_v35 }
 0xea0   :  { %v9321_v49 = vcombine.high %v15240_v1, %v15240_v1 }
 0xea1   :  { %v10680_v16 = vmul.f32 -1.442695, %v9194_v21  ;;  %v9195_v27 = vadd.f32 %v10586_v39, %v9183_v59  ;;  %v9320_v48 = vcombine.high %v15237_v51, %v15237_v51 }
 0xea3   :  { %11555 = vpow2.f32 %v10680_v16  ;;  %v10681_v17 = vmul.f32 -1.442695, %v9195_v27 }
 0xea4   :  { %v9187_v31 = vpop.f32.mrb[52].mxu0 }
 0xea5   :  { %11557 = vpow2.f32 %v10681_v17  ;;  %v9188_v15 = vadd.f32 %v9187_v31, %v9048_v28  ;;  %v9189_v24 = vpop.f32.mrb[53].mxu0  ;;  %v9272_v28 = vcombine.high %v15227_v0, %v15227_v0  ;;  %v9369_v17 = vcombine.high %v15254_v41, %v15254_v41 }
 0xea6   :  { %v9190_v22 = vpop.f32.mrb[54].mxu0  ;;  %11559 = vrcp.f32 %v8780_v2  ;;  %v15281_v24 = vrot.slane %v9340_v10, %v15618_v9 }
 0xea7   :  { %v9196_v26 = vadd.f32 %v10586_v39, %v9188_v15  ;;  %v9191_v3 = vadd.f32 %v9190_v22, %v9051_v50  ;;  %v9192_v53 = vpop.f32.mrb[55].mxu0  ;;  %v15257_v50 = vrot.slane %v9338_v14, %v15618_v9  ;;  %v9371_v22 = vcombine.high %v15260_v18, %v15260_v18 }
 0xea9   :  { %v10682_v5 = vmul.f32 -1.442695, %v9196_v26  ;;  %v9197_v13 = vadd.f32 %v10586_v39, %v9191_v3  ;;  %v9290_v39 = vcombine.high %v9282_v23, %v9282_v23  ;;  %v9370_v42 = vcombine.high %v15257_v50, %v15257_v50 }
 0xeab   :  { %11561 = vpow2.f32 %v10682_v5  ;;  %v10683_v56 = vmul.f32 -1.442695, %v9197_v13  ;;  %v15243_v7 = vrot.slane %v9290_v39, %v15618_v9 }
 0xead   :  { %v11556_v25 = vpop.eup %11555  ;;  %11563 = vpow2.f32 %v10683_v56  ;;  %v9322_v59 = vcombine.high %v15243_v7, %v15243_v7 }
 0xeae   :  { %v9210_v44 = vadd.f32 1.0, %v11556_v25 }
 0xeaf   :  { %v11558_v19 = vpop.eup %11557 }
 0xeb0   :  { %11565 = vrcp.f32 %v9210_v44  ;;  %v9211_v52 = vadd.f32 1.0, %v11558_v19  ;;  %v11560_v45 = vpop.eup %11559 }
 0xeb1   :  { %v9379_v57 = vrot.slane %v11560_v45, %v15618_v9 }
 0xeb2   :  { %11567 = vrcp.f32 %v9211_v52 }
 0xeb3   :  { %v9380_v29 = vcombine.high %v9379_v57, %v9379_v57  ;;  %v15273_v16 = vrot.slane %v9379_v57, %v15618_v9 }
 0xeb5   :  { %v11562_v36 = vpop.eup %11561  ;;  %v15290_v63 = vrot.slane %v9380_v29, %v15618_v9  ;;  %v9395_v5 = vcombine.high %v15273_v16, %v15273_v16 }
 0xeb6   :  { %v9212_v33 = vadd.f32 1.0, %v11562_v36 }
 0xeb7   :  { %v11564_v30 = vpop.eup %11563 }
 0xeb8   :  { %v9213_v27 = vadd.f32 1.0, %v11564_v30  ;;  %11569 = vrcp.f32 %v9212_v33 }
 0xeba   :  { %v11566_v21 = vpop.eup %11565  ;;  %11571 = vrcp.f32 %v9213_v27 }
 0xebb   :  { %v9429_v31 = vcombine.high %v11566_v21, %v11566_v21  ;;  %v9436_v2 = vrot.slane %v11566_v21, %v15618_v9 }
 0xebc   :  { %v11568_v15 = vpop.eup %11567 }
 0xebd   :  { %v9443_v26 = vrot.slane %v9429_v31, %v15618_v9  ;;  %v9444_v3 = vcombine.high %v9436_v2, %v9436_v2  ;;  %v9452_v53 = vrot.slane %v9436_v2, %v15618_v9  ;;  %v9478_v58 = vcombine.high %v11568_v15, %v11568_v15 }
 0xebe   :  { %v9485_v13 = vrot.slane %v11568_v15, %v15618_v9 }
 0xebf   :  { %v9445_v32 = vcombine.high %v9443_v26, %v9443_v26  ;;  %v9459_v56 = vrot.slane %v9443_v26, %v15618_v9  ;;  %v9466_v37 = vrot.slane %v9444_v3, %v15618_v9  ;;  %v9474_v25 = vcombine.high %v9452_v53, %v9452_v53 }
 0xec0   :  { %v9603_v62 = vrot.slane %v9452_v53, %v15619_v6  ;;  %v9492_v23 = vrot.slane %v9478_v58, %v15618_v9  ;;  %v9493_v44 = vcombine.high %v9485_v13, %v9485_v13  ;;  %v9501_v19 = vrot.slane %v9485_v13, %v15618_v9 }
 0xec1   :  { %v9473_v61 = vrot.slane %v9445_v32, %v15618_v9  ;;  %v9475_v11 = vcombine.high %v9459_v56, %v9459_v56  ;;  %v9476_v38 = vcombine.high %v9466_v37, %v9466_v37  ;;  %v9607_v52 = vrot.slane %v9466_v37, %v15619_v6 }
 0xec2   :  { %v9611_v43 = vrot.slane %v9474_v25, %v15619_v6  ;;  %v9619_v54 = vrot.slane %v9459_v56, %v15619_v6  ;;  %v9740_v39 = vsel %vm1379_vm2, %v15224_v55, %v9603_v62  ;;  %v9494_v45 = vcombine.high %v9492_v23, %v9492_v23  ;;  %v11570_v31 = vpop.eup %11569 }
 0xec3   :  { %v9477_v34 = vcombine.high %v9473_v61, %v9473_v61  ;;  %v9615_v14 = vrot.slane %v9476_v38, %v15619_v6  ;;  %v9623_v12 = vrot.slane %v9473_v61, %v15619_v6  ;;  %v9627_v36 = vrot.slane %v9475_v11, %v15619_v6 }
 0xec4   :  { %v9741_v57 = vsel %vm1379_vm2, %v15231_v35, %v9607_v52  ;;  %v9742_v30 = vsel %vm1379_vm2, %v9271_v46, %v9611_v43  ;;  %v9744_v10 = vsel %vm1379_vm2, %v15227_v0, %v9619_v54  ;;  %v9508_v33 = vrot.slane %v9492_v23, %v15618_v9  ;;  %v11572_v58 = vpop.eup %11571 }
 0xec5   :  { %v9631_v55 = vrot.slane %v9477_v34, %v15619_v6  ;;  %v9743_v21 = vsel %vm1379_vm2, %v9273_v20, %v9615_v14  ;;  %v9745_v29 = vsel %vm1379_vm2, %v15234_v60, %v9623_v12  ;;  %v9746_v27 = vsel %vm1379_vm2, %v9272_v28, %v9627_v36 }
 0xec6   :  { %v9796_v2 = vcombine.low %v9740_v39, %v9741_v57  ;;  %v9797_v15 = vcombine.low %v9742_v30, %v9743_v21  ;;  %v9813_v35 = vcombine.low %v9744_v10, %v9745_v29  ;;  %v9515_v46 = vrot.slane %v9493_v44, %v15618_v9 }
 0xec7   :  { %v9747_v26 = vsel %vm1379_vm2, %v9274_v47, %v9631_v55  ;;  %v9522_v0 = vrot.slane %v9494_v45, %v15618_v9  ;;  %v9523_v3 = vcombine.high %v9501_v19, %v9501_v19  ;;  %v9524_v53 = vcombine.high %v9508_v33, %v9508_v33 }
 0xec8   :  { %v9804_v20 = vrot.slane %v9796_v2, %v15610_v4  ;;  %v9811_v13 = vrot.slane %v9797_v15, %v15610_v4  ;;  %v9814_v60 = vcombine.low %v9746_v27, %v9747_v26  ;;  %v9821_v28 = vrot.slane %v9813_v35, %v15610_v4 }
 0xec9   :  { %v9525_v32 = vcombine.high %v9515_v46, %v9515_v46  ;;  %v9526_v56 = vcombine.high %v9522_v0, %v9522_v0  ;;  %v9635_v37 = vrot.slane %v9501_v19, %v15619_v6  ;;  %v9639_v25 = vrot.slane %v9515_v46, %v15619_v6 }
 0xeca   :  { %v9812_v62 = vcombine.low %v9804_v20, %v9811_v13  ;;  %v9828_v47 = vrot.slane %v9814_v60, %v15610_v4  ;;  %v9643_v23 = vrot.slane %v9523_v3, %v15619_v6  ;;  %v9651_v44 = vrot.slane %v9508_v33, %v15619_v6 }
 0xecb   :  { %v9647_v61 = vrot.slane %v9525_v32, %v15619_v6  ;;  %v9655_v11 = vrot.slane %v9522_v0, %v15619_v6  ;;  %v9659_v38 = vrot.slane %v9524_v53, %v15619_v6  ;;  %v9663_v52 = vrot.slane %v9526_v56, %v15619_v6 }
 0xecc   :  { %v9829_v43 = vcombine.low %v9821_v28, %v9828_v47  ;;  %9922 = vst.msk [vmem:[%s15476_s20] sm:$0xff] %vm15620_vm11, %v9812_v62  ;;  %v9748_v19 = vsel %vm1379_vm2, %v15237_v51, %v9635_v37  ;;  %v9749_v54 = vsel %vm1379_vm2, %v15243_v7, %v9639_v25  ;;  %v9750_v39 = vsel %vm1379_vm2, %v9320_v48, %v9643_v23 }
 0xecd   :  { %v9751_v45 = vsel %vm1379_vm2, %v9322_v59, %v9647_v61  ;;  %v9752_v34 = vsel %vm1379_vm2, %v15240_v1, %v9651_v44  ;;  %v9753_v14 = vsel %vm1379_vm2, %v15251_v8, %v9655_v11  ;;  %v9754_v12 = vsel %vm1379_vm2, %v9321_v49, %v9659_v38 }
 0xece   :  { %9923 = vst.msk [vmem:[%s15476_s20 + $0x8] sm:$0xff] %vm15621_vm13, %v9829_v43  ;;  %v9755_v51 = vsel %vm1379_vm2, %v9323_v40, %v9663_v52  ;;  %v9830_v7 = vcombine.low %v9748_v19, %v9749_v54  ;;  %v9831_v48 = vcombine.low %v9750_v39, %v9751_v45  ;;  %v9847_v59 = vcombine.low %v9752_v34, %v9753_v14 }
 0xecf   :  { %v9855_v36 = vcombine.low %v9754_v12, %v9755_v51  ;;  %v9527_v57 = vcombine.high %v11570_v31, %v11570_v31  ;;  %v9534_v30 = vrot.slane %v11570_v31, %v15618_v9  ;;  %v9582_v1 = vrot.slane %v11572_v58, %v15618_v9 }
 0xed0   :  { %v9372_v49 = vcombine.high %v15281_v24, %v15281_v24  ;;  %v9838_v10 = vrot.slane %v9830_v7, %v15610_v4  ;;  %v9845_v33 = vrot.slane %v9831_v48, %v15610_v4  ;;  %v9854_v8 = vrot.slane %v9847_v59, %v15610_v4 }
 0xed1   :  { %v9396_v40 = vcombine.high %v15290_v63, %v15290_v63  ;;  %v9541_v55 = vrot.slane %v9527_v57, %v15618_v9  ;;  %v9542_v21 = vcombine.high %v9534_v30, %v9534_v30  ;;  %v9550_v29 = vrot.slane %v9534_v30, %v15618_v9 }
 0xed2   :  { %v9846_v27 = vcombine.low %v9838_v10, %v9845_v33  ;;  %9925 = vst.msk [vmem:[%s15476_s20 + $0x18] sm:$0xf] %vm15622_vm14, %v9854_v8  ;;  %v9863_v31 = vrot.slane %v9855_v36, %v15610_v4  ;;  %v9583_v2 = vcombine.high %v9582_v1, %v9582_v1  ;;  %v9590_v15 = vrot.slane %v9582_v1, %v15618_v9 }
 0xed3   :  { %v9543_v35 = vcombine.high %v9541_v55, %v9541_v55  ;;  %v9557_v46 = vrot.slane %v9541_v55, %v15618_v9  ;;  %v9564_v26 = vrot.slane %v9542_v21, %v15618_v9  ;;  %v9572_v0 = vcombine.high %v9550_v29, %v9550_v29 }
 0xed4   :  { %9924 = vst.msk [vmem:[%s15476_s20 + $0x10] sm:$0xff] %vm15623_vm7, %v9846_v27  ;;  %v9667_v3 = vrot.slane %v9550_v29, %v15619_v6  ;;  %v9597_v53 = vrot.slane %v9583_v2, %v15618_v9  ;;  %v9598_v58 = vcombine.high %v9590_v15, %v9590_v15  ;;  %v9699_v20 = vrot.slane %v9590_v15, %v15619_v6 }
 0xed5   :  { %v9571_v13 = vrot.slane %v9543_v35, %v15618_v9  ;;  %v9573_v60 = vcombine.high %v9557_v46, %v9557_v46  ;;  %v9574_v28 = vcombine.high %v9564_v26, %v9564_v26  ;;  %v9671_v32 = vrot.slane %v9564_v26, %v15619_v6 }
 0xed6   :  { %v9675_v56 = vrot.slane %v9572_v0, %v15619_v6  ;;  %v9683_v37 = vrot.slane %v9557_v46, %v15619_v6  ;;  %v9756_v25 = vsel %vm1379_vm2, %v15254_v41, %v9667_v3  ;;  %v9599_v62 = vcombine.high %v9597_v53, %v9597_v53 }
 0xed7   :  { %v9575_v47 = vcombine.high %v9571_v13, %v9571_v13  ;;  %v9679_v23 = vrot.slane %v9574_v28, %v15619_v6  ;;  %v9687_v44 = vrot.slane %v9571_v13, %v15619_v6  ;;  %v9691_v61 = vrot.slane %v9573_v60, %v15619_v6 }
 0xed8   :  { %v9757_v9 = vsel %vm1379_vm2, %v15260_v18, %v9671_v32  ;;  %v9758_v11 = vsel %vm1379_vm2, %v9369_v17, %v9675_v56  ;;  %v9760_v38 = vsel %vm1379_vm2, %v15257_v50, %v9683_v37  ;;  %v9703_v52 = vrot.slane %v9597_v53, %v15619_v6 }
 0xed9   :  { %v9695_v43 = vrot.slane %v9575_v47, %v15619_v6  ;;  %v9759_v19 = vsel %vm1379_vm2, %v9371_v22, %v9679_v23  ;;  %v9761_v54 = vsel %vm1379_vm2, %v15281_v24, %v9687_v44  ;;  %v9762_v41 = vsel %vm1379_vm2, %v9370_v42, %v9691_v61 }
 0xeda   :  { %v9856_v17 = vcombine.low %v9756_v25, %v9757_v9  ;;  %v9872_v39 = vcombine.low %v9758_v11, %v9759_v19  ;;  %v9873_v45 = vcombine.low %v9760_v38, %v9761_v54  ;;  %v9707_v34 = vrot.slane %v9598_v58, %v15619_v6 }
 0xedb   :  { %v9763_v14 = vsel %vm1379_vm2, %v9372_v49, %v9695_v43  ;;  %v9711_v12 = vrot.slane %v9599_v62, %v15619_v6  ;;  %v9764_v18 = vsel %vm1379_vm2, %v15273_v16, %v9699_v20  ;;  %v9765_v24 = vsel %vm1379_vm2, %v15290_v63, %v9703_v52 }
 0xedc   :  { %v9870_v22 = vrot.slane %v9856_v17, %v15610_v4  ;;  %v9880_v50 = vrot.slane %v9872_v39, %v15610_v4  ;;  %v9887_v42 = vrot.slane %v9873_v45, %v15610_v4  ;;  %v9889_v51 = vcombine.low %v9762_v41, %v9763_v14 }
 0xedd   :  { %v9766_v7 = vsel %vm1379_vm2, %v9395_v5, %v9707_v34  ;;  %v9767_v6 = vsel %vm1379_vm2, %v9396_v40, %v9711_v12  ;;  %v9890_v48 = vcombine.low %v9764_v18, %v9765_v24  ;;  %vm15626_vm2 = vmmov %vm15622_vm14 }
 0xede   :  { %v9871_v59 = vcombine.low %v9863_v31, %v9870_v22  ;;  %v9888_v36 = vcombine.low %v9880_v50, %v9887_v42  ;;  %v9897_v57 = vrot.slane %v9889_v51, %v15610_v4  ;;  %v9906_v63 = vcombine.low %v9766_v7, %v9767_v6 }
 0xedf   :  { %v9904_v30 = vrot.slane %v9890_v48, %v15610_v4 }
 0xee0   :  { %9926 = vst.msk [vmem:[%s15476_s20 + $0x20] sm:$0xff] %vm15624_vm9, %v9871_v59  ;;  %v9913_v16 = vrot.slane %v9906_v63, %v15610_v4 }
 0xee1   :  { %9927 = vst.msk [vmem:[%s15476_s20 + $0x28] sm:$0xff] %vm15625_vm8, %v9888_v36  ;;  %v9905_v5 = vcombine.low %v9897_v57, %v9904_v30 }
 0xee2   :  { %9929 = vst.msk [vmem:[%s15476_s20 + $0x38] sm:$0xf] %vm15626_vm2, %v9913_v16 }
 0xee3   :  { %9928 = vst.msk [vmem:[%s15476_s20 + $0x30] sm:$0xff] %vm15627_vm1, %v9905_v5 }
 0xee4   :  { %11643 = dma.done.wait [#allocation9], 32  }
 0xee5   :  { %11644 = vsyncadd [#allocation9], 4294967264 }
 0xee6   :  { %9947 = vsyncpa [#allocation8], 1 }
 0xee7   :  { %9948 = vsyncpa [#allocation11], 1 }
 0xee8   :  { %9949 = vsyncpa [#allocation9], 1 }

</bundles_post_ra>
